<compile_context>
chip_gen: v7x
topology: tpu7x:2x2x1
jax: 0.10.0
libtpu: 0.0.40
codegen_flags: <defaults>
</compile_context>

<pallas_src>
import jax
import jax.numpy as jnp
from jax import lax
from jax.experimental import pallas as pl
from jax.experimental.pallas import tpu as pltpu

DIM = 16                     # emb_dim used by the ViT encoder/decoder
N_HEADS = 8
HEAD_DIM = DIM // N_HEADS    # 2
NUM_TOKENS = 16              # number of patch tokens
FF_DIM = DIM * 10            # 160
LN_EPS = 1e-5                # torch.nn.LayerNorm default
PACK_W = FF_DIM              # width of the packed small-parameter matrix


def _layernorm(x, gamma, beta):
    mu = jnp.mean(x, axis=-1, keepdims=True)
    var = jnp.mean((x - mu) ** 2, axis=-1, keepdims=True)
    return (x - mu) * lax.rsqrt(var + LN_EPS) * gamma + beta


def _gelu(x):
    # exact (erf-based) GELU, matching torch.nn.GELU() default
    return 0.5 * x * (1.0 + lax.erf(x * (2.0 ** -0.5)))


def transformer_kernel(x_ref, qkv_w_ref, proj_w_ref, ff1_w_ref, ff2_w_ref,
                       pk_ref, out_ref):
    rows = x_ref.shape[0]            # BT * NUM_TOKENS (e.g. 128)
    bt = rows // NUM_TOKENS
    f32 = jnp.float32

    x = x_ref[...]                   # (rows, DIM)

    # packed small params: rows = [ln1_g, ln1_b, qkv_b, proj_b, ln2_g, ln2_b, ff1_b, ff2_b]
    ln1_g = pk_ref[0:1, 0:DIM]
    ln1_b = pk_ref[1:2, 0:DIM]
    qkv_b = pk_ref[2:3, 0:3 * DIM]
    proj_b = pk_ref[3:4, 0:DIM]
    ln2_g = pk_ref[4:5, 0:DIM]
    ln2_b = pk_ref[5:6, 0:DIM]
    ff1_b = pk_ref[6:7, 0:FF_DIM]
    ff2_b = pk_ref[7:8, 0:DIM]

    # ---- ln1 + multi-head attention ----
    xn = _layernorm(x, ln1_g, ln1_b)
    qkv = jnp.dot(xn, qkv_w_ref[...], preferred_element_type=f32) + qkv_b   # (rows, 3*DIM)

    q3 = qkv[:, 0:DIM].reshape(bt, NUM_TOKENS, DIM)          # (bt, N, DIM)
    k3 = qkv[:, DIM:2 * DIM].reshape(bt, NUM_TOKENS, DIM)
    v2 = qkv[:, 2 * DIM:3 * DIM]                             # (rows, DIM)

    proj_w = proj_w_ref[...]                                  # (DIM, DIM)
    scale = HEAD_DIM ** -0.5

    attn_acc = jnp.zeros((bt, NUM_TOKENS, DIM), f32)
    for h in range(N_HEADS):                                  # static 8-way unroll
        sl = slice(h * HEAD_DIM, (h + 1) * HEAD_DIM)
        qh = q3[:, :, sl]                                     # (bt, N, hd)
        kh = k3[:, :, sl]
        # scores over the folded batch; contraction on head_dim, no explicit .T
        s = jnp.einsum('bnd,bmd->bnm', qh, kh,
                       preferred_element_type=f32) * scale    # (bt, N, N)
        s = s - jnp.max(s, axis=-1, keepdims=True)
        e = jnp.exp(s)
        p = e * pl.reciprocal(jnp.sum(e, axis=-1, keepdims=True), approx=True)
        # fold the output projection into the head loop:
        #   (p @ v_h) @ W_h == p @ (v_h @ W_h)   -> no concat of head outputs
        vproj = jnp.dot(v2[:, sl], proj_w[sl, :],
                        preferred_element_type=f32).reshape(bt, NUM_TOKENS, DIM)
        attn_acc = attn_acc + jnp.einsum('bnm,bmo->bno', p, vproj,
                                         preferred_element_type=f32)

    h1 = x + attn_acc.reshape(rows, DIM) + proj_b             # residual 1

    # ---- ln2 + feed-forward ----
    h1n = _layernorm(h1, ln2_g, ln2_b)
    f = jnp.dot(h1n, ff1_w_ref[...], preferred_element_type=f32) + ff1_b    # (rows, 160)
    f = _gelu(f)
    f = jnp.dot(f, ff2_w_ref[...], preferred_element_type=f32) + ff2_b      # (rows, DIM)

    out_ref[...] = h1 + f                                      # residual 2


def init_params(key):
    ks = jax.random.split(key, 4)

    def lin(k, fan_in, fan_out):
        kw, kb = jax.random.split(k)
        w = jax.random.normal(kw, (fan_in, fan_out), jnp.float32) * 0.05
        b = jax.random.normal(kb, (fan_out,), jnp.float32) * 0.05
        return w, b

    p = {}
    p["ln1_g"] = jnp.ones((DIM,), jnp.float32)
    p["ln1_b"] = jnp.zeros((DIM,), jnp.float32)
    p["qkv_w"], p["qkv_b"] = lin(ks[0], DIM, 3 * DIM)
    p["aproj_w"], p["aproj_b"] = lin(ks[1], DIM, DIM)
    p["ln2_g"] = jnp.ones((DIM,), jnp.float32)
    p["ln2_b"] = jnp.zeros((DIM,), jnp.float32)
    p["ff1_w"], p["ff1_b"] = lin(ks[2], DIM, FF_DIM)
    p["ff2_w"], p["ff2_b"] = lin(ks[3], FF_DIM, DIM)
    return p


_SMALL_ORDER = ["ln1_g", "ln1_b", "qkv_b", "aproj_b", "ln2_g", "ln2_b", "ff1_b", "ff2_b"]


def _pack_small(params):
    rows = []
    for name in _SMALL_ORDER:
        v = params[name].reshape(-1).astype(jnp.float32)
        rows.append(jnp.pad(v, (0, PACK_W - v.shape[0])))
    return jnp.stack(rows, axis=0)                             # (8, PACK_W)


def transformer_forward(x, params, *, block_batch=8):
    """x: (B, NUM_TOKENS, DIM) float32 -> (B, NUM_TOKENS, DIM) float32."""
    B, N, D = x.shape
    assert N == NUM_TOKENS and D == DIM

    bt = max(1, min(block_batch, B))
    pad = (-B) % bt
    xp = jnp.pad(x, ((0, pad), (0, 0), (0, 0))) if pad else x
    bp = B + pad

    x2 = xp.reshape(bp * N, D).astype(jnp.float32)             # flat token rows
    packed = _pack_small(params)
    rows_blk = bt * N                                          # 128 for bt=8

    out2 = pl.pallas_call(
        transformer_kernel,
        out_shape=jax.ShapeDtypeStruct((bp * N, D), jnp.float32),
        grid_spec=pltpu.PrefetchScalarGridSpec(
            num_scalar_prefetch=0,
            grid=(bp // bt,),
            in_specs=[
                pl.BlockSpec((rows_blk, D), lambda b: (b, 0)),
                pl.BlockSpec(params["qkv_w"].shape, lambda b: (0, 0)),
                pl.BlockSpec(params["aproj_w"].shape, lambda b: (0, 0)),
                pl.BlockSpec(params["ff1_w"].shape, lambda b: (0, 0)),
                pl.BlockSpec(params["ff2_w"].shape, lambda b: (0, 0)),
                pl.BlockSpec((8, PACK_W), lambda b: (0, 0)),
            ],
            out_specs=pl.BlockSpec((rows_blk, D), lambda b: (b, 0)),
        ),
        compiler_params=pltpu.CompilerParams(dimension_semantics=("parallel",)),
    )(x2, params["qkv_w"], params["aproj_w"], params["ff1_w"], params["ff2_w"], packed)

    return out2.reshape(bp, N, D)[:B]


def transformer_reference(x, params):
    """Pure-JAX reference of the PyTorch Transformer forward (for validation)."""
    def ln(t, g, b):
        mu = jnp.mean(t, axis=-1, keepdims=True)
        var = jnp.mean((t - mu) ** 2, axis=-1, keepdims=True)
        return (t - mu) * lax.rsqrt(var + LN_EPS) * g + b

    B, N, D = x.shape
    xn = ln(x, params["ln1_g"], params["ln1_b"])
    qkv = xn @ params["qkv_w"] + params["qkv_b"]
    q, k, v = jnp.split(qkv, 3, axis=-1)

    def split_heads(t):
        return t.reshape(B, N, N_HEADS, HEAD_DIM).transpose(0, 2, 1, 3)

    qh, kh, vh = split_heads(q), split_heads(k), split_heads(v)
    s = jnp.einsum("bhnd,bhmd->bhnm", qh, kh) * HEAD_DIM ** -0.5
    p = jax.nn.softmax(s, axis=-1)
    wa = jnp.einsum("bhnm,bhmd->bhnd", p, vh).transpose(0, 2, 1, 3).reshape(B, N, D)
    attn = wa @ params["aproj_w"] + params["aproj_b"]
    x1 = x + attn
    x1n = ln(x1, params["ln2_g"], params["ln2_b"])
    f = x1n @ params["ff1_w"] + params["ff1_b"]
    f = 0.5 * f * (1.0 + lax.erf(f * (2.0 ** -0.5)))
    f = f @ params["ff2_w"] + params["ff2_b"]
    return x1 + f


if __name__ == "__main__":
    key = jax.random.PRNGKey(0)
    kx, kp = jax.random.split(key)

    B = 16                                                # folded as 2 grid steps of BT=8
    x = jax.random.normal(kx, (B, NUM_TOKENS, DIM), jnp.float32)
    params = init_params(kp)

    out = transformer_forward(x, params, block_batch=8)
    out = jax.block_until_ready(out)
    assert out.shape == (B, NUM_TOKENS, DIM), out.shape
    assert out.dtype == jnp.float32

    ref = transformer_reference(x, params)
    err = float(jnp.max(jnp.abs(out - ref)))
    assert err < 2e-2, f"max abs error vs reference: {err}"

    print("KERNEL_OK")
</pallas_src>

<mosaic_0001>
module attributes {stable_mosaic.version = 11 : i64} {
  func.func @transformer_kernel(%arg0: i32, %arg1: memref<128x16xf32, #tpu.memory_space<vmem>>, %arg2: memref<16x48xf32, #tpu.memory_space<vmem>>, %arg3: memref<16x16xf32, #tpu.memory_space<vmem>>, %arg4: memref<16x160xf32, #tpu.memory_space<vmem>>, %arg5: memref<160x16xf32, #tpu.memory_space<vmem>>, %arg6: memref<8x160xf32, #tpu.memory_space<vmem>>, %arg7: memref<128x16xf32, #tpu.memory_space<vmem>>) attributes {dimension_semantics = [#tpu.dimension_semantics<parallel>], iteration_bounds = array<i64: 2>, scalar_prefetch = 0 : i64, scratch_operands = 0 : i64, tpu.core_type = #tpu.core_type<tc>, window_params = [{transform_indices = @transform_0, window_bounds = array<i64: 128, 16>}, {pipeline_mode = #tpu.pipeline_mode<synchronous>, transform_indices = @transform_1, window_bounds = array<i64: 16, 48>}, {pipeline_mode = #tpu.pipeline_mode<synchronous>, transform_indices = @transform_2, window_bounds = array<i64: 16, 16>}, {pipeline_mode = #tpu.pipeline_mode<synchronous>, transform_indices = @transform_3, window_bounds = array<i64: 16, 160>}, {pipeline_mode = #tpu.pipeline_mode<synchronous>, transform_indices = @transform_4, window_bounds = array<i64: 160, 16>}, {pipeline_mode = #tpu.pipeline_mode<synchronous>, transform_indices = @transform_5, window_bounds = array<i64: 8, 160>}, {transform_indices = @transform_6, window_bounds = array<i64: 128, 16>}]} {
    %c0 = arith.constant 0 : index
    %c0_0 = arith.constant 0 : index
    %0 = vector.load %arg1[%c0, %c0_0] : memref<128x16xf32, #tpu.memory_space<vmem>>, vector<128x16xf32>
    %c0_1 = arith.constant 0 : index
    %c0_2 = arith.constant 0 : index
    %1 = vector.load %arg6[%c0_1, %c0_2] : memref<8x160xf32, #tpu.memory_space<vmem>>, vector<1x16xf32>
    %c1 = arith.constant 1 : index
    %c0_3 = arith.constant 0 : index
    %2 = vector.load %arg6[%c1, %c0_3] : memref<8x160xf32, #tpu.memory_space<vmem>>, vector<1x16xf32>
    %c2 = arith.constant 2 : index
    %c0_4 = arith.constant 0 : index
    %3 = vector.load %arg6[%c2, %c0_4] : memref<8x160xf32, #tpu.memory_space<vmem>>, vector<1x48xf32>
    %c3 = arith.constant 3 : index
    %c0_5 = arith.constant 0 : index
    %4 = vector.load %arg6[%c3, %c0_5] : memref<8x160xf32, #tpu.memory_space<vmem>>, vector<1x16xf32>
    %c4 = arith.constant 4 : index
    %c0_6 = arith.constant 0 : index
    %5 = vector.load %arg6[%c4, %c0_6] : memref<8x160xf32, #tpu.memory_space<vmem>>, vector<1x16xf32>
    %c5 = arith.constant 5 : index
    %c0_7 = arith.constant 0 : index
    %6 = vector.load %arg6[%c5, %c0_7] : memref<8x160xf32, #tpu.memory_space<vmem>>, vector<1x16xf32>
    %c6 = arith.constant 6 : index
    %c0_8 = arith.constant 0 : index
    %7 = vector.load %arg6[%c6, %c0_8] : memref<8x160xf32, #tpu.memory_space<vmem>>, vector<1x160xf32>
    %c7 = arith.constant 7 : index
    %c0_9 = arith.constant 0 : index
    %8 = vector.load %arg6[%c7, %c0_9] : memref<8x160xf32, #tpu.memory_space<vmem>>, vector<1x16xf32>
    %cst = arith.constant dense<0.000000e+00> : vector<128xf32>
    %9 = vector.multi_reduction <add>, %0, %cst [1] : vector<128x16xf32> to vector<128xf32>
    %10 = vector.shape_cast %9 : vector<128xf32> to vector<128x1xf32>
    %cst_10 = arith.constant 1.600000e+01 : f32
    %11 = vector.broadcast %cst_10 : f32 to vector<128x1xf32>
    %12 = arith.divf %10, %11 : vector<128x1xf32>
    %13 = vector.broadcast %12 : vector<128x1xf32> to vector<128x16xf32>
    %14 = arith.subf %0, %13 : vector<128x16xf32>
    %15 = arith.mulf %14, %14 : vector<128x16xf32>
    %cst_11 = arith.constant dense<0.000000e+00> : vector<128xf32>
    %16 = vector.multi_reduction <add>, %15, %cst_11 [1] : vector<128x16xf32> to vector<128xf32>
    %17 = vector.shape_cast %16 : vector<128xf32> to vector<128x1xf32>
    %cst_12 = arith.constant 1.600000e+01 : f32
    %18 = vector.broadcast %cst_12 : f32 to vector<128x1xf32>
    %19 = arith.divf %17, %18 : vector<128x1xf32>
    %20 = vector.broadcast %12 : vector<128x1xf32> to vector<128x16xf32>
    %21 = arith.subf %0, %20 : vector<128x16xf32>
    %cst_13 = arith.constant 9.99999974E-6 : f32
    %22 = vector.broadcast %cst_13 : f32 to vector<128x1xf32>
    %23 = arith.addf %19, %22 : vector<128x1xf32>
    %24 = math.rsqrt %23 : vector<128x1xf32>
    %25 = vector.broadcast %24 : vector<128x1xf32> to vector<128x16xf32>
    %26 = arith.mulf %21, %25 : vector<128x16xf32>
    %27 = vector.broadcast %1 : vector<1x16xf32> to vector<128x16xf32>
    %28 = arith.mulf %26, %27 : vector<128x16xf32>
    %29 = vector.broadcast %2 : vector<1x16xf32> to vector<128x16xf32>
    %30 = arith.addf %28, %29 : vector<128x16xf32>
    %c0_14 = arith.constant 0 : index
    %c0_15 = arith.constant 0 : index
    %31 = vector.load %arg2[%c0_14, %c0_15] : memref<16x48xf32, #tpu.memory_space<vmem>>, vector<16x48xf32>
    %cst_16 = arith.constant dense<0.000000e+00> : vector<128x48xf32>
    %32 = tpu.matmul %30, %31, %cst_16 {dimension_numbers = #tpu.dot_dimension_numbers<[1], [0], [0], [1], [0, 0, 1, 1], [], []>} : vector<128x16xf32>, vector<16x48xf32>, vector<128x48xf32> -> vector<128x48xf32>
    %33 = vector.broadcast %3 : vector<1x48xf32> to vector<128x48xf32>
    %34 = arith.addf %32, %33 : vector<128x48xf32>
    %35 = vector.extract_strided_slice %34 {offsets = [0, 0], sizes = [128, 16], strides = [1, 1]} : vector<128x48xf32> to vector<128x16xf32>
    %36 = vector.shape_cast %35 : vector<128x16xf32> to vector<8x16x16xf32>
    %37 = vector.extract_strided_slice %34 {offsets = [0, 16], sizes = [128, 16], strides = [1, 1]} : vector<128x48xf32> to vector<128x16xf32>
    %38 = vector.shape_cast %37 : vector<128x16xf32> to vector<8x16x16xf32>
    %39 = vector.extract_strided_slice %34 {offsets = [0, 32], sizes = [128, 16], strides = [1, 1]} : vector<128x48xf32> to vector<128x16xf32>
    %c0_17 = arith.constant 0 : index
    %c0_18 = arith.constant 0 : index
    %40 = vector.load %arg3[%c0_17, %c0_18] : memref<16x16xf32, #tpu.memory_space<vmem>>, vector<16x16xf32>
    %cst_19 = arith.constant 0.000000e+00 : f32
    %41 = vector.broadcast %cst_19 : f32 to vector<8x16x16xf32>
    %42 = vector.extract_strided_slice %36 {offsets = [0, 0, 0], sizes = [8, 16, 2], strides = [1, 1, 1]} : vector<8x16x16xf32> to vector<8x16x2xf32>
    %43 = vector.extract_strided_slice %38 {offsets = [0, 0, 0], sizes = [8, 16, 2], strides = [1, 1, 1]} : vector<8x16x16xf32> to vector<8x16x2xf32>
    "tpu.trace_start"() <{level = 10 : i32, message = "bnd,bmd->bnm"}> : () -> ()
    %cst_20 = arith.constant dense<0.000000e+00> : vector<8x16x16xf32>
    %44 = tpu.matmul %42, %43, %cst_20 {dimension_numbers = #tpu.dot_dimension_numbers<[2], [2], [1], [1], [0, 0, 0, 1, 1, 1], [0], [0]>} : vector<8x16x2xf32>, vector<8x16x2xf32>, vector<8x16x16xf32> -> vector<8x16x16xf32>
    "tpu.trace_stop"() : () -> ()
    %cst_21 = arith.constant 0.707106769 : f32
    %45 = vector.broadcast %cst_21 : f32 to vector<8x16x16xf32>
    %46 = arith.mulf %44, %45 : vector<8x16x16xf32>
    %cst_22 = arith.constant dense<0xFF800000> : vector<8x16xf32>
    %47 = vector.multi_reduction <maximumf>, %46, %cst_22 [2] : vector<8x16x16xf32> to vector<8x16xf32>
    %48 = vector.shape_cast %47 : vector<8x16xf32> to vector<8x16x1xf32>
    %49 = vector.broadcast %48 : vector<8x16x1xf32> to vector<8x16x16xf32>
    %50 = arith.subf %46, %49 : vector<8x16x16xf32>
    %51 = math.exp %50 : vector<8x16x16xf32>
    %cst_23 = arith.constant dense<0.000000e+00> : vector<8x16xf32>
    %52 = vector.multi_reduction <add>, %51, %cst_23 [2] : vector<8x16x16xf32> to vector<8x16xf32>
    %53 = vector.shape_cast %52 : vector<8x16xf32> to vector<8x16x1xf32>
    %54 = tpu.reciprocal %53 {approx = true} : vector<8x16x1xf32> -> vector<8x16x1xf32>
    %55 = vector.broadcast %54 : vector<8x16x1xf32> to vector<8x16x16xf32>
    %56 = arith.mulf %51, %55 : vector<8x16x16xf32>
    %57 = vector.extract_strided_slice %39 {offsets = [0, 0], sizes = [128, 2], strides = [1, 1]} : vector<128x16xf32> to vector<128x2xf32>
    %58 = vector.extract_strided_slice %40 {offsets = [0, 0], sizes = [2, 16], strides = [1, 1]} : vector<16x16xf32> to vector<2x16xf32>
    %cst_24 = arith.constant dense<0.000000e+00> : vector<128x16xf32>
    %59 = tpu.matmul %57, %58, %cst_24 {dimension_numbers = #tpu.dot_dimension_numbers<[1], [0], [0], [1], [0, 0, 1, 1], [], []>} : vector<128x2xf32>, vector<2x16xf32>, vector<128x16xf32> -> vector<128x16xf32>
    %60 = vector.shape_cast %59 : vector<128x16xf32> to vector<8x16x16xf32>
    "tpu.trace_start"() <{level = 10 : i32, message = "bnm,bmo->bno"}> : () -> ()
    %cst_25 = arith.constant dense<0.000000e+00> : vector<8x16x16xf32>
    %61 = tpu.matmul %56, %60, %cst_25 {dimension_numbers = #tpu.dot_dimension_numbers<[2], [1], [1], [2], [0, 0, 0, 1, 1, 2], [0], [0]>} : vector<8x16x16xf32>, vector<8x16x16xf32>, vector<8x16x16xf32> -> vector<8x16x16xf32>
    "tpu.trace_stop"() : () -> ()
    %62 = arith.addf %41, %61 : vector<8x16x16xf32>
    %63 = vector.extract_strided_slice %36 {offsets = [0, 0, 2], sizes = [8, 16, 2], strides = [1, 1, 1]} : vector<8x16x16xf32> to vector<8x16x2xf32>
    %64 = vector.extract_strided_slice %38 {offsets = [0, 0, 2], sizes = [8, 16, 2], strides = [1, 1, 1]} : vector<8x16x16xf32> to vector<8x16x2xf32>
    "tpu.trace_start"() <{level = 10 : i32, message = "bnd,bmd->bnm"}> : () -> ()
    %cst_26 = arith.constant dense<0.000000e+00> : vector<8x16x16xf32>
    %65 = tpu.matmul %63, %64, %cst_26 {dimension_numbers = #tpu.dot_dimension_numbers<[2], [2], [1], [1], [0, 0, 0, 1, 1, 1], [0], [0]>} : vector<8x16x2xf32>, vector<8x16x2xf32>, vector<8x16x16xf32> -> vector<8x16x16xf32>
    "tpu.trace_stop"() : () -> ()
    %cst_27 = arith.constant 0.707106769 : f32
    %66 = vector.broadcast %cst_27 : f32 to vector<8x16x16xf32>
    %67 = arith.mulf %65, %66 : vector<8x16x16xf32>
    %cst_28 = arith.constant dense<0xFF800000> : vector<8x16xf32>
    %68 = vector.multi_reduction <maximumf>, %67, %cst_28 [2] : vector<8x16x16xf32> to vector<8x16xf32>
    %69 = vector.shape_cast %68 : vector<8x16xf32> to vector<8x16x1xf32>
    %70 = vector.broadcast %69 : vector<8x16x1xf32> to vector<8x16x16xf32>
    %71 = arith.subf %67, %70 : vector<8x16x16xf32>
    %72 = math.exp %71 : vector<8x16x16xf32>
    %cst_29 = arith.constant dense<0.000000e+00> : vector<8x16xf32>
    %73 = vector.multi_reduction <add>, %72, %cst_29 [2] : vector<8x16x16xf32> to vector<8x16xf32>
    %74 = vector.shape_cast %73 : vector<8x16xf32> to vector<8x16x1xf32>
    %75 = tpu.reciprocal %74 {approx = true} : vector<8x16x1xf32> -> vector<8x16x1xf32>
    %76 = vector.broadcast %75 : vector<8x16x1xf32> to vector<8x16x16xf32>
    %77 = arith.mulf %72, %76 : vector<8x16x16xf32>
    %78 = vector.extract_strided_slice %39 {offsets = [0, 2], sizes = [128, 2], strides = [1, 1]} : vector<128x16xf32> to vector<128x2xf32>
    %79 = vector.extract_strided_slice %40 {offsets = [2, 0], sizes = [2, 16], strides = [1, 1]} : vector<16x16xf32> to vector<2x16xf32>
    %cst_30 = arith.constant dense<0.000000e+00> : vector<128x16xf32>
    %80 = tpu.matmul %78, %79, %cst_30 {dimension_numbers = #tpu.dot_dimension_numbers<[1], [0], [0], [1], [0, 0, 1, 1], [], []>} : vector<128x2xf32>, vector<2x16xf32>, vector<128x16xf32> -> vector<128x16xf32>
    %81 = vector.shape_cast %80 : vector<128x16xf32> to vector<8x16x16xf32>
    "tpu.trace_start"() <{level = 10 : i32, message = "bnm,bmo->bno"}> : () -> ()
    %cst_31 = arith.constant dense<0.000000e+00> : vector<8x16x16xf32>
    %82 = tpu.matmul %77, %81, %cst_31 {dimension_numbers = #tpu.dot_dimension_numbers<[2], [1], [1], [2], [0, 0, 0, 1, 1, 2], [0], [0]>} : vector<8x16x16xf32>, vector<8x16x16xf32>, vector<8x16x16xf32> -> vector<8x16x16xf32>
    "tpu.trace_stop"() : () -> ()
    %83 = arith.addf %62, %82 : vector<8x16x16xf32>
    %84 = vector.extract_strided_slice %36 {offsets = [0, 0, 4], sizes = [8, 16, 2], strides = [1, 1, 1]} : vector<8x16x16xf32> to vector<8x16x2xf32>
    %85 = vector.extract_strided_slice %38 {offsets = [0, 0, 4], sizes = [8, 16, 2], strides = [1, 1, 1]} : vector<8x16x16xf32> to vector<8x16x2xf32>
    "tpu.trace_start"() <{level = 10 : i32, message = "bnd,bmd->bnm"}> : () -> ()
    %cst_32 = arith.constant dense<0.000000e+00> : vector<8x16x16xf32>
    %86 = tpu.matmul %84, %85, %cst_32 {dimension_numbers = #tpu.dot_dimension_numbers<[2], [2], [1], [1], [0, 0, 0, 1, 1, 1], [0], [0]>} : vector<8x16x2xf32>, vector<8x16x2xf32>, vector<8x16x16xf32> -> vector<8x16x16xf32>
    "tpu.trace_stop"() : () -> ()
    %cst_33 = arith.constant 0.707106769 : f32
    %87 = vector.broadcast %cst_33 : f32 to vector<8x16x16xf32>
    %88 = arith.mulf %86, %87 : vector<8x16x16xf32>
    %cst_34 = arith.constant dense<0xFF800000> : vector<8x16xf32>
    %89 = vector.multi_reduction <maximumf>, %88, %cst_34 [2] : vector<8x16x16xf32> to vector<8x16xf32>
    %90 = vector.shape_cast %89 : vector<8x16xf32> to vector<8x16x1xf32>
    %91 = vector.broadcast %90 : vector<8x16x1xf32> to vector<8x16x16xf32>
    %92 = arith.subf %88, %91 : vector<8x16x16xf32>
    %93 = math.exp %92 : vector<8x16x16xf32>
    %cst_35 = arith.constant dense<0.000000e+00> : vector<8x16xf32>
    %94 = vector.multi_reduction <add>, %93, %cst_35 [2] : vector<8x16x16xf32> to vector<8x16xf32>
    %95 = vector.shape_cast %94 : vector<8x16xf32> to vector<8x16x1xf32>
    %96 = tpu.reciprocal %95 {approx = true} : vector<8x16x1xf32> -> vector<8x16x1xf32>
    %97 = vector.broadcast %96 : vector<8x16x1xf32> to vector<8x16x16xf32>
    %98 = arith.mulf %93, %97 : vector<8x16x16xf32>
    %99 = vector.extract_strided_slice %39 {offsets = [0, 4], sizes = [128, 2], strides = [1, 1]} : vector<128x16xf32> to vector<128x2xf32>
    %100 = vector.extract_strided_slice %40 {offsets = [4, 0], sizes = [2, 16], strides = [1, 1]} : vector<16x16xf32> to vector<2x16xf32>
    %cst_36 = arith.constant dense<0.000000e+00> : vector<128x16xf32>
    %101 = tpu.matmul %99, %100, %cst_36 {dimension_numbers = #tpu.dot_dimension_numbers<[1], [0], [0], [1], [0, 0, 1, 1], [], []>} : vector<128x2xf32>, vector<2x16xf32>, vector<128x16xf32> -> vector<128x16xf32>
    %102 = vector.shape_cast %101 : vector<128x16xf32> to vector<8x16x16xf32>
    "tpu.trace_start"() <{level = 10 : i32, message = "bnm,bmo->bno"}> : () -> ()
    %cst_37 = arith.constant dense<0.000000e+00> : vector<8x16x16xf32>
    %103 = tpu.matmul %98, %102, %cst_37 {dimension_numbers = #tpu.dot_dimension_numbers<[2], [1], [1], [2], [0, 0, 0, 1, 1, 2], [0], [0]>} : vector<8x16x16xf32>, vector<8x16x16xf32>, vector<8x16x16xf32> -> vector<8x16x16xf32>
    "tpu.trace_stop"() : () -> ()
    %104 = arith.addf %83, %103 : vector<8x16x16xf32>
    %105 = vector.extract_strided_slice %36 {offsets = [0, 0, 6], sizes = [8, 16, 2], strides = [1, 1, 1]} : vector<8x16x16xf32> to vector<8x16x2xf32>
    %106 = vector.extract_strided_slice %38 {offsets = [0, 0, 6], sizes = [8, 16, 2], strides = [1, 1, 1]} : vector<8x16x16xf32> to vector<8x16x2xf32>
    "tpu.trace_start"() <{level = 10 : i32, message = "bnd,bmd->bnm"}> : () -> ()
    %cst_38 = arith.constant dense<0.000000e+00> : vector<8x16x16xf32>
    %107 = tpu.matmul %105, %106, %cst_38 {dimension_numbers = #tpu.dot_dimension_numbers<[2], [2], [1], [1], [0, 0, 0, 1, 1, 1], [0], [0]>} : vector<8x16x2xf32>, vector<8x16x2xf32>, vector<8x16x16xf32> -> vector<8x16x16xf32>
    "tpu.trace_stop"() : () -> ()
    %cst_39 = arith.constant 0.707106769 : f32
    %108 = vector.broadcast %cst_39 : f32 to vector<8x16x16xf32>
    %109 = arith.mulf %107, %108 : vector<8x16x16xf32>
    %cst_40 = arith.constant dense<0xFF800000> : vector<8x16xf32>
    %110 = vector.multi_reduction <maximumf>, %109, %cst_40 [2] : vector<8x16x16xf32> to vector<8x16xf32>
    %111 = vector.shape_cast %110 : vector<8x16xf32> to vector<8x16x1xf32>
    %112 = vector.broadcast %111 : vector<8x16x1xf32> to vector<8x16x16xf32>
    %113 = arith.subf %109, %112 : vector<8x16x16xf32>
    %114 = math.exp %113 : vector<8x16x16xf32>
    %cst_41 = arith.constant dense<0.000000e+00> : vector<8x16xf32>
    %115 = vector.multi_reduction <add>, %114, %cst_41 [2] : vector<8x16x16xf32> to vector<8x16xf32>
    %116 = vector.shape_cast %115 : vector<8x16xf32> to vector<8x16x1xf32>
    %117 = tpu.reciprocal %116 {approx = true} : vector<8x16x1xf32> -> vector<8x16x1xf32>
    %118 = vector.broadcast %117 : vector<8x16x1xf32> to vector<8x16x16xf32>
    %119 = arith.mulf %114, %118 : vector<8x16x16xf32>
    %120 = vector.extract_strided_slice %39 {offsets = [0, 6], sizes = [128, 2], strides = [1, 1]} : vector<128x16xf32> to vector<128x2xf32>
    %121 = vector.extract_strided_slice %40 {offsets = [6, 0], sizes = [2, 16], strides = [1, 1]} : vector<16x16xf32> to vector<2x16xf32>
    %cst_42 = arith.constant dense<0.000000e+00> : vector<128x16xf32>
    %122 = tpu.matmul %120, %121, %cst_42 {dimension_numbers = #tpu.dot_dimension_numbers<[1], [0], [0], [1], [0, 0, 1, 1], [], []>} : vector<128x2xf32>, vector<2x16xf32>, vector<128x16xf32> -> vector<128x16xf32>
    %123 = vector.shape_cast %122 : vector<128x16xf32> to vector<8x16x16xf32>
    "tpu.trace_start"() <{level = 10 : i32, message = "bnm,bmo->bno"}> : () -> ()
    %cst_43 = arith.constant dense<0.000000e+00> : vector<8x16x16xf32>
    %124 = tpu.matmul %119, %123, %cst_43 {dimension_numbers = #tpu.dot_dimension_numbers<[2], [1], [1], [2], [0, 0, 0, 1, 1, 2], [0], [0]>} : vector<8x16x16xf32>, vector<8x16x16xf32>, vector<8x16x16xf32> -> vector<8x16x16xf32>
    "tpu.trace_stop"() : () -> ()
    %125 = arith.addf %104, %124 : vector<8x16x16xf32>
    %126 = vector.extract_strided_slice %36 {offsets = [0, 0, 8], sizes = [8, 16, 2], strides = [1, 1, 1]} : vector<8x16x16xf32> to vector<8x16x2xf32>
    %127 = vector.extract_strided_slice %38 {offsets = [0, 0, 8], sizes = [8, 16, 2], strides = [1, 1, 1]} : vector<8x16x16xf32> to vector<8x16x2xf32>
    "tpu.trace_start"() <{level = 10 : i32, message = "bnd,bmd->bnm"}> : () -> ()
    %cst_44 = arith.constant dense<0.000000e+00> : vector<8x16x16xf32>
    %128 = tpu.matmul %126, %127, %cst_44 {dimension_numbers = #tpu.dot_dimension_numbers<[2], [2], [1], [1], [0, 0, 0, 1, 1, 1], [0], [0]>} : vector<8x16x2xf32>, vector<8x16x2xf32>, vector<8x16x16xf32> -> vector<8x16x16xf32>
    "tpu.trace_stop"() : () -> ()
    %cst_45 = arith.constant 0.707106769 : f32
    %129 = vector.broadcast %cst_45 : f32 to vector<8x16x16xf32>
    %130 = arith.mulf %128, %129 : vector<8x16x16xf32>
    %cst_46 = arith.constant dense<0xFF800000> : vector<8x16xf32>
    %131 = vector.multi_reduction <maximumf>, %130, %cst_46 [2] : vector<8x16x16xf32> to vector<8x16xf32>
    %132 = vector.shape_cast %131 : vector<8x16xf32> to vector<8x16x1xf32>
    %133 = vector.broadcast %132 : vector<8x16x1xf32> to vector<8x16x16xf32>
    %134 = arith.subf %130, %133 : vector<8x16x16xf32>
    %135 = math.exp %134 : vector<8x16x16xf32>
    %cst_47 = arith.constant dense<0.000000e+00> : vector<8x16xf32>
    %136 = vector.multi_reduction <add>, %135, %cst_47 [2] : vector<8x16x16xf32> to vector<8x16xf32>
    %137 = vector.shape_cast %136 : vector<8x16xf32> to vector<8x16x1xf32>
    %138 = tpu.reciprocal %137 {approx = true} : vector<8x16x1xf32> -> vector<8x16x1xf32>
    %139 = vector.broadcast %138 : vector<8x16x1xf32> to vector<8x16x16xf32>
    %140 = arith.mulf %135, %139 : vector<8x16x16xf32>
    %141 = vector.extract_strided_slice %39 {offsets = [0, 8], sizes = [128, 2], strides = [1, 1]} : vector<128x16xf32> to vector<128x2xf32>
    %142 = vector.extract_strided_slice %40 {offsets = [8, 0], sizes = [2, 16], strides = [1, 1]} : vector<16x16xf32> to vector<2x16xf32>
    %cst_48 = arith.constant dense<0.000000e+00> : vector<128x16xf32>
    %143 = tpu.matmul %141, %142, %cst_48 {dimension_numbers = #tpu.dot_dimension_numbers<[1], [0], [0], [1], [0, 0, 1, 1], [], []>} : vector<128x2xf32>, vector<2x16xf32>, vector<128x16xf32> -> vector<128x16xf32>
    %144 = vector.shape_cast %143 : vector<128x16xf32> to vector<8x16x16xf32>
    "tpu.trace_start"() <{level = 10 : i32, message = "bnm,bmo->bno"}> : () -> ()
    %cst_49 = arith.constant dense<0.000000e+00> : vector<8x16x16xf32>
    %145 = tpu.matmul %140, %144, %cst_49 {dimension_numbers = #tpu.dot_dimension_numbers<[2], [1], [1], [2], [0, 0, 0, 1, 1, 2], [0], [0]>} : vector<8x16x16xf32>, vector<8x16x16xf32>, vector<8x16x16xf32> -> vector<8x16x16xf32>
    "tpu.trace_stop"() : () -> ()
    %146 = arith.addf %125, %145 : vector<8x16x16xf32>
    %147 = vector.extract_strided_slice %36 {offsets = [0, 0, 10], sizes = [8, 16, 2], strides = [1, 1, 1]} : vector<8x16x16xf32> to vector<8x16x2xf32>
    %148 = vector.extract_strided_slice %38 {offsets = [0, 0, 10], sizes = [8, 16, 2], strides = [1, 1, 1]} : vector<8x16x16xf32> to vector<8x16x2xf32>
    "tpu.trace_start"() <{level = 10 : i32, message = "bnd,bmd->bnm"}> : () -> ()
    %cst_50 = arith.constant dense<0.000000e+00> : vector<8x16x16xf32>
    %149 = tpu.matmul %147, %148, %cst_50 {dimension_numbers = #tpu.dot_dimension_numbers<[2], [2], [1], [1], [0, 0, 0, 1, 1, 1], [0], [0]>} : vector<8x16x2xf32>, vector<8x16x2xf32>, vector<8x16x16xf32> -> vector<8x16x16xf32>
    "tpu.trace_stop"() : () -> ()
    %cst_51 = arith.constant 0.707106769 : f32
    %150 = vector.broadcast %cst_51 : f32 to vector<8x16x16xf32>
    %151 = arith.mulf %149, %150 : vector<8x16x16xf32>
    %cst_52 = arith.constant dense<0xFF800000> : vector<8x16xf32>
    %152 = vector.multi_reduction <maximumf>, %151, %cst_52 [2] : vector<8x16x16xf32> to vector<8x16xf32>
    %153 = vector.shape_cast %152 : vector<8x16xf32> to vector<8x16x1xf32>
    %154 = vector.broadcast %153 : vector<8x16x1xf32> to vector<8x16x16xf32>
    %155 = arith.subf %151, %154 : vector<8x16x16xf32>
    %156 = math.exp %155 : vector<8x16x16xf32>
    %cst_53 = arith.constant dense<0.000000e+00> : vector<8x16xf32>
    %157 = vector.multi_reduction <add>, %156, %cst_53 [2] : vector<8x16x16xf32> to vector<8x16xf32>
    %158 = vector.shape_cast %157 : vector<8x16xf32> to vector<8x16x1xf32>
    %159 = tpu.reciprocal %158 {approx = true} : vector<8x16x1xf32> -> vector<8x16x1xf32>
    %160 = vector.broadcast %159 : vector<8x16x1xf32> to vector<8x16x16xf32>
    %161 = arith.mulf %156, %160 : vector<8x16x16xf32>
    %162 = vector.extract_strided_slice %39 {offsets = [0, 10], sizes = [128, 2], strides = [1, 1]} : vector<128x16xf32> to vector<128x2xf32>
    %163 = vector.extract_strided_slice %40 {offsets = [10, 0], sizes = [2, 16], strides = [1, 1]} : vector<16x16xf32> to vector<2x16xf32>
    %cst_54 = arith.constant dense<0.000000e+00> : vector<128x16xf32>
    %164 = tpu.matmul %162, %163, %cst_54 {dimension_numbers = #tpu.dot_dimension_numbers<[1], [0], [0], [1], [0, 0, 1, 1], [], []>} : vector<128x2xf32>, vector<2x16xf32>, vector<128x16xf32> -> vector<128x16xf32>
    %165 = vector.shape_cast %164 : vector<128x16xf32> to vector<8x16x16xf32>
    "tpu.trace_start"() <{level = 10 : i32, message = "bnm,bmo->bno"}> : () -> ()
    %cst_55 = arith.constant dense<0.000000e+00> : vector<8x16x16xf32>
    %166 = tpu.matmul %161, %165, %cst_55 {dimension_numbers = #tpu.dot_dimension_numbers<[2], [1], [1], [2], [0, 0, 0, 1, 1, 2], [0], [0]>} : vector<8x16x16xf32>, vector<8x16x16xf32>, vector<8x16x16xf32> -> vector<8x16x16xf32>
    "tpu.trace_stop"() : () -> ()
    %167 = arith.addf %146, %166 : vector<8x16x16xf32>
    %168 = vector.extract_strided_slice %36 {offsets = [0, 0, 12], sizes = [8, 16, 2], strides = [1, 1, 1]} : vector<8x16x16xf32> to vector<8x16x2xf32>
    %169 = vector.extract_strided_slice %38 {offsets = [0, 0, 12], sizes = [8, 16, 2], strides = [1, 1, 1]} : vector<8x16x16xf32> to vector<8x16x2xf32>
    "tpu.trace_start"() <{level = 10 : i32, message = "bnd,bmd->bnm"}> : () -> ()
    %cst_56 = arith.constant dense<0.000000e+00> : vector<8x16x16xf32>
    %170 = tpu.matmul %168, %169, %cst_56 {dimension_numbers = #tpu.dot_dimension_numbers<[2], [2], [1], [1], [0, 0, 0, 1, 1, 1], [0], [0]>} : vector<8x16x2xf32>, vector<8x16x2xf32>, vector<8x16x16xf32> -> vector<8x16x16xf32>
    "tpu.trace_stop"() : () -> ()
    %cst_57 = arith.constant 0.707106769 : f32
    %171 = vector.broadcast %cst_57 : f32 to vector<8x16x16xf32>
    %172 = arith.mulf %170, %171 : vector<8x16x16xf32>
    %cst_58 = arith.constant dense<0xFF800000> : vector<8x16xf32>
    %173 = vector.multi_reduction <maximumf>, %172, %cst_58 [2] : vector<8x16x16xf32> to vector<8x16xf32>
    %174 = vector.shape_cast %173 : vector<8x16xf32> to vector<8x16x1xf32>
    %175 = vector.broadcast %174 : vector<8x16x1xf32> to vector<8x16x16xf32>
    %176 = arith.subf %172, %175 : vector<8x16x16xf32>
    %177 = math.exp %176 : vector<8x16x16xf32>
    %cst_59 = arith.constant dense<0.000000e+00> : vector<8x16xf32>
    %178 = vector.multi_reduction <add>, %177, %cst_59 [2] : vector<8x16x16xf32> to vector<8x16xf32>
    %179 = vector.shape_cast %178 : vector<8x16xf32> to vector<8x16x1xf32>
    %180 = tpu.reciprocal %179 {approx = true} : vector<8x16x1xf32> -> vector<8x16x1xf32>
    %181 = vector.broadcast %180 : vector<8x16x1xf32> to vector<8x16x16xf32>
    %182 = arith.mulf %177, %181 : vector<8x16x16xf32>
    %183 = vector.extract_strided_slice %39 {offsets = [0, 12], sizes = [128, 2], strides = [1, 1]} : vector<128x16xf32> to vector<128x2xf32>
    %184 = vector.extract_strided_slice %40 {offsets = [12, 0], sizes = [2, 16], strides = [1, 1]} : vector<16x16xf32> to vector<2x16xf32>
    %cst_60 = arith.constant dense<0.000000e+00> : vector<128x16xf32>
    %185 = tpu.matmul %183, %184, %cst_60 {dimension_numbers = #tpu.dot_dimension_numbers<[1], [0], [0], [1], [0, 0, 1, 1], [], []>} : vector<128x2xf32>, vector<2x16xf32>, vector<128x16xf32> -> vector<128x16xf32>
    %186 = vector.shape_cast %185 : vector<128x16xf32> to vector<8x16x16xf32>
    "tpu.trace_start"() <{level = 10 : i32, message = "bnm,bmo->bno"}> : () -> ()
    %cst_61 = arith.constant dense<0.000000e+00> : vector<8x16x16xf32>
    %187 = tpu.matmul %182, %186, %cst_61 {dimension_numbers = #tpu.dot_dimension_numbers<[2], [1], [1], [2], [0, 0, 0, 1, 1, 2], [0], [0]>} : vector<8x16x16xf32>, vector<8x16x16xf32>, vector<8x16x16xf32> -> vector<8x16x16xf32>
    "tpu.trace_stop"() : () -> ()
    %188 = arith.addf %167, %187 : vector<8x16x16xf32>
    %189 = vector.extract_strided_slice %36 {offsets = [0, 0, 14], sizes = [8, 16, 2], strides = [1, 1, 1]} : vector<8x16x16xf32> to vector<8x16x2xf32>
    %190 = vector.extract_strided_slice %38 {offsets = [0, 0, 14], sizes = [8, 16, 2], strides = [1, 1, 1]} : vector<8x16x16xf32> to vector<8x16x2xf32>
    "tpu.trace_start"() <{level = 10 : i32, message = "bnd,bmd->bnm"}> : () -> ()
    %cst_62 = arith.constant dense<0.000000e+00> : vector<8x16x16xf32>
    %191 = tpu.matmul %189, %190, %cst_62 {dimension_numbers = #tpu.dot_dimension_numbers<[2], [2], [1], [1], [0, 0, 0, 1, 1, 1], [0], [0]>} : vector<8x16x2xf32>, vector<8x16x2xf32>, vector<8x16x16xf32> -> vector<8x16x16xf32>
    "tpu.trace_stop"() : () -> ()
    %cst_63 = arith.constant 0.707106769 : f32
    %192 = vector.broadcast %cst_63 : f32 to vector<8x16x16xf32>
    %193 = arith.mulf %191, %192 : vector<8x16x16xf32>
    %cst_64 = arith.constant dense<0xFF800000> : vector<8x16xf32>
    %194 = vector.multi_reduction <maximumf>, %193, %cst_64 [2] : vector<8x16x16xf32> to vector<8x16xf32>
    %195 = vector.shape_cast %194 : vector<8x16xf32> to vector<8x16x1xf32>
    %196 = vector.broadcast %195 : vector<8x16x1xf32> to vector<8x16x16xf32>
    %197 = arith.subf %193, %196 : vector<8x16x16xf32>
    %198 = math.exp %197 : vector<8x16x16xf32>
    %cst_65 = arith.constant dense<0.000000e+00> : vector<8x16xf32>
    %199 = vector.multi_reduction <add>, %198, %cst_65 [2] : vector<8x16x16xf32> to vector<8x16xf32>
    %200 = vector.shape_cast %199 : vector<8x16xf32> to vector<8x16x1xf32>
    %201 = tpu.reciprocal %200 {approx = true} : vector<8x16x1xf32> -> vector<8x16x1xf32>
    %202 = vector.broadcast %201 : vector<8x16x1xf32> to vector<8x16x16xf32>
    %203 = arith.mulf %198, %202 : vector<8x16x16xf32>
    %204 = vector.extract_strided_slice %39 {offsets = [0, 14], sizes = [128, 2], strides = [1, 1]} : vector<128x16xf32> to vector<128x2xf32>
    %205 = vector.extract_strided_slice %40 {offsets = [14, 0], sizes = [2, 16], strides = [1, 1]} : vector<16x16xf32> to vector<2x16xf32>
    %cst_66 = arith.constant dense<0.000000e+00> : vector<128x16xf32>
    %206 = tpu.matmul %204, %205, %cst_66 {dimension_numbers = #tpu.dot_dimension_numbers<[1], [0], [0], [1], [0, 0, 1, 1], [], []>} : vector<128x2xf32>, vector<2x16xf32>, vector<128x16xf32> -> vector<128x16xf32>
    %207 = vector.shape_cast %206 : vector<128x16xf32> to vector<8x16x16xf32>
    "tpu.trace_start"() <{level = 10 : i32, message = "bnm,bmo->bno"}> : () -> ()
    %cst_67 = arith.constant dense<0.000000e+00> : vector<8x16x16xf32>
    %208 = tpu.matmul %203, %207, %cst_67 {dimension_numbers = #tpu.dot_dimension_numbers<[2], [1], [1], [2], [0, 0, 0, 1, 1, 2], [0], [0]>} : vector<8x16x16xf32>, vector<8x16x16xf32>, vector<8x16x16xf32> -> vector<8x16x16xf32>
    "tpu.trace_stop"() : () -> ()
    %209 = arith.addf %188, %208 : vector<8x16x16xf32>
    %210 = vector.shape_cast %209 : vector<8x16x16xf32> to vector<128x16xf32>
    %211 = arith.addf %0, %210 : vector<128x16xf32>
    %212 = vector.broadcast %4 : vector<1x16xf32> to vector<128x16xf32>
    %213 = arith.addf %211, %212 : vector<128x16xf32>
    %cst_68 = arith.constant dense<0.000000e+00> : vector<128xf32>
    %214 = vector.multi_reduction <add>, %213, %cst_68 [1] : vector<128x16xf32> to vector<128xf32>
    %215 = vector.shape_cast %214 : vector<128xf32> to vector<128x1xf32>
    %cst_69 = arith.constant 1.600000e+01 : f32
    %216 = vector.broadcast %cst_69 : f32 to vector<128x1xf32>
    %217 = arith.divf %215, %216 : vector<128x1xf32>
    %218 = vector.broadcast %217 : vector<128x1xf32> to vector<128x16xf32>
    %219 = arith.subf %213, %218 : vector<128x16xf32>
    %220 = arith.mulf %219, %219 : vector<128x16xf32>
    %cst_70 = arith.constant dense<0.000000e+00> : vector<128xf32>
    %221 = vector.multi_reduction <add>, %220, %cst_70 [1] : vector<128x16xf32> to vector<128xf32>
    %222 = vector.shape_cast %221 : vector<128xf32> to vector<128x1xf32>
    %cst_71 = arith.constant 1.600000e+01 : f32
    %223 = vector.broadcast %cst_71 : f32 to vector<128x1xf32>
    %224 = arith.divf %222, %223 : vector<128x1xf32>
    %225 = vector.broadcast %217 : vector<128x1xf32> to vector<128x16xf32>
    %226 = arith.subf %213, %225 : vector<128x16xf32>
    %cst_72 = arith.constant 9.99999974E-6 : f32
    %227 = vector.broadcast %cst_72 : f32 to vector<128x1xf32>
    %228 = arith.addf %224, %227 : vector<128x1xf32>
    %229 = math.rsqrt %228 : vector<128x1xf32>
    %230 = vector.broadcast %229 : vector<128x1xf32> to vector<128x16xf32>
    %231 = arith.mulf %226, %230 : vector<128x16xf32>
    %232 = vector.broadcast %5 : vector<1x16xf32> to vector<128x16xf32>
    %233 = arith.mulf %231, %232 : vector<128x16xf32>
    %234 = vector.broadcast %6 : vector<1x16xf32> to vector<128x16xf32>
    %235 = arith.addf %233, %234 : vector<128x16xf32>
    %c0_73 = arith.constant 0 : index
    %c0_74 = arith.constant 0 : index
    %236 = vector.load %arg4[%c0_73, %c0_74] : memref<16x160xf32, #tpu.memory_space<vmem>>, vector<16x160xf32>
    %cst_75 = arith.constant dense<0.000000e+00> : vector<128x160xf32>
    %237 = tpu.matmul %235, %236, %cst_75 {dimension_numbers = #tpu.dot_dimension_numbers<[1], [0], [0], [1], [0, 0, 1, 1], [], []>} : vector<128x16xf32>, vector<16x160xf32>, vector<128x160xf32> -> vector<128x160xf32>
    %238 = vector.broadcast %7 : vector<1x160xf32> to vector<128x160xf32>
    %239 = arith.addf %237, %238 : vector<128x160xf32>
    %cst_76 = arith.constant 5.000000e-01 : f32
    %240 = vector.broadcast %cst_76 : f32 to vector<128x160xf32>
    %241 = arith.mulf %240, %239 : vector<128x160xf32>
    %cst_77 = arith.constant 0.707106769 : f32
    %242 = vector.broadcast %cst_77 : f32 to vector<128x160xf32>
    %243 = arith.mulf %239, %242 : vector<128x160xf32>
    %244 = math.erf %243 : vector<128x160xf32>
    %cst_78 = arith.constant 1.000000e+00 : f32
    %245 = vector.broadcast %cst_78 : f32 to vector<128x160xf32>
    %246 = arith.addf %245, %244 : vector<128x160xf32>
    %247 = arith.mulf %241, %246 : vector<128x160xf32>
    %c0_79 = arith.constant 0 : index
    %c0_80 = arith.constant 0 : index
    %248 = vector.load %arg5[%c0_79, %c0_80] : memref<160x16xf32, #tpu.memory_space<vmem>>, vector<160x16xf32>
    %cst_81 = arith.constant dense<0.000000e+00> : vector<128x16xf32>
    %249 = tpu.matmul %247, %248, %cst_81 {dimension_numbers = #tpu.dot_dimension_numbers<[1], [0], [0], [1], [0, 0, 1, 1], [], []>} : vector<128x160xf32>, vector<160x16xf32>, vector<128x16xf32> -> vector<128x16xf32>
    %250 = vector.broadcast %8 : vector<1x16xf32> to vector<128x16xf32>
    %251 = arith.addf %249, %250 : vector<128x16xf32>
    %252 = arith.addf %213, %251 : vector<128x16xf32>
    %c0_82 = arith.constant 0 : index
    %c0_83 = arith.constant 0 : index
    %253 = vector.load %arg7[%c0_82, %c0_83] : memref<128x16xf32, #tpu.memory_space<vmem>>, vector<128x16xf32>
    tpu.vector_store %arg7[%c0_82, %c0_83], %252 {strides = array<i32>} : memref<128x16xf32, #tpu.memory_space<vmem>>, vector<128x16xf32>,
    return
  }
  func.func @transform_0(%arg0: i32) -> (i32, i32) {
    %c0_i32 = arith.constant 0 : i32
    %c0_i32_0 = arith.constant 0 : i32
    return %arg0, %c0_i32 : i32, i32
  }
  func.func @transform_1(%arg0: i32) -> (i32, i32) {
    %c0_i32 = arith.constant 0 : i32
    %c0_i32_0 = arith.constant 0 : i32
    %c0_i32_1 = arith.constant 0 : i32
    return %c0_i32, %c0_i32_0 : i32, i32
  }
  func.func @transform_2(%arg0: i32) -> (i32, i32) {
    %c0_i32 = arith.constant 0 : i32
    %c0_i32_0 = arith.constant 0 : i32
    %c0_i32_1 = arith.constant 0 : i32
    return %c0_i32, %c0_i32_0 : i32, i32
  }
  func.func @transform_3(%arg0: i32) -> (i32, i32) {
    %c0_i32 = arith.constant 0 : i32
    %c0_i32_0 = arith.constant 0 : i32
    %c0_i32_1 = arith.constant 0 : i32
    return %c0_i32, %c0_i32_0 : i32, i32
  }
  func.func @transform_4(%arg0: i32) -> (i32, i32) {
    %c0_i32 = arith.constant 0 : i32
    %c0_i32_0 = arith.constant 0 : i32
    %c0_i32_1 = arith.constant 0 : i32
    return %c0_i32, %c0_i32_0 : i32, i32
  }
  func.func @transform_5(%arg0: i32) -> (i32, i32) {
    %c0_i32 = arith.constant 0 : i32
    %c0_i32_0 = arith.constant 0 : i32
    %c0_i32_1 = arith.constant 0 : i32
    return %c0_i32, %c0_i32_0 : i32, i32
  }
  func.func @transform_6(%arg0: i32) -> (i32, i32) {
    %c0_i32 = arith.constant 0 : i32
    %c0_i32_0 = arith.constant 0 : i32
    return %arg0, %c0_i32 : i32, i32
  }
}

</mosaic_0001>

<bundles_post_ra>
// kernel: tpu_custom_call.1
= control target key start
LH: loop header
LB: loop body
LE: loop exit
PB: predicated region body
PF: predicated region fallthrough
CT: control target
= control target key end

     0   :  { %s20247_s21 = smov 0   ;;  %s24165_s0 = inlined_call_operand.vmem [shape: f32[256,16], index: 0, kind: input, shape index: {}]   ;;  %s24166_s1 = inlined_call_operand.vmem [shape: f32[16,48], index: 1, kind: input, shape index: {}]   ;;  %s24167_s2 = inlined_call_operand.vmem [shape: f32[16,16], index: 2, kind: input, shape index: {}]   ;;  %s24168_s3 = inlined_call_operand.vmem [shape: f32[16,160], index: 3, kind: input, shape index: {}]   ;;  %s24169_s4 = inlined_call_operand.vmem [shape: f32[160,16], index: 4, kind: input, shape index: {}]   ;;  %s24170_s5 = inlined_call_operand.vmem [shape: f32[8,160], index: 5, kind: input, shape index: {}]   ;;  %s24171_s6 = inlined_call_operand.vmem [shape: f32[256,16], index: 6, kind: output, shape index: {}]  }
   0x1 LB: > { %s15999_s22 = sadd.s32 4294967295, %s20185_s21   ;;  %p16003_p0 = scmp.ge.s32.totalorder %s20185_s21, 1  ;;  %s20185_s21 = sphi %s20247_s21, %s16_s21  }
   0x2   : > { %p213_p1 = scmp.lt.s32.totalorder %s20185_s21, 3 }
   0x4   : > { %p214_p2 = pnand %p16003_p0, %p213_p1 }
   0x6   : > { %217 = sbr.rel (%p214_p2) target bundleno = 5969 (0x1751), region = 44 }
   0xd   : > { %s16004_s23 = sshll.u32 %s15999_s22, 4  ;;  %vm280_vm0 = vcmask 130048   ;;  %vm725_vm1 = vcmask 15360   ;;  %s20187_s14 = smov 96   ;;  %vm1688_vm3 = vcmask 1041408   ;;  %vm15717_vm4 = vcmask 261120  }
   0xe   : > { %p244_p3 = scmp.lt.s32.totalorder %s16004_s23, 31  ;;  %s20188_s15 = smov 112   ;;  %vm20710_vm2 = vmpackc.low %vm725_vm1, %vm725_vm1 }
   0xf   : > { %s20189_s16 = smov 110   ;;  %s20190_s17 = smov 126  }
  0x10   : > { %s24397_s23 = smov (!%p244_p3, %s16004_s23), 31  ;;  %s20191_s18 = smov 94  }
  0x11   : > { %s16005_s24 = sshll.u32 %s24397_s23, 3  ;;  %s20192_s22 = smov 108  }
  0x12   : > { %s20263_s27 = scalar_lea.vmem %s24165_s0, %s16005_s24  ;;  %s20193_s25 = smov 124  }
  0x13   : > { %v255_v0 = vld [vmem:[%s20263_s27] sm:$0xff]  ;;  %v257_v1 = vld [vmem:[%s20263_s27 + $0x10] sm:$0xff]  ;;  %v256_v2 = vld [vmem:[%s20263_s27 + $0x8] sm:$0xff]  ;;  %s20194_s26 = smov 92   ;;  %s20195_s28 = smov 106  }
  0x14   : > { %v281_v3 = vsel %vm280_vm0, %v255_v0, 0.0  ;;  %v287_v4 = vsel %vm280_vm0, %v257_v1, 0.0  ;;  %v258_v5 = vld [vmem:[%s20263_s27 + $0x18] sm:$0xff]  ;;  %v284_v6 = vsel %vm280_vm0, %v256_v2, 0.0  ;;  %v259_v8 = vld [vmem:[%s20263_s27 + $0x20] sm:$0xff]  ;;  %v260_v9 = vld [vmem:[%s20263_s27 + $0x28] sm:$0xff] }
  0x15   : > { %282 = vadd.xlane.f32.xlu0 %v281_v3  ;;  %288 = vadd.xlane.f32.xlu1 %v287_v4  ;;  %v290_v7 = vsel %vm280_vm0, %v258_v5, 0.0  ;;  %v293_v10 = vsel %vm280_vm0, %v259_v8, 0.0  ;;  %v296_v11 = vsel %vm280_vm0, %v260_v9, 0.0  ;;  %v20278_v12 = vld [vmem:[%s20263_s27 + $0x30] sm:$0xff]  ;;  %v20281_v13 = vld [vmem:[%s20263_s27 + $0x38] sm:$0xff]  ;;  %v20288_v16 = vld [vmem:[%s20263_s27 + $0x40] sm:$0xff] }
  0x16   : > { %v299_v14 = vsel %vm280_vm0, %v20278_v12, 0.0  ;;  %v302_v15 = vsel %vm280_vm0, %v20281_v13, 0.0  ;;  %v20291_v17 = vld [vmem:[%s20263_s27 + $0x48] sm:$0xff]  ;;  %v305_v18 = vsel %vm280_vm0, %v20288_v16, 0.0  ;;  %v20298_v20 = vld [vmem:[%s20263_s27 + $0x50] sm:$0xff]  ;;  %v20301_v21 = vld [vmem:[%s20263_s27 + $0x58] sm:$0xff] }
  0x17   : > { %v308_v19 = vsel %vm280_vm0, %v20291_v17, 0.0  ;;  %v311_v22 = vsel %vm280_vm0, %v20298_v20, 0.0  ;;  %v314_v23 = vsel %vm280_vm0, %v20301_v21, 0.0  ;;  %v20308_v24 = vld [vmem:[%s20263_s27 + $0x60] sm:$0xff]  ;;  %v20311_v25 = vld [vmem:[%s20263_s27 + $0x68] sm:$0xff]  ;;  %v20318_v28 = vld [vmem:[%s20263_s27 + $0x70] sm:$0xff] }
  0x18   : > { %v317_v26 = vsel %vm280_vm0, %v20308_v24, 0.0  ;;  %v320_v27 = vsel %vm280_vm0, %v20311_v25, 0.0  ;;  %v20321_v29 = vld [vmem:[%s20263_s27 + $0x78] sm:$0xff]  ;;  %v323_v30 = vsel %vm280_vm0, %v20318_v28, 0.0  ;;  %s20196_s29 = smov 122   ;;  %s20197_s8 = smov 90  }
  0x19   : > { %285 = vadd.xlane.f32.xlu0 %v284_v6  ;;  %291 = vadd.xlane.f32.xlu1 %v290_v7  ;;  %v326_v31 = vsel %vm280_vm0, %v20321_v29, 0.0  ;;  %s20198_s9 = smov 104   ;;  %s20199_s10 = smov 120  }
  0x1a   : > { %s20200_s11 = smov 88   ;;  %s20201_s12 = smov 102  }
  0x1b   : > { %s20202_s13 = smov 118   ;;  %s20206_s19 = smov 84  }
  0x1d   : > { %294 = vadd.xlane.f32.xlu0 %v293_v10  ;;  %297 = vadd.xlane.f32.xlu1 %v296_v11 }
  0x21   : > { %300 = vadd.xlane.f32.xlu0 %v299_v14  ;;  %303 = vadd.xlane.f32.xlu1 %v302_v15 }
  0x25   : > { %306 = vadd.xlane.f32.xlu0 %v305_v18  ;;  %309 = vadd.xlane.f32.xlu1 %v308_v19 }
  0x29   : > { %312 = vadd.xlane.f32.xlu0 %v311_v22  ;;  %315 = vadd.xlane.f32.xlu1 %v314_v23 }
  0x2d   : > { %318 = vadd.xlane.f32.xlu0 %v317_v26  ;;  %321 = vadd.xlane.f32.xlu1 %v320_v27 }
  0x31   : > { %324 = vadd.xlane.f32.xlu0 %v323_v30  ;;  %327 = vadd.xlane.f32.xlu1 %v326_v31 }
  0xa2   : > { %v283_v32 = vpop.xlane.xlu0 %282  ;;  %v289_v33 = vpop.xlane.xlu1 %288 }
  0xa3   : > { %v330_v34 = vmul.f32 0.0625, %v283_v32  ;;  %v332_v35 = vmul.f32 0.0625, %v289_v33 }
  0xa5   : > { %v20327_v36 = vsub.f32 %v255_v0, %v330_v34  ;;  %v20329_v37 = vsub.f32 %v257_v1, %v332_v35 }
  0xa6   : > { %v286_v38 = vpop.xlane.xlu0 %285  ;;  %v292_v39 = vpop.xlane.xlu1 %291 }
  0xa7   : > { %v331_v40 = vmul.f32 0.0625, %v286_v38  ;;  %v333_v41 = vmul.f32 0.0625, %v292_v39  ;;  %v362_v42 = vmul.f32 %v20327_v36, %v20327_v36  ;;  %v364_v43 = vmul.f32 %v20329_v37, %v20329_v37 }
  0xa9   : > { %v20335_v44 = vsub.f32 %v256_v2, %v331_v40  ;;  %v20337_v45 = vsub.f32 %v258_v5, %v333_v41  ;;  %v378_v46 = vsel %vm280_vm0, %v362_v42, 0.0  ;;  %v384_v49 = vsel %vm280_vm0, %v364_v43, 0.0 }
  0xaa   : > { %379 = vadd.xlane.f32.xlu0 %v378_v46  ;;  %v295_v47 = vpop.xlane.xlu0 %294  ;;  %v298_v48 = vpop.xlane.xlu1 %297 }
  0xab   : > { %v334_v50 = vmul.f32 0.0625, %v295_v47  ;;  %v335_v51 = vmul.f32 0.0625, %v298_v48  ;;  %v363_v52 = vmul.f32 %v20335_v44, %v20335_v44  ;;  %v365_v53 = vmul.f32 %v20337_v45, %v20337_v45 }
  0xad   : > { %v20345_v54 = vsub.f32 %v259_v8, %v334_v50  ;;  %v20347_v55 = vsub.f32 %v260_v9, %v335_v51  ;;  %v381_v56 = vsel %vm280_vm0, %v363_v52, 0.0  ;;  %v387_v59 = vsel %vm280_vm0, %v365_v53, 0.0  ;;  %v523_v53 = vld [vmem:[%s24166_s1 + $0x8] sm:$0xff] }
  0xae   : > { %385 = vadd.xlane.f32.xlu0 %v384_v49  ;;  %382 = vadd.xlane.f32.xlu1 %v381_v56  ;;  %v301_v57 = vpop.xlane.xlu0 %300  ;;  %v304_v58 = vpop.xlane.xlu1 %303 }
  0xaf   : > { %v336_v60 = vmul.f32 0.0625, %v301_v57  ;;  %v337_v61 = vmul.f32 0.0625, %v304_v58  ;;  %v366_v62 = vmul.f32 %v20345_v54, %v20345_v54  ;;  %v367_v63 = vmul.f32 %v20347_v55, %v20347_v55 }
  0xb1   : > { %v20356_v0 = vsub.f32 %v20278_v12, %v336_v60  ;;  %v20359_v1 = vsub.f32 %v20281_v13, %v337_v61  ;;  %v390_v2 = vsel %vm280_vm0, %v366_v62, 0.0  ;;  %v393_v5 = vsel %vm280_vm0, %v367_v63, 0.0 }
  0xb2   : > { %388 = vadd.xlane.f32.xlu1 %v387_v59  ;;  %391 = vadd.xlane.f32.xlu0 %v390_v2  ;;  %v307_v3 = vpop.xlane.xlu0 %306  ;;  %v310_v4 = vpop.xlane.xlu1 %309 }
  0xb3   : > { %v338_v6 = vmul.f32 0.0625, %v307_v3  ;;  %v339_v7 = vmul.f32 0.0625, %v310_v4  ;;  %v368_v8 = vmul.f32 %v20356_v0, %v20356_v0  ;;  %v369_v9 = vmul.f32 %v20359_v1, %v20359_v1 }
  0xb5   : > { %v20368_v10 = vsub.f32 %v20288_v16, %v338_v6  ;;  %v20371_v11 = vsub.f32 %v20291_v17, %v339_v7  ;;  %v396_v12 = vsel %vm280_vm0, %v368_v8, 0.0  ;;  %v399_v15 = vsel %vm280_vm0, %v369_v9, 0.0 }
  0xb6   : > { %394 = vadd.xlane.f32.xlu1 %v393_v5  ;;  %397 = vadd.xlane.f32.xlu0 %v396_v12  ;;  %v313_v13 = vpop.xlane.xlu0 %312  ;;  %v316_v14 = vpop.xlane.xlu1 %315 }
  0xb7   : > { %v340_v18 = vmul.f32 0.0625, %v313_v13  ;;  %v341_v19 = vmul.f32 0.0625, %v316_v14  ;;  %v370_v22 = vmul.f32 %v20368_v10, %v20368_v10  ;;  %v371_v16 = vmul.f32 %v20371_v11, %v20371_v11 }
  0xb9   : > { %v20380_v23 = vsub.f32 %v20298_v20, %v340_v18  ;;  %v20383_v17 = vsub.f32 %v20301_v21, %v341_v19  ;;  %v402_v26 = vsel %vm280_vm0, %v370_v22, 0.0  ;;  %v405_v31 = vsel %vm280_vm0, %v371_v16, 0.0  ;;  %v20426_v16 = vld [vmem:[%s24170_s5] ss:$0 sm:$0xff] }
  0xba   : > { %400 = vadd.xlane.f32.xlu1 %v399_v15  ;;  %403 = vadd.xlane.f32.xlu0 %v402_v26  ;;  %v319_v27 = vpop.xlane.xlu0 %318  ;;  %v322_v30 = vpop.xlane.xlu1 %321 }
  0xbb   : > { %v342_v32 = vmul.f32 0.0625, %v319_v27  ;;  %v343_v33 = vmul.f32 0.0625, %v322_v30  ;;  %v372_v34 = vmul.f32 %v20380_v23, %v20380_v23  ;;  %v373_v20 = vmul.f32 %v20383_v17, %v20383_v17 }
  0xbd   : > { %v20392_v35 = vsub.f32 %v20308_v24, %v342_v32  ;;  %v20395_v21 = vsub.f32 %v20311_v25, %v343_v33  ;;  %v408_v38 = vsel %vm280_vm0, %v372_v34, 0.0  ;;  %v411_v41 = vsel %vm280_vm0, %v373_v20, 0.0  ;;  %v20432_v33 = vld [vmem:[%s24170_s5 + $0x1] ss:$0 sm:$0xff] }
  0xbe   : > { %406 = vadd.xlane.f32.xlu1 %v405_v31  ;;  %409 = vadd.xlane.f32.xlu0 %v408_v38  ;;  %v325_v39 = vpop.xlane.xlu0 %324  ;;  %v328_v40 = vpop.xlane.xlu1 %327 }
  0xbf   : > { %v344_v42 = vmul.f32 0.0625, %v325_v39  ;;  %v345_v43 = vmul.f32 0.0625, %v328_v40  ;;  %v374_v46 = vmul.f32 %v20392_v35, %v20392_v35  ;;  %v375_v24 = vmul.f32 %v20395_v21, %v20395_v21 }
  0xc1   : > { %v20404_v47 = vsub.f32 %v20318_v28, %v344_v42  ;;  %v20407_v25 = vsub.f32 %v20321_v29, %v345_v43  ;;  %v414_v48 = vsel %vm280_vm0, %v374_v46, 0.0  ;;  %v417_v49 = vsel %vm280_vm0, %v375_v24, 0.0  ;;  %v522_v29 = vld [vmem:[%s24166_s1] sm:$0xff] }
  0xc2   : > { %412 = vadd.xlane.f32.xlu1 %v411_v41  ;;  %415 = vadd.xlane.f32.xlu0 %v414_v48  ;;  %v18377_v56 = vpack.c.bf16 %v523_v53, %v522_v29 }
  0xc3   : > { %v376_v50 = vmul.f32 %v20404_v47, %v20404_v47  ;;  %v377_v51 = vmul.f32 %v20407_v25, %v20407_v25 }
  0xc4   : > { %18378 = vmatprep.subr.bf16.mxu0 %v18377_v56 }
  0xc5   : > { %v420_v52 = vsel %vm280_vm0, %v376_v50, 0.0  ;;  %v423_v28 = vsel %vm280_vm0, %v377_v51, 0.0  ;;  %18380 = vmatpush3.bf16.msra.mxu0 %v18377_v56 }
  0xc6   : > { %418 = vadd.xlane.f32.xlu1 %v417_v49  ;;  %421 = vadd.xlane.f32.xlu0 %v420_v52 }
  0xca   : > { %424 = vadd.xlane.f32.xlu1 %v423_v28 }
 0x137   : > { %v380_v57 = vpop.xlane.xlu0 %379 }
 0x138   : > { %v426_v58 = vmul.f32 0.0625, %v380_v57 }
 0x13a   : > { %v442_v59 = vadd.f32 1e-05, %v426_v58 }
 0x13b   : > { %v383_v60 = vpop.xlane.xlu1 %382  ;;  %v386_v61 = vpop.xlane.xlu0 %385 }
 0x13c   : > { %19520 = vrsqrt.f32 %v442_v59  ;;  %v427_v62 = vmul.f32 0.0625, %v383_v60  ;;  %v428_v63 = vmul.f32 0.0625, %v386_v61 }
 0x13e   : > { %v443_v2 = vadd.f32 1e-05, %v427_v62  ;;  %v444_v3 = vadd.f32 1e-05, %v428_v63 }
 0x13f   : > { %v389_v4 = vpop.xlane.xlu1 %388  ;;  %v392_v5 = vpop.xlane.xlu0 %391 }
 0x140   : > { %19522 = vrsqrt.f32 %v443_v2  ;;  %v429_v6 = vmul.f32 0.0625, %v389_v4  ;;  %v430_v7 = vmul.f32 0.0625, %v392_v5 }
 0x141   : > { %19524 = vrsqrt.f32 %v444_v3 }
 0x142   : > { %v445_v8 = vadd.f32 1e-05, %v429_v6  ;;  %v446_v9 = vadd.f32 1e-05, %v430_v7 }
 0x143   : > { %v395_v12 = vpop.xlane.xlu1 %394  ;;  %v398_v13 = vpop.xlane.xlu0 %397 }
 0x144   : > { %19526 = vrsqrt.f32 %v445_v8  ;;  %v431_v14 = vmul.f32 0.0625, %v395_v12  ;;  %v432_v15 = vmul.f32 0.0625, %v398_v13 }
 0x145   : > { %19528 = vrsqrt.f32 %v446_v9 }
 0x146   : > { %v19521_v18 = vpop.eup %19520  ;;  %v447_v19 = vadd.f32 1e-05, %v431_v14  ;;  %v448_v22 = vadd.f32 1e-05, %v432_v15 }
 0x147   : > { %v401_v26 = vpop.xlane.xlu1 %400  ;;  %v404_v27 = vpop.xlane.xlu0 %403  ;;  %v474_v30 = vmul.f32 %v19521_v18, %v20327_v36 }
 0x148   : > { %19530 = vrsqrt.f32 %v447_v19  ;;  %v433_v31 = vmul.f32 0.0625, %v401_v26  ;;  %v434_v32 = vmul.f32 0.0625, %v404_v27 }
 0x149   : > { %19532 = vrsqrt.f32 %v448_v22  ;;  %v490_v34 = vmul.f32 %v474_v30, %v20426_v16 }
 0x14a   : > { %v19523_v20 = vpop.eup %19522  ;;  %v449_v38 = vadd.f32 1e-05, %v433_v31  ;;  %v450_v39 = vadd.f32 1e-05, %v434_v32 }
 0x14b   : > { %v19525_v40 = vpop.eup %19524  ;;  %v407_v41 = vpop.xlane.xlu1 %406  ;;  %v506_v43 = vadd.f32 %v490_v34, %v20432_v33  ;;  %v475_v36 = vmul.f32 %v19523_v20, %v20335_v44 }
 0x14c   : > { %v410_v42 = vpop.xlane.xlu0 %409  ;;  %19534 = vrsqrt.f32 %v449_v38  ;;  %v435_v46 = vmul.f32 0.0625, %v407_v41  ;;  %v476_v48 = vmul.f32 %v19525_v40, %v20329_v37 }
 0x14d   : > { %v436_v24 = vmul.f32 0.0625, %v410_v42  ;;  %19536 = vrsqrt.f32 %v450_v39  ;;  %17249 = vmatprep.mubr.msk.f32.mxu0 %vm280_vm0, %v506_v43  ;;  %v491_v49 = vmul.f32 %v475_v36, %v20426_v16 }
 0x14e   : > { %v19527_v50 = vpop.eup %19526  ;;  %v451_v51 = vadd.f32 1e-05, %v435_v46  ;;  %v492_v28 = vmul.f32 %v476_v48, %v20426_v16 }
 0x14f   : > { %v452_v52 = vadd.f32 1e-05, %v436_v24  ;;  %v19529_v29 = vpop.eup %19528  ;;  %v413_v53 = vpop.xlane.xlu1 %412  ;;  %v507_v44 = vadd.f32 %v491_v49, %v20432_v33  ;;  %v477_v57 = vmul.f32 %v19527_v50, %v20337_v45 }
 0x150   : > { %v416_v56 = vpop.xlane.xlu0 %415  ;;  %19538 = vrsqrt.f32 %v451_v51  ;;  %v437_v58 = vmul.f32 0.0625, %v413_v53  ;;  %v508_v59 = vadd.f32 %v492_v28, %v20432_v33  ;;  %v478_v61 = vmul.f32 %v19529_v29, %v20345_v54 }
 0x151   : > { %v438_v37 = vmul.f32 0.0625, %v416_v56  ;;  %19540 = vrsqrt.f32 %v452_v52  ;;  %17250 = vmatmul.mubr.msk.f32.vlgmr.msra.gmra.mrb[0].mxu0 %vm280_vm0, %v507_v44  ;;  %v493_v60 = vmul.f32 %v477_v57, %v20426_v16 }
 0x152   : > { %v19531_v62 = vpop.eup %19530  ;;  %v453_v63 = vadd.f32 1e-05, %v437_v58  ;;  %17252 = vmatprep.mubr.msk.f32.mxu0 %vm280_vm0, %v508_v59  ;;  %v494_v6 = vmul.f32 %v478_v61, %v20426_v16  ;;  %v20500_v59 = vld [vmem:[%s24170_s5 + $0x2] ss:$0 sm:$0xff] }
 0x153   : > { %v454_v2 = vadd.f32 1e-05, %v438_v37  ;;  %v19533_v3 = vpop.eup %19532  ;;  %v419_v4 = vpop.xlane.xlu1 %418  ;;  %v509_v5 = vadd.f32 %v493_v60, %v20432_v33  ;;  %v479_v7 = vmul.f32 %v19531_v62, %v20347_v55 }
 0x154   : > { %v422_v45 = vpop.xlane.xlu0 %421  ;;  %19542 = vrsqrt.f32 %v453_v63  ;;  %v439_v8 = vmul.f32 0.0625, %v419_v4  ;;  %v480_v12 = vmul.f32 %v19533_v3, %v20356_v0  ;;  %v510_v54 = vadd.f32 %v494_v6, %v20432_v33 }
 0x155   : > { %v440_v9 = vmul.f32 0.0625, %v422_v45  ;;  %19544 = vrsqrt.f32 %v454_v2  ;;  %17253 = vmatmul.mubr.msk.f32.gmra.mrb[2].mxu0 %vm280_vm0, %v509_v5  ;;  %v495_v13 = vmul.f32 %v479_v7, %v20426_v16 }
 0x156   : > { %v19535_v14 = vpop.eup %19534  ;;  %v455_v15 = vadd.f32 1e-05, %v439_v8  ;;  %v496_v19 = vmul.f32 %v480_v12, %v20426_v16  ;;  %17255 = vmatprep.mubr.msk.f32.mxu0 %vm280_vm0, %v510_v54 }
 0x157   : > { %v456_v18 = vadd.f32 1e-05, %v440_v9  ;;  %v19537_v22 = vpop.eup %19536  ;;  %v425_v55 = vpop.xlane.xlu1 %424  ;;  %v511_v26 = vadd.f32 %v495_v13, %v20432_v33  ;;  %v481_v0 = vmul.f32 %v19535_v14, %v20359_v1 }
 0x158   : > { %19546 = vrsqrt.f32 %v455_v15  ;;  %v441_v27 = vmul.f32 0.0625, %v425_v55  ;;  %v512_v30 = vadd.f32 %v496_v19, %v20432_v33  ;;  %v482_v31 = vmul.f32 %v19537_v22, %v20368_v10 }
 0x159   : > { %19548 = vrsqrt.f32 %v456_v18  ;;  %17256 = vmatmul.mubr.msk.f32.gmra.mrb[4].mxu0 %vm280_vm0, %v511_v26  ;;  %v497_v32 = vmul.f32 %v481_v0, %v20426_v16 }
 0x15a   : > { %v19539_v34 = vpop.eup %19538  ;;  %v457_v20 = vadd.f32 1e-05, %v441_v27  ;;  %17258 = vmatprep.mubr.msk.f32.mxu0 %vm280_vm0, %v512_v30  ;;  %v498_v38 = vmul.f32 %v482_v31, %v20426_v16 }
 0x15b   : > { %v19541_v39 = vpop.eup %19540  ;;  %v513_v1 = vadd.f32 %v497_v32, %v20432_v33  ;;  %v483_v40 = vmul.f32 %v19539_v34, %v20371_v11 }
 0x15c   : > { %19550 = vrsqrt.f32 %v457_v20  ;;  %v514_v41 = vadd.f32 %v498_v38, %v20432_v33  ;;  %v484_v10 = vmul.f32 %v19541_v39, %v20380_v23 }
 0x15d   : > { %17259 = vmatmul.mubr.msk.f32.gmra.mrb[6].mxu0 %vm280_vm0, %v513_v1  ;;  %v499_v42 = vmul.f32 %v483_v40, %v20426_v16 }
 0x15e   : > { %v19543_v43 = vpop.eup %19542  ;;  %17261 = vmatprep.mubr.msk.f32.mxu0 %vm280_vm0, %v514_v41  ;;  %v500_v36 = vmul.f32 %v484_v10, %v20426_v16 }
 0x15f   : > { %v19545_v46 = vpop.eup %19544  ;;  %v515_v24 = vadd.f32 %v499_v42, %v20432_v33  ;;  %v485_v48 = vmul.f32 %v19543_v43, %v20383_v17 }
 0x160   : > { %v516_v11 = vadd.f32 %v500_v36, %v20432_v33  ;;  %v486_v49 = vmul.f32 %v19545_v46, %v20392_v35 }
 0x161   : > { %17262 = vmatmul.mubr.msk.f32.gmra.mrb[8].mxu0 %vm280_vm0, %v515_v24  ;;  %v501_v23 = vmul.f32 %v485_v48, %v20426_v16  ;;  %v24288_v48 = vmov 0 }
 0x162   : > { %v19547_v50 = vpop.eup %19546  ;;  %17264 = vmatprep.mubr.msk.f32.mxu0 %vm280_vm0, %v516_v11  ;;  %v502_v51 = vmul.f32 %v486_v49, %v20426_v16  ;;  %v24289_v48 = vsel %vm20710_vm2, 4294967295, %v24288_v48 }
 0x163   : > { %v19549_v52 = vpop.eup %19548  ;;  %v517_v28 = vadd.f32 %v501_v23, %v20432_v33  ;;  %v487_v29 = vmul.f32 %v19547_v50, %v20395_v21  ;;  %24290 = vst [vmem:[#allocation26_spill] sm:$0xff] %v24289_v48 }
 0x164   : > { %v518_v17 = vadd.f32 %v502_v51, %v20432_v33  ;;  %v488_v53 = vmul.f32 %v19549_v52, %v20404_v47 }
 0x165   : > { %17265 = vmatmul.mubr.msk.f32.gmra.mrb[10].mxu0 %vm280_vm0, %v517_v28  ;;  %v503_v35 = vmul.f32 %v487_v29, %v20426_v16 }
 0x166   : > { %v19551_v56 = vpop.eup %19550  ;;  %17267 = vmatprep.mubr.msk.f32.mxu0 %vm280_vm0, %v518_v17  ;;  %v504_v44 = vmul.f32 %v488_v53, %v20426_v16 }
 0x167   : > { %v519_v57 = vadd.f32 %v503_v35, %v20432_v33  ;;  %v489_v58 = vmul.f32 %v19551_v56, %v20407_v25 }
 0x168   : > { %v520_v37 = vadd.f32 %v504_v44, %v20432_v33 }
 0x169   : > { %17268 = vmatmul.mubr.msk.f32.gmra.mrb[12].mxu0 %vm280_vm0, %v519_v57  ;;  %v505_v21 = vmul.f32 %v489_v58, %v20426_v16 }
 0x16a   : > { %17270 = vmatprep.mubr.msk.f32.mxu0 %vm280_vm0, %v520_v37 }
 0x16b   : > { %v521_v47 = vadd.f32 %v505_v21, %v20432_v33 }
 0x16d   : > { %17271 = vmatmul.mubr.msk.f32.gmra.mrb[14].mxu0 %vm280_vm0, %v521_v47 }
 0x224   : > { %v17251_v60 = vpop.f32.mrb[0].mxu0 }
 0x225   : > { %v20503_v25 = vadd.f32 %v17251_v60, %v20500_v59  ;;  %v638_v61 = vpop.f32.mrb[1].mxu0 }
 0x226   : > { %v20506_v62 = vadd.f32 %v638_v61, %v20500_v59 }
 0x227   : > { %24264 = vst [vmem:[#allocation2_spill] sm:$0xff] %v20503_v25  ;;  %1626 = vrot.lane.b32.xlu1 %v20503_v25, %s20187_s14 }
 0x228   : > { %24265 = vst [vmem:[#allocation3_spill] sm:$0xff] %v20506_v62  ;;  %v17254_v16 = vpop.f32.mrb[2].mxu0  ;;  %17277 = vmatprep.mubr.msk.f32.mxu1 %vm725_vm1, %v20506_v62  ;;  %v20514_v33 = vpack.i.bf16 %v20503_v25, %v20506_v62 }
 0x229   : > { %v20517_v63 = vadd.f32 %v17254_v16, %v20500_v59  ;;  %v648_v2 = vpop.f32.mrb[3].mxu0 }
 0x22a   : > { %24266 = vst [vmem:[#allocation4_spill] sm:$0xff] %v20514_v33  ;;  %v20520_v3 = vadd.f32 %v648_v2, %v20500_v59  ;;  %19201 = vrot.lane.b32.xlu0 %v20514_v33, %s20188_s15 }
 0x22b   : > { %24267 = vst [vmem:[#allocation5_spill] sm:$0xff] %v20517_v63 }
 0x22c   : > { %24268 = vst [vmem:[#allocation6_spill] sm:$0xff] %v20520_v3  ;;  %v17257_v4 = vpop.f32.mrb[4].mxu0  ;;  %v20526_v45 = vpack.i.bf16 %v20517_v63, %v20520_v3 }
 0x22d   : > { %v658_v5 = vpop.f32.mrb[5].mxu0  ;;  %v20533_v6 = vadd.f32 %v17257_v4, %v20500_v59 }
 0x22e   : > { %24269 = vst [vmem:[#allocation7_spill] sm:$0xff] %v20526_v45  ;;  %1624 = vrot.lane.b32.xlu0 %v20506_v62, %s20187_s14  ;;  %19211 = vrot.lane.b32.xlu1 %v20526_v45, %s20188_s15  ;;  %v20536_v7 = vadd.f32 %v658_v5, %v20500_v59 }
 0x22f   : > { %24270 = vst [vmem:[#allocation8_spill] sm:$0xff] %v20533_v6 }
 0x230   : > { %24271 = vst [vmem:[#allocation9_spill] sm:$0xff] %v20536_v7  ;;  %v17260_v8 = vpop.f32.mrb[6].mxu0  ;;  %v20544_v54 = vpack.i.bf16 %v20533_v6, %v20536_v7 }
 0x231   : > { %v668_v9 = vpop.f32.mrb[7].mxu0  ;;  %v20557_v18 = vadd.f32 %v17260_v8, %v20500_v59 }
 0x232   : > { %19206 = vrot.lane.b32.xlu0 %v20514_v33, %s20189_s16  ;;  %1628 = vrot.lane.b32.xlu1 %v20520_v3, %s20187_s14  ;;  %24272 = vst [vmem:[#allocation10_spill] sm:$0xff] %v20544_v54  ;;  %v20560_v19 = vadd.f32 %v668_v9, %v20500_v59 }
 0x233   : > { %24275 = vst [vmem:[#allocation13_spill] sm:$0xff] %v20557_v18 }
 0x234   : > { %v17263_v12 = vpop.f32.mrb[8].mxu0  ;;  %24276 = vst [vmem:[#allocation14_spill] sm:$0xff] %v20560_v19  ;;  %v20574_v27 = vpack.i.bf16 %v20557_v18, %v20560_v19 }
 0x235   : > { %v20547_v13 = vadd.f32 %v17263_v12, %v20500_v59  ;;  %v678_v14 = vpop.f32.mrb[9].mxu0 }
 0x236   : > { %v20550_v15 = vadd.f32 %v678_v14, %v20500_v59  ;;  %1630 = vrot.lane.b32.xlu0 %v20517_v63, %s20187_s14  ;;  %19216 = vrot.lane.b32.xlu1 %v20544_v54, %s20188_s15  ;;  %24278 = vst [vmem:[#allocation16_spill] sm:$0xff] %v20574_v27 }
 0x237   : > { %24273 = vst [vmem:[#allocation11_spill] sm:$0xff] %v20547_v13 }
 0x238   : > { %24274 = vst [vmem:[#allocation12_spill] sm:$0xff] %v20550_v15  ;;  %v17266_v22 = vpop.f32.mrb[10].mxu0  ;;  %17305 = vmatprep.mubr.msk.f32.mxu0 %vm725_vm1, %v20550_v15  ;;  %v20566_v55 = vpack.i.bf16 %v20547_v13, %v20550_v15 }
 0x239   : > { %v688_v26 = vpop.f32.mrb[11].mxu0  ;;  %v20587_v34 = vadd.f32 %v17266_v22, %v20500_v59 }
 0x23a   : > { %24277 = vst [vmem:[#allocation15_spill] sm:$0xff] %v20566_v55  ;;  %1632 = vrot.lane.b32.xlu1 %v20536_v7, %s20187_s14  ;;  %19226 = vrot.lane.b32.xlu0 %v20566_v55, %s20188_s15  ;;  %v20590_v20 = vadd.f32 %v688_v26, %v20500_v59 }
 0x23b   : > { %24281 = vst [vmem:[#allocation19_spill] sm:$0xff] %v20587_v34 }
 0x23c   : > { %v17269_v0 = vpop.f32.mrb[12].mxu0  ;;  %24282 = vst [vmem:[#allocation20_spill] sm:$0xff] %v20590_v20  ;;  %v20602_v40 = vpack.i.bf16 %v20587_v34, %v20590_v20 }
 0x23d   : > { %v20577_v30 = vadd.f32 %v17269_v0, %v20500_v59  ;;  %v698_v31 = vpop.f32.mrb[13].mxu0 }
 0x23e   : > { %v20580_v32 = vadd.f32 %v698_v31, %v20500_v59  ;;  %19221 = vrot.lane.b32.xlu1 %v20574_v27, %s20188_s15  ;;  %1634 = vrot.lane.b32.xlu0 %v20533_v6, %s20187_s14  ;;  %24284 = vst [vmem:[#allocation22_spill] sm:$0xff] %v20602_v40  ;;  %v20765_v31 = vld [vmem:[%s24167_s2] sm:$0xff] }
 0x23f   : > { %24279 = vst [vmem:[#allocation17_spill] sm:$0xff] %v20577_v30 }
 0x240   : > { %24280 = vst [vmem:[#allocation18_spill] sm:$0xff] %v20580_v32  ;;  %v17272_v38 = vpop.f32.mrb[14].mxu0  ;;  %v20594_v39 = vpack.i.bf16 %v20577_v30, %v20580_v32 }
 0x241   : > { %v708_v1 = vpop.f32.mrb[15].mxu0  ;;  %v20613_v41 = vadd.f32 %v17272_v38, %v20500_v59 }
 0x242   : > { %24283 = vst [vmem:[#allocation21_spill] sm:$0xff] %v20594_v39  ;;  %19231 = vrot.lane.b32.xlu1 %v20526_v45, %s20189_s16  ;;  %19241 = vrot.lane.b32.xlu0 %v20594_v39, %s20188_s15  ;;  %v20616_v10 = vadd.f32 %v708_v1, %v20500_v59 }
 0x243   : > { %24285 = vst [vmem:[#allocation23_spill] sm:$0xff] %v20613_v41 }
 0x244   : > { %24286 = vst [vmem:[#allocation24_spill] sm:$0xff] %v20616_v10  ;;  %v20624_v42 = vpack.i.bf16 %v20613_v41, %v20616_v10 }
 0x246   : > { %19236 = vrot.lane.b32.xlu1 %v20602_v40, %s20188_s15  ;;  %1636 = vrot.lane.b32.xlu0 %v20560_v19, %s20187_s14  ;;  %24287 = vst [vmem:[#allocation25_spill] sm:$0xff] %v20624_v42 }
 0x24a   : > { %1638 = vrot.lane.b32.xlu1 %v20557_v18, %s20187_s14  ;;  %1837 = vrot.lane.b32.xlu0 %v20506_v62, %s20190_s17 }
 0x24e   : > { %1839 = vrot.lane.b32.xlu1 %v20503_v25, %s20190_s17  ;;  %1640 = vrot.lane.b32.xlu0 %v20550_v15, %s20187_s14 }
 0x252   : > { %19251 = vrot.lane.b32.xlu0 %v20544_v54, %s20189_s16  ;;  %19246 = vrot.lane.b32.xlu1 %v20624_v42, %s20188_s15 }
 0x256   : > { %1646 = vrot.lane.b32.xlu0 %v20587_v34, %s20187_s14  ;;  %1642 = vrot.lane.b32.xlu1 %v20547_v13, %s20187_s14 }
 0x25a   : > { %1930 = vrot.lane.b32.xlu0 %v20517_v63, %s20190_s17  ;;  %1644 = vrot.lane.b32.xlu1 %v20590_v20, %s20187_s14 }
 0x25e   : > { %1648 = vrot.lane.b32.xlu0 %v20580_v32, %s20187_s14  ;;  %1928 = vrot.lane.b32.xlu1 %v20520_v3, %s20190_s17 }
 0x262   : > { %19261 = vrot.lane.b32.xlu0 %v20566_v55, %s20189_s16  ;;  %19256 = vrot.lane.b32.xlu1 %v20574_v27, %s20189_s16 }
 0x266   : > { %2019 = vrot.lane.b32.xlu0 %v20536_v7, %s20190_s17  ;;  %1650 = vrot.lane.b32.xlu1 %v20577_v30, %s20187_s14 }
 0x26a   : > { %2021 = vrot.lane.b32.xlu0 %v20533_v6, %s20190_s17  ;;  %1654 = vrot.lane.b32.xlu1 %v20613_v41, %s20187_s14 }
 0x26e   : > { %2110 = vrot.lane.b32.xlu0 %v20560_v19, %s20190_s17  ;;  %19266 = vrot.lane.b32.xlu1 %v20602_v40, %s20189_s16 }
 0x272   : > { %19271 = vrot.lane.b32.xlu0 %v20594_v39, %s20189_s16  ;;  %1652 = vrot.lane.b32.xlu1 %v20616_v10, %s20187_s14 }
 0x276   : > { %2203 = vrot.lane.b32.xlu0 %v20547_v13, %s20190_s17  ;;  %2112 = vrot.lane.b32.xlu1 %v20557_v18, %s20190_s17 }
 0x27a   : > { %2292 = vrot.lane.b32.xlu0 %v20590_v20, %s20190_s17  ;;  %2201 = vrot.lane.b32.xlu1 %v20550_v15, %s20190_s17 }
 0x27e   : > { %2383 = vrot.lane.b32.xlu0 %v20580_v32, %s20190_s17  ;;  %19276 = vrot.lane.b32.xlu1 %v20624_v42, %s20189_s16  ;;  %s20203_s16 = smov 86  }
 0x282   : > { %2474 = vrot.lane.b32.xlu0 %v20616_v10, %s20190_s17  ;;  %2294 = vrot.lane.b32.xlu1 %v20587_v34, %s20190_s17 }
 0x286   : > { %2757 = vrot.lane.b32.xlu0 %v20506_v62, %s20191_s18  ;;  %2385 = vrot.lane.b32.xlu1 %v20577_v30, %s20190_s17 }
 0x28a   : > { %2761 = vrot.lane.b32.xlu0 %v20520_v3, %s20191_s18  ;;  %2476 = vrot.lane.b32.xlu1 %v20613_v41, %s20190_s17  ;;  %s20204_s17 = smov 100  }
 0x28e   : > { %2765 = vrot.lane.b32.xlu0 %v20536_v7, %s20191_s18  ;;  %2759 = vrot.lane.b32.xlu1 %v20503_v25, %s20191_s18 }
 0x292   : > { %2769 = vrot.lane.b32.xlu0 %v20560_v19, %s20191_s18  ;;  %2763 = vrot.lane.b32.xlu1 %v20517_v63, %s20191_s18 }
 0x296   : > { %2773 = vrot.lane.b32.xlu0 %v20550_v15, %s20191_s18  ;;  %2767 = vrot.lane.b32.xlu1 %v20533_v6, %s20191_s18 }
 0x299   : > { %v20702_v43 = vpop.permute.xlu1 %1626 }
 0x29a   : > { %2777 = vrot.lane.b32.xlu0 %v20590_v20, %s20191_s18  ;;  %2771 = vrot.lane.b32.xlu1 %v20557_v18, %s20191_s18 }
 0x29c   : > { %v19202_v36 = vpop.permute.xlu0 %19201 }
 0x29d   : > { %v19204_v46 = vunpack.i.h.bf16 %v19202_v36  ;;  %v19203_v24 = vunpack.i.l.bf16 %v19202_v36 }
 0x29e   : > { %2781 = vrot.lane.b32.xlu0 %v20580_v32, %s20191_s18  ;;  %2775 = vrot.lane.b32.xlu1 %v20547_v13, %s20191_s18 }
 0x29f   : > { %v18381_v11 = vpack.c.bf16 %v19204_v46, %v19203_v24 }
 0x2a0   : > { %v19212_v49 = vpop.permute.xlu1 %19211  ;;  %v20714_v23 = vpop.permute.xlu0 %1624 }
 0x2a1   : > { %v19214_v50 = vunpack.i.h.bf16 %v19212_v49  ;;  %v19213_v51 = vunpack.i.l.bf16 %v19212_v49  ;;  %18383 = vmatprep.subr.msk.bf16.mxu1 %vm20710_vm2, %v18381_v11 }
 0x2a2   : > { %2785 = vrot.lane.b32.xlu0 %v20616_v10, %s20191_s18  ;;  %2779 = vrot.lane.b32.xlu1 %v20587_v34, %s20191_s18 }
 0x2a3   : > { %v18387_v52 = vpack.c.bf16 %v19214_v50, %v19213_v51  ;;  %18386 = vmatpush3.bf16.xpose.msk.msra.mxu1 %vm20710_vm2, %v18381_v11 }
 0x2a4   : > { %v20724_v28 = vpop.permute.xlu1 %1628  ;;  %v20726_v29 = vpop.permute.xlu0 %19206 }
 0x2a5   : > { %18389 = vmatprep.subr.msk.bf16.mxu1 %vm20710_vm2, %v18387_v52 }
 0x2a6   : > { %2783 = vrot.lane.b32.xlu1 %v20577_v30, %s20191_s18 }
 0x2a8   : > { %v19217_v17 = vpop.permute.xlu1 %19216  ;;  %v20732_v53 = vpop.permute.xlu0 %1630 }
 0x2a9   : > { %v19219_v35 = vunpack.i.h.bf16 %v19217_v17  ;;  %v19218_v56 = vunpack.i.l.bf16 %v19217_v17 }
 0x2aa   : > { %17278 = vmatmul.mubr.msk.f32.vlgmr.msra.gmra.mrb[0].mxu1 %vm725_vm1, %v20503_v25  ;;  %2787 = vrot.lane.b32.xlu1 %v20613_v41, %s20191_s18  ;;  %s20205_s18 = smov 116  }
 0x2ab   : > { %v18393_v44 = vpack.c.bf16 %v19219_v35, %v19218_v56  ;;  %18392 = vmatpush3.bf16.xpose.msk.msra.mxu1 %vm20710_vm2, %v18387_v52  ;;  %17284 = vmatprep.mubr.msk.f32.mxu1 %vm725_vm1, %v20520_v3  ;;  %v19209_v52 = vunpack.i.h.bf16 %v20726_v29 }
 0x2ac   : > { %v20742_v57 = vpop.permute.xlu1 %1632  ;;  %v19227_v58 = vpop.permute.xlu0 %19226 }
 0x2ad   : > { %v19229_v37 = vunpack.i.h.bf16 %v19227_v58  ;;  %v19228_v21 = vunpack.i.l.bf16 %v19227_v58  ;;  %18395 = vmatprep.subr.msk.bf16.mxu1 %vm20710_vm2, %v18393_v44 }
 0x2af   : > { %v18405_v47 = vpack.c.bf16 %v19229_v37, %v19228_v21 }
 0x2b0   : > { %v19222_v59 = vpop.permute.xlu1 %19221  ;;  %v1635_v60 = vpop.permute.xlu0 %1634 }
 0x2b1   : > { %v19224_v61 = vunpack.i.h.bf16 %v19222_v59  ;;  %v19223_v16 = vunpack.i.l.bf16 %v19222_v59  ;;  %18407 = vmatprep.subr.msk.bf16.mxu0 %vm20710_vm2, %v18405_v47 }
 0x2b2   : > { %17285 = vmatmul.mubr.msk.f32.vlgmr.msra.gmra.mrb[2].mxu1 %vm725_vm1, %v20517_v63  ;;  %18410 = vmatpush3.bf16.xpose.msk.msra.mxu0 %vm20710_vm2, %v18405_v47 }
 0x2b3   : > { %v18399_v2 = vpack.c.bf16 %v19224_v61, %v19223_v16  ;;  %18398 = vmatpush3.bf16.xpose.msk.msra.mxu1 %vm20710_vm2, %v18393_v44  ;;  %17291 = vmatprep.mubr.msk.f32.mxu1 %vm725_vm1, %v20536_v7 }
 0x2b4   : > { %v19232_v4 = vpop.permute.xlu1 %19231  ;;  %v19242_v5 = vpop.permute.xlu0 %19241 }
 0x2b5   : > { %v19244_v8 = vunpack.i.h.bf16 %v19242_v5  ;;  %v19243_v9 = vunpack.i.l.bf16 %v19242_v5  ;;  %18401 = vmatprep.subr.msk.bf16.mxu1 %vm20710_vm2, %v18399_v2 }
 0x2b7   : > { %v18417_v12 = vpack.c.bf16 %v19244_v8, %v19243_v9 }
 0x2b8   : > { %v19237_v14 = vpop.permute.xlu1 %19236  ;;  %v1637_v22 = vpop.permute.xlu0 %1636 }
 0x2b9   : > { %v19239_v26 = vunpack.i.h.bf16 %v19237_v14  ;;  %v19238_v0 = vunpack.i.l.bf16 %v19237_v14  ;;  %17306 = vmatmul.mubr.msk.f32.vlgmr.msra.gmra.mrb[16].mxu0 %vm725_vm1, %v20547_v13  ;;  %18419 = vmatprep.subr.msk.bf16.mxu0 %vm20710_vm2, %v18417_v12 }
 0x2ba   : > { %17292 = vmatmul.mubr.msk.f32.vlgmr.msra.gmra.mrb[4].mxu1 %vm725_vm1, %v20533_v6  ;;  %18422 = vmatpush3.bf16.xpose.msk.msra.mxu0 %vm20710_vm2, %v18417_v12 }
 0x2bb   : > { %v18411_v38 = vpack.c.bf16 %v19239_v26, %v19238_v0  ;;  %18404 = vmatpush3.bf16.xpose.msk.msra.mxu1 %vm20710_vm2, %v18399_v2  ;;  %17298 = vmatprep.mubr.msk.f32.mxu1 %vm725_vm1, %v20560_v19 }
 0x2bc   : > { %17319 = vmatprep.mubr.msk.f32.mxu0 %vm725_vm1, %v20580_v32  ;;  %v1639_v1 = vpop.permute.xlu1 %1638  ;;  %v1838_v36 = vpop.permute.xlu0 %1837  ;;  %17329 = vmatprep.subr.msk.mxu0 %vm1688_vm3, %v20765_v31 }
 0x2bd   : > { %18413 = vmatprep.subr.msk.bf16.mxu1 %vm20710_vm2, %v18411_v38 }
 0x2c0   : > { %v1840_v46 = vpop.permute.xlu1 %1839  ;;  %v1641_v24 = vpop.permute.xlu0 %1640 }
 0x2c1   : > { %17320 = vmatmul.mubr.msk.f32.vlgmr.msra.gmra.mrb[18].mxu0 %vm725_vm1, %v20577_v30 }
 0x2c2   : > { %17299 = vmatmul.mubr.msk.f32.vlgmr.msra.gmra.mrb[6].mxu1 %vm725_vm1, %v20557_v18  ;;  %17331 = vmatprep.mubr.msk.f32.mxu0 %vm725_vm1, %v20714_v23  ;;  %v19208_v23 = vunpack.i.l.bf16 %v20726_v29  ;;  %v19234_v29 = vunpack.i.h.bf16 %v19232_v4 }
 0x2c3   : > { %18416 = vmatpush3.bf16.xpose.msk.msra.mxu1 %vm20710_vm2, %v18411_v38  ;;  %17312 = vmatprep.mubr.msk.f32.mxu1 %vm725_vm1, %v20590_v20 }
 0x2c4   : > { %v19247_v11 = vpop.permute.xlu1 %19246  ;;  %v19252_v49 = vpop.permute.xlu0 %19251  ;;  %17330 = vmatpush3.msk.msra.mxu0 %vm1688_vm3, %v20765_v31  ;;  %v18429_v44 = vpack.c.bf16 %v19209_v52, %v19208_v23 }
 0x2c5   : > { %v19249_v50 = vunpack.i.h.bf16 %v19247_v11  ;;  %v19248_v51 = vunpack.i.l.bf16 %v19247_v11  ;;  %17332 = vmatmul.mubr.msk.f32.vlgmr.msra.gmra.mrb[20].mxu0 %vm725_vm1, %v20702_v43  ;;  %v19254_v61 = vunpack.i.h.bf16 %v19252_v49  ;;  %v19253_v16 = vunpack.i.l.bf16 %v19252_v49 }
 0x2c6   : > { %17334 = vmatprep.mubr.msk.f32.mxu0 %vm725_vm1, %v20724_v28 }
 0x2c7   : > { %v18423_v17 = vpack.c.bf16 %v19249_v50, %v19248_v51  ;;  %v18441_v8 = vpack.c.bf16 %v19254_v61, %v19253_v16 }
 0x2c8   : > { %v1643_v35 = vpop.permute.xlu1 %1642  ;;  %v1647_v56 = vpop.permute.xlu0 %1646 }
 0x2c9   : > { %18425 = vmatprep.subr.msk.bf16.mxu1 %vm20710_vm2, %v18423_v17  ;;  %17335 = vmatmul.mubr.msk.f32.gmra.mrb[22].mxu0 %vm725_vm1, %v20732_v53  ;;  %v19233_v53 = vunpack.i.l.bf16 %v19232_v4 }
 0x2ca   : > { %17313 = vmatmul.mubr.msk.f32.vlgmr.msra.gmra.mrb[8].mxu1 %vm725_vm1, %v20587_v34  ;;  %17337 = vmatprep.mubr.msk.f32.mxu0 %vm725_vm1, %v20742_v57 }
 0x2cb   : > { %18428 = vmatpush3.bf16.xpose.msk.msra.mxu1 %vm20710_vm2, %v18423_v17  ;;  %17326 = vmatprep.mubr.msk.f32.mxu1 %vm725_vm1, %v20616_v10  ;;  %v18435_v57 = vpack.c.bf16 %v19234_v29, %v19233_v53  ;;  %v2789_v53 = vrot.slane %v20765_v31, 2 }
 0x2cc   : > { %18431 = vmatprep.subr.msk.bf16.mxu1 %vm20710_vm2, %v18429_v44  ;;  %v1645_v43 = vpop.permute.xlu1 %1644  ;;  %v1931_v28 = vpop.permute.xlu0 %1930 }
 0x2cd   : > { %17338 = vmatmul.mubr.msk.f32.gmra.mrb[24].mxu0 %vm725_vm1, %v1635_v60 }
 0x2ce   : > { %17340 = vmatprep.mubr.msk.f32.mxu0 %vm725_vm1, %v1637_v22 }
 0x2d0   : > { %v1929_v58 = vpop.permute.xlu1 %1928  ;;  %v1649_v37 = vpop.permute.xlu0 %1648 }
 0x2d1   : > { %17341 = vmatmul.mubr.msk.f32.gmra.mrb[26].mxu0 %vm725_vm1, %v1639_v1 }
 0x2d2   : > { %17327 = vmatmul.mubr.msk.f32.vlgmr.msra.gmra.mrb[10].mxu1 %vm725_vm1, %v20613_v41  ;;  %17343 = vmatprep.mubr.msk.f32.mxu0 %vm725_vm1, %v1641_v24 }
 0x2d3   : > { %18434 = vmatpush3.bf16.xpose.msk.msra.mxu1 %vm20710_vm2, %v18429_v44  ;;  %17359 = vmatprep.mubr.msk.f32.mxu1 %vm725_vm1, %v1838_v36 }
 0x2d4   : > { %18437 = vmatprep.subr.msk.bf16.mxu1 %vm20710_vm2, %v18435_v57  ;;  %v19257_v21 = vpop.permute.xlu1 %19256  ;;  %v19262_v47 = vpop.permute.xlu0 %19261 }
 0x2d5   : > { %v19259_v59 = vunpack.i.h.bf16 %v19257_v21  ;;  %v19258_v60 = vunpack.i.l.bf16 %v19257_v21  ;;  %17344 = vmatmul.mubr.msk.f32.gmra.mrb[28].mxu0 %vm725_vm1, %v1643_v35  ;;  %v19264_v14 = vunpack.i.h.bf16 %v19262_v47  ;;  %v19263_v22 = vunpack.i.l.bf16 %v19262_v47 }
 0x2d6   : > { %17346 = vmatprep.mubr.msk.f32.mxu0 %vm725_vm1, %v1645_v43 }
 0x2d7   : > { %v18447_v2 = vpack.c.bf16 %v19259_v59, %v19258_v60  ;;  %v18453_v36 = vpack.c.bf16 %v19264_v14, %v19263_v22 }
 0x2d8   : > { %v1651_v4 = vpop.permute.xlu1 %1650  ;;  %v2020_v5 = vpop.permute.xlu0 %2019 }
 0x2d9   : > { %17347 = vmatmul.mubr.msk.f32.gmra.mrb[30].mxu0 %vm725_vm1, %v1647_v56  ;;  %18449 = vmatprep.subr.msk.bf16.mxu0 %vm20710_vm2, %v18447_v2 }
 0x2da   : > { %17360 = vmatmul.mubr.msk.f32.vlgmr.msra.gmra.mrb[12].mxu1 %vm725_vm1, %v1840_v46  ;;  %17349 = vmatprep.mubr.msk.f32.mxu0 %vm725_vm1, %v1649_v37 }
 0x2db   : > { %18440 = vmatpush3.bf16.xpose.msk.msra.mxu1 %vm20710_vm2, %v18435_v57  ;;  %17366 = vmatprep.mubr.msk.f32.mxu1 %vm725_vm1, %v1929_v58 }
 0x2dc   : > { %18452 = vmatpush3.bf16.xpose.msk.msra.mxu0 %vm20710_vm2, %v18447_v2  ;;  %18443 = vmatprep.subr.msk.bf16.mxu1 %vm20710_vm2, %v18441_v8  ;;  %v1655_v9 = vpop.permute.xlu1 %1654  ;;  %v2022_v12 = vpop.permute.xlu0 %2021 }
 0x2dd   : > { %17350 = vmatmul.mubr.msk.f32.gmra.mrb[32].mxu0 %vm725_vm1, %v1651_v4 }
 0x2e0   : > { %v19267_v26 = vpop.permute.xlu1 %19266  ;;  %v2111_v0 = vpop.permute.xlu0 %2110 }
 0x2e1   : > { %v19269_v38 = vunpack.i.h.bf16 %v19267_v26  ;;  %v19268_v1 = vunpack.i.l.bf16 %v19267_v26 }
 0x2e2   : > { %17367 = vmatmul.mubr.msk.f32.vlgmr.msra.gmra.mrb[14].mxu1 %vm725_vm1, %v1931_v28 }
 0x2e3   : > { %v18459_v46 = vpack.c.bf16 %v19269_v38, %v19268_v1  ;;  %18446 = vmatpush3.bf16.xpose.msk.msra.mxu1 %vm20710_vm2, %v18441_v8  ;;  %17373 = vmatprep.mubr.msk.f32.mxu1 %vm725_vm1, %v2020_v5 }
 0x2e4   : > { %18455 = vmatprep.subr.msk.bf16.mxu1 %vm20710_vm2, %v18453_v36  ;;  %v1653_v24 = vpop.permute.xlu1 %1652  ;;  %v19272_v11 = vpop.permute.xlu0 %19271 }
 0x2e5   : > { %17352 = vmatprep.mubr.msk.f32.mxu0 %vm725_vm1, %v1653_v24  ;;  %18461 = vmatprep.subr.msk.bf16.mxu0 %vm20710_vm2, %v18459_v46  ;;  %v19274_v49 = vunpack.i.h.bf16 %v19272_v11  ;;  %v19273_v50 = vunpack.i.l.bf16 %v19272_v11 }
 0x2e6   : > { %17353 = vmatmul.mubr.msk.f32.gmra.mrb[34].mxu0 %vm725_vm1, %v1655_v9 }
 0x2e7   : > { %17380 = vmatprep.mubr.msk.f32.mxu0 %vm725_vm1, %v2111_v0  ;;  %v18465_v23 = vpack.c.bf16 %v19274_v49, %v19273_v50 }
 0x2e8   : > { %v2113_v51 = vpop.permute.xlu1 %2112  ;;  %v2204_v52 = vpop.permute.xlu0 %2203 }
 0x2ea   : > { %17374 = vmatmul.mubr.msk.f32.vlgmr.msra.gmra.mrb[16].mxu1 %vm725_vm1, %v2022_v12  ;;  %17381 = vmatmul.mubr.msk.f32.vlgmr.msra.gmra.mrb[36].mxu0 %vm725_vm1, %v2113_v51 }
 0x2eb   : > { %18458 = vmatpush3.bf16.xpose.msk.msra.mxu1 %vm20710_vm2, %v18453_v36  ;;  %18464 = vmatpush3.bf16.xpose.msk.msra.mxu0 %vm20710_vm2, %v18459_v46 }
 0x2ec   : > { %18467 = vmatprep.subr.msk.bf16.mxu1 %vm20710_vm2, %v18465_v23  ;;  %v2202_v17 = vpop.permute.xlu1 %2201  ;;  %v2293_v35 = vpop.permute.xlu0 %2292 }
 0x2ed   : > { %17387 = vmatprep.mubr.msk.f32.mxu1 %vm725_vm1, %v2202_v17  ;;  %17394 = vmatprep.mubr.msk.f32.mxu0 %vm725_vm1, %v2293_v35 }
 0x2f0   : > { %v19277_v56 = vpop.permute.xlu1 %19276  ;;  %v2384_v44 = vpop.permute.xlu0 %2383 }
 0x2f1   : > { %v19279_v43 = vunpack.i.h.bf16 %v19277_v56  ;;  %v19278_v28 = vunpack.i.l.bf16 %v19277_v56 }
 0x2f2   : > { %17388 = vmatmul.mubr.msk.f32.vlgmr.msra.gmra.mrb[18].mxu1 %vm725_vm1, %v2204_v52 }
 0x2f3   : > { %v18471_v29 = vpack.c.bf16 %v19279_v43, %v19278_v28  ;;  %18470 = vmatpush3.bf16.xpose.msk.msra.mxu1 %vm20710_vm2, %v18465_v23  ;;  %17401 = vmatprep.mubr.msk.f32.mxu1 %vm725_vm1, %v2384_v44 }
 0x2f4   : > { %v2295_v58 = vpop.permute.xlu1 %2294  ;;  %v2475_v37 = vpop.permute.xlu0 %2474 }
 0x2f5   : > { %17395 = vmatmul.mubr.msk.f32.vlgmr.msra.gmra.mrb[38].mxu0 %vm725_vm1, %v2295_v58  ;;  %18473 = vmatprep.subr.msk.bf16.mxu0 %vm20710_vm2, %v18471_v29 }
 0x2f6   : > { %18476 = vmatpush3.bf16.xpose.msk.msra.mxu0 %vm20710_vm2, %v18471_v29  ;;  %17408 = vmatprep.mubr.msk.f32.mxu0 %vm725_vm1, %v2475_v37 }
 0x2f7   : > { %17411 = vmatprep.subr.msk.mxu0 %vm1688_vm3, %v2789_v53 }
 0x2f8   : > { %v2386_v57 = vpop.permute.xlu1 %2385  ;;  %v2758_v21 = vpop.permute.xlu0 %2757 }
 0x2fa   : > { %17402 = vmatmul.mubr.msk.f32.vlgmr.msra.gmra.mrb[20].mxu1 %vm725_vm1, %v2386_v57 }
 0x2fc   : > { %v2477_v47 = vpop.permute.xlu1 %2476  ;;  %v2762_v31 = vpop.permute.xlu0 %2761 }
 0x2fd   : > { %17409 = vmatmul.mubr.msk.f32.vlgmr.msra.gmra.mrb[40].mxu0 %vm725_vm1, %v2477_v47 }
 0x2fe   : > { %17413 = vmatprep.mubr.msk.f32.mxu0 %vm725_vm1, %v2758_v21  ;;  %17412 = vmatpush3.msk.msra.mxu0 %vm1688_vm3, %v2789_v53 }
 0x300   : > { %v2760_v59 = vpop.permute.xlu1 %2759  ;;  %v2766_v60 = vpop.permute.xlu0 %2765 }
 0x301   : > { %17414 = vmatmul.mubr.msk.f32.vlgmr.msra.gmra.mrb[42].mxu0 %vm725_vm1, %v2760_v59 }
 0x302   : > { %17416 = vmatprep.mubr.msk.f32.mxu0 %vm725_vm1, %v2762_v31 }
 0x304   : > { %v2764_v61 = vpop.permute.xlu1 %2763  ;;  %v2770_v16 = vpop.permute.xlu0 %2769 }
 0x305   : > { %17417 = vmatmul.mubr.msk.f32.gmra.mrb[44].mxu0 %vm725_vm1, %v2764_v61 }
 0x306   : > { %17419 = vmatprep.mubr.msk.f32.mxu0 %vm725_vm1, %v2766_v60 }
 0x308   : > { %v2768_v2 = vpop.permute.xlu1 %2767  ;;  %v2774_v4 = vpop.permute.xlu0 %2773 }
 0x309   : > { %17420 = vmatmul.mubr.msk.f32.gmra.mrb[46].mxu0 %vm725_vm1, %v2768_v2 }
 0x30a   : > { %17422 = vmatprep.mubr.msk.f32.mxu0 %vm725_vm1, %v2770_v16 }
 0x30c   : > { %v2772_v5 = vpop.permute.xlu1 %2771  ;;  %v2778_v8 = vpop.permute.xlu0 %2777 }
 0x30d   : > { %17423 = vmatmul.mubr.msk.f32.gmra.mrb[48].mxu0 %vm725_vm1, %v2772_v5 }
 0x30e   : > { %17425 = vmatprep.mubr.msk.f32.mxu0 %vm725_vm1, %v2774_v4 }
 0x310   : > { %v2776_v9 = vpop.permute.xlu1 %2775  ;;  %v2782_v12 = vpop.permute.xlu0 %2781 }
 0x311   : > { %17426 = vmatmul.mubr.msk.f32.gmra.mrb[50].mxu0 %vm725_vm1, %v2776_v9 }
 0x312   : > { %17428 = vmatprep.mubr.msk.f32.mxu0 %vm725_vm1, %v2778_v8 }
 0x314   : > { %v2780_v14 = vpop.permute.xlu1 %2779  ;;  %v2786_v26 = vpop.permute.xlu0 %2785 }
 0x315   : > { %17429 = vmatmul.mubr.msk.f32.gmra.mrb[52].mxu0 %vm725_vm1, %v2780_v14 }
 0x316   : > { %17431 = vmatprep.mubr.msk.f32.mxu0 %vm725_vm1, %v2782_v12 }
 0x318   : > { %v2784_v22 = vpop.permute.xlu1 %2783 }
 0x319   : > { %17432 = vmatmul.mubr.msk.f32.gmra.mrb[54].mxu0 %vm725_vm1, %v2784_v22 }
 0x31a   : > { %17434 = vmatprep.mubr.msk.f32.mxu0 %vm725_vm1, %v2786_v26 }
 0x31c   : > { %v2788_v0 = vpop.permute.xlu1 %2787 }
 0x31d   : > { %17435 = vmatmul.mubr.msk.f32.gmra.mrb[56].mxu0 %vm725_vm1, %v2788_v0 }
 0x37d   : > { %v20891_v38 = vpop.f32.mrb[0].mxu1 }
 0x37e   : > { %v20893_v1 = vpop.f32.mrb[1].mxu1  ;;  %v20998_v10 = vmul.f32 0.70710677, %v20891_v38 }
 0x380   : > { %v1451_v38 = vsel %vm280_vm0, %v20998_v10, -inf }
 0x385   : > { %v20895_v36 = vpop.f32.mrb[2].mxu1 }
 0x386   : > { %v20897_v46 = vpop.f32.mrb[3].mxu1 }
 0x38c   : > { %v20899_v24 = vpop.f32.mrb[16].mxu0 }
 0x38d   : > { %v20901_v11 = vpop.f32.mrb[4].mxu1  ;;  %v20903_v49 = vpop.f32.mrb[17].mxu0 }
 0x38e   : > { %v20905_v50 = vpop.f32.mrb[5].mxu1 }
 0x394   : > { %v20907_v51 = vpop.f32.mrb[18].mxu0 }
 0x395   : > { %v20909_v52 = vpop.f32.mrb[6].mxu1  ;;  %v20911_v23 = vpop.f32.mrb[19].mxu0 }
 0x396   : > { %v20913_v17 = vpop.f32.mrb[7].mxu1 }
 0x398   : > { %v17333_v35 = vpop.f32.mrb[20].mxu0 }
 0x399   : > { %v1758_v56 = vpop.f32.mrb[21].mxu0 }
 0x39a   : > { %v20915_v44 = vpack.c.bf16 %v17333_v35, %v1758_v56 }
 0x39c   : > { %24291 = vst [vmem:[#allocation27_spill] sm:$0xff] %v20915_v44  ;;  %v17336_v43 = vpop.f32.mrb[22].mxu0 }
 0x39d   : > { %v20917_v28 = vpop.f32.mrb[8].mxu1  ;;  %v1768_v29 = vpop.f32.mrb[23].mxu0 }
 0x39e   : > { %v20919_v53 = vpop.f32.mrb[9].mxu1  ;;  %v20921_v58 = vpack.c.bf16 %v17336_v43, %v1768_v29 }
 0x3a0   : > { %24292 = vst [vmem:[#allocation28_spill] sm:$0xff] %v20921_v58  ;;  %v17339_v37 = vpop.f32.mrb[24].mxu0 }
 0x3a1   : > { %v1778_v57 = vpop.f32.mrb[25].mxu0 }
 0x3a2   : > { %v20923_v21 = vpack.c.bf16 %v17339_v37, %v1778_v57 }
 0x3a4   : > { %24293 = vst [vmem:[#allocation29_spill] sm:$0xff] %v20923_v21  ;;  %v17342_v47 = vpop.f32.mrb[26].mxu0 }
 0x3a5   : > { %v20925_v31 = vpop.f32.mrb[10].mxu1  ;;  %v1788_v59 = vpop.f32.mrb[27].mxu0 }
 0x3a6   : > { %v20927_v60 = vpop.f32.mrb[11].mxu1  ;;  %v20929_v61 = vpack.c.bf16 %v17342_v47, %v1788_v59 }
 0x3a8   : > { %24294 = vst [vmem:[#allocation30_spill] sm:$0xff] %v20929_v61  ;;  %v17345_v16 = vpop.f32.mrb[28].mxu0 }
 0x3a9   : > { %v1798_v2 = vpop.f32.mrb[29].mxu0 }
 0x3aa   : > { %v20931_v4 = vpack.c.bf16 %v17345_v16, %v1798_v2 }
 0x3ac   : > { %24295 = vst [vmem:[#allocation31_spill] sm:$0xff] %v20931_v4  ;;  %v17348_v5 = vpop.f32.mrb[30].mxu0 }
 0x3ad   : > { %v17361_v8 = vpop.f32.mrb[12].mxu1  ;;  %v1808_v9 = vpop.f32.mrb[31].mxu0 }
 0x3ae   : > { %v20933_v12 = vmul.f32 0.70710677, %v17361_v8  ;;  %v20935_v14 = vpack.c.bf16 %v17348_v5, %v1808_v9  ;;  %v1919_v22 = vpop.f32.mrb[13].mxu1 }
 0x3af   : > { %v20937_v26 = vmul.f32 0.70710677, %v1919_v22 }
 0x3b0   : > { %24296 = vst [vmem:[#allocation32_spill] sm:$0xff] %v20935_v14  ;;  %v17351_v0 = vpop.f32.mrb[32].mxu0  ;;  %v2584_v35 = vsel %vm280_vm0, %v20933_v12, -inf }
 0x3b1   : > { %2585 = vmax.xlane.f32.xlu1 %v2584_v35  ;;  %v1818_v56 = vpop.f32.mrb[33].mxu0  ;;  %v2581_v43 = vsel %vm280_vm0, %v20937_v26, -inf }
 0x3b2   : > { %v20943_v29 = vpack.c.bf16 %v17351_v0, %v1818_v56  ;;  %2582 = vmax.xlane.f32.xlu0 %v2581_v43 }
 0x3b4   : > { %24297 = vst [vmem:[#allocation33_spill] sm:$0xff] %v20943_v29 }
 0x3b5   : > { %v17368_v37 = vpop.f32.mrb[14].mxu1 }
 0x3b6   : > { %v20945_v57 = vmul.f32 0.70710677, %v17368_v37  ;;  %v2010_v47 = vpop.f32.mrb[15].mxu1 }
 0x3b7   : > { %v20947_v59 = vmul.f32 0.70710677, %v2010_v47 }
 0x3b8   : > { %v2590_v16 = vsel %vm280_vm0, %v20945_v57, -inf }
 0x3b9   : > { %2591 = vmax.xlane.f32.xlu0 %v2590_v16  ;;  %v17354_v2 = vpop.f32.mrb[34].mxu0  ;;  %v2587_v9 = vsel %vm280_vm0, %v20947_v59, -inf }
 0x3ba   : > { %v1828_v5 = vpop.f32.mrb[35].mxu0 }
 0x3bb   : > { %v18537_v8 = vpack.c.bf16 %v17354_v2, %v1828_v5 }
 0x3bd   : > { %2588 = vmax.xlane.f32.xlu0 %v2587_v9  ;;  %v17375_v22 = vpop.f32.mrb[16].mxu1  ;;  %v17382_v0 = vpop.f32.mrb[36].mxu0  ;;  %18538 = vmatprep.subr.bf16.mxu1 %v18537_v8 }
 0x3be   : > { %v2101_v35 = vpop.f32.mrb[17].mxu1  ;;  %v20953_v56 = vmul.f32 0.70710677, %v17382_v0  ;;  %v2192_v43 = vpop.f32.mrb[37].mxu0  ;;  %18540 = vmatpush3.bf16.msra.mxu1 %v18537_v8  ;;  %v20957_v47 = vmul.f32 0.70710677, %v17375_v22 }
 0x3bf   : > { %v20955_v37 = vmul.f32 0.70710677, %v2192_v43  ;;  %v20961_v2 = vmul.f32 0.70710677, %v2101_v35 }
 0x3c0   : > { %v2602_v16 = vsel %vm280_vm0, %v20953_v56, -inf  ;;  %v2596_v9 = vsel %vm280_vm0, %v20957_v47, -inf }
 0x3c1   : > { %2603 = vmax.xlane.f32.xlu1 %v2602_v16  ;;  %v2599_v5 = vsel %vm280_vm0, %v20955_v37, -inf  ;;  %v2593_v8 = vsel %vm280_vm0, %v20961_v2, -inf }
 0x3c2   : > { %2600 = vmax.xlane.f32.xlu0 %v2599_v5 }
 0x3c5   : > { %v17389_v0 = vpop.f32.mrb[18].mxu1  ;;  %2597 = vmax.xlane.f32.xlu1 %v2596_v9 }
 0x3c6   : > { %v2283_v22 = vpop.f32.mrb[19].mxu1  ;;  %2594 = vmax.xlane.f32.xlu0 %v2593_v8  ;;  %v20973_v16 = vmul.f32 0.70710677, %v17389_v0 }
 0x3c7   : > { %v20977_v4 = vmul.f32 0.70710677, %v2283_v22 }
 0x3c8   : > { %v17396_v43 = vpop.f32.mrb[38].mxu0 }
 0x3c9   : > { %v20969_v29 = vmul.f32 0.70710677, %v17396_v43  ;;  %v2374_v35 = vpop.f32.mrb[39].mxu0  ;;  %v2608_v43 = vsel %vm280_vm0, %v20973_v16, -inf  ;;  %v2605_v0 = vsel %vm280_vm0, %v20977_v4, -inf }
 0x3ca   : > { %v20971_v14 = vmul.f32 0.70710677, %v2374_v35 }
 0x3cb   : > { %v2614_v5 = vsel %vm280_vm0, %v20969_v29, -inf }
 0x3cc   : > { %2615 = vmax.xlane.f32.xlu1 %v2614_v5  ;;  %v2611_v9 = vsel %vm280_vm0, %v20971_v14, -inf }
 0x3cd   : > { %v17403_v61 = vpop.f32.mrb[20].mxu1  ;;  %2612 = vmax.xlane.f32.xlu0 %v2611_v9 }
 0x3ce   : > { %v2465_v8 = vpop.f32.mrb[21].mxu1  ;;  %v20989_v5 = vmul.f32 0.70710677, %v17403_v61  ;;  %v21003_v61 = vmul.f32 0.70710677, %v20893_v1 }
 0x3cf   : > { %v20993_v58 = vmul.f32 0.70710677, %v2465_v8  ;;  %v21015_v1 = vmul.f32 0.70710677, %v20897_v46  ;;  %v21028_v46 = vmul.f32 0.70710677, %v20905_v50 }
 0x3d0   : > { %v17410_v21 = vpop.f32.mrb[40].mxu0  ;;  %2609 = vmax.xlane.f32.xlu1 %v2608_v43 }
 0x3d1   : > { %v20985_v35 = vmul.f32 0.70710677, %v17410_v21  ;;  %v2556_v48 = vpop.f32.mrb[41].mxu0  ;;  %2606 = vmax.xlane.f32.xlu0 %v2605_v0  ;;  %v2617_v8 = vsel %vm280_vm0, %v20993_v58, -inf }
 0x3d2   : > { %v20987_v22 = vmul.f32 0.70710677, %v2556_v48  ;;  %v2620_v48 = vsel %vm280_vm0, %v20989_v5, -inf }
 0x3d3   : > { %v2626_v9 = vsel %vm280_vm0, %v20985_v35, -inf }
 0x3d4   : > { %v17415_v44 = vpop.f32.mrb[42].mxu0  ;;  %2627 = vmax.xlane.f32.xlu1 %v2626_v9  ;;  %v2623_v43 = vsel %vm280_vm0, %v20987_v22, -inf }
 0x3d5   : > { %v2890_v41 = vpop.f32.mrb[43].mxu0  ;;  %2624 = vmax.xlane.f32.xlu0 %v2623_v43 }
 0x3d6   : > { %v18477_v21 = vpack.c.bf16 %v17415_v44, %v2890_v41  ;;  %v21010_v41 = vmul.f32 0.70710677, %v20895_v36  ;;  %v21023_v36 = vmul.f32 0.70710677, %v20901_v11 }
 0x3d8   : > { %v17418_v0 = vpop.f32.mrb[44].mxu0  ;;  %18478 = vmatprep.subr.bf16.mxu0 %v18477_v21  ;;  %2621 = vmax.xlane.f32.xlu1 %v2620_v48  ;;  %v1448_v48 = vsel %vm280_vm0, %v21003_v61, -inf  ;;  %v1463_v11 = vsel %vm280_vm0, %v21023_v36, -inf }
 0x3d9   : > { %v2900_v9 = vpop.f32.mrb[45].mxu0  ;;  %18480 = vmatpush3.bf16.msra.mxu0 %v18477_v21  ;;  %2618 = vmax.xlane.f32.xlu0 %v2617_v8  ;;  %v1457_v8 = vsel %vm280_vm0, %v21010_v41, -inf }
 0x3da   : > { %v21007_v43 = vpack.c.bf16 %v17418_v0, %v2900_v9 }
 0x3dc   : > { %24298 = vst [vmem:[#allocation34_spill] sm:$0xff] %v21007_v43  ;;  %v17421_v44 = vpop.f32.mrb[46].mxu0  ;;  %18482 = vmatprep.subr.bf16.mxu0 %v21007_v43  ;;  %1452 = vmax.xlane.f32.xlu1 %v1451_v38  ;;  %v1454_v38 = vsel %vm280_vm0, %v21015_v1, -inf }
 0x3dd   : > { %v2910_v21 = vpop.f32.mrb[47].mxu0  ;;  %1449 = vmax.xlane.f32.xlu0 %v1448_v48  ;;  %v21040_v48 = vmul.f32 0.70710677, %v20927_v60 }
 0x3de   : > { %v21020_v0 = vpack.c.bf16 %v17421_v44, %v2910_v21  ;;  %v21035_v44 = vmul.f32 0.70710677, %v20925_v31  ;;  %v1460_v21 = vsel %vm280_vm0, %v21028_v46, -inf }
 0x3e0   : > { %24299 = vst [vmem:[#allocation35_spill] sm:$0xff] %v21020_v0  ;;  %v17424_v9 = vpop.f32.mrb[48].mxu0  ;;  %1458 = vmax.xlane.f32.xlu1 %v1457_v8  ;;  %v1493_v31 = vsel %vm280_vm0, %v21035_v44, -inf }
 0x3e1   : > { %v2920_v43 = vpop.f32.mrb[49].mxu0  ;;  %1455 = vmax.xlane.f32.xlu0 %v1454_v38  ;;  %v1490_v38 = vsel %vm280_vm0, %v21040_v48, -inf }
 0x3e2   : > { %v21032_v30 = vpack.c.bf16 %v17424_v9, %v2920_v43  ;;  %v21047_v43 = vmul.f32 0.70710677, %v20909_v52  ;;  %v21052_v9 = vmul.f32 0.70710677, %v20913_v17 }
 0x3e4   : > { %24300 = vst [vmem:[#allocation36_spill] sm:$0xff] %v21032_v30  ;;  %v17427_v50 = vpop.f32.mrb[50].mxu0  ;;  %1464 = vmax.xlane.f32.xlu1 %v1463_v11  ;;  %v1469_v52 = vsel %vm280_vm0, %v21047_v43, -inf }
 0x3e5   : > { %v2930_v8 = vpop.f32.mrb[51].mxu0  ;;  %1461 = vmax.xlane.f32.xlu0 %v1460_v21  ;;  %v21064_v21 = vmul.f32 0.70710677, %v20903_v49 }
 0x3e6   : > { %v21044_v0 = vpack.c.bf16 %v17427_v50, %v2930_v8  ;;  %v21059_v50 = vmul.f32 0.70710677, %v20899_v24  ;;  %v1466_v8 = vsel %vm280_vm0, %v21052_v9, -inf }
 0x3e8   : > { %24301 = vst [vmem:[#allocation37_spill] sm:$0xff] %v21044_v0  ;;  %v17430_v60 = vpop.f32.mrb[52].mxu0  ;;  %1494 = vmax.xlane.f32.xlu1 %v1493_v31  ;;  %v1475_v24 = vsel %vm280_vm0, %v21059_v50, -inf }
 0x3e9   : > { %v2940_v11 = vpop.f32.mrb[53].mxu0  ;;  %1491 = vmax.xlane.f32.xlu0 %v1490_v38  ;;  %v21076_v38 = vmul.f32 0.70710677, %v20919_v53 }
 0x3ea   : > { %v21056_v30 = vpack.c.bf16 %v17430_v60, %v2940_v11  ;;  %v21071_v60 = vmul.f32 0.70710677, %v20917_v28  ;;  %v1472_v11 = vsel %vm280_vm0, %v21064_v21, -inf }
 0x3eb   : > { %v1478_v53 = vsel %vm280_vm0, %v21076_v38, -inf }
 0x3ec   : > { %24302 = vst [vmem:[#allocation38_spill] sm:$0xff] %v21056_v30  ;;  %v17433_v17 = vpop.f32.mrb[54].mxu0  ;;  %1470 = vmax.xlane.f32.xlu1 %v1469_v52  ;;  %v1481_v28 = vsel %vm280_vm0, %v21071_v60, -inf }
 0x3ed   : > { %v2950_v31 = vpop.f32.mrb[55].mxu0  ;;  %1467 = vmax.xlane.f32.xlu0 %v1466_v8  ;;  %v21088_v8 = vmul.f32 0.70710677, %v20911_v23 }
 0x3ee   : > { %v21068_v0 = vpack.c.bf16 %v17433_v17, %v2950_v31  ;;  %v21083_v17 = vmul.f32 0.70710677, %v20907_v51 }
 0x3f0   : > { %24303 = vst [vmem:[#allocation39_spill] sm:$0xff] %v21068_v0  ;;  %v17436_v49 = vpop.f32.mrb[56].mxu0  ;;  %1476 = vmax.xlane.f32.xlu1 %v1475_v24  ;;  %v1487_v31 = vsel %vm280_vm0, %v21083_v17, -inf  ;;  %v1484_v24 = vsel %vm280_vm0, %v21088_v8, -inf }
 0x3f1   : > { %v2960_v52 = vpop.f32.mrb[57].mxu0  ;;  %1473 = vmax.xlane.f32.xlu0 %v1472_v11 }
 0x3f2   : > { %v21080_v30 = vpack.c.bf16 %v17436_v49, %v2960_v52 }
 0x3f4   : > { %24304 = vst [vmem:[#allocation40_spill] sm:$0xff] %v21080_v30  ;;  %1482 = vmax.xlane.f32.xlu1 %v1481_v28 }
 0x3f5   : > { %1479 = vmax.xlane.f32.xlu0 %v1478_v53 }
 0x3f8   : > { %1488 = vmax.xlane.f32.xlu1 %v1487_v31 }
 0x3f9   : > { %1485 = vmax.xlane.f32.xlu0 %v1484_v24 }
 0x43e   : > { %v21100_v11 = vpop.xlane.xlu1 %2585 }
 0x43f   : > { %v21096_v51 = vpop.xlane.xlu0 %2582 }
 0x446   : > { %v21098_v49 = vpop.xlane.xlu0 %2591 }
 0x44a   : > { %v21102_v23 = vpop.xlane.xlu0 %2588 }
 0x44e   : > { %v21104_v52 = vpop.xlane.xlu1 %2603 }
 0x44f   : > { %v21106_v28 = vpop.xlane.xlu0 %2600 }
 0x452   : > { %v21108_v53 = vpop.xlane.xlu1 %2597 }
 0x453   : > { %v21110_v30 = vpop.xlane.xlu0 %2594 }
 0x459   : > { %v21112_v31 = vpop.xlane.xlu1 %2615 }
 0x45a   : > { %v21114_v0 = vpop.xlane.xlu0 %2612 }
 0x45d   : > { %v21116_v24 = vpop.xlane.xlu1 %2609 }
 0x45e   : > { %v21118_v32 = vpop.xlane.xlu0 %2606 }
 0x461   : > { %v21120_v42 = vpop.xlane.xlu1 %2627 }
 0x462   : > { %v21122_v34 = vpop.xlane.xlu0 %2624 }
 0x465   : > { %v21124_v39 = vpop.xlane.xlu1 %2621 }
 0x466   : > { %v21126_v20 = vpop.xlane.xlu0 %2618 }
 0x469   : > { %v1453_v13 = vpop.xlane.xlu1 %1452 }
 0x46a   : > { %v1497_v15 = vsub.f32 %v20998_v10, %v1453_v13  ;;  %v1450_v18 = vpop.xlane.xlu0 %1449 }
 0x46b   : > { %v1496_v19 = vsub.f32 %v21003_v61, %v1450_v18 }
 0x46c   : > { %v1514_v40 = vmul.f32 1.442695, %v1497_v15 }
 0x46d   : > { %v1512_v6 = vmul.f32 1.442695, %v1496_v19  ;;  %v1459_v7 = vpop.xlane.xlu1 %1458 }
 0x46e   : > { %19552 = vpow2.f32 %v1514_v40  ;;  %v1499_v55 = vsub.f32 %v21010_v41, %v1459_v7  ;;  %v1456_v27 = vpop.xlane.xlu0 %1455 }
 0x46f   : > { %19554 = vpow2.f32 %v1512_v6  ;;  %v1498_v63 = vsub.f32 %v21015_v1, %v1456_v27  ;;  %v2630_v1 = vsub.f32 %v20933_v12, %v21100_v11 }
 0x470   : > { %v1518_v3 = vmul.f32 1.442695, %v1499_v55 }
 0x471   : > { %v1516_v54 = vmul.f32 1.442695, %v1498_v63  ;;  %v1465_v25 = vpop.xlane.xlu1 %1464  ;;  %v2647_v11 = vmul.f32 1.442695, %v2630_v1 }
 0x472   : > { %19556 = vpow2.f32 %v1518_v3  ;;  %v1501_v33 = vsub.f32 %v21023_v36, %v1465_v25  ;;  %v1462_v13 = vpop.xlane.xlu0 %1461 }
 0x473   : > { %19558 = vpow2.f32 %v1516_v54  ;;  %v1500_v18 = vsub.f32 %v21028_v46, %v1462_v13 }
 0x474   : > { %v1522_v15 = vmul.f32 1.442695, %v1501_v33 }
 0x475   : > { %v1520_v19 = vmul.f32 1.442695, %v1500_v18  ;;  %v1495_v10 = vpop.xlane.xlu1 %1494 }
 0x476   : > { %19560 = vpow2.f32 %v1522_v15  ;;  %v1492_v40 = vpop.xlane.xlu0 %1491  ;;  %v1511_v6 = vsub.f32 %v21035_v44, %v1495_v10  ;;  %v2632_v15 = vsub.f32 %v20945_v57, %v21098_v49  ;;  %v2636_v57 = vsub.f32 %v20953_v56, %v21104_v52 }
 0x477   : > { %19562 = vpow2.f32 %v1520_v19  ;;  %v1510_v63 = vsub.f32 %v21040_v48, %v1492_v40  ;;  %v2629_v48 = vsub.f32 %v20937_v26, %v21096_v51  ;;  %v2631_v19 = vsub.f32 %v20947_v59, %v21102_v23 }
 0x478   : > { %v21134_v7 = vpop.eup %19552  ;;  %v1542_v36 = vmul.f32 1.442695, %v1511_v6  ;;  %v2651_v6 = vmul.f32 1.442695, %v2632_v15  ;;  %v2659_v23 = vmul.f32 1.442695, %v2636_v57 }
 0x479   : > { %v21137_v55 = vpop.eup %19554  ;;  %v1471_v3 = vpop.xlane.xlu1 %1470  ;;  %v1547_v25 = vsel %vm280_vm0, %v21134_v7, 0.0  ;;  %v2645_v51 = vmul.f32 1.442695, %v2629_v48  ;;  %v2649_v49 = vmul.f32 1.442695, %v2631_v19 }
 0x47a   : > { %v1503_v54 = vsub.f32 %v21047_v43, %v1471_v3  ;;  %1548 = vadd.xlane.f32.xlu1 %v1547_v25  ;;  %v1468_v33 = vpop.xlane.xlu0 %1467  ;;  %v1544_v27 = vsel %vm280_vm0, %v21137_v55, 0.0  ;;  %v1540_v43 = vmul.f32 1.442695, %v1510_v63  ;;  %v2635_v63 = vsub.f32 %v20955_v37, %v21106_v28 }
 0x47b   : > { %v1502_v61 = vsub.f32 %v21052_v9, %v1468_v33  ;;  %1545 = vadd.xlane.f32.xlu0 %v1544_v27  ;;  %v2634_v3 = vsub.f32 %v20957_v47, %v21108_v53  ;;  %v2633_v33 = vsub.f32 %v20961_v2, %v21110_v30  ;;  %v2640_v53 = vsub.f32 %v20969_v29, %v21112_v31 }
 0x47c   : > { %v21146_v41 = vpop.eup %19556  ;;  %v1526_v46 = vmul.f32 1.442695, %v1503_v54  ;;  %v2657_v54 = vmul.f32 1.442695, %v2635_v63  ;;  %v2639_v30 = vsub.f32 %v20971_v14, %v21114_v0  ;;  %v2638_v29 = vsub.f32 %v20973_v16, %v21116_v24 }
 0x47d   : > { %v21150_v44 = vpop.eup %19558  ;;  %v1524_v13 = vmul.f32 1.442695, %v1502_v61  ;;  %v1553_v18 = vsel %vm280_vm0, %v21146_v41, 0.0  ;;  %v2655_v47 = vmul.f32 1.442695, %v2634_v3  ;;  %v2637_v14 = vsub.f32 %v20977_v4, %v21118_v32  ;;  %v1477_v4 = vpop.xlane.xlu1 %1476 }
 0x47e   : > { %19564 = vpow2.f32 %v1526_v46  ;;  %1554 = vadd.xlane.f32.xlu1 %v1553_v18  ;;  %v1550_v9 = vsel %vm280_vm0, %v21150_v44, 0.0  ;;  %v2653_v27 = vmul.f32 1.442695, %v2633_v33  ;;  %v2667_v46 = vmul.f32 1.442695, %v2640_v53  ;;  %v1474_v15 = vpop.xlane.xlu0 %1473 }
 0x47f   : > { %19566 = vpow2.f32 %v1524_v13  ;;  %1551 = vadd.xlane.f32.xlu0 %v1550_v9  ;;  %v2665_v31 = vmul.f32 1.442695, %v2639_v30  ;;  %v2663_v18 = vmul.f32 1.442695, %v2638_v29  ;;  %v2644_v16 = vsub.f32 %v20985_v35, %v21120_v42 }
 0x480   : > { %v21158_v12 = vpop.eup %19560  ;;  %19568 = vpow2.f32 %v1542_v36  ;;  %v2661_v24 = vmul.f32 1.442695, %v2637_v14  ;;  %v2643_v32 = vsub.f32 %v20987_v22, %v21122_v34  ;;  %v2642_v35 = vsub.f32 %v20989_v5, %v21124_v39 }
 0x481   : > { %v21162_v26 = vpop.eup %19562  ;;  %19570 = vpow2.f32 %v1540_v43  ;;  %v1559_v10 = vsel %vm280_vm0, %v21158_v12, 0.0  ;;  %v2675_v42 = vmul.f32 1.442695, %v2644_v16  ;;  %v2641_v22 = vsub.f32 %v20993_v58, %v21126_v20 }
 0x482   : > { %1560 = vadd.xlane.f32.xlu1 %v1559_v10  ;;  %v1556_v40 = vsel %vm280_vm0, %v21162_v26, 0.0  ;;  %19572 = vpow2.f32 %v2647_v11  ;;  %v2673_v34 = vmul.f32 1.442695, %v2643_v32  ;;  %v2671_v39 = vmul.f32 1.442695, %v2642_v35  ;;  %v1480_v63 = vpop.xlane.xlu0 %1479 }
 0x483   : > { %1557 = vadd.xlane.f32.xlu0 %v1556_v40  ;;  %19574 = vpow2.f32 %v2645_v51  ;;  %v1505_v5 = vsub.f32 %v21059_v50, %v1477_v4  ;;  %v2669_v20 = vmul.f32 1.442695, %v2641_v22  ;;  %v1504_v58 = vsub.f32 %v21064_v21, %v1474_v15 }
 0x484   : > { %19576 = vpow2.f32 %v2651_v6  ;;  %v1506_v21 = vsub.f32 %v21076_v38, %v1480_v63 }
 0x485   : > { %19578 = vpow2.f32 %v2649_v49  ;;  %v1483_v49 = vpop.xlane.xlu1 %1482 }
 0x486   : > { %19580 = vpow2.f32 %v2659_v23  ;;  %v1507_v50 = vsub.f32 %v21071_v60, %v1483_v49  ;;  %v1486_v30 = vpop.xlane.xlu0 %1485  ;;  %v1532_v38 = vmul.f32 1.442695, %v1506_v21  ;;  %v24312_v21 = vld [vmem:[#allocation9_spill] sm:$0xff] }
 0x487   : > { %19582 = vpow2.f32 %v2657_v54  ;;  %v1508_v29 = vsub.f32 %v21088_v8, %v1486_v30  ;;  %v24315_v30 = vld [vmem:[#allocation14_spill] sm:$0xff] }
 0x488   : > { %v21174_v59 = vpop.eup %19564  ;;  %19584 = vpow2.f32 %v2655_v47  ;;  %v1534_v60 = vmul.f32 1.442695, %v1507_v50  ;;  %v24310_v50 = vld [vmem:[#allocation16_spill] sm:$0xff] }
 0x489   : > { %v21178_v25 = vpop.eup %19566  ;;  %v1565_v56 = vsel %vm280_vm0, %v21174_v59, 0.0  ;;  %19586 = vpow2.f32 %v2653_v27  ;;  %v1489_v47 = vpop.xlane.xlu1 %1488 }
 0x48a   : > { %v21184_v52 = vpop.eup %19568  ;;  %1566 = vadd.xlane.f32.xlu1 %v1565_v56  ;;  %v1562_v37 = vsel %vm280_vm0, %v21178_v25, 0.0  ;;  %19588 = vpow2.f32 %v2667_v46  ;;  %v1530_v56 = vmul.f32 1.442695, %v1505_v5  ;;  %v1509_v46 = vsub.f32 %v21083_v17, %v1489_v47  ;;  %v24313_v47 = vld [vmem:[#allocation8_spill] sm:$0xff] }
 0x48b   : > { %v21188_v28 = vpop.eup %19570  ;;  %1563 = vadd.xlane.f32.xlu0 %v1562_v37  ;;  %v1589_v2 = vsel %vm280_vm0, %v21184_v52, 0.0  ;;  %19590 = vpow2.f32 %v2665_v31  ;;  %v1528_v37 = vmul.f32 1.442695, %v1504_v58  ;;  %v1536_v17 = vmul.f32 1.442695, %v1508_v29  ;;  %v24306_v58 = vld [vmem:[#allocation2_spill] sm:$0xff] }
 0x48c   : > { %v21196_v61 = vpop.eup %19572  ;;  %v1586_v1 = vsel %vm280_vm0, %v21188_v28, 0.0  ;;  %19592 = vpow2.f32 %v2663_v18  ;;  %v1538_v18 = vmul.f32 1.442695, %v1509_v46  ;;  %v24318_v46 = vld [vmem:[#allocation11_spill] sm:$0xff]  ;;  %v24320_v29 = vld [vmem:[#allocation21_spill] sm:$0xff] }
 0x48d   : > { %v21200_v36 = vpop.eup %19574  ;;  %v2680_v0 = vsel %vm280_vm0, %v21196_v61, 0.0  ;;  %19594 = vpow2.f32 %v2661_v24 }
 0x48e   : > { %1590 = vadd.xlane.f32.xlu1 %v1589_v2  ;;  %v21208_v48 = vpop.eup %19576  ;;  %v2677_v43 = vsel %vm280_vm0, %v21200_v36, 0.0  ;;  %19596 = vpow2.f32 %v2675_v42 }
 0x48f   : > { %1587 = vadd.xlane.f32.xlu0 %v1586_v1  ;;  %v21212_v13 = vpop.eup %19578  ;;  %v2686_v9 = vsel %vm280_vm0, %v21208_v48, 0.0  ;;  %19598 = vpow2.f32 %v2673_v34 }
 0x490   : > { %v21220_v11 = vpop.eup %19580  ;;  %v2683_v51 = vsel %vm280_vm0, %v21212_v13, 0.0  ;;  %19600 = vpow2.f32 %v2671_v39 }
 0x491   : > { %v21224_v19 = vpop.eup %19582  ;;  %v2698_v10 = vsel %vm280_vm0, %v21220_v11, 0.0  ;;  %19602 = vpow2.f32 %v2669_v20  ;;  %v24305_v20 = vld [vmem:[#allocation4_spill] sm:$0xff] }
 0x492   : > { %2681 = vadd.xlane.f32.xlu1 %v2680_v0  ;;  %v21232_v40 = vpop.eup %19584  ;;  %v2695_v6 = vsel %vm280_vm0, %v21224_v19, 0.0  ;;  %19604 = vpow2.f32 %v1530_v56  ;;  %v24309_v56 = vld [vmem:[#allocation5_spill] sm:$0xff] }
 0x493   : > { %2678 = vadd.xlane.f32.xlu0 %v2677_v43  ;;  %v21236_v57 = vpop.eup %19586  ;;  %v2692_v23 = vsel %vm280_vm0, %v21232_v40, 0.0  ;;  %19606 = vpow2.f32 %v1528_v37  ;;  %v24311_v37 = vld [vmem:[#allocation15_spill] sm:$0xff] }
 0x494   : > { %v21242_v3 = vpop.eup %19588  ;;  %v2689_v54 = vsel %vm280_vm0, %v21236_v57, 0.0  ;;  %19608 = vpow2.f32 %v1534_v60  ;;  %v24317_v60 = vld [vmem:[#allocation12_spill] sm:$0xff] }
 0x495   : > { %v21246_v33 = vpop.eup %19590  ;;  %v2710_v53 = vsel %vm280_vm0, %v21242_v3, 0.0  ;;  %19610 = vpow2.f32 %v1532_v38  ;;  %v24319_v38 = vld [vmem:[#allocation20_spill] sm:$0xff] }
 0x496   : > { %2687 = vadd.xlane.f32.xlu1 %v2686_v9  ;;  %v21252_v27 = vpop.eup %19592  ;;  %v2707_v2 = vsel %vm280_vm0, %v21246_v33, 0.0  ;;  %19612 = vpow2.f32 %v1538_v18  ;;  %v24323_v18 = vld [vmem:[#allocation18_spill] sm:$0xff] }
 0x497   : > { %2684 = vadd.xlane.f32.xlu0 %v2683_v51  ;;  %v21256_v1 = vpop.eup %19594  ;;  %v2704_v31 = vsel %vm280_vm0, %v21252_v27, 0.0  ;;  %19614 = vpow2.f32 %v1536_v17  ;;  %v24324_v17 = vld [vmem:[#allocation17_spill] sm:$0xff] }
 0x498   : > { %v21262_v14 = vpop.eup %19596  ;;  %v2701_v0 = vsel %vm280_vm0, %v21256_v1, 0.0 }
 0x499   : > { %v21266_v43 = vpop.eup %19598  ;;  %v2722_v16 = vsel %vm280_vm0, %v21262_v14, 0.0 }
 0x49a   : > { %2699 = vadd.xlane.f32.xlu1 %v2698_v10  ;;  %v21270_v8 = vpop.eup %19600  ;;  %v2719_v24 = vsel %vm280_vm0, %v21266_v43, 0.0 }
 0x49b   : > { %2696 = vadd.xlane.f32.xlu0 %v2695_v6  ;;  %v21274_v32 = vpop.eup %19602  ;;  %v2716_v4 = vsel %vm280_vm0, %v21270_v8, 0.0 }
 0x49c   : > { %v21278_v9 = vpop.eup %19604  ;;  %v2713_v15 = vsel %vm280_vm0, %v21274_v32, 0.0 }
 0x49d   : > { %v21282_v51 = vpop.eup %19606  ;;  %v1571_v42 = vsel %vm280_vm0, %v21278_v9, 0.0 }
 0x49e   : > { %2693 = vadd.xlane.f32.xlu1 %v2692_v23  ;;  %v21286_v35 = vpop.eup %19608  ;;  %v1568_v34 = vsel %vm280_vm0, %v21282_v51, 0.0  ;;  %v24307_v23 = vld [vmem:[#allocation10_spill] sm:$0xff] }
 0x49f   : > { %2690 = vadd.xlane.f32.xlu0 %v2689_v54  ;;  %v21290_v22 = vpop.eup %19610  ;;  %v1577_v10 = vsel %vm280_vm0, %v21286_v35, 0.0  ;;  %v24308_v54 = vld [vmem:[#allocation6_spill] sm:$0xff] }
 0x4a0   : > { %v21294_v6 = vpop.eup %19612  ;;  %v1574_v49 = vsel %vm280_vm0, %v21290_v22, 0.0 }
 0x4a1   : > { %v21298_v39 = vpop.eup %19614  ;;  %v1583_v5 = vsel %vm280_vm0, %v21294_v6, 0.0 }
 0x4a2   : > { %2711 = vadd.xlane.f32.xlu1 %v2710_v53  ;;  %v1580_v63 = vsel %vm280_vm0, %v21298_v39, 0.0  ;;  %v24314_v53 = vld [vmem:[#allocation22_spill] sm:$0xff] }
 0x4a3   : > { %2708 = vadd.xlane.f32.xlu0 %v2707_v2  ;;  %v24316_v2 = vld [vmem:[#allocation13_spill] sm:$0xff] }
 0x4a6   : > { %2705 = vadd.xlane.f32.xlu1 %v2704_v31  ;;  %v24321_v31 = vld [vmem:[#allocation19_spill] sm:$0xff] }
 0x4a7   : > { %2702 = vadd.xlane.f32.xlu0 %v2701_v0  ;;  %v24322_v0 = vld [vmem:[#allocation25_spill] sm:$0xff] }
 0x4aa   : > { %2723 = vadd.xlane.f32.xlu1 %v2722_v16  ;;  %v24325_v16 = vld [vmem:[#allocation24_spill] sm:$0xff] }
 0x4ab   : > { %2720 = vadd.xlane.f32.xlu0 %v2719_v24  ;;  %v24326_v24 = vld [vmem:[#allocation23_spill] sm:$0xff] }
 0x4ae   : > { %2717 = vadd.xlane.f32.xlu1 %v2716_v4 }
 0x4af   : > { %2714 = vadd.xlane.f32.xlu0 %v2713_v15 }
 0x4b2   : > { %1572 = vadd.xlane.f32.xlu1 %v1571_v42 }
 0x4b3   : > { %1569 = vadd.xlane.f32.xlu0 %v1568_v34 }
 0x4b6   : > { %1578 = vadd.xlane.f32.xlu1 %v1577_v10 }
 0x4b7   : > { %1575 = vadd.xlane.f32.xlu0 %v1574_v49 }
 0x4ba   : > { %1584 = vadd.xlane.f32.xlu1 %v1583_v5 }
 0x4bb   : > { %1581 = vadd.xlane.f32.xlu0 %v1580_v63 }
 0x4cb   : > { %19286 = vrot.lane.b32.xlu1 %v20526_v45, %s20192_s22 }
 0x4cf   : > { %4265 = vrot.lane.b32.xlu1 %v20506_v62, %s20193_s25 }
 0x4d1   : > { %19281 = vrot.lane.b32.xlu0 %v24305_v20, %s20192_s22 }
 0x4d3   : > { %4267 = vrot.lane.b32.xlu1 %v24306_v58, %s20193_s25 }
 0x4d5   : > { %19291 = vrot.lane.b32.xlu0 %v24307_v23, %s20192_s22 }
 0x4d7   : > { %4356 = vrot.lane.b32.xlu1 %v24308_v54, %s20193_s25 }
 0x4d9   : > { %4358 = vrot.lane.b32.xlu0 %v24309_v56, %s20193_s25 }
 0x4db   : > { %19296 = vrot.lane.b32.xlu1 %v24310_v50, %s20192_s22 }
 0x4dd   : > { %19301 = vrot.lane.b32.xlu0 %v24311_v37, %s20192_s22 }
 0x4df   : > { %4447 = vrot.lane.b32.xlu1 %v24312_v21, %s20193_s25 }
 0x4e1   : > { %4449 = vrot.lane.b32.xlu0 %v24313_v47, %s20193_s25 }
 0x4e3   : > { %19306 = vrot.lane.b32.xlu1 %v24314_v53, %s20192_s22 }
 0x4e5   : > { %4538 = vrot.lane.b32.xlu0 %v24315_v30, %s20193_s25 }
 0x4e7   : > { %4540 = vrot.lane.b32.xlu1 %v24316_v2, %s20193_s25 }
 0x4e9   : > { %4629 = vrot.lane.b32.xlu0 %v24317_v60, %s20193_s25 }
 0x4eb   : > { %4631 = vrot.lane.b32.xlu1 %v24318_v46, %s20193_s25 }
 0x4ed   : > { %4720 = vrot.lane.b32.xlu0 %v24319_v38, %s20193_s25 }
 0x4ef   : > { %19311 = vrot.lane.b32.xlu1 %v24320_v29, %s20192_s22 }
 0x4f1   : > { %4722 = vrot.lane.b32.xlu0 %v24321_v31, %s20193_s25 }
 0x4f3   : > { %19316 = vrot.lane.b32.xlu1 %v24322_v0, %s20192_s22 }
 0x4f5   : > { %4811 = vrot.lane.b32.xlu0 %v24323_v18, %s20193_s25 }
 0x4f7   : > { %4813 = vrot.lane.b32.xlu1 %v24324_v17, %s20193_s25 }
 0x4f9   : > { %4902 = vrot.lane.b32.xlu0 %v24325_v16, %s20193_s25 }
 0x4fb   : > { %4904 = vrot.lane.b32.xlu1 %v24326_v24, %s20193_s25  ;;  %s20207_s25 = smov 98  }
 0x4fd   : > { %5185 = vrot.lane.b32.xlu0 %v20506_v62, %s20194_s26 }
 0x4ff   : > { %5187 = vrot.lane.b32.xlu1 %v24306_v58, %s20194_s26 }
 0x501   : > { %5189 = vrot.lane.b32.xlu0 %v24308_v54, %s20194_s26 }
 0x503   : > { %5191 = vrot.lane.b32.xlu1 %v24309_v56, %s20194_s26 }
 0x505   : > { %5193 = vrot.lane.b32.xlu0 %v24312_v21, %s20194_s26 }
 0x507   : > { %5195 = vrot.lane.b32.xlu1 %v24313_v47, %s20194_s26  ;;  %v21334_v4 = vpop.xlane.xlu1 %1548 }
 0x508   : > { %v21336_v15 = vpop.xlane.xlu0 %1545 }
 0x509   : > { %5197 = vrot.lane.b32.xlu0 %v24315_v30, %s20194_s26 }
 0x50b   : > { %5199 = vrot.lane.b32.xlu1 %v24316_v2, %s20194_s26  ;;  %v21340_v42 = vpop.xlane.xlu1 %1554 }
 0x50c   : > { %v21343_v34 = vpop.xlane.xlu0 %1551 }
 0x50d   : > { %5201 = vrot.lane.b32.xlu0 %v24317_v60, %s20194_s26 }
 0x50f   : > { %5203 = vrot.lane.b32.xlu1 %v24318_v46, %s20194_s26  ;;  %v21347_v10 = vpop.xlane.xlu1 %1560 }
 0x510   : > { %v21350_v49 = vpop.xlane.xlu0 %1557 }
 0x511   : > { %5205 = vrot.lane.b32.xlu0 %v24319_v38, %s20194_s26 }
 0x513   : > { %5207 = vrot.lane.b32.xlu1 %v24321_v31, %s20194_s26 }
 0x515   : > { %5209 = vrot.lane.b32.xlu0 %v24323_v18, %s20194_s26 }
 0x517   : > { %5211 = vrot.lane.b32.xlu1 %v24324_v17, %s20194_s26  ;;  %v21354_v5 = vpop.xlane.xlu1 %1566 }
 0x518   : > { %v21356_v63 = vpop.xlane.xlu0 %1563 }
 0x519   : > { %5213 = vrot.lane.b32.xlu0 %v24325_v16, %s20194_s26 }
 0x51b   : > { %5215 = vrot.lane.b32.xlu1 %v24326_v24, %s20194_s26  ;;  %v1591_v0 = vpop.xlane.xlu1 %1590  ;;  %s20208_s26 = smov 114  }
 0x51c   : > { %19616 = vrcp.f32 %v1591_v0  ;;  %v1588_v38 = vpop.xlane.xlu0 %1587 }
 0x51d   : > { %19618 = vrcp.f32 %v1588_v38  ;;  %19321 = vrot.lane.b32.xlu0 %v24305_v20, %s20195_s28 }
 0x51f   : > { %19326 = vrot.lane.b32.xlu1 %v20526_v45, %s20195_s28  ;;  %v2682_v18 = vpop.xlane.xlu1 %2681 }
 0x520   : > { %19620 = vrcp.f32 %v2682_v18  ;;  %v2679_v31 = vpop.xlane.xlu0 %2678 }
 0x521   : > { %19622 = vrcp.f32 %v2679_v31 }
 0x523   : > { %19331 = vrot.lane.b32.xlu1 %v24307_v23, %s20195_s28  ;;  %v2688_v16 = vpop.xlane.xlu1 %2687 }
 0x524   : > { %19624 = vrcp.f32 %v2688_v16  ;;  %v2685_v24 = vpop.xlane.xlu0 %2684 }
 0x525   : > { %19626 = vrcp.f32 %v2685_v24 }
 0x526   : > { %v19617_v0 = vpop.eup %19616 }
 0x527   : > { %v19619_v38 = vpop.eup %19618  ;;  %6061 = vrot.lane.b32.xlu1 %v20506_v62, %s20196_s29  ;;  %v2700_v20 = vpop.xlane.xlu1 %2699  ;;  %v1623_v18 = vmul.f32 %v19617_v0, %v21184_v52 }
 0x528   : > { %v2697_v17 = vpop.xlane.xlu0 %2696  ;;  %v1622_v45 = vmul.f32 %v19619_v38, %v21188_v28  ;;  %v24328_v38 = vld [vmem:[#allocation35_spill] sm:$0xff] }
 0x529   : > { %19628 = vrcp.f32 %v2697_v17 }
 0x52a   : > { %v19621_v31 = vpop.eup %19620  ;;  %17546 = vmatprep.mubr.msk.f32.mxu1 %vm280_vm0, %v1622_v45  ;;  %v24327_v45 = vld [vmem:[#allocation34_spill] sm:$0xff] }
 0x52b   : > { %v19623_v23 = vpop.eup %19622  ;;  %v2694_v16 = vpop.xlane.xlu1 %2693  ;;  %17547 = vmatmul.mubr.msk.f32.vlgmr.msra.gmra.mrb[22].mxu1 %vm280_vm0, %v1623_v18  ;;  %v2742_v62 = vmul.f32 %v19621_v31, %v21196_v61 }
 0x52c   : > { %19630 = vrcp.f32 %v2694_v16  ;;  %v2691_v24 = vpop.xlane.xlu0 %2690  ;;  %v2741_v60 = vmul.f32 %v19623_v23, %v21200_v36  ;;  %v24329_v23 = vld [vmem:[#allocation36_spill] sm:$0xff] }
 0x52d   : > { %19632 = vrcp.f32 %v2691_v24 }
 0x52e   : > { %v19625_v29 = vpop.eup %19624  ;;  %17441 = vmatprep.mubr.msk.f32.mxu0 %vm280_vm0, %v2741_v60  ;;  %19634 = vrcp.f32 %v2700_v20 }
 0x52f   : > { %v19627_v28 = vpop.eup %19626  ;;  %v2712_v52 = vpop.xlane.xlu1 %2711  ;;  %17442 = vmatmul.mubr.msk.f32.vlgmr.msra.gmra.mrb[58].mxu0 %vm280_vm0, %v2742_v62  ;;  %v2744_v36 = vmul.f32 %v19625_v29, %v21208_v48 }
 0x530   : > { %18484 = vmatpush3.bf16.msra.mxu0 %v24327_v45  ;;  %v2709_v17 = vpop.xlane.xlu0 %2708  ;;  %v2743_v0 = vmul.f32 %v19627_v28, %v21212_v13 }
 0x531   : > { %18486 = vmatprep.subr.bf16.mxu0 %v24328_v38  ;;  %19636 = vrcp.f32 %v2709_v17  ;;  %v24330_v17 = vld [vmem:[#allocation37_spill] sm:$0xff] }
 0x532   : > { %17448 = vmatprep.mubr.msk.f32.mxu0 %vm280_vm0, %v2743_v0 }
 0x533   : > { %v2706_v61 = vpop.xlane.xlu1 %2705  ;;  %17449 = vmatmul.mubr.msk.f32.vlgmr.msra.gmra.mrb[60].mxu0 %vm280_vm0, %v2744_v36  ;;  %v19629_v20 = vpop.eup %19628 }
 0x534   : > { %19638 = vrcp.f32 %v2706_v61  ;;  %18488 = vmatpush3.bf16.msra.mxu0 %v24328_v38  ;;  %v2703_v62 = vpop.xlane.xlu0 %2702  ;;  %v2747_v24 = vmul.f32 %v19629_v20, %v21224_v19  ;;  %v24331_v61 = vld [vmem:[#allocation38_spill] sm:$0xff] }
 0x535   : > { %18490 = vmatprep.subr.bf16.mxu0 %v24329_v23  ;;  %19640 = vrcp.f32 %v2703_v62 }
 0x536   : > { %v19631_v60 = vpop.eup %19630  ;;  %19642 = vrcp.f32 %v2712_v52 }
 0x537   : > { %v19633_v13 = vpop.eup %19632  ;;  %v2724_v18 = vpop.xlane.xlu1 %2723  ;;  %v2746_v29 = vmul.f32 %v19631_v60, %v21232_v40  ;;  %v24332_v60 = vld [vmem:[#allocation39_spill] sm:$0xff] }
 0x538   : > { %v2721_v31 = vpop.xlane.xlu0 %2720  ;;  %v2745_v48 = vmul.f32 %v19633_v13, %v21236_v57  ;;  %v19635_v16 = vpop.eup %19634 }
 0x539   : > { %19644 = vrcp.f32 %v2721_v31  ;;  %v2748_v40 = vmul.f32 %v19635_v16, %v21220_v11 }
 0x53a   : > { %17455 = vmatprep.mubr.msk.f32.mxu0 %vm280_vm0, %v2745_v48  ;;  %v24333_v48 = vld [vmem:[#allocation40_spill] sm:$0xff] }
 0x53b   : > { %v2718_v28 = vpop.xlane.xlu1 %2717  ;;  %17456 = vmatmul.mubr.msk.f32.vlgmr.msra.gmra.mrb[62].mxu0 %vm280_vm0, %v2746_v29  ;;  %v19637_v45 = vpop.eup %19636 }
 0x53c   : > { %19646 = vrcp.f32 %v2718_v28  ;;  %18492 = vmatpush3.bf16.msra.mxu0 %v24329_v23  ;;  %17462 = vmatprep.mubr.msk.f32.mxu0 %vm280_vm0, %v2747_v24  ;;  %v2715_v52 = vpop.xlane.xlu0 %2714  ;;  %v2751_v11 = vmul.f32 %v19637_v45, %v21246_v33 }
 0x53d   : > { %18494 = vmatprep.subr.bf16.mxu0 %v24330_v17  ;;  %19648 = vrcp.f32 %v2715_v52 }
 0x53e   : > { %v19639_v57 = vpop.eup %19638  ;;  %19650 = vrcp.f32 %v2724_v18 }
 0x53f   : > { %v19641_v0 = vpop.eup %19640  ;;  %v21393_v38 = vpop.xlane.xlu1 %1572  ;;  %17463 = vmatmul.mubr.msk.f32.vlgmr.msra.gmra.mrb[64].mxu0 %vm280_vm0, %v2748_v40  ;;  %19652 = vrcp.f32 %v21336_v15  ;;  %v2750_v62 = vmul.f32 %v19639_v57, %v21252_v27 }
 0x540   : > { %18496 = vmatpush3.bf16.msra.mxu0 %v24330_v17  ;;  %v1570_v19 = vpop.xlane.xlu0 %1569  ;;  %v2749_v36 = vmul.f32 %v19641_v0, %v21256_v1  ;;  %v19643_v20 = vpop.eup %19642  ;;  %19654 = vrcp.f32 %v21334_v4 }
 0x541   : > { %18498 = vmatprep.subr.bf16.mxu0 %v24331_v61  ;;  %v2752_v27 = vmul.f32 %v19643_v20, %v21242_v3  ;;  %19656 = vrcp.f32 %v21343_v34 }
 0x542   : > { %17469 = vmatprep.mubr.msk.f32.mxu0 %vm280_vm0, %v2749_v36  ;;  %19658 = vrcp.f32 %v21340_v42  ;;  %v24334_v42 = vld [vmem:[#allocation27_spill] sm:$0xff] }
 0x543   : > { %v21403_v23 = vpop.xlane.xlu1 %1578  ;;  %17470 = vmatmul.mubr.msk.f32.vlgmr.msra.gmra.mrb[66].mxu0 %vm280_vm0, %v2750_v62  ;;  %v19645_v15 = vpop.eup %19644  ;;  %19660 = vrcp.f32 %v21350_v49 }
 0x544   : > { %18500 = vmatpush3.bf16.msra.mxu0 %v24331_v61  ;;  %17476 = vmatprep.mubr.msk.f32.mxu0 %vm280_vm0, %v2751_v11  ;;  %v1576_v1 = vpop.xlane.xlu0 %1575  ;;  %v2755_v29 = vmul.f32 %v19645_v15, %v21266_v43  ;;  %19662 = vrcp.f32 %v21347_v10 }
 0x545   : > { %18502 = vmatprep.subr.bf16.mxu0 %v24332_v60  ;;  %19664 = vrcp.f32 %v21356_v63 }
 0x546   : > { %v19647_v13 = vpop.eup %19646  ;;  %19666 = vrcp.f32 %v21354_v5 }
 0x547   : > { %v19649_v33 = vpop.eup %19648  ;;  %v21412_v18 = vpop.xlane.xlu1 %1584  ;;  %17477 = vmatmul.mubr.msk.f32.vlgmr.msra.gmra.mrb[68].mxu0 %vm280_vm0, %v2752_v27  ;;  %v2754_v3 = vmul.f32 %v19647_v13, %v21270_v8  ;;  %19668 = vrcp.f32 %v1570_v19  ;;  %v24337_v19 = vld [vmem:[#allocation29_spill] sm:$0xff] }
 0x548   : > { %18504 = vmatpush3.bf16.msra.mxu0 %v24332_v60  ;;  %v21417_v4 = vpop.xlane.xlu0 %1581  ;;  %v2753_v31 = vmul.f32 %v19649_v33, %v21274_v32  ;;  %v19651_v34 = vpop.eup %19650  ;;  %19670 = vrcp.f32 %v21393_v38 }
 0x549   : > { %18506 = vmatprep.subr.bf16.mxu0 %v24333_v48  ;;  %v19653_v16 = vpop.eup %19652  ;;  %v2756_v28 = vmul.f32 %v19651_v34, %v21262_v14  ;;  %v24335_v14 = vld [vmem:[#allocation28_spill] sm:$0xff]  ;;  %19672 = vrcp.f32 %v1576_v1 }
 0x54a   : > { %17483 = vmatprep.mubr.msk.f32.mxu0 %vm280_vm0, %v2753_v31  ;;  %v19655_v52 = vpop.eup %19654  ;;  %v1608_v17 = vmul.f32 %v19653_v16, %v21137_v55  ;;  %19674 = vrcp.f32 %v21403_v23  ;;  %v24338_v31 = vld [vmem:[#allocation30_spill] sm:$0xff] }
 0x54b   : > { %v19287_v24 = vpop.permute.xlu1 %19286  ;;  %17484 = vmatmul.mubr.msk.f32.vlgmr.msra.gmra.mrb[70].mxu0 %vm280_vm0, %v2754_v3  ;;  %v19657_v0 = vpop.eup %19656  ;;  %v1609_v63 = vmul.f32 %v19655_v52, %v21134_v7  ;;  %19676 = vrcp.f32 %v21417_v4 }
 0x54c   : > { %18508 = vmatpush3.bf16.msra.mxu0 %v24333_v48  ;;  %17490 = vmatprep.mubr.msk.f32.mxu0 %vm280_vm0, %v2755_v29  ;;  %v19282_v32 = vpop.permute.xlu0 %19281  ;;  %v19289_v43 = vunpack.i.h.bf16 %v19287_v24  ;;  %v19288_v45 = vunpack.i.l.bf16 %v19287_v24  ;;  %v19659_v36 = vpop.eup %19658  ;;  %v1610_v5 = vmul.f32 %v19657_v0, %v21150_v44  ;;  %19678 = vrcp.f32 %v21412_v18  ;;  %v24339_v29 = vld [vmem:[#allocation31_spill] sm:$0xff] }
 0x54d   : > { %18510 = vmatprep.subr.bf16.mxu0 %v24334_v42  ;;  %v19284_v49 = vunpack.i.h.bf16 %v19282_v32  ;;  %v19283_v8 = vunpack.i.l.bf16 %v19282_v32  ;;  %v19661_v62 = vpop.eup %19660  ;;  %v1611_v11 = vmul.f32 %v19659_v36, %v21146_v41 }
 0x54e   : > { %v18547_v55 = vpack.c.bf16 %v19289_v43, %v19288_v45  ;;  %v1612_v27 = vmul.f32 %v19661_v62, %v21162_v26  ;;  %v19663_v44 = vpop.eup %19662 }
 0x54f   : > { %v18541_v40 = vpack.c.bf16 %v19284_v49, %v19283_v8  ;;  %v4266_v57 = vpop.permute.xlu1 %4265  ;;  %17491 = vmatmul.mubr.msk.f32.vlgmr.msra.gmra.mrb[72].mxu0 %vm280_vm0, %v2756_v28  ;;  %v19665_v33 = vpop.eup %19664  ;;  %v1613_v26 = vmul.f32 %v19663_v44, %v21158_v12  ;;  %v24340_v8 = vld [vmem:[#allocation32_spill] sm:$0xff] }
 0x550   : > { %18512 = vmatpush3.bf16.msra.mxu0 %v24334_v42  ;;  %17497 = vmatprep.mubr.msk.f32.mxu0 %vm280_vm0, %v1608_v17  ;;  %v19292_v10 = vpop.permute.xlu0 %19291  ;;  %v19667_v1 = vpop.eup %19666  ;;  %v1614_v3 = vmul.f32 %v19665_v33, %v21178_v25 }
 0x551   : > { %18514 = vmatprep.subr.bf16.mxu0 %v24335_v14  ;;  %17553 = vmatprep.mubr.msk.f32.mxu1 %vm725_vm1, %v4266_v57  ;;  %v19294_v15 = vunpack.i.h.bf16 %v19292_v10  ;;  %v19293_v60 = vunpack.i.l.bf16 %v19292_v10  ;;  %v19669_v34 = vpop.eup %19668  ;;  %v1615_v16 = vmul.f32 %v19667_v1, %v21174_v59 }
 0x552   : > { %18543 = vmatprep.subr.msk.bf16.mxu1 %vm20710_vm2, %v18541_v40  ;;  %v19671_v25 = vpop.eup %19670  ;;  %v1616_v32 = vmul.f32 %v19669_v34, %v21282_v51 }
 0x553   : > { %18546 = vmatpush3.bf16.xpose.msk.msra.mxu1 %vm20710_vm2, %v18541_v40  ;;  %v4268_v20 = vpop.permute.xlu1 %4267  ;;  %17498 = vmatmul.mubr.msk.f32.vlgmr.msra.gmra.mrb[58].mxu0 %vm280_vm0, %v1609_v63  ;;  %v18553_v41 = vpack.c.bf16 %v19294_v15, %v19293_v60  ;;  %v19673_v42 = vpop.eup %19672  ;;  %v1617_v28 = vmul.f32 %v19671_v25, %v21278_v9  ;;  %v24341_v9 = vld [vmem:[#allocation33_spill] sm:$0xff] }
 0x554   : > { %18516 = vmatpush3.bf16.msra.mxu0 %v24335_v14  ;;  %18549 = vmatprep.subr.msk.bf16.mxu1 %vm20710_vm2, %v18547_v55  ;;  %v4359_v7 = vpop.permute.xlu0 %4358  ;;  %v19675_v59 = vpop.eup %19674  ;;  %v1618_v52 = vmul.f32 %v19673_v42, %v21290_v22 }
 0x555   : > { %17504 = vmatprep.mubr.msk.f32.mxu0 %vm280_vm0, %v1610_v5  ;;  %18518 = vmatprep.subr.bf16.mxu0 %v24337_v19  ;;  %v19677_v43 = vpop.eup %19676  ;;  %v1619_v57 = vmul.f32 %v19675_v59, %v21286_v35 }
 0x556   : > { %v19679_v0 = vpop.eup %19678  ;;  %v1620_v22 = vmul.f32 %v19677_v43, %v21298_v39 }
 0x557   : > { %v4357_v13 = vpop.permute.xlu1 %4356  ;;  %17505 = vmatmul.mubr.msk.f32.vlgmr.msra.gmra.mrb[60].mxu0 %vm280_vm0, %v1611_v11  ;;  %v1621_v36 = vmul.f32 %v19679_v0, %v21294_v6  ;;  %v21511_v6 = vld [vmem:[%s24167_s2] sm:$0xff] }
 0x558   : > { %18520 = vmatpush3.bf16.msra.mxu0 %v24337_v19  ;;  %17511 = vmatprep.mubr.msk.f32.mxu0 %vm280_vm0, %v1612_v27  ;;  %v19302_v38 = vpop.permute.xlu0 %19301  ;;  %v5217_v60 = vrot.slane %v21511_v6, 4 }
 0x559   : > { %18522 = vmatprep.subr.bf16.mxu0 %v24338_v31  ;;  %v19304_v12 = vunpack.i.h.bf16 %v19302_v38  ;;  %v19303_v4 = vunpack.i.l.bf16 %v19302_v38 }
 0x55a   : > { %17554 = vmatmul.mubr.msk.f32.vlgmr.msra.gmra.mrb[24].mxu1 %vm725_vm1, %v4268_v20 }
 0x55b   : > { %18552 = vmatpush3.bf16.xpose.msk.msra.mxu1 %vm20710_vm2, %v18547_v55  ;;  %17560 = vmatprep.mubr.msk.f32.mxu1 %vm725_vm1, %v4357_v13  ;;  %v19297_v48 = vpop.permute.xlu1 %19296  ;;  %v18565_v18 = vpack.c.bf16 %v19304_v12, %v19303_v4 }
 0x55c   : > { %17512 = vmatmul.mubr.msk.f32.vlgmr.msra.gmra.mrb[62].mxu0 %vm280_vm0, %v1613_v26  ;;  %18555 = vmatprep.subr.msk.bf16.mxu1 %vm20710_vm2, %v18553_v41  ;;  %v4450_v23 = vpop.permute.xlu0 %4449  ;;  %v19299_v45 = vunpack.i.h.bf16 %v19297_v48  ;;  %v19298_v17 = vunpack.i.l.bf16 %v19297_v48 }
 0x55d   : > { %18524 = vmatpush3.bf16.msra.mxu0 %v24338_v31  ;;  %17518 = vmatprep.mubr.msk.f32.mxu0 %vm280_vm0, %v1614_v3 }
 0x55e   : > { %18526 = vmatprep.subr.bf16.mxu0 %v24339_v29  ;;  %v18559_v14 = vpack.c.bf16 %v19299_v45, %v19298_v17 }
 0x55f   : > { %v4448_v24 = vpop.permute.xlu1 %4447 }
 0x560   : > { %17519 = vmatmul.mubr.msk.f32.vlgmr.msra.gmra.mrb[64].mxu0 %vm280_vm0, %v1615_v16  ;;  %v4539_v49 = vpop.permute.xlu0 %4538 }
 0x561   : > { %18528 = vmatpush3.bf16.msra.mxu0 %v24339_v29  ;;  %17525 = vmatprep.mubr.msk.f32.mxu0 %vm280_vm0, %v1616_v32 }
 0x562   : > { %18530 = vmatprep.subr.bf16.mxu0 %v24340_v8  ;;  %17561 = vmatmul.mubr.msk.f32.vlgmr.msra.gmra.mrb[26].mxu1 %vm725_vm1, %v4359_v7 }
 0x563   : > { %18558 = vmatpush3.bf16.xpose.msk.msra.mxu1 %vm20710_vm2, %v18553_v41  ;;  %17567 = vmatprep.mubr.msk.f32.mxu1 %vm725_vm1, %v4448_v24  ;;  %v19307_v51 = vpop.permute.xlu1 %19306 }
 0x564   : > { %17526 = vmatmul.mubr.msk.f32.vlgmr.msra.gmra.mrb[66].mxu0 %vm280_vm0, %v1617_v28  ;;  %18567 = vmatprep.subr.msk.bf16.mxu1 %vm20710_vm2, %v18565_v18  ;;  %v4630_v40 = vpop.permute.xlu0 %4629  ;;  %v19309_v55 = vunpack.i.h.bf16 %v19307_v51  ;;  %v19308_v62 = vunpack.i.l.bf16 %v19307_v51 }
 0x565   : > { %18532 = vmatpush3.bf16.msra.mxu0 %v24340_v8  ;;  %17532 = vmatprep.mubr.msk.f32.mxu0 %vm280_vm0, %v1618_v52 }
 0x566   : > { %18534 = vmatprep.subr.bf16.mxu0 %v24341_v9  ;;  %v18571_v11 = vpack.c.bf16 %v19309_v55, %v19308_v62 }
 0x567   : > { %v4541_v10 = vpop.permute.xlu1 %4540 }
 0x568   : > { %17533 = vmatmul.mubr.msk.f32.vlgmr.msra.gmra.mrb[68].mxu0 %vm280_vm0, %v1619_v57  ;;  %v4721_v63 = vpop.permute.xlu0 %4720 }
 0x569   : > { %18536 = vmatpush3.bf16.msra.mxu0 %v24341_v9  ;;  %17539 = vmatprep.mubr.msk.f32.mxu0 %vm280_vm0, %v1620_v22 }
 0x56a   : > { %18561 = vmatprep.subr.msk.bf16.mxu0 %vm20710_vm2, %v18559_v14  ;;  %17568 = vmatmul.mubr.msk.f32.vlgmr.msra.gmra.mrb[28].mxu1 %vm725_vm1, %v4450_v23 }
 0x56b   : > { %18570 = vmatpush3.bf16.xpose.msk.msra.mxu1 %vm20710_vm2, %v18565_v18  ;;  %17581 = vmatprep.mubr.msk.f32.mxu1 %vm725_vm1, %v4630_v40  ;;  %v4632_v35 = vpop.permute.xlu1 %4631 }
 0x56c   : > { %17540 = vmatmul.mubr.msk.f32.vlgmr.msra.gmra.mrb[70].mxu0 %vm280_vm0, %v1621_v36  ;;  %v4723_v39 = vpop.permute.xlu0 %4722 }
 0x56d   : > { %17574 = vmatprep.mubr.msk.f32.mxu0 %vm725_vm1, %v4539_v49 }
 0x56f   : > { %v19312_v20 = vpop.permute.xlu1 %19311 }
 0x570   : > { %v19314_v5 = vunpack.i.h.bf16 %v19312_v20  ;;  %v19313_v7 = vunpack.i.l.bf16 %v19312_v20  ;;  %v4812_v19 = vpop.permute.xlu0 %4811 }
 0x572   : > { %v18577_v15 = vpack.c.bf16 %v19314_v5, %v19313_v7  ;;  %18564 = vmatpush3.bf16.xpose.msk.msra.mxu0 %vm20710_vm2, %v18559_v14  ;;  %17582 = vmatmul.mubr.msk.f32.vlgmr.msra.gmra.mrb[30].mxu1 %vm725_vm1, %v4632_v35 }
 0x573   : > { %18573 = vmatprep.subr.msk.bf16.mxu0 %vm20710_vm2, %v18571_v11  ;;  %17595 = vmatprep.mubr.msk.f32.mxu1 %vm725_vm1, %v4812_v19  ;;  %v19317_v27 = vpop.permute.xlu1 %19316 }
 0x574   : > { %v19319_v44 = vunpack.i.h.bf16 %v19317_v27  ;;  %v19318_v13 = vunpack.i.l.bf16 %v19317_v27  ;;  %v4903_v33 = vpop.permute.xlu0 %4902  ;;  %18579 = vmatprep.subr.msk.bf16.mxu1 %vm20710_vm2, %v18577_v15 }
 0x575   : > { %18582 = vmatpush3.bf16.xpose.msk.msra.mxu1 %vm20710_vm2, %v18577_v15 }
 0x576   : > { %17605 = vmatprep.subr.msk.mxu1 %vm1688_vm3, %v5217_v60  ;;  %v18583_v38 = vpack.c.bf16 %v19319_v44, %v19318_v13 }
 0x577   : > { %v4814_v31 = vpop.permute.xlu1 %4813 }
 0x578   : > { %v5186_v41 = vpop.permute.xlu0 %5185 }
 0x579   : > { %17575 = vmatmul.mubr.msk.f32.vlgmr.msra.gmra.mrb[74].mxu0 %vm725_vm1, %v4541_v10 }
 0x57a   : > { %18576 = vmatpush3.bf16.xpose.msk.msra.mxu0 %vm20710_vm2, %v18571_v11  ;;  %17588 = vmatprep.mubr.msk.f32.mxu0 %vm725_vm1, %v4721_v63 }
 0x57b   : > { %18585 = vmatprep.subr.msk.bf16.mxu0 %vm20710_vm2, %v18583_v38  ;;  %v4905_v26 = vpop.permute.xlu1 %4904 }
 0x57c   : > { %v5190_v1 = vpop.permute.xlu0 %5189  ;;  %17596 = vmatmul.mubr.msk.f32.vlgmr.msra.gmra.mrb[32].mxu1 %vm725_vm1, %v4814_v31 }
 0x57d   : > { %17607 = vmatprep.mubr.msk.f32.mxu1 %vm725_vm1, %v5186_v41  ;;  %17606 = vmatpush3.msk.msra.mxu1 %vm1688_vm3, %v5217_v60 }
 0x57f   : > { %v5188_v48 = vpop.permute.xlu1 %5187 }
 0x580   : > { %v5194_v3 = vpop.permute.xlu0 %5193  ;;  %17608 = vmatmul.mubr.msk.f32.vlgmr.msra.gmra.mrb[34].mxu1 %vm725_vm1, %v5188_v48 }
 0x581   : > { %17589 = vmatmul.mubr.msk.f32.vlgmr.msra.gmra.mrb[76].mxu0 %vm725_vm1, %v4723_v39  ;;  %17610 = vmatprep.mubr.msk.f32.mxu1 %vm725_vm1, %v5190_v1 }
 0x582   : > { %18588 = vmatpush3.bf16.xpose.msk.msra.mxu0 %vm20710_vm2, %v18583_v38  ;;  %17602 = vmatprep.mubr.msk.f32.mxu0 %vm725_vm1, %v4903_v33 }
 0x583   : > { %v5192_v34 = vpop.permute.xlu1 %5191 }
 0x584   : > { %v5198_v23 = vpop.permute.xlu0 %5197  ;;  %17611 = vmatmul.mubr.msk.f32.gmra.mrb[36].mxu1 %vm725_vm1, %v5192_v34 }
 0x585   : > { %17613 = vmatprep.mubr.msk.f32.mxu1 %vm725_vm1, %v5194_v3 }
 0x587   : > { %v5196_v12 = vpop.permute.xlu1 %5195 }
 0x588   : > { %v5202_v4 = vpop.permute.xlu0 %5201  ;;  %17614 = vmatmul.mubr.msk.f32.gmra.mrb[38].mxu1 %vm725_vm1, %v5196_v12 }
 0x589   : > { %17603 = vmatmul.mubr.msk.f32.vlgmr.msra.gmra.mrb[78].mxu0 %vm725_vm1, %v4905_v26  ;;  %17616 = vmatprep.mubr.msk.f32.mxu1 %vm725_vm1, %v5198_v23 }
 0x58b   : > { %v5200_v29 = vpop.permute.xlu1 %5199 }
 0x58c   : > { %v5206_v16 = vpop.permute.xlu0 %5205  ;;  %17617 = vmatmul.mubr.msk.f32.gmra.mrb[40].mxu1 %vm725_vm1, %v5200_v29 }
 0x58d   : > { %17619 = vmatprep.mubr.msk.f32.mxu1 %vm725_vm1, %v5202_v4 }
 0x58f   : > { %v5204_v25 = vpop.permute.xlu1 %5203 }
 0x590   : > { %17620 = vmatmul.mubr.msk.f32.gmra.mrb[42].mxu1 %vm725_vm1, %v5204_v25  ;;  %v5210_v24 = vpop.permute.xlu0 %5209 }
 0x591   : > { %17622 = vmatprep.mubr.msk.f32.mxu1 %vm725_vm1, %v5206_v16 }
 0x593   : > { %v5208_v32 = vpop.permute.xlu1 %5207 }
 0x594   : > { %17623 = vmatmul.mubr.msk.f32.gmra.mrb[44].mxu1 %vm725_vm1, %v5208_v32  ;;  %v5214_v49 = vpop.permute.xlu0 %5213 }
 0x595   : > { %17625 = vmatprep.mubr.msk.f32.mxu1 %vm725_vm1, %v5210_v24 }
 0x597   : > { %v5212_v42 = vpop.permute.xlu1 %5211 }
 0x598   : > { %17626 = vmatmul.mubr.msk.f32.gmra.mrb[46].mxu1 %vm725_vm1, %v5212_v42 }
 0x599   : > { %17628 = vmatprep.mubr.msk.f32.mxu1 %vm725_vm1, %v5214_v49 }
 0x59b   : > { %v5216_v18 = vpop.permute.xlu1 %5215 }
 0x59c   : > { %17629 = vmatmul.mubr.msk.f32.gmra.mrb[48].mxu1 %vm725_vm1, %v5216_v18 }
 0x622   : > { %v21551_v8 = vpop.f32.mrb[72].mxu0 }
 0x623   : > { %24342 = vst [vmem:[#allocation2_spill] sm:$0xff] %v21551_v8  ;;  %v21553_v28 = vpop.f32.mrb[73].mxu0 }
 0x624   : > { %24343 = vst [vmem:[#allocation6_spill] sm:$0xff] %v21553_v28 }
 0x62d   : > { %v17555_v59 = vpop.f32.mrb[24].mxu1 }
 0x62e   : > { %v21555_v51 = vmul.f32 0.70710677, %v17555_v59  ;;  %v4347_v52 = vpop.f32.mrb[25].mxu1 }
 0x62f   : > { %v21557_v43 = vmul.f32 0.70710677, %v4347_v52 }
 0x630   : > { %v5012_v45 = vsel %vm280_vm0, %v21555_v51, -inf }
 0x631   : > { %5013 = vmax.xlane.f32.xlu1 %v5012_v45  ;;  %v5009_v17 = vsel %vm280_vm0, %v21557_v43, -inf }
 0x632   : > { %5010 = vmax.xlane.f32.xlu0 %v5009_v17 }
 0x635   : > { %v17562_v40 = vpop.f32.mrb[26].mxu1 }
 0x636   : > { %v21563_v9 = vmul.f32 0.70710677, %v17562_v40  ;;  %v4438_v57 = vpop.f32.mrb[27].mxu1 }
 0x637   : > { %v21565_v0 = vmul.f32 0.70710677, %v4438_v57 }
 0x638   : > { %v5018_v10 = vsel %vm280_vm0, %v21563_v9, -inf }
 0x639   : > { %5019 = vmax.xlane.f32.xlu0 %v5018_v10  ;;  %v5015_v22 = vsel %vm280_vm0, %v21565_v0, -inf }
 0x63d   : > { %5016 = vmax.xlane.f32.xlu0 %v5015_v22  ;;  %v17569_v14 = vpop.f32.mrb[28].mxu1 }
 0x63e   : > { %v21571_v63 = vmul.f32 0.70710677, %v17569_v14  ;;  %v4529_v36 = vpop.f32.mrb[29].mxu1 }
 0x63f   : > { %v21573_v35 = vmul.f32 0.70710677, %v4529_v36 }
 0x640   : > { %v5024_v39 = vsel %vm280_vm0, %v21571_v63, -inf }
 0x641   : > { %5025 = vmax.xlane.f32.xlu1 %v5024_v39  ;;  %v5021_v55 = vsel %vm280_vm0, %v21573_v35, -inf }
 0x642   : > { %5022 = vmax.xlane.f32.xlu0 %v5021_v55 }
 0x645   : > { %v17583_v62 = vpop.f32.mrb[30].mxu1 }
 0x646   : > { %v21579_v20 = vmul.f32 0.70710677, %v17583_v62  ;;  %v4711_v5 = vpop.f32.mrb[31].mxu1 }
 0x647   : > { %v21581_v7 = vmul.f32 0.70710677, %v4711_v5 }
 0x648   : > { %v5036_v19 = vsel %vm280_vm0, %v21579_v20, -inf }
 0x649   : > { %5037 = vmax.xlane.f32.xlu1 %v5036_v19  ;;  %v5033_v11 = vsel %vm280_vm0, %v21581_v7, -inf }
 0x64a   : > { %5034 = vmax.xlane.f32.xlu0 %v5033_v11 }
 0x64c   : > { %v17576_v15 = vpop.f32.mrb[74].mxu0 }
 0x64d   : > { %v4620_v60 = vpop.f32.mrb[75].mxu0  ;;  %v21591_v38 = vmul.f32 0.70710677, %v17576_v15 }
 0x64e   : > { %v21595_v41 = vmul.f32 0.70710677, %v4620_v60 }
 0x64f   : > { %v17597_v27 = vpop.f32.mrb[32].mxu1  ;;  %v5030_v4 = vsel %vm280_vm0, %v21591_v38, -inf }
 0x650   : > { %v21587_v44 = vmul.f32 0.70710677, %v17597_v27  ;;  %v4893_v13 = vpop.f32.mrb[33].mxu1  ;;  %v5027_v25 = vsel %vm280_vm0, %v21595_v41, -inf  ;;  %v19327_v27 = vpop.permute.xlu1 %19326 }
 0x651   : > { %v21589_v33 = vmul.f32 0.70710677, %v4893_v13 }
 0x652   : > { %v5048_v31 = vsel %vm280_vm0, %v21587_v44, -inf }
 0x653   : > { %5049 = vmax.xlane.f32.xlu1 %v5048_v31  ;;  %v17609_v26 = vpop.f32.mrb[34].mxu1  ;;  %v5045_v1 = vsel %vm280_vm0, %v21589_v33, -inf }
 0x654   : > { %v17590_v48 = vpop.f32.mrb[76].mxu0  ;;  %v5318_v3 = vpop.f32.mrb[35].mxu1  ;;  %5046 = vmax.xlane.f32.xlu0 %v5045_v1  ;;  %v19328_v1 = vunpack.i.l.bf16 %v19327_v27 }
 0x655   : > { %v4802_v34 = vpop.f32.mrb[77].mxu0  ;;  %v18589_v23 = vpack.c.bf16 %v17609_v26, %v5318_v3  ;;  %v21599_v12 = vmul.f32 0.70710677, %v17590_v48  ;;  %v19329_v26 = vunpack.i.h.bf16 %v19327_v27 }
 0x656   : > { %v21603_v29 = vmul.f32 0.70710677, %v4802_v34 }
 0x657   : > { %5031 = vmax.xlane.f32.xlu1 %v5030_v4  ;;  %v17612_v16 = vpop.f32.mrb[36].mxu1  ;;  %18590 = vmatprep.subr.bf16.mxu0 %v18589_v23  ;;  %v5042_v42 = vsel %vm280_vm0, %v21599_v12, -inf  ;;  %v21641_v4 = vpop.permute.xlu1 %19331 }
 0x658   : > { %v5328_v24 = vpop.f32.mrb[37].mxu1  ;;  %18592 = vmatpush3.bf16.msra.mxu0 %v18589_v23  ;;  %5028 = vmax.xlane.f32.xlu0 %v5027_v25  ;;  %v5039_v18 = vsel %vm280_vm0, %v21603_v29, -inf  ;;  %v21634_v23 = vpack.c.bf16 %v19329_v26, %v19328_v1  ;;  %v21645_v25 = vpop.permute.xlu0 %19321 }
 0x659   : > { %v21607_v32 = vpack.c.bf16 %v17612_v16, %v5328_v24 }
 0x65b   : > { %5043 = vmax.xlane.f32.xlu1 %v5042_v42  ;;  %v17615_v49 = vpop.f32.mrb[38].mxu1  ;;  %18594 = vmatprep.subr.bf16.mxu0 %v21607_v32  ;;  %v21643_v16 = vpop.permute.xlu1 %6061 }
 0x65c   : > { %v17604_v59 = vpop.f32.mrb[78].mxu0  ;;  %v5338_v52 = vpop.f32.mrb[39].mxu1  ;;  %5040 = vmax.xlane.f32.xlu0 %v5039_v18 }
 0x65d   : > { %v21614_v45 = vmul.f32 0.70710677, %v17604_v59  ;;  %v4984_v17 = vpop.f32.mrb[79].mxu0  ;;  %v21616_v40 = vpack.c.bf16 %v17615_v49, %v5338_v52 }
 0x65e   : > { %v21618_v57 = vmul.f32 0.70710677, %v4984_v17 }
 0x65f   : > { %v5054_v10 = vsel %vm280_vm0, %v21614_v45, -inf  ;;  %v17618_v22 = vpop.f32.mrb[40].mxu1 }
 0x660   : > { %5055 = vmax.xlane.f32.xlu1 %v5054_v10  ;;  %v5348_v14 = vpop.f32.mrb[41].mxu1  ;;  %v5051_v36 = vsel %vm280_vm0, %v21618_v57, -inf }
 0x661   : > { %v21624_v39 = vpack.c.bf16 %v17618_v22, %v5348_v14  ;;  %5052 = vmax.xlane.f32.xlu0 %v5051_v36 }
 0x663   : > { %v17621_v55 = vpop.f32.mrb[42].mxu1 }
 0x664   : > { %v5358_v62 = vpop.f32.mrb[43].mxu1 }
 0x665   : > { %v21626_v5 = vpack.c.bf16 %v17621_v55, %v5358_v62 }
 0x667   : > { %v17624_v19 = vpop.f32.mrb[44].mxu1 }
 0x668   : > { %v5368_v11 = vpop.f32.mrb[45].mxu1 }
 0x669   : > { %v21628_v15 = vpack.c.bf16 %v17624_v19, %v5368_v11 }
 0x66b   : > { %v17627_v60 = vpop.f32.mrb[46].mxu1 }
 0x66c   : > { %v5378_v13 = vpop.f32.mrb[47].mxu1 }
 0x66d   : > { %v21630_v31 = vpack.c.bf16 %v17627_v60, %v5378_v13 }
 0x66f   : > { %v17630_v48 = vpop.f32.mrb[48].mxu1 }
 0x670   : > { %v5388_v3 = vpop.f32.mrb[49].mxu1 }
 0x671   : > { %19336 = vrot.lane.b32.xlu1 %v24310_v50, %s20195_s28  ;;  %v18617_v34 = vpack.c.bf16 %v17630_v48, %v5388_v3 }
 0x673   : > { %18618 = vmatprep.subr.bf16.mxu1 %v18617_v34 }
 0x674   : > { %18620 = vmatpush3.bf16.msra.mxu1 %v18617_v34 }
 0x675   : > { %18629 = vmatprep.subr.msk.bf16.mxu1 %vm20710_vm2, %v21634_v23 }
 0x677   : > { %6063 = vrot.lane.b32.xlu0 %v24306_v58, %s20196_s29 }
 0x6be   : > { %v5014_v24 = vpop.xlane.xlu1 %5013 }
 0x6bf   : > { %v5058_v42 = vsub.f32 %v21555_v51, %v5014_v24  ;;  %v5011_v49 = vpop.xlane.xlu0 %5010 }
 0x6c0   : > { %v5057_v18 = vsub.f32 %v21557_v43, %v5011_v49 }
 0x6c1   : > { %v5075_v59 = vmul.f32 1.442695, %v5058_v42 }
 0x6c2   : > { %v5073_v52 = vmul.f32 1.442695, %v5057_v18 }
 0x6c3   : > { %19680 = vpow2.f32 %v5075_v59 }
 0x6c4   : > { %19682 = vpow2.f32 %v5073_v52 }
 0x6c6   : > { %v5020_v17 = vpop.xlane.xlu0 %5019 }
 0x6c7   : > { %v5060_v10 = vsub.f32 %v21563_v9, %v5020_v17 }
 0x6c9   : > { %v5079_v22 = vmul.f32 1.442695, %v5060_v10 }
 0x6ca   : > { %v5017_v14 = vpop.xlane.xlu0 %5016 }
 0x6cb   : > { %19684 = vpow2.f32 %v5079_v22  ;;  %v5059_v36 = vsub.f32 %v21565_v0, %v5017_v14 }
 0x6cd   : > { %v21651_v55 = vpop.eup %19680  ;;  %v5077_v62 = vmul.f32 1.442695, %v5059_v36 }
 0x6ce   : > { %v21653_v19 = vpop.eup %19682  ;;  %v5026_v51 = vpop.xlane.xlu1 %5025  ;;  %v5108_v43 = vsel %vm280_vm0, %v21651_v55, 0.0 }
 0x6cf   : > { %19686 = vpow2.f32 %v5077_v62  ;;  %v5062_v11 = vsub.f32 %v21571_v63, %v5026_v51  ;;  %v5023_v60 = vpop.xlane.xlu0 %5022  ;;  %5109 = vadd.xlane.f32.xlu1 %v5108_v43  ;;  %v5105_v9 = vsel %vm280_vm0, %v21653_v19, 0.0 }
 0x6d0   : > { %v5061_v27 = vsub.f32 %v21573_v35, %v5023_v60  ;;  %5106 = vadd.xlane.f32.xlu0 %v5105_v9 }
 0x6d1   : > { %v5083_v0 = vmul.f32 1.442695, %v5062_v11 }
 0x6d2   : > { %v5081_v13 = vmul.f32 1.442695, %v5061_v27 }
 0x6d3   : > { %19688 = vpow2.f32 %v5083_v0 }
 0x6d4   : > { %19690 = vpow2.f32 %v5081_v13 }
 0x6d5   : > { %v21661_v26 = vpop.eup %19684 }
 0x6d6   : > { %v5038_v1 = vpop.xlane.xlu1 %5037  ;;  %v5114_v48 = vsel %vm280_vm0, %v21661_v26, 0.0 }
 0x6d7   : > { %v5066_v63 = vsub.f32 %v21579_v20, %v5038_v1  ;;  %v5035_v3 = vpop.xlane.xlu0 %5034  ;;  %5115 = vadd.xlane.f32.xlu1 %v5114_v48 }
 0x6d8   : > { %v5065_v34 = vsub.f32 %v21581_v7, %v5035_v3 }
 0x6d9   : > { %v21667_v24 = vpop.eup %19686  ;;  %v5091_v35 = vmul.f32 1.442695, %v5066_v63 }
 0x6da   : > { %v5089_v42 = vmul.f32 1.442695, %v5065_v34  ;;  %v5111_v49 = vsel %vm280_vm0, %v21667_v24, 0.0 }
 0x6db   : > { %19692 = vpow2.f32 %v5091_v35  ;;  %5112 = vadd.xlane.f32.xlu0 %v5111_v49 }
 0x6dc   : > { %19694 = vpow2.f32 %v5089_v42 }
 0x6dd   : > { %v21671_v18 = vpop.eup %19688 }
 0x6de   : > { %v21673_v59 = vpop.eup %19690  ;;  %v5120_v20 = vsel %vm280_vm0, %v21671_v18, 0.0 }
 0x6df   : > { %5121 = vadd.xlane.f32.xlu1 %v5120_v20  ;;  %v5117_v7 = vsel %vm280_vm0, %v21673_v59, 0.0 }
 0x6e0   : > { %5118 = vadd.xlane.f32.xlu0 %v5117_v7  ;;  %v5050_v52 = vpop.xlane.xlu1 %5049 }
 0x6e1   : > { %v5070_v17 = vsub.f32 %v21587_v44, %v5050_v52  ;;  %v5047_v10 = vpop.xlane.xlu0 %5046 }
 0x6e2   : > { %v5069_v22 = vsub.f32 %v21589_v33, %v5047_v10 }
 0x6e3   : > { %v5099_v14 = vmul.f32 1.442695, %v5070_v17 }
 0x6e4   : > { %v5097_v36 = vmul.f32 1.442695, %v5069_v22  ;;  %v5032_v62 = vpop.xlane.xlu1 %5031 }
 0x6e5   : > { %v21681_v51 = vpop.eup %19692  ;;  %19696 = vpow2.f32 %v5099_v14  ;;  %v5064_v43 = vsub.f32 %v21591_v38, %v5032_v62  ;;  %v5029_v11 = vpop.xlane.xlu0 %5028 }
 0x6e6   : > { %v21684_v60 = vpop.eup %19694  ;;  %19698 = vpow2.f32 %v5097_v36  ;;  %v5063_v9 = vsub.f32 %v21595_v41, %v5029_v11  ;;  %v5132_v44 = vsel %vm280_vm0, %v21681_v51, 0.0 }
 0x6e7   : > { %v5087_v27 = vmul.f32 1.442695, %v5064_v43  ;;  %5133 = vadd.xlane.f32.xlu1 %v5132_v44  ;;  %v5129_v33 = vsel %vm280_vm0, %v21684_v60, 0.0 }
 0x6e8   : > { %v5085_v0 = vmul.f32 1.442695, %v5063_v9  ;;  %5130 = vadd.xlane.f32.xlu0 %v5129_v33  ;;  %v5044_v13 = vpop.xlane.xlu1 %5043 }
 0x6e9   : > { %19700 = vpow2.f32 %v5087_v27  ;;  %v5068_v38 = vsub.f32 %v21599_v12, %v5044_v13  ;;  %v5041_v1 = vpop.xlane.xlu0 %5040  ;;  %v24347_v13 = vld [vmem:[#allocation20_spill] sm:$0xff] }
 0x6ea   : > { %19702 = vpow2.f32 %v5085_v0  ;;  %v5067_v48 = vsub.f32 %v21603_v29, %v5041_v1  ;;  %v24346_v0 = vld [vmem:[#allocation25_spill] sm:$0xff] }
 0x6eb   : > { %v5095_v63 = vmul.f32 1.442695, %v5068_v38  ;;  %v24348_v38 = vld [vmem:[#allocation17_spill] sm:$0xff] }
 0x6ec   : > { %v5093_v41 = vmul.f32 1.442695, %v5067_v48 }
 0x6ed   : > { %19704 = vpow2.f32 %v5095_v63  ;;  %v5056_v22 = vpop.xlane.xlu1 %5055  ;;  %v24349_v63 = vld [vmem:[#allocation19_spill] sm:$0xff] }
 0x6ee   : > { %19706 = vpow2.f32 %v5093_v41  ;;  %v5053_v14 = vpop.xlane.xlu0 %5052  ;;  %v5072_v36 = vsub.f32 %v21614_v45, %v5056_v22  ;;  %v24344_v45 = vld [vmem:[#allocation21_spill] sm:$0xff]  ;;  %v24350_v41 = vld [vmem:[#allocation23_spill] sm:$0xff] }
 0x6ef   : > { %v21693_v3 = vpop.eup %19696  ;;  %v5071_v62 = vsub.f32 %v21618_v57, %v5053_v14  ;;  %v24345_v57 = vld [vmem:[#allocation12_spill] sm:$0xff] }
 0x6f0   : > { %v21695_v34 = vpop.eup %19698  ;;  %v5144_v35 = vsel %vm280_vm0, %v21693_v3, 0.0  ;;  %v5103_v43 = vmul.f32 1.442695, %v5072_v36 }
 0x6f1   : > { %5145 = vadd.xlane.f32.xlu1 %v5144_v35  ;;  %v5141_v42 = vsel %vm280_vm0, %v21695_v34, 0.0  ;;  %v5101_v11 = vmul.f32 1.442695, %v5071_v62  ;;  %v21755_v1 = vpop.permute.xlu1 %19336 }
 0x6f2   : > { %5142 = vadd.xlane.f32.xlu0 %v5141_v42  ;;  %19708 = vpow2.f32 %v5103_v43  ;;  %v21757_v48 = vpop.permute.xlu0 %6063 }
 0x6f3   : > { %v21701_v12 = vpop.eup %19700  ;;  %19710 = vpow2.f32 %v5101_v11 }
 0x6f4   : > { %v21703_v49 = vpop.eup %19702  ;;  %v5126_v29 = vsel %vm280_vm0, %v21701_v12, 0.0 }
 0x6f5   : > { %5127 = vadd.xlane.f32.xlu1 %v5126_v29  ;;  %v5123_v20 = vsel %vm280_vm0, %v21703_v49, 0.0  ;;  %v24351_v29 = vld [vmem:[#allocation18_spill] sm:$0xff] }
 0x6f6   : > { %5124 = vadd.xlane.f32.xlu0 %v5123_v20  ;;  %v24352_v20 = vld [vmem:[#allocation24_spill] sm:$0xff] }
 0x6f7   : > { %v21709_v7 = vpop.eup %19704 }
 0x6f8   : > { %v21711_v52 = vpop.eup %19706  ;;  %v5138_v17 = vsel %vm280_vm0, %v21709_v7, 0.0 }
 0x6f9   : > { %5139 = vadd.xlane.f32.xlu1 %v5138_v17  ;;  %v5135_v10 = vsel %vm280_vm0, %v21711_v52, 0.0 }
 0x6fa   : > { %5136 = vadd.xlane.f32.xlu0 %v5135_v10  ;;  %v24353_v10 = vld [vmem:[#allocation3_spill] sm:$0xff] }
 0x6fc   : > { %v21723_v9 = vpop.eup %19708 }
 0x6fd   : > { %v21725_v44 = vpop.eup %19710  ;;  %v5150_v27 = vsel %vm280_vm0, %v21723_v9, 0.0 }
 0x6fe   : > { %v5147_v33 = vsel %vm280_vm0, %v21725_v44, 0.0 }
 0x70a   : > { %6154 = vrot.lane.b32.xlu1 %v24309_v56, %s20196_s29 }
 0x710   : > { %6152 = vrot.lane.b32.xlu0 %v24308_v54, %s20196_s29 }
 0x72e   : > { %5151 = vadd.xlane.f32.xlu1 %v5150_v27 }
 0x72f   : > { %5148 = vadd.xlane.f32.xlu0 %v5147_v33 }
 0x73f   : > { %6243 = vrot.lane.b32.xlu1 %v24312_v21, %s20196_s29 }
 0x743   : > { %19346 = vrot.lane.b32.xlu1 %v24314_v53, %s20195_s28 }
 0x745   : > { %19341 = vrot.lane.b32.xlu0 %v24311_v37, %s20195_s28 }
 0x747   : > { %6336 = vrot.lane.b32.xlu1 %v24316_v2, %s20196_s29 }
 0x749   : > { %6245 = vrot.lane.b32.xlu0 %v24313_v47, %s20196_s29 }
 0x74b   : > { %6427 = vrot.lane.b32.xlu1 %v24318_v46, %s20196_s29 }
 0x74d   : > { %6334 = vrot.lane.b32.xlu0 %v24315_v30, %s20196_s29 }
 0x74f   : > { %19351 = vrot.lane.b32.xlu1 %v24344_v45, %s20195_s28 }
 0x751   : > { %6425 = vrot.lane.b32.xlu0 %v24345_v57, %s20196_s29 }
 0x753   : > { %19356 = vrot.lane.b32.xlu1 %v24346_v0, %s20195_s28  ;;  %s20209_s28 = smov 82  }
 0x755   : > { %6516 = vrot.lane.b32.xlu0 %v24347_v13, %s20196_s29 }
 0x757   : > { %6609 = vrot.lane.b32.xlu1 %v24348_v38, %s20196_s29 }
 0x759   : > { %6518 = vrot.lane.b32.xlu0 %v24349_v63, %s20196_s29 }
 0x75b   : > { %6700 = vrot.lane.b32.xlu1 %v24350_v41, %s20196_s29 }
 0x75c   : > { %v5110_v35 = vpop.xlane.xlu1 %5109 }
 0x75d   : > { %19712 = vrcp.f32 %v5110_v35  ;;  %v5107_v42 = vpop.xlane.xlu0 %5106  ;;  %6607 = vrot.lane.b32.xlu0 %v24351_v29, %s20196_s29 }
 0x75e   : > { %19714 = vrcp.f32 %v5107_v42 }
 0x75f   : > { %6983 = vrot.lane.b32.xlu1 %v24306_v58, %s20197_s8 }
 0x761   : > { %6698 = vrot.lane.b32.xlu0 %v24352_v20, %s20196_s29 }
 0x763   : > { %6987 = vrot.lane.b32.xlu1 %v24309_v56, %s20197_s8 }
 0x764   : > { %v5116_v17 = vpop.xlane.xlu1 %5115 }
 0x765   : > { %6981 = vrot.lane.b32.xlu0 %v24353_v10, %s20197_s8  ;;  %19716 = vrcp.f32 %v5116_v17 }
 0x767   : > { %v19713_v22 = vpop.eup %19712  ;;  %6991 = vrot.lane.b32.xlu1 %v24313_v47, %s20197_s8 }
 0x768   : > { %v19715_v14 = vpop.eup %19714  ;;  %v5113_v36 = vpop.xlane.xlu0 %5112  ;;  %v5170_v43 = vmul.f32 %v19713_v22, %v21651_v55 }
 0x769   : > { %19718 = vrcp.f32 %v5113_v36  ;;  %6985 = vrot.lane.b32.xlu0 %v24308_v54, %s20197_s8  ;;  %v5169_v62 = vmul.f32 %v19715_v14, %v21653_v19 }
 0x76b   : > { %17635 = vmatprep.mubr.msk.f32.mxu0 %vm280_vm0, %v5169_v62  ;;  %6995 = vrot.lane.b32.xlu1 %v24316_v2, %s20197_s8 }
 0x76c   : > { %v5122_v11 = vpop.xlane.xlu1 %5121  ;;  %17636 = vmatmul.mubr.msk.f32.vlgmr.msra.gmra.mrb[58].mxu0 %vm280_vm0, %v5170_v43 }
 0x76d   : > { %19720 = vrcp.f32 %v5122_v11  ;;  %18596 = vmatpush3.bf16.msra.mxu0 %v21607_v32  ;;  %v5119_v27 = vpop.xlane.xlu0 %5118  ;;  %6989 = vrot.lane.b32.xlu0 %v24312_v21, %s20197_s8 }
 0x76e   : > { %18598 = vmatprep.subr.bf16.mxu0 %v21616_v40  ;;  %19722 = vrcp.f32 %v5119_v27 }
 0x76f   : > { %6999 = vrot.lane.b32.xlu1 %v24318_v46, %s20197_s8  ;;  %v19717_v55 = vpop.eup %19716 }
 0x770   : > { %v5172_v33 = vmul.f32 %v19717_v55, %v21661_v26 }
 0x771   : > { %6993 = vrot.lane.b32.xlu0 %v24315_v30, %s20197_s8 }
 0x773   : > { %v19719_v19 = vpop.eup %19718  ;;  %7003 = vrot.lane.b32.xlu1 %v24349_v63, %s20197_s8 }
 0x774   : > { %v5171_v32 = vmul.f32 %v19719_v19, %v21667_v24  ;;  %v5134_v17 = vpop.xlane.xlu1 %5133 }
 0x775   : > { %6997 = vrot.lane.b32.xlu0 %v24345_v57, %s20197_s8  ;;  %v5131_v22 = vpop.xlane.xlu0 %5130 }
 0x776   : > { %17642 = vmatprep.mubr.msk.f32.mxu0 %vm280_vm0, %v5171_v32  ;;  %19724 = vrcp.f32 %v5131_v22 }
 0x777   : > { %v19721_v35 = vpop.eup %19720  ;;  %17643 = vmatmul.mubr.msk.f32.vlgmr.msra.gmra.mrb[60].mxu0 %vm280_vm0, %v5172_v33  ;;  %7007 = vrot.lane.b32.xlu1 %v24348_v38, %s20197_s8 }
 0x778   : > { %v19723_v42 = vpop.eup %19722  ;;  %18600 = vmatpush3.bf16.msra.mxu0 %v21616_v40  ;;  %v5174_v26 = vmul.f32 %v19721_v35, %v21671_v18 }
 0x779   : > { %18602 = vmatprep.subr.bf16.mxu0 %v21624_v39  ;;  %7001 = vrot.lane.b32.xlu0 %v24347_v13, %s20197_s8  ;;  %v5173_v24 = vmul.f32 %v19723_v42, %v21673_v59 }
 0x77b   : > { %17649 = vmatprep.mubr.msk.f32.mxu0 %vm280_vm0, %v5173_v24  ;;  %7011 = vrot.lane.b32.xlu1 %v24350_v41, %s20197_s8  ;;  %v19324_v24 = vunpack.i.h.bf16 %v21645_v25 }
 0x77c   : > { %17650 = vmatmul.mubr.msk.f32.vlgmr.msra.gmra.mrb[62].mxu0 %vm280_vm0, %v5174_v26 }
 0x77d   : > { %18604 = vmatpush3.bf16.msra.mxu0 %v21624_v39  ;;  %7005 = vrot.lane.b32.xlu0 %v24351_v29, %s20197_s8 }
 0x77e   : > { %18606 = vmatprep.subr.bf16.mxu0 %v21626_v5  ;;  %v5146_v40 = vpop.xlane.xlu1 %5145 }
 0x77f   : > { %v5143_v59 = vpop.xlane.xlu0 %5142 }
 0x780   : > { %v19725_v39 = vpop.eup %19724 }
 0x781   : > { %7009 = vrot.lane.b32.xlu0 %v24352_v20, %s20197_s8  ;;  %v5177_v32 = vmul.f32 %v19725_v39, %v21684_v60  ;;  %v19339_v39 = vunpack.i.h.bf16 %v21755_v1 }
 0x782   : > { %v5128_v18 = vpop.xlane.xlu1 %5127 }
 0x783   : > { %19726 = vrcp.f32 %v5128_v18  ;;  %v5125_v14 = vpop.xlane.xlu0 %5124 }
 0x784   : > { %19728 = vrcp.f32 %v5125_v14 }
 0x785   : > { %19730 = vrcp.f32 %v5134_v17  ;;  %v19323_v17 = vunpack.i.l.bf16 %v21645_v25  ;;  %v19334_v25 = vunpack.i.h.bf16 %v21641_v4 }
 0x786   : > { %v5140_v62 = vpop.xlane.xlu1 %5139 }
 0x787   : > { %v5137_v36 = vpop.xlane.xlu0 %5136  ;;  %v18621_v26 = vpack.c.bf16 %v19324_v24, %v19323_v17 }
 0x788   : > { %19732 = vrcp.f32 %v5137_v36 }
 0x789   : > { %19734 = vrcp.f32 %v5140_v62 }
 0x78a   : > { %19736 = vrcp.f32 %v5143_v59 }
 0x78b   : > { %19738 = vrcp.f32 %v5146_v40 }
 0x78d   : > { %v19727_v43 = vpop.eup %19726 }
 0x78e   : > { %v19729_v11 = vpop.eup %19728  ;;  %v5176_v55 = vmul.f32 %v19727_v43, %v21701_v12  ;;  %v19338_v43 = vunpack.i.l.bf16 %v21755_v1 }
 0x78f   : > { %v5175_v27 = vmul.f32 %v19729_v11, %v21703_v49  ;;  %v19731_v19 = vpop.eup %19730 }
 0x790   : > { %v5178_v35 = vmul.f32 %v19731_v19, %v21681_v51 }
 0x791   : > { %17656 = vmatprep.mubr.msk.f32.mxu0 %vm280_vm0, %v5175_v27 }
 0x792   : > { %v19733_v33 = vpop.eup %19732  ;;  %17657 = vmatmul.mubr.msk.f32.vlgmr.msra.gmra.mrb[64].mxu0 %vm280_vm0, %v5176_v55 }
 0x793   : > { %18608 = vmatpush3.bf16.msra.mxu0 %v21626_v5  ;;  %17663 = vmatprep.mubr.msk.f32.mxu0 %vm280_vm0, %v5177_v32  ;;  %v19735_v42 = vpop.eup %19734  ;;  %v5179_v49 = vmul.f32 %v19733_v33, %v21711_v52  ;;  %v18639_v32 = vpack.c.bf16 %v19339_v39, %v19338_v43 }
 0x794   : > { %18610 = vmatprep.subr.bf16.mxu0 %v21628_v15  ;;  %v19737_v12 = vpop.eup %19736  ;;  %v5180_v5 = vmul.f32 %v19735_v42, %v21709_v7  ;;  %v19333_v7 = vunpack.i.l.bf16 %v21641_v4 }
 0x795   : > { %v19739_v60 = vpop.eup %19738  ;;  %v5181_v51 = vmul.f32 %v19737_v12, %v21695_v34 }
 0x796   : > { %17664 = vmatmul.mubr.msk.f32.vlgmr.msra.gmra.mrb[66].mxu0 %vm280_vm0, %v5178_v35  ;;  %v18633_v34 = vpack.c.bf16 %v19334_v25, %v19333_v7 }
 0x797   : > { %18612 = vmatpush3.bf16.msra.mxu0 %v21628_v15  ;;  %17670 = vmatprep.mubr.msk.f32.mxu0 %vm280_vm0, %v5179_v49  ;;  %v5182_v15 = vmul.f32 %v19739_v60, %v21693_v3  ;;  %v6153_v3 = vpop.permute.xlu0 %6152 }
 0x798   : > { %18614 = vmatprep.subr.bf16.mxu0 %v21630_v31 }
 0x79a   : > { %17671 = vmatmul.mubr.msk.f32.vlgmr.msra.gmra.mrb[68].mxu0 %vm280_vm0, %v5180_v5  ;;  %v7013_v5 = vrot.slane %v21511_v6, 6 }
 0x79b   : > { %18616 = vmatpush3.bf16.msra.mxu0 %v21630_v31  ;;  %17677 = vmatprep.mubr.msk.f32.mxu0 %vm280_vm0, %v5181_v51  ;;  %v6155_v31 = vpop.permute.xlu1 %6154 }
 0x79c   : > { %18623 = vmatprep.subr.msk.bf16.mxu0 %vm20710_vm2, %v18621_v26 }
 0x79e   : > { %17678 = vmatmul.mubr.msk.f32.vlgmr.msra.gmra.mrb[70].mxu0 %vm280_vm0, %v5182_v15 }
 0x79f   : > { %17691 = vmatprep.mubr.msk.f32.mxu0 %vm725_vm1, %v21643_v16 }
 0x7a4   : > { %18626 = vmatpush3.bf16.xpose.msk.msra.mxu0 %vm20710_vm2, %v18621_v26 }
 0x7a5   : > { %18635 = vmatprep.subr.msk.bf16.mxu0 %vm20710_vm2, %v18633_v34 }
 0x7ab   : > { %17692 = vmatmul.mubr.msk.f32.vlgmr.msra.gmra.mrb[80].mxu0 %vm725_vm1, %v21757_v48 }
 0x7ac   : > { %18638 = vmatpush3.bf16.xpose.msk.msra.mxu0 %vm20710_vm2, %v18633_v34 }
 0x7bb   : > { %v5152_v52 = vpop.xlane.xlu1 %5151 }
 0x7bc   : > { %19740 = vrcp.f32 %v5152_v52  ;;  %v5149_v4 = vpop.xlane.xlu0 %5148 }
 0x7bd   : > { %19742 = vrcp.f32 %v5149_v4 }
 0x7bf   : > { %v6244_v16 = vpop.permute.xlu1 %6243 }
 0x7c0   : > { %17705 = vmatprep.mubr.msk.f32.mxu0 %vm725_vm1, %v6244_v16  ;;  %v19342_v22 = vpop.permute.xlu0 %19341 }
 0x7c1   : > { %v19344_v40 = vunpack.i.h.bf16 %v19342_v22  ;;  %v19343_v59 = vunpack.i.l.bf16 %v19342_v22 }
 0x7c3   : > { %v18645_v18 = vpack.c.bf16 %v19344_v40, %v19343_v59  ;;  %v19347_v14 = vpop.permute.xlu1 %19346 }
 0x7c4   : > { %v6246_v36 = vpop.permute.xlu0 %6245 }
 0x7c5   : > { %17706 = vmatmul.mubr.msk.f32.vlgmr.msra.gmra.mrb[82].mxu0 %vm725_vm1, %v6246_v36  ;;  %18647 = vmatprep.subr.msk.bf16.mxu0 %vm20710_vm2, %v18645_v18 }
 0x7c6   : > { %v19741_v48 = vpop.eup %19740  ;;  %18650 = vmatpush3.bf16.xpose.msk.msra.mxu0 %vm20710_vm2, %v18645_v18 }
 0x7c7   : > { %v19743_v62 = vpop.eup %19742  ;;  %v6337_v11 = vpop.permute.xlu1 %6336  ;;  %v5184_v19 = vmul.f32 %v19741_v48, %v21723_v9  ;;  %v19349_v9 = vunpack.i.h.bf16 %v19347_v14 }
 0x7c8   : > { %v6335_v27 = vpop.permute.xlu0 %6334  ;;  %v5183_v55 = vmul.f32 %v19743_v62, %v21725_v44  ;;  %v19348_v44 = vunpack.i.l.bf16 %v19347_v14 }
 0x7ca   : > { %17684 = vmatprep.mubr.msk.f32.mxu1 %vm280_vm0, %v5183_v55  ;;  %v18651_v17 = vpack.c.bf16 %v19349_v9, %v19348_v44 }
 0x7cb   : > { %v6428_v33 = vpop.permute.xlu1 %6427  ;;  %17685 = vmatmul.mubr.msk.f32.vlgmr.msra.gmra.mrb[22].mxu1 %vm280_vm0, %v5184_v19 }
 0x7cc   : > { %18632 = vmatpush3.bf16.xpose.msk.msra.mxu1 %vm20710_vm2, %v21634_v23  ;;  %17698 = vmatprep.mubr.msk.f32.mxu1 %vm725_vm1, %v6153_v3  ;;  %v6426_v35 = vpop.permute.xlu0 %6425 }
 0x7cd   : > { %18641 = vmatprep.subr.msk.bf16.mxu1 %vm20710_vm2, %v18639_v32  ;;  %17719 = vmatprep.mubr.msk.f32.mxu0 %vm725_vm1, %v6426_v35 }
 0x7ce   : > { %17720 = vmatmul.mubr.msk.f32.vlgmr.msra.gmra.mrb[84].mxu0 %vm725_vm1, %v6428_v33 }
 0x7cf   : > { %v19352_v1 = vpop.permute.xlu1 %19351 }
 0x7d0   : > { %v19354_v42 = vunpack.i.h.bf16 %v19352_v1  ;;  %v19353_v49 = vunpack.i.l.bf16 %v19352_v1  ;;  %v6517_v12 = vpop.permute.xlu0 %6516 }
 0x7d2   : > { %v18657_v24 = vpack.c.bf16 %v19354_v42, %v19353_v49 }
 0x7d3   : > { %17699 = vmatmul.mubr.msk.f32.vlgmr.msra.gmra.mrb[50].mxu1 %vm725_vm1, %v6155_v31  ;;  %v19357_v23 = vpop.permute.xlu1 %19356 }
 0x7d4   : > { %18644 = vmatpush3.bf16.xpose.msk.msra.mxu1 %vm20710_vm2, %v18639_v32  ;;  %17712 = vmatprep.mubr.msk.f32.mxu1 %vm725_vm1, %v6335_v27  ;;  %v6519_v60 = vpop.permute.xlu0 %6518  ;;  %v19359_v51 = vunpack.i.h.bf16 %v19357_v23  ;;  %v19358_v26 = vunpack.i.l.bf16 %v19357_v23 }
 0x7d5   : > { %18653 = vmatprep.subr.msk.bf16.mxu1 %vm20710_vm2, %v18651_v17  ;;  %18659 = vmatprep.subr.msk.bf16.mxu0 %vm20710_vm2, %v18657_v24 }
 0x7d6   : > { %18662 = vmatpush3.bf16.xpose.msk.msra.mxu0 %vm20710_vm2, %v18657_v24  ;;  %v18663_v25 = vpack.c.bf16 %v19359_v51, %v19358_v26 }
 0x7d7   : > { %v6610_v15 = vpop.permute.xlu1 %6609  ;;  %17743 = vmatprep.subr.msk.mxu0 %vm1688_vm3, %v7013_v5 }
 0x7d8   : > { %v6608_v6 = vpop.permute.xlu0 %6607 }
 0x7d9   : > { %17733 = vmatprep.mubr.msk.f32.mxu0 %vm725_vm1, %v6608_v6 }
 0x7db   : > { %17713 = vmatmul.mubr.msk.f32.vlgmr.msra.gmra.mrb[52].mxu1 %vm725_vm1, %v6337_v11  ;;  %v6701_v7 = vpop.permute.xlu1 %6700 }
 0x7dc   : > { %18656 = vmatpush3.bf16.xpose.msk.msra.mxu1 %vm20710_vm2, %v18651_v17  ;;  %17726 = vmatprep.mubr.msk.f32.mxu1 %vm725_vm1, %v6517_v12  ;;  %v6699_v34 = vpop.permute.xlu0 %6698 }
 0x7dd   : > { %18665 = vmatprep.subr.msk.bf16.mxu1 %vm20710_vm2, %v18663_v25  ;;  %17734 = vmatmul.mubr.msk.f32.vlgmr.msra.gmra.mrb[86].mxu0 %vm725_vm1, %v6610_v15 }
 0x7de   : > { %17744 = vmatpush3.msk.msra.mxu0 %vm1688_vm3, %v7013_v5 }
 0x7df   : > { %v6984_v31 = vpop.permute.xlu1 %6983 }
 0x7e0   : > { %v6982_v3 = vpop.permute.xlu0 %6981 }
 0x7e1   : > { %17745 = vmatprep.mubr.msk.f32.mxu0 %vm725_vm1, %v6982_v3 }
 0x7e2   : > { %17746 = vmatmul.mubr.msk.f32.vlgmr.msra.gmra.mrb[88].mxu0 %vm725_vm1, %v6984_v31 }
 0x7e3   : > { %17727 = vmatmul.mubr.msk.f32.vlgmr.msra.gmra.mrb[54].mxu1 %vm725_vm1, %v6519_v60  ;;  %v6988_v52 = vpop.permute.xlu1 %6987 }
 0x7e4   : > { %18668 = vmatpush3.bf16.xpose.msk.msra.mxu1 %vm20710_vm2, %v18663_v25  ;;  %17740 = vmatprep.mubr.msk.f32.mxu1 %vm725_vm1, %v6699_v34  ;;  %v6986_v4 = vpop.permute.xlu0 %6985 }
 0x7e5   : > { %17748 = vmatprep.mubr.msk.f32.mxu0 %vm725_vm1, %v6986_v4 }
 0x7e6   : > { %17749 = vmatmul.mubr.msk.f32.gmra.mrb[90].mxu0 %vm725_vm1, %v6988_v52 }
 0x7e7   : > { %v6992_v16 = vpop.permute.xlu1 %6991 }
 0x7e8   : > { %v6990_v22 = vpop.permute.xlu0 %6989 }
 0x7e9   : > { %17751 = vmatprep.mubr.msk.f32.mxu0 %vm725_vm1, %v6990_v22 }
 0x7ea   : > { %17752 = vmatmul.mubr.msk.f32.gmra.mrb[92].mxu0 %vm725_vm1, %v6992_v16 }
 0x7eb   : > { %17741 = vmatmul.mubr.msk.f32.vlgmr.msra.gmra.mrb[56].mxu1 %vm725_vm1, %v6701_v7  ;;  %v6996_v40 = vpop.permute.xlu1 %6995 }
 0x7ec   : > { %v6994_v59 = vpop.permute.xlu0 %6993 }
 0x7ed   : > { %17754 = vmatprep.mubr.msk.f32.mxu0 %vm725_vm1, %v6994_v59 }
 0x7ee   : > { %17755 = vmatmul.mubr.msk.f32.gmra.mrb[94].mxu0 %vm725_vm1, %v6996_v40 }
 0x7ef   : > { %v7000_v18 = vpop.permute.xlu1 %6999 }
 0x7f0   : > { %v6998_v14 = vpop.permute.xlu0 %6997 }
 0x7f1   : > { %17757 = vmatprep.mubr.msk.f32.mxu0 %vm725_vm1, %v6998_v14 }
 0x7f2   : > { %17758 = vmatmul.mubr.msk.f32.gmra.mrb[96].mxu0 %vm725_vm1, %v7000_v18 }
 0x7f3   : > { %v7004_v36 = vpop.permute.xlu1 %7003 }
 0x7f4   : > { %v7002_v48 = vpop.permute.xlu0 %7001 }
 0x7f5   : > { %17760 = vmatprep.mubr.msk.f32.mxu0 %vm725_vm1, %v7002_v48 }
 0x7f6   : > { %17761 = vmatmul.mubr.msk.f32.gmra.mrb[98].mxu0 %vm725_vm1, %v7004_v36 }
 0x7f7   : > { %v7008_v62 = vpop.permute.xlu1 %7007 }
 0x7f8   : > { %v7006_v39 = vpop.permute.xlu0 %7005 }
 0x7f9   : > { %17763 = vmatprep.mubr.msk.f32.mxu0 %vm725_vm1, %v7006_v39 }
 0x7fa   : > { %17764 = vmatmul.mubr.msk.f32.gmra.mrb[100].mxu0 %vm725_vm1, %v7008_v62 }
 0x7fb   : > { %v7012_v11 = vpop.permute.xlu1 %7011 }
 0x7fc   : > { %v7010_v43 = vpop.permute.xlu0 %7009 }
 0x7fd   : > { %17766 = vmatprep.mubr.msk.f32.mxu0 %vm725_vm1, %v7010_v43 }
 0x7fe   : > { %17767 = vmatmul.mubr.msk.f32.gmra.mrb[102].mxu0 %vm725_vm1, %v7012_v11 }
 0x87e   : > { %v17693_v27 = vpop.f32.mrb[80].mxu0 }
 0x87f   : > { %v21916_v55 = vmul.f32 0.70710677, %v17693_v27  ;;  %v6143_v19 = vpop.f32.mrb[81].mxu0 }
 0x880   : > { %v21926_v17 = vmul.f32 0.70710677, %v6143_v19 }
 0x881   : > { %v6808_v32 = vsel %vm280_vm0, %v21916_v55, -inf }
 0x882   : > { %6809 = vmax.xlane.f32.xlu1 %v6808_v32  ;;  %v6805_v51 = vsel %vm280_vm0, %v21926_v17, -inf }
 0x898   : > { %v17707_v33 = vpop.f32.mrb[82].mxu0 }
 0x899   : > { %v21920_v35 = vmul.f32 0.70710677, %v17707_v33  ;;  %v6325_v9 = vpop.f32.mrb[83].mxu0 }
 0x89a   : > { %v21940_v31 = vmul.f32 0.70710677, %v6325_v9 }
 0x89b   : > { %v6820_v44 = vsel %vm280_vm0, %v21920_v35, -inf }
 0x89c   : > { %6821 = vmax.xlane.f32.xlu1 %v6820_v44  ;;  %v6817_v40 = vsel %vm280_vm0, %v21940_v31, -inf }
 0x8a1   : > { %v17721_v1 = vpop.f32.mrb[84].mxu0 }
 0x8a2   : > { %v6507_v42 = vpop.f32.mrb[85].mxu0  ;;  %v21936_v25 = vmul.f32 0.70710677, %v17721_v1 }
 0x8a3   : > { %v21956_v43 = vmul.f32 0.70710677, %v6507_v42 }
 0x8a4   : > { %v6832_v52 = vsel %vm280_vm0, %v21936_v25, -inf }
 0x8a5   : > { %v6829_v1 = vsel %vm280_vm0, %v21956_v43, -inf }
 0x8a6   : > { %v17700_v49 = vpop.f32.mrb[50].mxu1 }
 0x8a7   : > { %v6234_v12 = vpop.f32.mrb[51].mxu1  ;;  %v21930_v5 = vmul.f32 0.70710677, %v17700_v49 }
 0x8a8   : > { %v21924_v24 = vmul.f32 0.70710677, %v6234_v12 }
 0x8a9   : > { %v6814_v3 = vsel %vm280_vm0, %v21930_v5, -inf }
 0x8aa   : > { %v6811_v23 = vsel %vm280_vm0, %v21924_v24, -inf }
 0x8ab   : > { %6812 = vmax.xlane.f32.xlu0 %v6811_v23 }
 0x8ae   : > { %v17714_v60 = vpop.f32.mrb[52].mxu1 }
 0x8af   : > { %v21934_v26 = vmul.f32 0.70710677, %v17714_v60  ;;  %6806 = vmax.xlane.f32.xlu0 %v6805_v51  ;;  %v6416_v15 = vpop.f32.mrb[53].mxu1 }
 0x8b0   : > { %v17735_v6 = vpop.f32.mrb[86].mxu0  ;;  %v21946_v16 = vmul.f32 0.70710677, %v6416_v15 }
 0x8b1   : > { %v6689_v7 = vpop.f32.mrb[87].mxu0  ;;  %v6826_v34 = vsel %vm280_vm0, %v21934_v26, -inf  ;;  %v21952_v48 = vmul.f32 0.70710677, %v17735_v6 }
 0x8b2   : > { %6827 = vmax.xlane.f32.xlu1 %v6826_v34  ;;  %v6823_v11 = vsel %vm280_vm0, %v21946_v16, -inf  ;;  %v21975_v15 = vmul.f32 0.70710677, %v6689_v7 }
 0x8b3   : > { %6815 = vmax.xlane.f32.xlu0 %v6814_v3  ;;  %v6844_v32 = vsel %vm280_vm0, %v21952_v48, -inf }
 0x8b5   : > { %v17747_v4 = vpop.f32.mrb[88].mxu0 }
 0x8b6   : > { %v17728_v22 = vpop.f32.mrb[54].mxu1  ;;  %6833 = vmax.xlane.f32.xlu1 %v6832_v52  ;;  %v7114_v59 = vpop.f32.mrb[89].mxu0 }
 0x8b7   : > { %v21950_v18 = vmul.f32 0.70710677, %v17728_v22  ;;  %6818 = vmax.xlane.f32.xlu0 %v6817_v40  ;;  %v6598_v14 = vpop.f32.mrb[55].mxu1  ;;  %v18669_v36 = vpack.c.bf16 %v17747_v4, %v7114_v59  ;;  %v6841_v40 = vsel %vm280_vm0, %v21975_v15, -inf }
 0x8b8   : > { %v21965_v9 = vmul.f32 0.70710677, %v6598_v14 }
 0x8b9   : > { %v6838_v62 = vsel %vm280_vm0, %v21950_v18, -inf  ;;  %v17750_v39 = vpop.f32.mrb[90].mxu0  ;;  %18670 = vmatprep.subr.bf16.mxu0 %v18669_v36 }
 0x8ba   : > { %6839 = vmax.xlane.f32.xlu1 %v6838_v62  ;;  %v7124_v27 = vpop.f32.mrb[91].mxu0  ;;  %18672 = vmatpush3.bf16.msra.mxu0 %v18669_v36  ;;  %v6835_v6 = vsel %vm280_vm0, %v21965_v9, -inf }
 0x8bb   : > { %6824 = vmax.xlane.f32.xlu0 %v6823_v11  ;;  %v21960_v19 = vpack.c.bf16 %v17750_v39, %v7124_v27 }
 0x8bd   : > { %v17753_v33 = vpop.f32.mrb[92].mxu0  ;;  %18674 = vmatprep.subr.bf16.mxu0 %v21960_v19 }
 0x8be   : > { %v17742_v44 = vpop.f32.mrb[56].mxu1  ;;  %6845 = vmax.xlane.f32.xlu1 %v6844_v32  ;;  %v7134_v42 = vpop.f32.mrb[93].mxu0 }
 0x8bf   : > { %v21969_v49 = vmul.f32 0.70710677, %v17742_v44  ;;  %v6780_v12 = vpop.f32.mrb[57].mxu1  ;;  %6830 = vmax.xlane.f32.xlu0 %v6829_v1  ;;  %v21971_v23 = vpack.c.bf16 %v17753_v33, %v7134_v42 }
 0x8c0   : > { %v21981_v4 = vmul.f32 0.70710677, %v6780_v12 }
 0x8c1   : > { %v6850_v60 = vsel %vm280_vm0, %v21969_v49, -inf  ;;  %v17756_v51 = vpop.f32.mrb[94].mxu0 }
 0x8c2   : > { %6851 = vmax.xlane.f32.xlu1 %v6850_v60  ;;  %v7144_v34 = vpop.f32.mrb[95].mxu0  ;;  %v6847_v36 = vsel %vm280_vm0, %v21981_v4, -inf }
 0x8c3   : > { %6836 = vmax.xlane.f32.xlu0 %v6835_v6  ;;  %v21979_v3 = vpack.c.bf16 %v17756_v51, %v7144_v34 }
 0x8c5   : > { %v17759_v52 = vpop.f32.mrb[96].mxu0 }
 0x8c6   : > { %v7154_v22 = vpop.f32.mrb[97].mxu0 }
 0x8c7   : > { %v21985_v59 = vpack.c.bf16 %v17759_v52, %v7154_v22  ;;  %6842 = vmax.xlane.f32.xlu0 %v6841_v40 }
 0x8c9   : > { %v17762_v7 = vpop.f32.mrb[98].mxu0 }
 0x8ca   : > { %v7164_v14 = vpop.f32.mrb[99].mxu0 }
 0x8cb   : > { %v21989_v62 = vpack.c.bf16 %v17762_v7, %v7164_v14  ;;  %6848 = vmax.xlane.f32.xlu0 %v6847_v36 }
 0x8cd   : > { %v17765_v39 = vpop.f32.mrb[100].mxu0 }
 0x8ce   : > { %v7174_v11 = vpop.f32.mrb[101].mxu0 }
 0x8cf   : > { %v21991_v27 = vpack.c.bf16 %v17765_v39, %v7174_v11 }
 0x8d1   : > { %v17768_v32 = vpop.f32.mrb[102].mxu0 }
 0x8d2   : > { %v7184_v33 = vpop.f32.mrb[103].mxu0 }
 0x8d3   : > { %v18697_v44 = vpack.c.bf16 %v17768_v32, %v7184_v33 }
 0x8d5   : > { %18698 = vmatprep.subr.bf16.mxu1 %v18697_v44 }
 0x8d6   : > { %18700 = vmatpush3.bf16.msra.mxu1 %v18697_v44 }
 0x90f   : > { %v6810_v1 = vpop.xlane.xlu1 %6809 }
 0x910   : > { %v6854_v52 = vsub.f32 %v21916_v55, %v6810_v1 }
 0x912   : > { %v6871_v36 = vmul.f32 1.442695, %v6854_v52 }
 0x929   : > { %v6822_v60 = vpop.xlane.xlu1 %6821 }
 0x92a   : > { %v6858_v33 = vsub.f32 %v21920_v35, %v6822_v60 }
 0x938   : > { %v6813_v42 = vpop.xlane.xlu0 %6812 }
 0x939   : > { %v6855_v12 = vsub.f32 %v21924_v24, %v6813_v42 }
 0x93b   : > { %v6873_v51 = vmul.f32 1.442695, %v6855_v12 }
 0x93c   : > { %v6807_v6 = vpop.xlane.xlu0 %6806 }
 0x93d   : > { %19744 = vpow2.f32 %v6873_v51  ;;  %v6853_v34 = vsub.f32 %v21926_v17, %v6807_v6 }
 0x93f   : > { %v6869_v22 = vmul.f32 1.442695, %v6853_v34  ;;  %v6828_v40 = vpop.xlane.xlu1 %6827 }
 0x940   : > { %v6816_v7 = vpop.xlane.xlu0 %6815  ;;  %v6860_v39 = vsub.f32 %v21934_v26, %v6828_v40  ;;  %v6879_v26 = vmul.f32 1.442695, %v6858_v33 }
 0x941   : > { %19746 = vpow2.f32 %v6869_v22  ;;  %v6856_v14 = vsub.f32 %v21930_v5, %v6816_v7 }
 0x942   : > { %v6883_v17 = vmul.f32 1.442695, %v6860_v39 }
 0x943   : > { %v6875_v11 = vmul.f32 1.442695, %v6856_v14  ;;  %v6834_v32 = vpop.xlane.xlu1 %6833 }
 0x944   : > { %v6819_v24 = vpop.xlane.xlu0 %6818  ;;  %v6862_v22 = vsub.f32 %v21936_v25, %v6834_v32 }
 0x945   : > { %19748 = vpow2.f32 %v6875_v11  ;;  %v6857_v55 = vsub.f32 %v21940_v31, %v6819_v24 }
 0x946   : > { %19750 = vpow2.f32 %v6871_v36  ;;  %v6887_v24 = vmul.f32 1.442695, %v6862_v22 }
 0x947   : > { %v21999_v44 = vpop.eup %19744  ;;  %v6840_v1 = vpop.xlane.xlu1 %6839  ;;  %19752 = vpow2.f32 %v6883_v17  ;;  %v6877_v6 = vmul.f32 1.442695, %v6857_v55 }
 0x948   : > { %v6825_v42 = vpop.xlane.xlu0 %6824  ;;  %v6907_v5 = vsel %vm280_vm0, %v21999_v44, 0.0  ;;  %v6864_v35 = vsub.f32 %v21950_v18, %v6840_v1 }
 0x949   : > { %v6859_v12 = vsub.f32 %v21946_v16, %v6825_v42  ;;  %6908 = vadd.xlane.f32.xlu0 %v6907_v5 }
 0x94a   : > { %v6891_v40 = vmul.f32 1.442695, %v6864_v35 }
 0x94b   : > { %v22005_v51 = vpop.eup %19746  ;;  %v6881_v60 = vmul.f32 1.442695, %v6859_v12  ;;  %v6846_v34 = vpop.xlane.xlu1 %6845 }
 0x94c   : > { %v6831_v52 = vpop.xlane.xlu0 %6830  ;;  %v6901_v31 = vsel %vm280_vm0, %v22005_v51, 0.0  ;;  %v6866_v1 = vsub.f32 %v21952_v48, %v6846_v34 }
 0x94d   : > { %19754 = vpow2.f32 %v6881_v60  ;;  %6902 = vadd.xlane.f32.xlu0 %v6901_v31  ;;  %v6861_v7 = vsub.f32 %v21956_v43, %v6831_v52 }
 0x94e   : > { %19756 = vpow2.f32 %v6879_v26  ;;  %v6895_v48 = vmul.f32 1.442695, %v6866_v1 }
 0x94f   : > { %v22011_v16 = vpop.eup %19748  ;;  %19758 = vpow2.f32 %v6877_v6  ;;  %v6852_v14 = vpop.xlane.xlu1 %6851  ;;  %v6885_v33 = vmul.f32 1.442695, %v6861_v7 }
 0x950   : > { %v6837_v36 = vpop.xlane.xlu0 %6836  ;;  %v6910_v18 = vsel %vm280_vm0, %v22011_v16, 0.0  ;;  %v22016_v39 = vpop.eup %19750  ;;  %19760 = vpow2.f32 %v6891_v40  ;;  %v6868_v25 = vsub.f32 %v21969_v49, %v6852_v14 }
 0x951   : > { %v6863_v11 = vsub.f32 %v21965_v9, %v6837_v36  ;;  %6911 = vadd.xlane.f32.xlu1 %v6910_v18  ;;  %v6904_v43 = vsel %vm280_vm0, %v22016_v39, 0.0  ;;  %v22022_v55 = vpop.eup %19752 }
 0x952   : > { %v6899_v9 = vmul.f32 1.442695, %v6868_v25  ;;  %v6922_v26 = vsel %vm280_vm0, %v22022_v55, 0.0 }
 0x953   : > { %v6889_v32 = vmul.f32 1.442695, %v6863_v11 }
 0x954   : > { %v6843_v17 = vpop.xlane.xlu0 %6842 }
 0x955   : > { %19762 = vpow2.f32 %v6889_v32  ;;  %6905 = vadd.xlane.f32.xlu1 %v6904_v43  ;;  %v6865_v5 = vsub.f32 %v21975_v15, %v6843_v17 }
 0x956   : > { %19764 = vpow2.f32 %v6887_v24 }
 0x957   : > { %v22025_v42 = vpop.eup %19754  ;;  %19766 = vpow2.f32 %v6885_v33  ;;  %v6893_v34 = vmul.f32 1.442695, %v6865_v5  ;;  %v24354_v5 = vld [vmem:[#allocation4_spill] sm:$0xff] }
 0x958   : > { %v22028_v12 = vpop.eup %19756  ;;  %v6849_v49 = vpop.xlane.xlu0 %6848  ;;  %v6919_v6 = vsel %vm280_vm0, %v22025_v42, 0.0  ;;  %19768 = vpow2.f32 %v6899_v9 }
 0x959   : > { %v22034_v35 = vpop.eup %19758  ;;  %v6867_v60 = vsub.f32 %v21981_v4, %v6849_v49  ;;  %6923 = vadd.xlane.f32.xlu1 %v6922_v26  ;;  %6920 = vadd.xlane.f32.xlu0 %v6919_v6  ;;  %v6916_v15 = vsel %vm280_vm0, %v22028_v12, 0.0  ;;  %v24355_v49 = vld [vmem:[#allocation7_spill] sm:$0xff]  ;;  %v24356_v26 = vld [vmem:[#allocation10_spill] sm:$0xff] }
 0x95a   : > { %v6913_v31 = vsel %vm280_vm0, %v22034_v35, 0.0  ;;  %v22041_v22 = vpop.eup %19760 }
 0x95b   : > { %v6897_v52 = vmul.f32 1.442695, %v6867_v60  ;;  %v6934_v7 = vsel %vm280_vm0, %v22041_v22, 0.0 }
 0x95d   : > { %19770 = vpow2.f32 %v6897_v52  ;;  %6917 = vadd.xlane.f32.xlu1 %v6916_v15  ;;  %6914 = vadd.xlane.f32.xlu0 %v6913_v31 }
 0x95e   : > { %19772 = vpow2.f32 %v6895_v48 }
 0x95f   : > { %v22043_v40 = vpop.eup %19762  ;;  %19774 = vpow2.f32 %v6893_v34 }
 0x960   : > { %v22045_v4 = vpop.eup %19764  ;;  %v6931_v14 = vsel %vm280_vm0, %v22043_v40, 0.0 }
 0x961   : > { %v22051_v36 = vpop.eup %19766  ;;  %6935 = vadd.xlane.f32.xlu1 %v6934_v7  ;;  %6932 = vadd.xlane.f32.xlu0 %v6931_v14  ;;  %v6928_v18 = vsel %vm280_vm0, %v22045_v4, 0.0 }
 0x962   : > { %v6925_v11 = vsel %vm280_vm0, %v22051_v36, 0.0  ;;  %v22057_v24 = vpop.eup %19768 }
 0x963   : > { %v6946_v32 = vsel %vm280_vm0, %v22057_v24, 0.0 }
 0x965   : > { %6929 = vadd.xlane.f32.xlu1 %v6928_v18  ;;  %6926 = vadd.xlane.f32.xlu0 %v6925_v11 }
 0x967   : > { %v22059_v33 = vpop.eup %19770 }
 0x968   : > { %v22061_v25 = vpop.eup %19772  ;;  %v6943_v17 = vsel %vm280_vm0, %v22059_v33, 0.0 }
 0x969   : > { %v22067_v43 = vpop.eup %19774  ;;  %6947 = vadd.xlane.f32.xlu1 %v6946_v32  ;;  %6944 = vadd.xlane.f32.xlu0 %v6943_v17  ;;  %v6940_v1 = vsel %vm280_vm0, %v22061_v25, 0.0 }
 0x96a   : > { %v6937_v9 = vsel %vm280_vm0, %v22067_v43, 0.0 }
 0x96d   : > { %6941 = vadd.xlane.f32.xlu1 %v6940_v1  ;;  %6938 = vadd.xlane.f32.xlu0 %v6937_v9 }
 0x97e   : > { %19366 = vrot.lane.b32.xlu1 %v24354_v5, %s20198_s9 }
 0x982   : > { %8494 = vrot.lane.b32.xlu1 %v24352_v20, %s20199_s10 }
 0x983   : > { %19361 = vrot.lane.b32.xlu0 %v24346_v0, %s20198_s9 }
 0x986   : > { %8496 = vrot.lane.b32.xlu1 %v24350_v41, %s20199_s10 }
 0x987   : > { %19371 = vrot.lane.b32.xlu0 %v24355_v49, %s20198_s9 }
 0x98a   : > { %7857 = vrot.lane.b32.xlu1 %v24353_v10, %s20199_s10 }
 0x98b   : > { %7859 = vrot.lane.b32.xlu0 %v24306_v58, %s20199_s10 }
 0x98e   : > { %19376 = vrot.lane.b32.xlu1 %v24356_v26, %s20198_s9 }
 0x98f   : > { %7948 = vrot.lane.b32.xlu0 %v24308_v54, %s20199_s10 }
 0x992   : > { %7950 = vrot.lane.b32.xlu1 %v24309_v56, %s20199_s10 }
 0x993   : > { %19381 = vrot.lane.b32.xlu0 %v24310_v50, %s20198_s9 }
 0x996   : > { %8039 = vrot.lane.b32.xlu1 %v24312_v21, %s20199_s10 }
 0x997   : > { %8041 = vrot.lane.b32.xlu0 %v24313_v47, %s20199_s10 }
 0x99a   : > { %19386 = vrot.lane.b32.xlu1 %v24311_v37, %s20198_s9 }
 0x99b   : > { %8130 = vrot.lane.b32.xlu0 %v24315_v30, %s20199_s10 }
 0x99e   : > { %8132 = vrot.lane.b32.xlu1 %v24316_v2, %s20199_s10 }
 0x99f   : > { %19391 = vrot.lane.b32.xlu0 %v24314_v53, %s20198_s9 }
 0x9a2   : > { %8221 = vrot.lane.b32.xlu1 %v24345_v57, %s20199_s10 }
 0x9a3   : > { %8223 = vrot.lane.b32.xlu0 %v24318_v46, %s20199_s10 }
 0x9a6   : > { %8312 = vrot.lane.b32.xlu1 %v24347_v13, %s20199_s10 }
 0x9a7   : > { %19396 = vrot.lane.b32.xlu0 %v24344_v45, %s20198_s9 }
 0x9aa   : > { %8314 = vrot.lane.b32.xlu1 %v24349_v63, %s20199_s10 }
 0x9ab   : > { %8403 = vrot.lane.b32.xlu0 %v24351_v29, %s20199_s10 }
 0x9ae   : > { %8405 = vrot.lane.b32.xlu1 %v24348_v38, %s20199_s10 }
 0x9af   : > { %8777 = vrot.lane.b32.xlu0 %v24353_v10, %s20200_s11 }
 0x9b2   : > { %8779 = vrot.lane.b32.xlu1 %v24306_v58, %s20200_s11 }
 0x9b3   : > { %8781 = vrot.lane.b32.xlu0 %v24308_v54, %s20200_s11 }
 0x9b6   : > { %8783 = vrot.lane.b32.xlu1 %v24309_v56, %s20200_s11 }
 0x9b7   : > { %8785 = vrot.lane.b32.xlu0 %v24312_v21, %s20200_s11 }
 0x9ba   : > { %8787 = vrot.lane.b32.xlu1 %v24313_v47, %s20200_s11 }
 0x9bb   : > { %8789 = vrot.lane.b32.xlu0 %v24315_v30, %s20200_s11 }
 0x9be   : > { %8791 = vrot.lane.b32.xlu1 %v24316_v2, %s20200_s11 }
 0x9bf   : > { %8793 = vrot.lane.b32.xlu0 %v24345_v57, %s20200_s11 }
 0x9c2   : > { %8795 = vrot.lane.b32.xlu1 %v24318_v46, %s20200_s11 }
 0x9c3   : > { %8797 = vrot.lane.b32.xlu0 %v24347_v13, %s20200_s11 }
 0x9c6   : > { %8799 = vrot.lane.b32.xlu1 %v24349_v63, %s20200_s11 }
 0x9c7   : > { %8801 = vrot.lane.b32.xlu0 %v24351_v29, %s20200_s11 }
 0x9ca   : > { %8803 = vrot.lane.b32.xlu1 %v24348_v38, %s20200_s11 }
 0x9cb   : > { %8805 = vrot.lane.b32.xlu0 %v24352_v20, %s20200_s11 }
 0x9ce   : > { %8807 = vrot.lane.b32.xlu1 %v24350_v41, %s20200_s11 }
 0x9cf   : > { %19401 = vrot.lane.b32.xlu0 %v24355_v49, %s20201_s12 }
 0x9d2   : > { %19406 = vrot.lane.b32.xlu1 %v24310_v50, %s20201_s12 }
 0x9d3   : > { %9746 = vrot.lane.b32.xlu0 %v24309_v56, %s20202_s13 }
 0x9d6   : > { %9744 = vrot.lane.b32.xlu1 %v24308_v54, %s20202_s13  ;;  %v6909_v6 = vpop.xlane.xlu0 %6908 }
 0x9da   : > { %19411 = vrot.lane.b32.xlu1 %v24314_v53, %s20201_s12  ;;  %v6903_v60 = vpop.xlane.xlu0 %6902 }
 0x9db   : > { %19776 = vrcp.f32 %v6903_v60 }
 0x9dc   : > { %19778 = vrcp.f32 %v6909_v6 }
 0x9de   : > { %v6912_v48 = vpop.xlane.xlu1 %6911 }
 0x9e2   : > { %v6906_v34 = vpop.xlane.xlu1 %6905 }
 0x9e3   : > { %19780 = vrcp.f32 %v6906_v34 }
 0x9e4   : > { %19782 = vrcp.f32 %v6912_v48 }
 0x9e5   : > { %v19777_v52 = vpop.eup %19776 }
 0x9e6   : > { %v6924_v15 = vpop.xlane.xlu1 %6923  ;;  %v6921_v31 = vpop.xlane.xlu0 %6920  ;;  %v6965_v7 = vmul.f32 %v19777_v52, %v22005_v51 }
 0x9e7   : > { %19784 = vrcp.f32 %v6921_v31  ;;  %v19779_v11 = vpop.eup %19778 }
 0x9e8   : > { %17773 = vmatprep.mubr.msk.f32.mxu0 %vm280_vm0, %v6965_v7  ;;  %v6967_v60 = vmul.f32 %v19779_v11, %v21999_v44 }
 0x9ea   : > { %v6918_v14 = vpop.xlane.xlu1 %6917  ;;  %v6915_v18 = vpop.xlane.xlu0 %6914 }
 0x9eb   : > { %19786 = vrcp.f32 %v6918_v14 }
 0x9ec   : > { %19788 = vrcp.f32 %v6915_v18 }
 0x9ed   : > { %v19781_v32 = vpop.eup %19780  ;;  %19790 = vrcp.f32 %v6924_v15 }
 0x9ee   : > { %v6966_v17 = vmul.f32 %v19781_v32, %v22016_v39  ;;  %v6936_v1 = vpop.xlane.xlu1 %6935  ;;  %v6933_v9 = vpop.xlane.xlu0 %6932 }
 0x9ef   : > { %v19783_v6 = vpop.eup %19782 }
 0x9f0   : > { %17774 = vmatmul.mubr.msk.f32.vlgmr.msra.gmra.mrb[58].mxu0 %vm280_vm0, %v6966_v17  ;;  %v6968_v34 = vmul.f32 %v19783_v6, %v22011_v16 }
 0x9f1   : > { %18676 = vmatpush3.bf16.msra.mxu0 %v21960_v19  ;;  %17780 = vmatprep.mubr.msk.f32.mxu0 %vm280_vm0, %v6967_v60  ;;  %v19785_v39 = vpop.eup %19784 }
 0x9f2   : > { %18678 = vmatprep.subr.bf16.mxu0 %v21971_v23  ;;  %v6930_v51 = vpop.xlane.xlu1 %6929  ;;  %v6927_v48 = vpop.xlane.xlu0 %6926  ;;  %v6971_v14 = vmul.f32 %v19785_v39, %v22025_v42 }
 0x9f3   : > { %19792 = vrcp.f32 %v6930_v51 }
 0x9f4   : > { %19794 = vrcp.f32 %v6927_v48  ;;  %17781 = vmatmul.mubr.msk.f32.vlgmr.msra.gmra.mrb[60].mxu0 %vm280_vm0, %v6968_v34 }
 0x9f5   : > { %v19787_v52 = vpop.eup %19786  ;;  %19796 = vrcp.f32 %v6933_v9  ;;  %18680 = vmatpush3.bf16.msra.mxu0 %v21971_v23 }
 0x9f6   : > { %v19789_v44 = vpop.eup %19788  ;;  %19798 = vrcp.f32 %v6936_v1  ;;  %18682 = vmatprep.subr.bf16.mxu0 %v21979_v3  ;;  %v6948_v19 = vpop.xlane.xlu1 %6947  ;;  %v6970_v31 = vmul.f32 %v19787_v52, %v22028_v12 }
 0x9f7   : > { %v6945_v15 = vpop.xlane.xlu0 %6944  ;;  %19800 = vrcp.f32 %v6948_v19  ;;  %v6969_v16 = vmul.f32 %v19789_v44, %v22034_v35  ;;  %v19791_v7 = vpop.eup %19790 }
 0x9f8   : > { %19802 = vrcp.f32 %v6945_v15  ;;  %v6972_v12 = vmul.f32 %v19791_v7, %v22022_v55 }
 0x9f9   : > { %17787 = vmatprep.mubr.msk.f32.mxu0 %vm280_vm0, %v6969_v16 }
 0x9fa   : > { %17788 = vmatmul.mubr.msk.f32.vlgmr.msra.gmra.mrb[62].mxu0 %vm280_vm0, %v6970_v31  ;;  %v6942_v23 = vpop.xlane.xlu1 %6941 }
 0x9fb   : > { %v6939_v18 = vpop.xlane.xlu0 %6938  ;;  %18684 = vmatpush3.bf16.msra.mxu0 %v21979_v3  ;;  %19804 = vrcp.f32 %v6942_v23  ;;  %17794 = vmatprep.mubr.msk.f32.mxu0 %vm280_vm0, %v6971_v14 }
 0x9fc   : > { %18686 = vmatprep.subr.bf16.mxu0 %v21985_v59  ;;  %19806 = vrcp.f32 %v6939_v18 }
 0x9fd   : > { %v19793_v35 = vpop.eup %19792 }
 0x9fe   : > { %v19795_v11 = vpop.eup %19794  ;;  %17795 = vmatmul.mubr.msk.f32.vlgmr.msra.gmra.mrb[64].mxu0 %vm280_vm0, %v6972_v12  ;;  %v19367_v32 = vpop.permute.xlu1 %19366  ;;  %v6974_v3 = vmul.f32 %v19793_v35, %v22045_v4 }
 0x9ff   : > { %v19362_v42 = vpop.permute.xlu0 %19361  ;;  %v19797_v17 = vpop.eup %19796  ;;  %18688 = vmatpush3.bf16.msra.mxu0 %v21985_v59  ;;  %v19369_v1 = vunpack.i.h.bf16 %v19367_v32  ;;  %v19368_v9 = vunpack.i.l.bf16 %v19367_v32  ;;  %v6973_v60 = vmul.f32 %v19795_v11, %v22051_v36 }
 0xa00   : > { %v19799_v6 = vpop.eup %19798  ;;  %18690 = vmatprep.subr.bf16.mxu0 %v21989_v62  ;;  %v19364_v34 = vunpack.i.h.bf16 %v19362_v42  ;;  %v6975_v52 = vmul.f32 %v19797_v17, %v22043_v40  ;;  %v19363_v19 = vunpack.i.l.bf16 %v19362_v42 }
 0xa01   : > { %v19801_v51 = vpop.eup %19800  ;;  %v18701_v55 = vpack.c.bf16 %v19369_v1, %v19368_v9  ;;  %17801 = vmatprep.mubr.msk.f32.mxu0 %vm280_vm0, %v6973_v60 }
 0xa02   : > { %v19803_v48 = vpop.eup %19802  ;;  %v8495_v39 = vpop.permute.xlu1 %8494  ;;  %v6980_v59 = vmul.f32 %v19801_v51, %v22057_v24  ;;  %17802 = vmatmul.mubr.msk.f32.vlgmr.msra.gmra.mrb[66].mxu0 %vm280_vm0, %v6974_v3  ;;  %v6976_v24 = vmul.f32 %v19799_v6, %v22041_v22  ;;  %v18743_v23 = vpack.c.bf16 %v19364_v34, %v19363_v19 }
 0xa03   : > { %v19372_v44 = vpop.permute.xlu0 %19371  ;;  %18703 = vmatprep.subr.msk.bf16.mxu1 %vm20710_vm2, %v18701_v55  ;;  %v6979_v36 = vmul.f32 %v19803_v48, %v22059_v33  ;;  %18692 = vmatpush3.bf16.msra.mxu0 %v21989_v62 }
 0xa04   : > { %v19374_v4 = vunpack.i.h.bf16 %v19372_v44  ;;  %v19373_v15 = vunpack.i.l.bf16 %v19372_v44  ;;  %17808 = vmatprep.mubr.msk.f32.mxu0 %vm280_vm0, %v6975_v52  ;;  %18694 = vmatprep.subr.bf16.mxu0 %v21991_v27 }
 0xa05   : > { %v19805_v31 = vpop.eup %19804  ;;  %17822 = vmatprep.mubr.msk.f32.mxu1 %vm280_vm0, %v6979_v36 }
 0xa06   : > { %v18707_v40 = vpack.c.bf16 %v19374_v4, %v19373_v15  ;;  %v19807_v16 = vpop.eup %19806  ;;  %17823 = vmatmul.mubr.msk.f32.vlgmr.msra.gmra.mrb[22].mxu1 %vm280_vm0, %v6980_v59  ;;  %v8497_v7 = vpop.permute.xlu1 %8496  ;;  %17809 = vmatmul.mubr.msk.f32.vlgmr.msra.gmra.mrb[68].mxu0 %vm280_vm0, %v6976_v24  ;;  %v6978_v33 = vmul.f32 %v19805_v31, %v22061_v25 }
 0xa07   : > { %v7860_v14 = vpop.permute.xlu0 %7859  ;;  %18706 = vmatpush3.bf16.xpose.msk.msra.mxu1 %vm20710_vm2, %v18701_v55  ;;  %v6977_v62 = vmul.f32 %v19807_v16, %v22067_v43  ;;  %18696 = vmatpush3.bf16.msra.mxu0 %v21991_v27 }
 0xa08   : > { %18709 = vmatprep.subr.msk.bf16.mxu1 %vm20710_vm2, %v18707_v40  ;;  %18745 = vmatprep.subr.msk.bf16.mxu0 %vm20710_vm2, %v18743_v23 }
 0xa09   : > { %17815 = vmatprep.mubr.msk.f32.mxu0 %vm280_vm0, %v6977_v62  ;;  %v22212_v62 = vld [vmem:[%s24167_s2 + $0x8] sm:$0xff] }
 0xa0a   : > { %v7858_v22 = vpop.permute.xlu1 %7857  ;;  %17816 = vmatmul.mubr.msk.f32.vlgmr.msra.gmra.mrb[70].mxu0 %vm280_vm0, %v6978_v33  ;;  %24357 = vst [vmem:[#allocation5_spill] sm:$0xff] %v22212_v62 }
 0xa0b   : > { %v7949_v18 = vpop.permute.xlu0 %7948  ;;  %17829 = vmatprep.mubr.msk.f32.mxu1 %vm725_vm1, %v7858_v22  ;;  %17878 = vmatprep.mubr.msk.f32.mxu0 %vm725_vm1, %v8495_v39 }
 0xa0e   : > { %17830 = vmatmul.mubr.msk.f32.vlgmr.msra.gmra.mrb[58].mxu1 %vm725_vm1, %v7860_v14  ;;  %v19377_v25 = vpop.permute.xlu1 %19376 }
 0xa0f   : > { %v19382_v27 = vpop.permute.xlu0 %19381  ;;  %18712 = vmatpush3.bf16.xpose.msk.msra.mxu1 %vm20710_vm2, %v18707_v40  ;;  %17836 = vmatprep.mubr.msk.f32.mxu1 %vm725_vm1, %v7949_v18  ;;  %v19379_v43 = vunpack.i.h.bf16 %v19377_v25  ;;  %v19378_v12 = vunpack.i.l.bf16 %v19377_v25 }
 0xa10   : > { %18748 = vmatpush3.bf16.xpose.msk.msra.mxu0 %vm20710_vm2, %v18743_v23  ;;  %v19384_v11 = vunpack.i.h.bf16 %v19382_v27  ;;  %v19383_v32 = vunpack.i.l.bf16 %v19382_v27 }
 0xa11   : > { %v18713_v35 = vpack.c.bf16 %v19379_v43, %v19378_v12 }
 0xa12   : > { %v7951_v42 = vpop.permute.xlu1 %7950  ;;  %v18719_v1 = vpack.c.bf16 %v19384_v11, %v19383_v32 }
 0xa13   : > { %v8042_v17 = vpop.permute.xlu0 %8041  ;;  %18715 = vmatprep.subr.msk.bf16.mxu1 %vm20710_vm2, %v18713_v35 }
 0xa16   : > { %17837 = vmatmul.mubr.msk.f32.vlgmr.msra.gmra.mrb[60].mxu1 %vm725_vm1, %v7951_v42  ;;  %v8040_v9 = vpop.permute.xlu1 %8039 }
 0xa17   : > { %v8131_v3 = vpop.permute.xlu0 %8130  ;;  %18718 = vmatpush3.bf16.xpose.msk.msra.mxu1 %vm20710_vm2, %v18713_v35  ;;  %17843 = vmatprep.mubr.msk.f32.mxu1 %vm725_vm1, %v8040_v9 }
 0xa18   : > { %17879 = vmatmul.mubr.msk.f32.vlgmr.msra.gmra.mrb[104].mxu0 %vm725_vm1, %v8497_v7  ;;  %18721 = vmatprep.subr.msk.bf16.mxu1 %vm20710_vm2, %v18719_v1 }
 0xa1a   : > { %v19387_v6 = vpop.permute.xlu1 %19386 }
 0xa1b   : > { %v19392_v60 = vpop.permute.xlu0 %19391  ;;  %v19389_v51 = vunpack.i.h.bf16 %v19387_v6  ;;  %v19388_v55 = vunpack.i.l.bf16 %v19387_v6 }
 0xa1c   : > { %v19394_v52 = vunpack.i.h.bf16 %v19392_v60  ;;  %v19393_v44 = vunpack.i.l.bf16 %v19392_v60 }
 0xa1d   : > { %v18725_v48 = vpack.c.bf16 %v19389_v51, %v19388_v55 }
 0xa1e   : > { %17844 = vmatmul.mubr.msk.f32.vlgmr.msra.gmra.mrb[62].mxu1 %vm725_vm1, %v8042_v17  ;;  %v8133_v34 = vpop.permute.xlu1 %8132  ;;  %v18731_v4 = vpack.c.bf16 %v19394_v52, %v19393_v44 }
 0xa1f   : > { %v8224_v39 = vpop.permute.xlu0 %8223  ;;  %18724 = vmatpush3.bf16.xpose.msk.msra.mxu1 %vm20710_vm2, %v18719_v1  ;;  %17850 = vmatprep.mubr.msk.f32.mxu1 %vm725_vm1, %v8131_v3 }
 0xa20   : > { %18727 = vmatprep.subr.msk.bf16.mxu1 %vm20710_vm2, %v18725_v48 }
 0xa22   : > { %v8222_v59 = vpop.permute.xlu1 %8221 }
 0xa23   : > { %v19397_v19 = vpop.permute.xlu0 %19396 }
 0xa24   : > { %v19399_v36 = vunpack.i.h.bf16 %v19397_v19  ;;  %v19398_v31 = vunpack.i.l.bf16 %v19397_v19 }
 0xa26   : > { %17851 = vmatmul.mubr.msk.f32.vlgmr.msra.gmra.mrb[64].mxu1 %vm725_vm1, %v8133_v34  ;;  %v8313_v15 = vpop.permute.xlu1 %8312  ;;  %v18737_v16 = vpack.c.bf16 %v19399_v36, %v19398_v31 }
 0xa27   : > { %18730 = vmatpush3.bf16.xpose.msk.msra.mxu1 %vm20710_vm2, %v18725_v48  ;;  %17857 = vmatprep.mubr.msk.f32.mxu1 %vm725_vm1, %v8222_v59  ;;  %v8404_v40 = vpop.permute.xlu0 %8403 }
 0xa28   : > { %18733 = vmatprep.subr.msk.bf16.mxu1 %vm20710_vm2, %v18731_v4 }
 0xa2a   : > { %v8315_v24 = vpop.permute.xlu1 %8314 }
 0xa2b   : > { %v8778_v14 = vpop.permute.xlu0 %8777 }
 0xa2e   : > { %17858 = vmatmul.mubr.msk.f32.vlgmr.msra.gmra.mrb[66].mxu1 %vm725_vm1, %v8224_v39  ;;  %v8406_v7 = vpop.permute.xlu1 %8405 }
 0xa2f   : > { %18736 = vmatpush3.bf16.xpose.msk.msra.mxu1 %vm20710_vm2, %v18731_v4  ;;  %17864 = vmatprep.mubr.msk.f32.mxu1 %vm725_vm1, %v8313_v15  ;;  %v8782_v33 = vpop.permute.xlu0 %8781 }
 0xa30   : > { %18739 = vmatprep.subr.msk.bf16.mxu1 %vm20710_vm2, %v18737_v16 }
 0xa32   : > { %v8780_v23 = vpop.permute.xlu1 %8779 }
 0xa33   : > { %v8786_v18 = vpop.permute.xlu0 %8785 }
 0xa36   : > { %17865 = vmatmul.mubr.msk.f32.vlgmr.msra.gmra.mrb[68].mxu1 %vm725_vm1, %v8315_v24  ;;  %v8784_v22 = vpop.permute.xlu1 %8783 }
 0xa37   : > { %18742 = vmatpush3.bf16.xpose.msk.msra.mxu1 %vm20710_vm2, %v18737_v16  ;;  %17871 = vmatprep.mubr.msk.f32.mxu1 %vm725_vm1, %v8404_v40  ;;  %v8790_v27 = vpop.permute.xlu0 %8789 }
 0xa38   : > { %17881 = vmatprep.subr.msk.mxu1 %vm1688_vm3, %v22212_v62 }
 0xa3a   : > { %v8788_v25 = vpop.permute.xlu1 %8787 }
 0xa3b   : > { %v8794_v12 = vpop.permute.xlu0 %8793 }
 0xa3e   : > { %17872 = vmatmul.mubr.msk.f32.vlgmr.msra.gmra.mrb[70].mxu1 %vm725_vm1, %v8406_v7  ;;  %v8792_v43 = vpop.permute.xlu1 %8791 }
 0xa3f   : > { %17883 = vmatprep.mubr.msk.f32.mxu1 %vm725_vm1, %v8778_v14  ;;  %17882 = vmatpush3.msk.msra.mxu1 %vm1688_vm3, %v22212_v62  ;;  %v8798_v11 = vpop.permute.xlu0 %8797 }
 0xa42   : > { %17884 = vmatmul.mubr.msk.f32.vlgmr.msra.gmra.mrb[72].mxu1 %vm725_vm1, %v8780_v23  ;;  %v8796_v35 = vpop.permute.xlu1 %8795 }
 0xa43   : > { %17886 = vmatprep.mubr.msk.f32.mxu1 %vm725_vm1, %v8782_v33  ;;  %v8802_v42 = vpop.permute.xlu0 %8801 }
 0xa46   : > { %17887 = vmatmul.mubr.msk.f32.gmra.mrb[74].mxu1 %vm725_vm1, %v8784_v22  ;;  %v8800_v32 = vpop.permute.xlu1 %8799 }
 0xa47   : > { %17889 = vmatprep.mubr.msk.f32.mxu1 %vm725_vm1, %v8786_v18  ;;  %v8806_v1 = vpop.permute.xlu0 %8805 }
 0xa4a   : > { %17890 = vmatmul.mubr.msk.f32.gmra.mrb[76].mxu1 %vm725_vm1, %v8788_v25  ;;  %v8804_v17 = vpop.permute.xlu1 %8803 }
 0xa4b   : > { %17892 = vmatprep.mubr.msk.f32.mxu1 %vm725_vm1, %v8790_v27 }
 0xa4e   : > { %17893 = vmatmul.mubr.msk.f32.gmra.mrb[78].mxu1 %vm725_vm1, %v8792_v43  ;;  %v8808_v9 = vpop.permute.xlu1 %8807 }
 0xa4f   : > { %17895 = vmatprep.mubr.msk.f32.mxu1 %vm725_vm1, %v8794_v12 }
 0xa52   : > { %17896 = vmatmul.mubr.msk.f32.gmra.mrb[80].mxu1 %vm725_vm1, %v8796_v35 }
 0xa53   : > { %17898 = vmatprep.mubr.msk.f32.mxu1 %vm725_vm1, %v8798_v11 }
 0xa56   : > { %17899 = vmatmul.mubr.msk.f32.gmra.mrb[82].mxu1 %vm725_vm1, %v8800_v32 }
 0xa57   : > { %17901 = vmatprep.mubr.msk.f32.mxu1 %vm725_vm1, %v8802_v42 }
 0xa5a   : > { %17902 = vmatmul.mubr.msk.f32.gmra.mrb[84].mxu1 %vm725_vm1, %v8804_v17 }
 0xa5b   : > { %17904 = vmatprep.mubr.msk.f32.mxu1 %vm725_vm1, %v8806_v1 }
 0xa5e   : > { %17905 = vmatmul.mubr.msk.f32.gmra.mrb[86].mxu1 %vm725_vm1, %v8808_v9 }
 0xae1   : > { %v17831_v3 = vpop.f32.mrb[58].mxu1 }
 0xae2   : > { %v22239_v6 = vmul.f32 0.70710677, %v17831_v3  ;;  %v7939_v60 = vpop.f32.mrb[59].mxu1 }
 0xae3   : > { %v22241_v51 = vmul.f32 0.70710677, %v7939_v60 }
 0xae4   : > { %v8604_v55 = vsel %vm280_vm0, %v22239_v6, -inf }
 0xae5   : > { %8605 = vmax.xlane.f32.xlu0 %v8604_v55  ;;  %v8601_v48 = vsel %vm280_vm0, %v22241_v51, -inf }
 0xae9   : > { %8602 = vmax.xlane.f32.xlu0 %v8601_v48  ;;  %v17838_v34 = vpop.f32.mrb[60].mxu1 }
 0xaea   : > { %v8030_v39 = vpop.f32.mrb[61].mxu1  ;;  %v22251_v4 = vmul.f32 0.70710677, %v17838_v34 }
 0xaeb   : > { %v17880_v52 = vpop.f32.mrb[104].mxu0  ;;  %v22255_v36 = vmul.f32 0.70710677, %v8030_v39 }
 0xaec   : > { %v22247_v44 = vmul.f32 0.70710677, %v17880_v52  ;;  %v8576_v59 = vpop.f32.mrb[105].mxu0  ;;  %v8610_v7 = vsel %vm280_vm0, %v22251_v4, -inf }
 0xaed   : > { %v22249_v19 = vmul.f32 0.70710677, %v8576_v59  ;;  %v8607_v23 = vsel %vm280_vm0, %v22255_v36, -inf }
 0xaee   : > { %v8646_v15 = vsel %vm280_vm0, %v22247_v44, -inf }
 0xaef   : > { %8647 = vmax.xlane.f32.xlu1 %v8646_v15  ;;  %v8643_v31 = vsel %vm280_vm0, %v22249_v19, -inf }
 0xaf0   : > { %8644 = vmax.xlane.f32.xlu0 %v8643_v31 }
 0xaf1   : > { %v17845_v40 = vpop.f32.mrb[62].mxu1 }
 0xaf2   : > { %v22259_v24 = vmul.f32 0.70710677, %v17845_v40  ;;  %v8121_v16 = vpop.f32.mrb[63].mxu1 }
 0xaf3   : > { %v22263_v14 = vmul.f32 0.70710677, %v8121_v16  ;;  %8611 = vmax.xlane.f32.xlu1 %v8610_v7 }
 0xaf4   : > { %8608 = vmax.xlane.f32.xlu0 %v8607_v23  ;;  %v8616_v33 = vsel %vm280_vm0, %v22259_v24, -inf }
 0xaf5   : > { %v8613_v22 = vsel %vm280_vm0, %v22263_v14, -inf }
 0xaf7   : > { %8617 = vmax.xlane.f32.xlu1 %v8616_v33 }
 0xaf8   : > { %8614 = vmax.xlane.f32.xlu0 %v8613_v22 }
 0xaf9   : > { %v17852_v18 = vpop.f32.mrb[64].mxu1 }
 0xafa   : > { %v22271_v25 = vmul.f32 0.70710677, %v17852_v18  ;;  %v8212_v27 = vpop.f32.mrb[65].mxu1 }
 0xafb   : > { %v22273_v43 = vmul.f32 0.70710677, %v8212_v27 }
 0xafc   : > { %v8622_v12 = vsel %vm280_vm0, %v22271_v25, -inf }
 0xafd   : > { %8623 = vmax.xlane.f32.xlu1 %v8622_v12  ;;  %v8619_v35 = vsel %vm280_vm0, %v22273_v43, -inf }
 0xafe   : > { %8620 = vmax.xlane.f32.xlu0 %v8619_v35 }
 0xb01   : > { %v17859_v11 = vpop.f32.mrb[66].mxu1 }
 0xb02   : > { %v22279_v32 = vmul.f32 0.70710677, %v17859_v11  ;;  %v8303_v42 = vpop.f32.mrb[67].mxu1 }
 0xb03   : > { %v22281_v17 = vmul.f32 0.70710677, %v8303_v42 }
 0xb04   : > { %v8628_v1 = vsel %vm280_vm0, %v22279_v32, -inf }
 0xb05   : > { %8629 = vmax.xlane.f32.xlu1 %v8628_v1  ;;  %v8625_v9 = vsel %vm280_vm0, %v22281_v17, -inf }
 0xb06   : > { %8626 = vmax.xlane.f32.xlu0 %v8625_v9 }
 0xb09   : > { %v17866_v3 = vpop.f32.mrb[68].mxu1 }
 0xb0a   : > { %v22287_v60 = vmul.f32 0.70710677, %v17866_v3  ;;  %v8394_v55 = vpop.f32.mrb[69].mxu1 }
 0xb0b   : > { %v22289_v48 = vmul.f32 0.70710677, %v8394_v55 }
 0xb0c   : > { %v8634_v34 = vsel %vm280_vm0, %v22287_v60, -inf }
 0xb0d   : > { %8635 = vmax.xlane.f32.xlu1 %v8634_v34  ;;  %v8631_v39 = vsel %vm280_vm0, %v22289_v48, -inf }
 0xb0e   : > { %8632 = vmax.xlane.f32.xlu0 %v8631_v39 }
 0xb11   : > { %v17873_v52 = vpop.f32.mrb[70].mxu1 }
 0xb12   : > { %v22295_v59 = vmul.f32 0.70710677, %v17873_v52  ;;  %v8485_v15 = vpop.f32.mrb[71].mxu1 }
 0xb13   : > { %v22297_v31 = vmul.f32 0.70710677, %v8485_v15 }
 0xb14   : > { %v8640_v40 = vsel %vm280_vm0, %v22295_v59, -inf }
 0xb15   : > { %v17885_v16 = vpop.f32.mrb[72].mxu1  ;;  %8641 = vmax.xlane.f32.xlu1 %v8640_v40  ;;  %v8637_v7 = vsel %vm280_vm0, %v22297_v31, -inf }
 0xb16   : > { %v8910_v23 = vpop.f32.mrb[73].mxu1  ;;  %8638 = vmax.xlane.f32.xlu0 %v8637_v7 }
 0xb17   : > { %v18749_v33 = vpack.c.bf16 %v17885_v16, %v8910_v23  ;;  %v19402_v16 = vpop.permute.xlu0 %19401 }
 0xb19   : > { %v17888_v22 = vpop.f32.mrb[74].mxu1  ;;  %18750 = vmatprep.subr.bf16.mxu0 %v18749_v33 }
 0xb1a   : > { %v8920_v18 = vpop.f32.mrb[75].mxu1  ;;  %18752 = vmatpush3.bf16.msra.mxu0 %v18749_v33  ;;  %v19404_v33 = vunpack.i.h.bf16 %v19402_v16 }
 0xb1b   : > { %v22303_v27 = vpack.c.bf16 %v17888_v22, %v8920_v18  ;;  %v19403_v22 = vunpack.i.l.bf16 %v19402_v16 }
 0xb1d   : > { %v17891_v12 = vpop.f32.mrb[76].mxu1  ;;  %18754 = vmatprep.subr.bf16.mxu0 %v22303_v27 }
 0xb1e   : > { %v8930_v35 = vpop.f32.mrb[77].mxu1 }
 0xb1f   : > { %v22306_v11 = vpack.c.bf16 %v17891_v12, %v8930_v35 }
 0xb21   : > { %v17894_v42 = vpop.f32.mrb[78].mxu1 }
 0xb22   : > { %v8940_v1 = vpop.f32.mrb[79].mxu1 }
 0xb23   : > { %v22308_v9 = vpack.c.bf16 %v17894_v42, %v8940_v1  ;;  %v22324_v42 = vpack.c.bf16 %v19404_v33, %v19403_v22  ;;  %v22329_v1 = vpop.permute.xlu1 %19406 }
 0xb25   : > { %24358 = vst [vmem:[#allocation9_spill] sm:$0xff] %v22308_v9  ;;  %v17897_v3 = vpop.f32.mrb[80].mxu1 }
 0xb26   : > { %v8950_v55 = vpop.f32.mrb[81].mxu1  ;;  %9928 = vrot.lane.b32.xlu1 %v24316_v2, %s20202_s13 }
 0xb27   : > { %v22312_v34 = vpack.c.bf16 %v17897_v3, %v8950_v55  ;;  %v22331_v3 = vpop.permute.xlu0 %9746  ;;  %v22333_v55 = vpop.permute.xlu1 %9744 }
 0xb29   : > { %24359 = vst [vmem:[#allocation8_spill] sm:$0xff] %v22312_v34  ;;  %v17900_v39 = vpop.f32.mrb[82].mxu1 }
 0xb2a   : > { %v8960_v52 = vpop.f32.mrb[83].mxu1  ;;  %19416 = vrot.lane.b32.xlu1 %v24346_v0, %s20201_s12 }
 0xb2b   : > { %v22316_v15 = vpack.c.bf16 %v17900_v39, %v8960_v52  ;;  %v22337_v33 = vpop.permute.xlu1 %19411 }
 0xb2c   : > { %9926 = vrot.lane.b32.xlu0 %v24315_v30, %s20202_s13 }
 0xb2d   : > { %24360 = vst [vmem:[#allocation14_spill] sm:$0xff] %v22316_v15  ;;  %v17903_v40 = vpop.f32.mrb[84].mxu1 }
 0xb2e   : > { %v8970_v7 = vpop.f32.mrb[85].mxu1  ;;  %10108 = vrot.lane.b32.xlu1 %v24347_v13, %s20202_s13 }
 0xb2f   : > { %v22322_v23 = vpack.c.bf16 %v17903_v40, %v8970_v7 }
 0xb31   : > { %24361 = vst [vmem:[#allocation13_spill] sm:$0xff] %v22322_v23  ;;  %v17906_v18 = vpop.f32.mrb[86].mxu1 }
 0xb32   : > { %v8980_v12 = vpop.f32.mrb[87].mxu1 }
 0xb33   : > { %v18777_v35 = vpack.c.bf16 %v17906_v18, %v8980_v12 }
 0xb35   : > { %18778 = vmatprep.subr.bf16.mxu1 %v18777_v35 }
 0xb36   : > { %18780 = vmatpush3.bf16.msra.mxu1 %v18777_v35 }
 0xb37   : > { %18789 = vmatprep.subr.msk.bf16.mxu1 %vm20710_vm2, %v22324_v42 }
 0xb72   : > { %v8606_v39 = vpop.xlane.xlu0 %8605 }
 0xb73   : > { %v8650_v52 = vsub.f32 %v22239_v6, %v8606_v39 }
 0xb75   : > { %v8667_v40 = vmul.f32 1.442695, %v8650_v52 }
 0xb76   : > { %v8603_v16 = vpop.xlane.xlu0 %8602 }
 0xb77   : > { %19808 = vpow2.f32 %v8667_v40  ;;  %v8649_v7 = vsub.f32 %v22241_v51, %v8603_v16 }
 0xb79   : > { %v8665_v22 = vmul.f32 1.442695, %v8649_v7 }
 0xb7b   : > { %19810 = vpow2.f32 %v8665_v22 }
 0xb7c   : > { %v8648_v18 = vpop.xlane.xlu1 %8647 }
 0xb7d   : > { %v8664_v12 = vsub.f32 %v22247_v44, %v8648_v18  ;;  %v8645_v35 = vpop.xlane.xlu0 %8644 }
 0xb7e   : > { %v8663_v28 = vsub.f32 %v22249_v19, %v8645_v35 }
 0xb7f   : > { %v8695_v8 = vmul.f32 1.442695, %v8664_v12 }
 0xb80   : > { %v8693_v0 = vmul.f32 1.442695, %v8663_v28 }
 0xb81   : > { %v22341_v62 = vpop.eup %19808  ;;  %19812 = vpow2.f32 %v8695_v8  ;;  %v8609_v19 = vpop.xlane.xlu0 %8608 }
 0xb82   : > { %19814 = vpow2.f32 %v8693_v0  ;;  %v8700_v6 = vsel %vm280_vm0, %v22341_v62, 0.0  ;;  %v8612_v0 = vpop.xlane.xlu1 %8611  ;;  %v8651_v53 = vsub.f32 %v22255_v36, %v8609_v19 }
 0xb83   : > { %8701 = vadd.xlane.f32.xlu1 %v8700_v6  ;;  %v8652_v35 = vsub.f32 %v22251_v4, %v8612_v0 }
 0xb84   : > { %v8669_v9 = vmul.f32 1.442695, %v8651_v53 }
 0xb85   : > { %v22345_v51 = vpop.eup %19810  ;;  %v8615_v16 = vpop.xlane.xlu0 %8614 }
 0xb86   : > { %v8697_v39 = vsel %vm280_vm0, %v22345_v51, 0.0  ;;  %v8618_v40 = vpop.xlane.xlu1 %8617 }
 0xb87   : > { %8698 = vadd.xlane.f32.xlu0 %v8697_v39  ;;  %v8654_v49 = vsub.f32 %v22259_v24, %v8618_v40 }
 0xb89   : > { %v8675_v0 = vmul.f32 1.442695, %v8654_v49 }
 0xb8a   : > { %v8624_v7 = vpop.xlane.xlu1 %8623 }
 0xb8b   : > { %v22349_v44 = vpop.eup %19812  ;;  %v8621_v22 = vpop.xlane.xlu0 %8620 }
 0xb8c   : > { %v22351_v52 = vpop.eup %19814  ;;  %v8742_v28 = vsel %vm280_vm0, %v22349_v44, 0.0  ;;  %v8655_v18 = vsub.f32 %v22273_v43, %v8621_v22 }
 0xb8d   : > { %8743 = vadd.xlane.f32.xlu1 %v8742_v28  ;;  %v8739_v8 = vsel %vm280_vm0, %v22351_v52, 0.0 }
 0xb8e   : > { %8740 = vadd.xlane.f32.xlu0 %v8739_v8  ;;  %v8677_v6 = vmul.f32 1.442695, %v8655_v18  ;;  %v8671_v8 = vmul.f32 1.442695, %v8652_v35 }
 0xb90   : > { %19816 = vpow2.f32 %v8677_v6 }
 0xb91   : > { %19818 = vpow2.f32 %v8671_v8 }
 0xb92   : > { %v8630_v12 = vpop.xlane.xlu1 %8629 }
 0xb93   : > { %v8658_v39 = vsub.f32 %v22279_v32, %v8630_v12  ;;  %v8653_v32 = vsub.f32 %v22263_v14, %v8615_v16  ;;  %v8627_v18 = vpop.xlane.xlu0 %8626 }
 0xb94   : > { %v8657_v14 = vsub.f32 %v22281_v17, %v8627_v18 }
 0xb95   : > { %v8683_v23 = vmul.f32 1.442695, %v8658_v39  ;;  %v8673_v19 = vmul.f32 1.442695, %v8653_v32 }
 0xb96   : > { %v8681_v40 = vmul.f32 1.442695, %v8657_v14 }
 0xb97   : > { %19820 = vpow2.f32 %v8683_v23 }
 0xb98   : > { %19822 = vpow2.f32 %v8669_v9 }
 0xb9a   : > { %v8636_v28 = vpop.xlane.xlu1 %8635  ;;  %v22371_v36 = vpop.eup %19816 }
 0xb9b   : > { %v8660_v15 = vsub.f32 %v22287_v60, %v8636_v28  ;;  %v8656_v60 = vsub.f32 %v22271_v25, %v8624_v7  ;;  %v22374_v53 = vpop.eup %19818  ;;  %v8715_v24 = vsel %vm280_vm0, %v22371_v36, 0.0  ;;  %v8633_v9 = vpop.xlane.xlu0 %8632 }
 0xb9c   : > { %v8659_v16 = vsub.f32 %v22289_v48, %v8633_v9 }
 0xb9d   : > { %v8687_v43 = vmul.f32 1.442695, %v8660_v15  ;;  %v8679_v49 = vmul.f32 1.442695, %v8656_v60 }
 0xb9e   : > { %10290 = vrot.lane.b32.xlu1 %v24352_v20, %s20202_s13  ;;  %v8685_v6 = vmul.f32 1.442695, %v8659_v16 }
 0xb9f   : > { %19824 = vpow2.f32 %v8687_v43 }
 0xba0   : > { %19826 = vpow2.f32 %v8675_v0 }
 0xba2   : > { %10292 = vrot.lane.b32.xlu1 %v24350_v41, %s20202_s13  ;;  %v8642_v34 = vpop.xlane.xlu1 %8641 }
 0xba3   : > { %v8662_v4 = vsub.f32 %v22295_v59, %v8642_v34  ;;  %v22378_v59 = vpop.eup %19820  ;;  %v8706_v34 = vsel %vm280_vm0, %v22374_v53, 0.0  ;;  %v8639_v18 = vpop.xlane.xlu0 %8638 }
 0xba4   : > { %10110 = vrot.lane.b32.xlu0 %v24349_v63, %s20202_s13  ;;  %v22383_v15 = vpop.eup %19822  ;;  %v8724_v25 = vsel %vm280_vm0, %v22378_v59, 0.0 }
 0xba5   : > { %v8691_v22 = vmul.f32 1.442695, %v8662_v4  ;;  %v8703_v17 = vsel %vm280_vm0, %v22383_v15, 0.0 }
 0xba6   : > { %v22438_v60 = vpop.permute.xlu1 %9928 }
 0xba7   : > { %19828 = vpow2.f32 %v8691_v22 }
 0xba8   : > { %19830 = vpow2.f32 %v8673_v19 }
 0xba9   : > { %v22387_v23 = vpop.eup %19824  ;;  %19832 = vpow2.f32 %v8679_v49 }
 0xbaa   : > { %v22392_v7 = vpop.eup %19826  ;;  %v8730_v12 = vsel %vm280_vm0, %v22387_v23, 0.0  ;;  %19834 = vpow2.f32 %v8681_v40  ;;  %v22445_v49 = vpop.permute.xlu1 %19416 }
 0xbab   : > { %v8712_v39 = vsel %vm280_vm0, %v22392_v7, 0.0  ;;  %19836 = vpow2.f32 %v8685_v6 }
 0xbae   : > { %v10109_v9 = vpop.permute.xlu1 %10108 }
 0xbb1   : > { %v22396_v35 = vpop.eup %19828 }
 0xbb2   : > { %v22400_v28 = vpop.eup %19830  ;;  %v8736_v48 = vsel %vm280_vm0, %v22396_v35, 0.0 }
 0xbb3   : > { %v8709_v8 = vsel %vm280_vm0, %v22400_v28, 0.0  ;;  %v22406_v43 = vpop.eup %19832 }
 0xbb4   : > { %v8718_v4 = vsel %vm280_vm0, %v22406_v43, 0.0  ;;  %v22410_v0 = vpop.eup %19834 }
 0xbb5   : > { %v8721_v32 = vsel %vm280_vm0, %v22410_v0, 0.0  ;;  %v22414_v22 = vpop.eup %19836 }
 0xbb6   : > { %v8727_v19 = vsel %vm280_vm0, %v22414_v22, 0.0 }
 0xbc3   : > { %8716 = vadd.xlane.f32.xlu0 %v8715_v24  ;;  %v8661_v24 = vsub.f32 %v22297_v31, %v8639_v18 }
 0xbc5   : > { %v8689_v14 = vmul.f32 1.442695, %v8661_v24 }
 0xbc6   : > { %8707 = vadd.xlane.f32.xlu1 %v8706_v34  ;;  %v9927_v34 = vpop.permute.xlu0 %9926 }
 0xbc7   : > { %8725 = vadd.xlane.f32.xlu0 %v8724_v25  ;;  %19838 = vpow2.f32 %v8689_v14 }
 0xbca   : > { %8704 = vadd.xlane.f32.xlu1 %v8703_v17 }
 0xbcb   : > { %8731 = vadd.xlane.f32.xlu0 %v8730_v12 }
 0xbce   : > { %8713 = vadd.xlane.f32.xlu1 %v8712_v39 }
 0xbcf   : > { %8737 = vadd.xlane.f32.xlu0 %v8736_v48 }
 0xbd1   : > { %v22455_v40 = vpop.eup %19838 }
 0xbd2   : > { %8710 = vadd.xlane.f32.xlu1 %v8709_v8  ;;  %v8733_v17 = vsel %vm280_vm0, %v22455_v40, 0.0 }
 0xbd6   : > { %8719 = vadd.xlane.f32.xlu1 %v8718_v4 }
 0xbda   : > { %8722 = vadd.xlane.f32.xlu1 %v8721_v32 }
 0xbde   : > { %8728 = vadd.xlane.f32.xlu1 %v8727_v19  ;;  %v19408_v19 = vunpack.i.l.bf16 %v22329_v1 }
 0xbe5   : > { %19421 = vrot.lane.b32.xlu0 %v24354_v5, %s20201_s12 }
 0xbe9   : > { %10017 = vrot.lane.b32.xlu0 %v24345_v57, %s20202_s13 }
 0xbed   : > { %19436 = vrot.lane.b32.xlu0 %v24344_v45, %s20201_s12 }
 0xbef   : > { %19426 = vrot.lane.b32.xlu1 %v24356_v26, %s20201_s12 }
 0xbf1   : > { %10201 = vrot.lane.b32.xlu0 %v24348_v38, %s20202_s13 }
 0xbf3   : > { %9653 = vrot.lane.b32.xlu1 %v24353_v10, %s20202_s13 }
 0xbf5   : > { %10575 = vrot.lane.b32.xlu0 %v24306_v58, %s20203_s16 }
 0xbf7   : > { %9655 = vrot.lane.b32.xlu1 %v24306_v58, %s20202_s13 }
 0xbf9   : > { %10579 = vrot.lane.b32.xlu0 %v24309_v56, %s20203_s16 }
 0xbfd   : > { %10583 = vrot.lane.b32.xlu0 %v24313_v47, %s20203_s16 }
 0xc01   : > { %10587 = vrot.lane.b32.xlu0 %v24316_v2, %s20203_s16 }
 0xc05   : > { %10591 = vrot.lane.b32.xlu0 %v24318_v46, %s20203_s16 }
 0xc09   : > { %10595 = vrot.lane.b32.xlu0 %v24349_v63, %s20203_s16 }
 0xc0d   : > { %10599 = vrot.lane.b32.xlu0 %v24348_v38, %s20203_s16 }
 0xc10   : > { %v8702_v25 = vpop.xlane.xlu1 %8701 }
 0xc11   : > { %10603 = vrot.lane.b32.xlu0 %v24350_v41, %s20203_s16  ;;  %19840 = vrcp.f32 %v8702_v25 }
 0xc14   : > { %v8699_v31 = vpop.xlane.xlu0 %8698 }
 0xc15   : > { %19441 = vrot.lane.b32.xlu0 %v24354_v5, %s20204_s17  ;;  %19842 = vrcp.f32 %v8699_v31  ;;  %v24362_v31 = vld [vmem:[#allocation7_spill] sm:$0xff] }
 0xc19   : > { %11449 = vrot.lane.b32.xlu0 %v24353_v10, %s20205_s18 }
 0xc1a   : > { %v8744_v16 = vpop.xlane.xlu1 %8743 }
 0xc1b   : > { %19844 = vrcp.f32 %v8744_v16  ;;  %8734 = vadd.xlane.f32.xlu1 %v8733_v17  ;;  %v8741_v12 = vpop.xlane.xlu0 %8740  ;;  %v19841_v6 = vpop.eup %19840 }
 0xc1c   : > { %19846 = vrcp.f32 %v8741_v12  ;;  %v8762_v8 = vmul.f32 %v19841_v6, %v22341_v62 }
 0xc1d   : > { %19451 = vrot.lane.b32.xlu0 %v24356_v26, %s20204_s17 }
 0xc1e   : > { %v10291_v24 = vpop.permute.xlu1 %10290 }
 0xc1f   : > { %v19843_v39 = vpop.eup %19842 }
 0xc20   : > { %v8761_v48 = vmul.f32 %v19843_v39, %v22345_v51  ;;  %v19409_v51 = vunpack.i.h.bf16 %v22329_v1  ;;  %v19414_v1 = vunpack.i.h.bf16 %v22337_v33 }
 0xc21   : > { %19456 = vrot.lane.b32.xlu0 %v24310_v50, %s20204_s17 }
 0xc22   : > { %17911 = vmatprep.mubr.msk.f32.mxu0 %vm280_vm0, %v8761_v48 }
 0xc23   : > { %17912 = vmatmul.mubr.msk.f32.vlgmr.msra.gmra.mrb[58].mxu0 %vm280_vm0, %v8762_v8 }
 0xc24   : > { %18756 = vmatpush3.bf16.msra.mxu0 %v22303_v27  ;;  %v18799_v27 = vpack.c.bf16 %v19409_v51, %v19408_v19  ;;  %v24363_v51 = vld [vmem:[#allocation9_spill] sm:$0xff] }
 0xc25   : > { %v19845_v4 = vpop.eup %19844  ;;  %11633 = vrot.lane.b32.xlu0 %v24313_v47, %s20205_s18  ;;  %18758 = vmatprep.subr.bf16.mxu0 %v22306_v11 }
 0xc26   : > { %v19847_v32 = vpop.eup %19846  ;;  %v8776_v62 = vmul.f32 %v19845_v4, %v22349_v44  ;;  %v19413_v44 = vunpack.i.l.bf16 %v22337_v33  ;;  %v19418_v33 = vunpack.i.l.bf16 %v22445_v49 }
 0xc27   : > { %v8775_v18 = vmul.f32 %v19847_v32, %v22351_v52 }
 0xc29   : > { %19461 = vrot.lane.b32.xlu0 %v24311_v37, %s20204_s17  ;;  %17960 = vmatprep.mubr.msk.f32.mxu1 %vm280_vm0, %v8775_v18 }
 0xc2a   : > { %17961 = vmatmul.mubr.msk.f32.vlgmr.msra.gmra.mrb[22].mxu1 %vm280_vm0, %v8776_v62 }
 0xc2b   : > { %18792 = vmatpush3.bf16.xpose.msk.msra.mxu1 %vm20710_vm2, %v22324_v42  ;;  %17974 = vmatprep.mubr.msk.f32.mxu1 %vm725_vm1, %v22333_v55  ;;  %v18811_v42 = vpack.c.bf16 %v19414_v1, %v19413_v44  ;;  %v19419_v55 = vunpack.i.h.bf16 %v22445_v49  ;;  %v24364_v44 = vld [vmem:[#allocation8_spill] sm:$0xff] }
 0xc2c   : > { %18801 = vmatprep.subr.msk.bf16.mxu1 %vm20710_vm2, %v18799_v27  ;;  %19431 = vrot.lane.b32.xlu1 %v24311_v37, %s20201_s12 }
 0xc2d   : > { %11724 = vrot.lane.b32.xlu0 %v24316_v2, %s20205_s18  ;;  %v18823_v52 = vpack.c.bf16 %v19419_v55, %v19418_v33  ;;  %v24365_v33 = vld [vmem:[#allocation14_spill] sm:$0xff] }
 0xc30   : > { %9835 = vrot.lane.b32.xlu1 %v24312_v21, %s20202_s13 }
 0xc31   : > { %11815 = vrot.lane.b32.xlu0 %v24318_v46, %s20205_s18 }
 0xc32   : > { %17975 = vmatmul.mubr.msk.f32.vlgmr.msra.gmra.mrb[88].mxu1 %vm725_vm1, %v22331_v3  ;;  %v10111_v3 = vpop.permute.xlu0 %10110 }
 0xc33   : > { %18804 = vmatpush3.bf16.xpose.msk.msra.mxu1 %vm20710_vm2, %v18799_v27  ;;  %17988 = vmatprep.mubr.msk.f32.mxu1 %vm725_vm1, %v9927_v34 }
 0xc34   : > { %18813 = vmatprep.subr.msk.bf16.mxu1 %vm20710_vm2, %v18811_v42  ;;  %9837 = vrot.lane.b32.xlu1 %v24313_v47, %s20202_s13 }
 0xc38   : > { %10019 = vrot.lane.b32.xlu1 %v24318_v46, %s20202_s13 }
 0xc3a   : > { %17989 = vmatmul.mubr.msk.f32.vlgmr.msra.gmra.mrb[90].mxu1 %vm725_vm1, %v22438_v60  ;;  %v10293_v60 = vpop.permute.xlu1 %10292 }
 0xc3b   : > { %18816 = vmatpush3.bf16.xpose.msk.msra.mxu1 %vm20710_vm2, %v18811_v42  ;;  %18002 = vmatprep.mubr.msk.f32.mxu1 %vm725_vm1, %v10109_v9 }
 0xc3c   : > { %18825 = vmatprep.subr.msk.bf16.mxu1 %vm20710_vm2, %v18823_v52  ;;  %10199 = vrot.lane.b32.xlu1 %v24351_v29, %s20202_s13 }
 0xc40   : > { %10573 = vrot.lane.b32.xlu1 %v24353_v10, %s20203_s16 }
 0xc42   : > { %18003 = vmatmul.mubr.msk.f32.vlgmr.msra.gmra.mrb[92].mxu1 %vm725_vm1, %v10111_v3 }
 0xc43   : > { %18828 = vmatpush3.bf16.xpose.msk.msra.mxu1 %vm20710_vm2, %v18823_v52  ;;  %18016 = vmatprep.mubr.msk.f32.mxu1 %vm725_vm1, %v10291_v24 }
 0xc44   : > { %10577 = vrot.lane.b32.xlu1 %v24308_v54, %s20203_s16 }
 0xc48   : > { %10581 = vrot.lane.b32.xlu1 %v24312_v21, %s20203_s16 }
 0xc4a   : > { %18017 = vmatmul.mubr.msk.f32.vlgmr.msra.gmra.mrb[94].mxu1 %vm725_vm1, %v10293_v60 }
 0xc4c   : > { %10585 = vrot.lane.b32.xlu1 %v24315_v30, %s20203_s16 }
 0xc50   : > { %10589 = vrot.lane.b32.xlu1 %v24345_v57, %s20203_s16  ;;  %v8717_v9 = vpop.xlane.xlu0 %8716 }
 0xc53   : > { %v8708_v49 = vpop.xlane.xlu1 %8707 }
 0xc54   : > { %10593 = vrot.lane.b32.xlu1 %v24347_v13, %s20203_s16  ;;  %19848 = vrcp.f32 %v8708_v49  ;;  %v8726_v17 = vpop.xlane.xlu0 %8725 }
 0xc57   : > { %v8705_v14 = vpop.xlane.xlu1 %8704 }
 0xc58   : > { %19850 = vrcp.f32 %v8705_v14  ;;  %10597 = vrot.lane.b32.xlu1 %v24351_v29, %s20203_s16  ;;  %v8732_v8 = vpop.xlane.xlu0 %8731  ;;  %v24367_v14 = vld [vmem:[#allocation22_spill] sm:$0xff] }
 0xc59   : > { %19852 = vrcp.f32 %v8717_v9 }
 0xc5b   : > { %v8714_v34 = vpop.xlane.xlu1 %8713 }
 0xc5c   : > { %10601 = vrot.lane.b32.xlu1 %v24352_v20, %s20203_s16  ;;  %19854 = vrcp.f32 %v8714_v34  ;;  %v8738_v62 = vpop.xlane.xlu0 %8737 }
 0xc5e   : > { %v19849_v16 = vpop.eup %19848 }
 0xc5f   : > { %v8711_v25 = vpop.xlane.xlu1 %8710  ;;  %v8764_v48 = vmul.f32 %v19849_v16, %v22374_v53 }
 0xc60   : > { %19856 = vrcp.f32 %v8711_v25  ;;  %19446 = vrot.lane.b32.xlu1 %v24362_v31, %s20204_s17  ;;  %v19422_v55 = vpop.permute.xlu0 %19421 }
 0xc61   : > { %v19424_v24 = vunpack.i.h.bf16 %v19422_v55  ;;  %v19423_v60 = vunpack.i.l.bf16 %v19422_v55 }
 0xc62   : > { %v19851_v12 = vpop.eup %19850 }
 0xc63   : > { %v8720_v6 = vpop.xlane.xlu1 %8719  ;;  %v8763_v39 = vmul.f32 %v19851_v12, %v22383_v15  ;;  %v19853_v32 = vpop.eup %19852 }
 0xc64   : > { %19858 = vrcp.f32 %v8720_v6  ;;  %11451 = vrot.lane.b32.xlu1 %v24306_v58, %s20205_s18  ;;  %v8767_v27 = vmul.f32 %v19853_v32, %v22371_v36 }
 0xc65   : > { %17918 = vmatprep.mubr.msk.f32.mxu0 %vm280_vm0, %v8763_v39  ;;  %19860 = vrcp.f32 %v8726_v17 }
 0xc66   : > { %17919 = vmatmul.mubr.msk.f32.vlgmr.msra.gmra.mrb[60].mxu0 %vm280_vm0, %v8764_v48  ;;  %v19855_v15 = vpop.eup %19854 }
 0xc67   : > { %18760 = vmatpush3.bf16.msra.mxu0 %v22306_v11  ;;  %v8723_v4 = vpop.xlane.xlu1 %8722  ;;  %v8766_v11 = vmul.f32 %v19855_v15, %v22392_v7  ;;  %v10018_v15 = vpop.permute.xlu0 %10017 }
 0xc68   : > { %19862 = vrcp.f32 %v8723_v4  ;;  %18762 = vmatprep.subr.bf16.mxu0 %v24363_v51  ;;  %11540 = vrot.lane.b32.xlu1 %v24308_v54, %s20205_s18 }
 0xc69   : > { %19864 = vrcp.f32 %v8732_v8 }
 0xc6a   : > { %v19857_v19 = vpop.eup %19856 }
 0xc6b   : > { %v8729_v53 = vpop.xlane.xlu1 %8728  ;;  %v8765_v18 = vmul.f32 %v19857_v19, %v22400_v28 }
 0xc6c   : > { %19866 = vrcp.f32 %v8729_v53  ;;  %11542 = vrot.lane.b32.xlu1 %v24309_v56, %s20205_s18 }
 0xc6d   : > { %17925 = vmatprep.mubr.msk.f32.mxu0 %vm280_vm0, %v8765_v18  ;;  %19868 = vrcp.f32 %v8738_v62 }
 0xc6e   : > { %v19859_v1 = vpop.eup %19858  ;;  %17926 = vmatmul.mubr.msk.f32.vlgmr.msra.gmra.mrb[62].mxu0 %vm280_vm0, %v8766_v11 }
 0xc6f   : > { %18764 = vmatpush3.bf16.msra.mxu0 %v24363_v51  ;;  %17932 = vmatprep.mubr.msk.f32.mxu0 %vm280_vm0, %v8767_v27  ;;  %v8768_v28 = vmul.f32 %v19859_v1, %v22406_v43  ;;  %v19861_v7 = vpop.eup %19860 }
 0xc70   : > { %18766 = vmatprep.subr.bf16.mxu0 %v24364_v44  ;;  %11631 = vrot.lane.b32.xlu1 %v24312_v21, %s20205_s18  ;;  %v8770_v43 = vmul.f32 %v19861_v7, %v22378_v59  ;;  %v18781_v59 = vpack.c.bf16 %v19424_v24, %v19423_v60 }
 0xc72   : > { %v19863_v42 = vpop.eup %19862  ;;  %17933 = vmatmul.mubr.msk.f32.vlgmr.msra.gmra.mrb[64].mxu0 %vm280_vm0, %v8768_v28 }
 0xc73   : > { %18768 = vmatpush3.bf16.msra.mxu0 %v24364_v44  ;;  %v8769_v36 = vmul.f32 %v19863_v42, %v22410_v0  ;;  %v19865_v52 = vpop.eup %19864  ;;  %v24366_v0 = vld [vmem:[#allocation13_spill] sm:$0xff] }
 0xc74   : > { %18770 = vmatprep.subr.bf16.mxu0 %v24365_v33  ;;  %11722 = vrot.lane.b32.xlu1 %v24315_v30, %s20205_s18  ;;  %v8772_v9 = vmul.f32 %v19865_v52, %v22387_v23  ;;  %v24368_v42 = vld [vmem:[#allocation5_spill] sm:$0xff] }
 0xc75   : > { %17939 = vmatprep.mubr.msk.f32.mxu0 %vm280_vm0, %v8769_v36  ;;  %v10605_v55 = vrot.slane %v24368_v42, 2 }
 0xc76   : > { %v19867_v3 = vpop.eup %19866  ;;  %17940 = vmatmul.mubr.msk.f32.vlgmr.msra.gmra.mrb[66].mxu0 %vm280_vm0, %v8770_v43 }
 0xc77   : > { %18772 = vmatpush3.bf16.msra.mxu0 %v24365_v33  ;;  %v8771_v49 = vmul.f32 %v19867_v3, %v22414_v22  ;;  %v19427_v22 = vpop.permute.xlu1 %19426  ;;  %v19869_v12 = vpop.eup %19868 }
 0xc78   : > { %18774 = vmatprep.subr.bf16.mxu0 %v24366_v0  ;;  %19466 = vrot.lane.b32.xlu1 %v24367_v14, %s20204_s17  ;;  %v19429_v39 = vunpack.i.h.bf16 %v19427_v22  ;;  %v19428_v48 = vunpack.i.l.bf16 %v19427_v22  ;;  %v8774_v4 = vmul.f32 %v19869_v12, %v22396_v35  ;;  %v19437_v35 = vpop.permute.xlu0 %19436 }
 0xc79   : > { %17946 = vmatprep.mubr.msk.f32.mxu0 %vm280_vm0, %v8771_v49  ;;  %v19439_v11 = vunpack.i.h.bf16 %v19437_v35  ;;  %v19438_v62 = vunpack.i.l.bf16 %v19437_v35 }
 0xc7a   : > { %17947 = vmatmul.mubr.msk.f32.vlgmr.msra.gmra.mrb[68].mxu0 %vm280_vm0, %v8772_v9  ;;  %v18793_v32 = vpack.c.bf16 %v19429_v39, %v19428_v48 }
 0xc7b   : > { %18776 = vmatpush3.bf16.msra.mxu0 %v24366_v0  ;;  %v9654_v34 = vpop.permute.xlu1 %9653  ;;  %v18817_v28 = vpack.c.bf16 %v19439_v11, %v19438_v62 }
 0xc7c   : > { %18783 = vmatprep.subr.msk.bf16.mxu0 %vm20710_vm2, %v18781_v59  ;;  %11813 = vrot.lane.b32.xlu1 %v24345_v57, %s20205_s18  ;;  %v10202_v1 = vpop.permute.xlu0 %10201 }
 0xc7f   : > { %v9656_v25 = vpop.permute.xlu1 %9655 }
 0xc80   : > { %11904 = vrot.lane.b32.xlu1 %v24347_v13, %s20205_s18  ;;  %v10576_v7 = vpop.permute.xlu0 %10575 }
 0xc84   : > { %v10580_v33 = vpop.permute.xlu0 %10579 }
 0xc88   : > { %v10584_v52 = vpop.permute.xlu0 %10583 }
 0xc8c   : > { %v10588_v24 = vpop.permute.xlu0 %10587 }
 0xc90   : > { %v10592_v49 = vpop.permute.xlu0 %10591 }
 0xc94   : > { %v10596_v9 = vpop.permute.xlu0 %10595 }
 0xc98   : > { %v10600_v22 = vpop.permute.xlu0 %10599 }
 0xca8   : > { %v8735_v23 = vpop.xlane.xlu1 %8734 }
 0xca9   : > { %19870 = vrcp.f32 %v8735_v23 }
 0xcac   : > { %v19432_v16 = vpop.permute.xlu1 %19431 }
 0xcad   : > { %v19434_v19 = vunpack.i.h.bf16 %v19432_v16  ;;  %v19433_v53 = vunpack.i.l.bf16 %v19432_v16 }
 0xcaf   : > { %v18805_v18 = vpack.c.bf16 %v19434_v19, %v19433_v53 }
 0xcb0   : > { %v9836_v17 = vpop.permute.xlu1 %9835 }
 0xcb3   : > { %v19871_v6 = vpop.eup %19870 }
 0xcb4   : > { %v8773_v8 = vmul.f32 %v19871_v6, %v22455_v40  ;;  %v9838_v51 = vpop.permute.xlu1 %9837 }
 0xcb6   : > { %17953 = vmatprep.mubr.msk.f32.mxu0 %vm280_vm0, %v8773_v8 }
 0xcb7   : > { %17954 = vmatmul.mubr.msk.f32.vlgmr.msra.gmra.mrb[70].mxu0 %vm280_vm0, %v8774_v4 }
 0xcb8   : > { %18786 = vmatpush3.bf16.xpose.msk.msra.mxu0 %vm20710_vm2, %v18781_v59  ;;  %17967 = vmatprep.mubr.msk.f32.mxu0 %vm725_vm1, %v9654_v34  ;;  %v10020_v40 = vpop.permute.xlu1 %10019 }
 0xcb9   : > { %18795 = vmatprep.subr.msk.bf16.mxu0 %vm20710_vm2, %v18793_v32 }
 0xcbc   : > { %v10200_v27 = vpop.permute.xlu1 %10199 }
 0xcbf   : > { %17968 = vmatmul.mubr.msk.f32.vlgmr.msra.gmra.mrb[106].mxu0 %vm725_vm1, %v9656_v25  ;;  %v10604_v25 = vpop.permute.xlu0 %10603 }
 0xcc0   : > { %18798 = vmatpush3.bf16.xpose.msk.msra.mxu0 %vm20710_vm2, %v18793_v32  ;;  %17981 = vmatprep.mubr.msk.f32.mxu0 %vm725_vm1, %v9836_v17  ;;  %v10574_v44 = vpop.permute.xlu1 %10573 }
 0xcc1   : > { %18807 = vmatprep.subr.msk.bf16.mxu0 %vm20710_vm2, %v18805_v18 }
 0xcc4   : > { %v10578_v36 = vpop.permute.xlu1 %10577 }
 0xcc7   : > { %17982 = vmatmul.mubr.msk.f32.vlgmr.msra.gmra.mrb[108].mxu0 %vm725_vm1, %v9838_v51 }
 0xcc8   : > { %18810 = vmatpush3.bf16.xpose.msk.msra.mxu0 %vm20710_vm2, %v18805_v18  ;;  %17995 = vmatprep.mubr.msk.f32.mxu0 %vm725_vm1, %v10018_v15  ;;  %v10582_v43 = vpop.permute.xlu1 %10581 }
 0xcc9   : > { %18819 = vmatprep.subr.msk.bf16.mxu0 %vm20710_vm2, %v18817_v28 }
 0xccc   : > { %v10586_v3 = vpop.permute.xlu1 %10585 }
 0xccf   : > { %17996 = vmatmul.mubr.msk.f32.vlgmr.msra.gmra.mrb[110].mxu0 %vm725_vm1, %v10020_v40 }
 0xcd0   : > { %18822 = vmatpush3.bf16.xpose.msk.msra.mxu0 %vm20710_vm2, %v18817_v28  ;;  %18009 = vmatprep.mubr.msk.f32.mxu0 %vm725_vm1, %v10200_v27  ;;  %v10590_v60 = vpop.permute.xlu1 %10589 }
 0xcd1   : > { %18019 = vmatprep.subr.msk.mxu0 %vm1688_vm3, %v10605_v55 }
 0xcd4   : > { %v10594_v0 = vpop.permute.xlu1 %10593 }
 0xcd7   : > { %18010 = vmatmul.mubr.msk.f32.vlgmr.msra.gmra.mrb[112].mxu0 %vm725_vm1, %v10202_v1 }
 0xcd8   : > { %18021 = vmatprep.mubr.msk.f32.mxu0 %vm725_vm1, %v10574_v44  ;;  %18020 = vmatpush3.msk.msra.mxu0 %vm1688_vm3, %v10605_v55  ;;  %v10598_v59 = vpop.permute.xlu1 %10597 }
 0xcdb   : > { %18022 = vmatmul.mubr.msk.f32.vlgmr.msra.gmra.mrb[114].mxu0 %vm725_vm1, %v10576_v7 }
 0xcdc   : > { %18024 = vmatprep.mubr.msk.f32.mxu0 %vm725_vm1, %v10578_v36  ;;  %v10602_v34 = vpop.permute.xlu1 %10601 }
 0xcdf   : > { %18025 = vmatmul.mubr.msk.f32.gmra.mrb[116].mxu0 %vm725_vm1, %v10580_v33 }
 0xce0   : > { %18027 = vmatprep.mubr.msk.f32.mxu0 %vm725_vm1, %v10582_v43  ;;  %v22667_v55 = vpop.permute.xlu1 %19446 }
 0xce3   : > { %18028 = vmatmul.mubr.msk.f32.gmra.mrb[118].mxu0 %vm725_vm1, %v10584_v52 }
 0xce4   : > { %18030 = vmatprep.mubr.msk.f32.mxu0 %vm725_vm1, %v10586_v3 }
 0xce7   : > { %18031 = vmatmul.mubr.msk.f32.gmra.mrb[120].mxu0 %vm725_vm1, %v10588_v24  ;;  %v22677_v24 = vpop.permute.xlu0 %19441 }
 0xce8   : > { %18033 = vmatprep.mubr.msk.f32.mxu0 %vm725_vm1, %v10590_v60  ;;  %v22679_v60 = vpop.permute.xlu1 %11451 }
 0xceb   : > { %18034 = vmatmul.mubr.msk.f32.gmra.mrb[122].mxu0 %vm725_vm1, %v10592_v49 }
 0xcec   : > { %18036 = vmatprep.mubr.msk.f32.mxu0 %vm725_vm1, %v10594_v0 }
 0xcef   : > { %18037 = vmatmul.mubr.msk.f32.gmra.mrb[124].mxu0 %vm725_vm1, %v10596_v9 }
 0xcf0   : > { %18039 = vmatprep.mubr.msk.f32.mxu0 %vm725_vm1, %v10598_v59 }
 0xcf3   : > { %18040 = vmatmul.mubr.msk.f32.gmra.mrb[126].mxu0 %vm725_vm1, %v10600_v22 }
 0xcf4   : > { %18042 = vmatprep.mubr.msk.f32.mxu0 %vm725_vm1, %v10602_v34  ;;  %v22687_v34 = vpop.permute.xlu0 %11449 }
 0xcf7   : > { %18043 = vmatmul.mubr.msk.f32.gmra.mrb[128].mxu0 %vm725_vm1, %v10604_v25 }
 0xd05   : > { %v17976_v23 = vpop.f32.mrb[88].mxu1 }
 0xd06   : > { %v22635_v16 = vmul.f32 0.70710677, %v17976_v23  ;;  %v9826_v17 = vpop.f32.mrb[89].mxu1  ;;  %v22691_v23 = vpop.permute.xlu1 %11540 }
 0xd07   : > { %v22637_v12 = vmul.f32 0.70710677, %v9826_v17 }
 0xd08   : > { %v10406_v6 = vsel %vm280_vm0, %v22635_v16, -inf }
 0xd09   : > { %10407 = vmax.xlane.f32.xlu1 %v10406_v6  ;;  %v10403_v39 = vsel %vm280_vm0, %v22637_v12, -inf }
 0xd0a   : > { %10404 = vmax.xlane.f32.xlu0 %v10403_v39 }
 0xd0d   : > { %v17990_v48 = vpop.f32.mrb[90].mxu1 }
 0xd0e   : > { %v22643_v8 = vmul.f32 0.70710677, %v17990_v48  ;;  %v10008_v4 = vpop.f32.mrb[91].mxu1  ;;  %v22695_v48 = vpop.permute.xlu0 %19451 }
 0xd0f   : > { %v22645_v32 = vmul.f32 0.70710677, %v10008_v4 }
 0xd10   : > { %v10418_v51 = vsel %vm280_vm0, %v22643_v8, -inf }
 0xd11   : > { %10419 = vmax.xlane.f32.xlu1 %v10418_v51  ;;  %v10415_v15 = vsel %vm280_vm0, %v22645_v32, -inf  ;;  %v22699_v51 = vpop.permute.xlu1 %11542 }
 0xd12   : > { %10416 = vmax.xlane.f32.xlu0 %v10415_v15 }
 0xd15   : > { %v18004_v19 = vpop.f32.mrb[92].mxu1 }
 0xd16   : > { %v22651_v53 = vmul.f32 0.70710677, %v18004_v19  ;;  %v10190_v40 = vpop.f32.mrb[93].mxu1 }
 0xd17   : > { %v22653_v18 = vmul.f32 0.70710677, %v10190_v40  ;;  %v22705_v40 = vpop.permute.xlu0 %19456 }
 0xd18   : > { %v10430_v35 = vsel %vm280_vm0, %v22651_v53, -inf }
 0xd19   : > { %10431 = vmax.xlane.f32.xlu1 %v10430_v35  ;;  %v10427_v11 = vsel %vm280_vm0, %v22653_v18, -inf }
 0xd1a   : > { %10428 = vmax.xlane.f32.xlu0 %v10427_v11  ;;  %v22707_v11 = vpop.permute.xlu1 %11631 }
 0xd1d   : > { %v18018_v62 = vpop.f32.mrb[94].mxu1 }
 0xd1e   : > { %v22659_v27 = vmul.f32 0.70710677, %v18018_v62  ;;  %v10372_v1 = vpop.f32.mrb[95].mxu1 }
 0xd1f   : > { %v22661_v28 = vmul.f32 0.70710677, %v10372_v1 }
 0xd20   : > { %v10442_v44 = vsel %vm280_vm0, %v22659_v27, -inf }
 0xd21   : > { %10443 = vmax.xlane.f32.xlu0 %v10442_v44  ;;  %v10439_v7 = vsel %vm280_vm0, %v22661_v28, -inf }
 0xd22   : > { %10440 = vmax.xlane.f32.xlu1 %v10439_v7 }
 0xd92   : > { %v17969_v42 = vpop.f32.mrb[106].mxu0 }
 0xd93   : > { %v22669_v36 = vmul.f32 0.70710677, %v17969_v42  ;;  %v9735_v33 = vpop.f32.mrb[107].mxu0 }
 0xd94   : > { %v22671_v43 = vmul.f32 0.70710677, %v9735_v33 }
 0xd95   : > { %v10400_v52 = vsel %vm280_vm0, %v22669_v36, -inf }
 0xd96   : > { %10401 = vmax.xlane.f32.xlu1 %v10400_v52  ;;  %v10397_v3 = vsel %vm280_vm0, %v22671_v43, -inf }
 0xd97   : > { %10398 = vmax.xlane.f32.xlu0 %v10397_v3  ;;  %v22717_v3 = vpop.permute.xlu0 %11633 }
 0xd9a   : > { %v17983_v49 = vpop.f32.mrb[108].mxu0 }
 0xd9b   : > { %v22681_v0 = vmul.f32 0.70710677, %v17983_v49  ;;  %v9917_v9 = vpop.f32.mrb[109].mxu0 }
 0xd9c   : > { %v22683_v59 = vmul.f32 0.70710677, %v9917_v9  ;;  %v22719_v9 = vpop.permute.xlu1 %11722 }
 0xd9d   : > { %v10412_v22 = vsel %vm280_vm0, %v22681_v0, -inf }
 0xd9e   : > { %10413 = vmax.xlane.f32.xlu1 %v10412_v22  ;;  %v10409_v25 = vsel %vm280_vm0, %v22683_v59, -inf }
 0xd9f   : > { %10410 = vmax.xlane.f32.xlu0 %v10409_v25 }
 0xda2   : > { %v17997_v17 = vpop.f32.mrb[110].mxu0 }
 0xda3   : > { %v22693_v6 = vmul.f32 0.70710677, %v17997_v17  ;;  %v10099_v39 = vpop.f32.mrb[111].mxu0 }
 0xda4   : > { %v22697_v4 = vmul.f32 0.70710677, %v10099_v39  ;;  %v22723_v39 = vpop.permute.xlu0 %19461 }
 0xda5   : > { %v10424_v15 = vsel %vm280_vm0, %v22693_v6, -inf }
 0xda6   : > { %10425 = vmax.xlane.f32.xlu1 %v10424_v15  ;;  %v10421_v19 = vsel %vm280_vm0, %v22697_v4, -inf }
 0xda7   : > { %10422 = vmax.xlane.f32.xlu0 %v10421_v19  ;;  %v22726_v19 = vpop.permute.xlu1 %19466 }
 0xdaa   : > { %v18011_v35 = vpop.f32.mrb[112].mxu0 }
 0xdab   : > { %v22709_v62 = vmul.f32 0.70710677, %v18011_v35  ;;  %v10281_v1 = vpop.f32.mrb[113].mxu0  ;;  %v22734_v14 = vpop.permute.xlu1 %11813 }
 0xdac   : > { %v22711_v44 = vmul.f32 0.70710677, %v10281_v1 }
 0xdad   : > { %v10436_v7 = vsel %vm280_vm0, %v22709_v62, -inf }
 0xdae   : > { %10437 = vmax.xlane.f32.xlu1 %v10436_v7  ;;  %v18023_v42 = vpop.f32.mrb[114].mxu0  ;;  %v10433_v33 = vsel %vm280_vm0, %v22711_v44, -inf }
 0xdaf   : > { %v10706_v52 = vpop.f32.mrb[115].mxu0  ;;  %10434 = vmax.xlane.f32.xlu0 %v10433_v33  ;;  %v22730_v33 = vpop.permute.xlu0 %11724 }
 0xdb0   : > { %v18829_v49 = vpack.c.bf16 %v18023_v42, %v10706_v52 }
 0xdb2   : > { %v18026_v22 = vpop.f32.mrb[116].mxu0  ;;  %18830 = vmatprep.subr.bf16.mxu0 %v18829_v49 }
 0xdb3   : > { %v10716_v25 = vpop.f32.mrb[117].mxu0  ;;  %18832 = vmatpush3.bf16.msra.mxu0 %v18829_v49  ;;  %v22740_v50 = vpop.permute.xlu0 %11815 }
 0xdb4   : > { %v22721_v17 = vpack.c.bf16 %v18026_v22, %v10716_v25  ;;  %24373 = vst [vmem:[#allocation37_spill] sm:$0xff] %v22740_v50 }
 0xdb6   : > { %24369 = vst [vmem:[#allocation11_spill] sm:$0xff] %v22721_v17  ;;  %v18029_v15 = vpop.f32.mrb[118].mxu0  ;;  %18834 = vmatprep.subr.bf16.mxu0 %v22721_v17 }
 0xdb7   : > { %v10726_v35 = vpop.f32.mrb[119].mxu0 }
 0xdb8   : > { %v22728_v1 = vpack.c.bf16 %v18029_v15, %v10726_v35  ;;  %v22742_v15 = vpop.permute.xlu1 %11904 }
 0xdb9   : > { %24374 = vst [vmem:[#allocation38_spill] sm:$0xff] %v22742_v15 }
 0xdba   : > { %24370 = vst [vmem:[#allocation34_spill] sm:$0xff] %v22728_v1  ;;  %v18032_v7 = vpop.f32.mrb[120].mxu0 }
 0xdbb   : > { %v10736_v42 = vpop.f32.mrb[121].mxu0 }
 0xdbc   : > { %v22732_v52 = vpack.c.bf16 %v18032_v7, %v10736_v42  ;;  %v10405_v7 = vpop.xlane.xlu0 %10404  ;;  %v10408_v5 = vpop.xlane.xlu1 %10407 }
 0xdbe   : > { %24371 = vst [vmem:[#allocation35_spill] sm:$0xff] %v22732_v52  ;;  %v18035_v49 = vpop.f32.mrb[122].mxu0 }
 0xdbf   : > { %11906 = vrot.lane.b32.xlu1 %v24349_v63, %s20205_s18  ;;  %v10746_v22 = vpop.f32.mrb[123].mxu0 }
 0xdc0   : > { %v22738_v25 = vpack.c.bf16 %v18035_v49, %v10746_v22  ;;  %v19444_v49 = vunpack.i.h.bf16 %v22677_v24  ;;  %v19443_v22 = vunpack.i.l.bf16 %v22677_v24  ;;  %v10420_v17 = vpop.xlane.xlu1 %10419  ;;  %v10447_v24 = vsub.f32 %v22637_v12, %v10405_v7 }
 0xdc2   : > { %24372 = vst [vmem:[#allocation36_spill] sm:$0xff] %v22738_v25  ;;  %v18038_v37 = vpop.f32.mrb[124].mxu0  ;;  %v10417_v25 = vpop.xlane.xlu0 %10416 }
 0xdc3   : > { %v10756_v35 = vpop.f32.mrb[125].mxu0 }
 0xdc4   : > { %v22744_v26 = vpack.c.bf16 %v18038_v37, %v10756_v35  ;;  %v10448_v37 = vsub.f32 %v22635_v16, %v10408_v5  ;;  %v22753_v35 = vpack.c.bf16 %v19444_v49, %v19443_v22  ;;  %v10465_v5 = vmul.f32 1.442695, %v10447_v24 }
 0xdc5   : > { %19471 = vrot.lane.b32.xlu0 %v24344_v45, %s20204_s17  ;;  %v10452_v45 = vsub.f32 %v22643_v8, %v10420_v17 }
 0xdc6   : > { %24375 = vst [vmem:[#allocation39_spill] sm:$0xff] %v22744_v26  ;;  %v18041_v42 = vpop.f32.mrb[126].mxu0  ;;  %v10429_v26 = vpop.xlane.xlu0 %10428 }
 0xdc7   : > { %v10766_v31 = vpop.f32.mrb[127].mxu0  ;;  %v10455_v22 = vsub.f32 %v22653_v18, %v10429_v26 }
 0xdc8   : > { %v22748_v52 = vpack.c.bf16 %v18041_v42, %v10766_v31  ;;  %v10467_v31 = vmul.f32 1.442695, %v10448_v37  ;;  %v10475_v42 = vmul.f32 1.442695, %v10452_v45 }
 0xdc9   : > { %v10481_v45 = vmul.f32 1.442695, %v10455_v22 }
 0xdca   : > { %24376 = vst [vmem:[#allocation40_spill] sm:$0xff] %v22748_v52  ;;  %v18044_v1 = vpop.f32.mrb[128].mxu0  ;;  %v10451_v52 = vsub.f32 %v22645_v32, %v10417_v25  ;;  %19872 = vpow2.f32 %v10467_v31 }
 0xdcb   : > { %v10776_v15 = vpop.f32.mrb[129].mxu0  ;;  %19874 = vpow2.f32 %v10475_v42 }
 0xdcc   : > { %v18857_v50 = vpack.c.bf16 %v18044_v1, %v10776_v15  ;;  %v10444_v1 = vpop.xlane.xlu0 %10443  ;;  %v10432_v15 = vpop.xlane.xlu1 %10431  ;;  %v10473_v8 = vmul.f32 1.442695, %v10451_v52  ;;  %19876 = vpow2.f32 %v10465_v5 }
 0xdcd   : > { %v10460_v16 = vsub.f32 %v22659_v27, %v10444_v1 }
 0xdce   : > { %18858 = vmatprep.subr.bf16.mxu1 %v18857_v50  ;;  %19878 = vpow2.f32 %v10473_v8 }
 0xdcf   : > { %18860 = vmatpush3.bf16.msra.mxu1 %v18857_v50  ;;  %v10456_v50 = vsub.f32 %v22651_v53, %v10432_v15  ;;  %v10491_v17 = vmul.f32 1.442695, %v10460_v16 }
 0xdd0   : > { %18863 = vmatprep.subr.msk.bf16.mxu1 %vm20710_vm2, %v22753_v35  ;;  %v10441_v12 = vpop.xlane.xlu1 %10440 }
 0xdd1   : > { %v10483_v49 = vmul.f32 1.442695, %v10456_v50  ;;  %19880 = vpow2.f32 %v10491_v17  ;;  %v10459_v32 = vsub.f32 %v22661_v28, %v10441_v12 }
 0xdd3   : > { %19882 = vpow2.f32 %v10483_v49  ;;  %v10489_v27 = vmul.f32 1.442695, %v10459_v32 }
 0xdd4   : > { %v22765_v25 = vpop.eup %19872  ;;  %19884 = vpow2.f32 %v10481_v45 }
 0xdd5   : > { %v22767_v7 = vpop.eup %19874  ;;  %v10502_v53 = vsel %vm280_vm0, %v22765_v25, 0.0  ;;  %19886 = vpow2.f32 %v10489_v27 }
 0xdd6   : > { %v22771_v52 = vpop.eup %19876  ;;  %v10514_v26 = vsel %vm280_vm0, %v22767_v7, 0.0 }
 0xdd7   : > { %v10499_v28 = vsel %vm280_vm0, %v22771_v52, 0.0 }
 0xdd8   : > { %v22775_v18 = vpop.eup %19878 }
 0xdd9   : > { %v10511_v31 = vsel %vm280_vm0, %v22775_v18, 0.0 }
 0xddb   : > { %v22779_v37 = vpop.eup %19880 }
 0xddc   : > { %v10538_v42 = vsel %vm280_vm0, %v22779_v37, 0.0 }
 0xddd   : > { %v22783_v24 = vpop.eup %19882 }
 0xdde   : > { %v10526_v1 = vsel %vm280_vm0, %v22783_v24, 0.0  ;;  %v22789_v15 = vpop.eup %19884 }
 0xddf   : > { %v10523_v5 = vsel %vm280_vm0, %v22789_v15, 0.0  ;;  %v22793_v16 = vpop.eup %19886 }
 0xde0   : > { %v10535_v8 = vsel %vm280_vm0, %v22793_v16, 0.0 }
 0xde3   : > { %10503 = vadd.xlane.f32.xlu1 %v10502_v53 }
 0xde4   : > { %10515 = vadd.xlane.f32.xlu0 %v10514_v26 }
 0xde7   : > { %10500 = vadd.xlane.f32.xlu1 %v10499_v28 }
 0xde8   : > { %10512 = vadd.xlane.f32.xlu0 %v10511_v31 }
 0xdeb   : > { %10539 = vadd.xlane.f32.xlu1 %v10538_v42 }
 0xdec   : > { %10527 = vadd.xlane.f32.xlu0 %v10526_v1 }
 0xdf0   : > { %10524 = vadd.xlane.f32.xlu0 %v10523_v5 }
 0xdf4   : > { %10536 = vadd.xlane.f32.xlu0 %v10535_v8 }
 0xe23   : > { %v10402_v50 = vpop.xlane.xlu1 %10401 }
 0xe24   : > { %v10446_v17 = vsub.f32 %v22669_v36, %v10402_v50  ;;  %v10399_v49 = vpop.xlane.xlu0 %10398 }
 0xe25   : > { %v10445_v22 = vsub.f32 %v22671_v43, %v10399_v49 }
 0xe26   : > { %v10463_v12 = vmul.f32 1.442695, %v10446_v17 }
 0xe27   : > { %v10461_v45 = vmul.f32 1.442695, %v10445_v22 }
 0xe28   : > { %19888 = vpow2.f32 %v10463_v12 }
 0xe29   : > { %19890 = vpow2.f32 %v10461_v45 }
 0xe2b   : > { %v10414_v32 = vpop.xlane.xlu1 %10413 }
 0xe2c   : > { %v10450_v27 = vsub.f32 %v22681_v0, %v10414_v32  ;;  %v10411_v53 = vpop.xlane.xlu0 %10410 }
 0xe2d   : > { %v10449_v26 = vsub.f32 %v22683_v59, %v10411_v53  ;;  %v24377_v53 = vld [vmem:[#allocation25_spill] sm:$0xff] }
 0xe2e   : > { %v10471_v28 = vmul.f32 1.442695, %v10450_v27 }
 0xe2f   : > { %v10469_v31 = vmul.f32 1.442695, %v10449_v26 }
 0xe30   : > { %19892 = vpow2.f32 %v10471_v28 }
 0xe31   : > { %19894 = vpow2.f32 %v10469_v31 }
 0xe32   : > { %v22801_v42 = vpop.eup %19888 }
 0xe33   : > { %v10426_v36 = vpop.xlane.xlu1 %10425  ;;  %v10496_v43 = vsel %vm280_vm0, %v22801_v42, 0.0  ;;  %v22805_v1 = vpop.eup %19890 }
 0xe34   : > { %v10454_v5 = vsub.f32 %v22693_v6, %v10426_v36  ;;  %v10423_v8 = vpop.xlane.xlu0 %10422  ;;  %10497 = vadd.xlane.f32.xlu1 %v10496_v43  ;;  %v10493_v17 = vsel %vm280_vm0, %v22805_v1, 0.0 }
 0xe35   : > { %v10453_v0 = vsub.f32 %v22697_v4, %v10423_v8 }
 0xe36   : > { %v10479_v50 = vmul.f32 1.442695, %v10454_v5 }
 0xe37   : > { %v10477_v59 = vmul.f32 1.442695, %v10453_v0 }
 0xe38   : > { %19896 = vpow2.f32 %v10479_v50  ;;  %10494 = vadd.xlane.f32.xlu1 %v10493_v17 }
 0xe39   : > { %19898 = vpow2.f32 %v10477_v59 }
 0xe3a   : > { %v22811_v49 = vpop.eup %19892 }
 0xe3b   : > { %v22813_v22 = vpop.eup %19894  ;;  %v10508_v12 = vsel %vm280_vm0, %v22811_v49, 0.0  ;;  %v10438_v28 = vpop.xlane.xlu1 %10437 }
 0xe3c   : > { %10509 = vadd.xlane.f32.xlu1 %v10508_v12  ;;  %v10505_v6 = vsel %vm280_vm0, %v22813_v22, 0.0  ;;  %v10435_v26 = vpop.xlane.xlu0 %10434  ;;  %v10458_v36 = vsub.f32 %v22709_v62, %v10438_v28 }
 0xe3d   : > { %10506 = vadd.xlane.f32.xlu0 %v10505_v6  ;;  %v10457_v31 = vsub.f32 %v22711_v44, %v10435_v26 }
 0xe3e   : > { %v10487_v5 = vmul.f32 1.442695, %v10458_v36 }
 0xe3f   : > { %v10485_v43 = vmul.f32 1.442695, %v10457_v31  ;;  %v22835_v0 = vpop.permute.xlu1 %11906 }
 0xe40   : > { %v22833_v8 = vpop.permute.xlu0 %19471 }
 0xe41   : > { %19900 = vpow2.f32 %v10485_v43 }
 0xe42   : > { %v22819_v4 = vpop.eup %19896  ;;  %19902 = vpow2.f32 %v10487_v5  ;;  %v19449_v5 = vunpack.i.h.bf16 %v22667_v55 }
 0xe43   : > { %v22821_v45 = vpop.eup %19898  ;;  %v10520_v32 = vsel %vm280_vm0, %v22819_v4, 0.0 }
 0xe44   : > { %10521 = vadd.xlane.f32.xlu1 %v10520_v32  ;;  %v10517_v27 = vsel %vm280_vm0, %v22821_v45, 0.0 }
 0xe45   : > { %10518 = vadd.xlane.f32.xlu0 %v10517_v27 }
 0xe4b   : > { %v22841_v17 = vpop.eup %19900 }
 0xe4c   : > { %v22845_v6 = vpop.eup %19902  ;;  %v10529_v62 = vsel %vm280_vm0, %v22841_v17, 0.0 }
 0xe4d   : > { %v10532_v27 = vsel %vm280_vm0, %v22845_v6, 0.0 }
 0xe55   : > { %11995 = vrot.lane.b32.xlu1 %v24351_v29, %s20205_s18 }
 0xe5b   : > { %19476 = vrot.lane.b32.xlu0 %v24377_v53, %s20204_s17 }
 0xe70   : > { %v22839_v59 = vpop.xlane.xlu1 %10503 }
 0xe71   : > { %v22837_v50 = vpop.xlane.xlu0 %10515 }
 0xe74   : > { %v22847_v44 = vpop.xlane.xlu1 %10500 }
 0xe75   : > { %v22843_v12 = vpop.xlane.xlu0 %10512 }
 0xe78   : > { %v10540_v28 = vpop.xlane.xlu1 %10539 }
 0xe79   : > { %10530 = vadd.xlane.f32.xlu1 %v10529_v62  ;;  %v22851_v32 = vpop.xlane.xlu0 %10527  ;;  %19904 = vrcp.f32 %v10540_v28  ;;  %v19448_v62 = vunpack.i.l.bf16 %v22667_v55  ;;  %v19454_v55 = vunpack.i.h.bf16 %v22695_v48 }
 0xe7a   : > { %10533 = vadd.xlane.f32.xlu0 %v10532_v27 }
 0xe7b   : > { %v18867_v28 = vpack.c.bf16 %v19449_v5, %v19448_v62 }
 0xe7d   : > { %v22855_v26 = vpop.xlane.xlu0 %10524 }
 0xe81   : > { %v10537_v31 = vpop.xlane.xlu0 %10536 }
 0xe82   : > { %19906 = vrcp.f32 %v10537_v31 }
 0xe83   : > { %v19905_v36 = vpop.eup %19904  ;;  %19908 = vrcp.f32 %v22847_v44 }
 0xe84   : > { %v10572_v27 = vmul.f32 %v19905_v36, %v22779_v37  ;;  %v19453_v37 = vunpack.i.l.bf16 %v22695_v48  ;;  %v19458_v48 = vunpack.i.l.bf16 %v22705_v40 }
 0xe8a   : > { %12086 = vrot.lane.b32.xlu1 %v24352_v20, %s20205_s18 }
 0xe8c   : > { %v19907_v43 = vpop.eup %19906 }
 0xe8d   : > { %v10571_v53 = vmul.f32 %v19907_v43, %v22793_v16  ;;  %v24378_v16 = vld [vmem:[#allocation37_spill] sm:$0xff] }
 0xe8e   : > { %12369 = vrot.lane.b32.xlu1 %v24353_v10, %s20206_s19 }
 0xe8f   : > { %18098 = vmatprep.mubr.msk.f32.mxu1 %vm280_vm0, %v10571_v53  ;;  %v24379_v53 = vld [vmem:[#allocation38_spill] sm:$0xff] }
 0xe90   : > { %11997 = vrot.lane.b32.xlu0 %v24348_v38, %s20205_s18  ;;  %18099 = vmatmul.mubr.msk.f32.vlgmr.msra.gmra.mrb[22].mxu1 %vm280_vm0, %v10572_v27 }
 0xe91   : > { %18866 = vmatpush3.bf16.xpose.msk.msra.mxu1 %vm20710_vm2, %v22753_v35  ;;  %18105 = vmatprep.mubr.msk.f32.mxu1 %vm725_vm1, %v22687_v34  ;;  %v18873_v35 = vpack.c.bf16 %v19454_v55, %v19453_v37  ;;  %v19459_v34 = vunpack.i.h.bf16 %v22705_v40  ;;  %v19463_v40 = vunpack.i.l.bf16 %v22723_v39 }
 0xe92   : > { %18869 = vmatprep.subr.msk.bf16.mxu1 %vm20710_vm2, %v18867_v28  ;;  %12373 = vrot.lane.b32.xlu1 %v24308_v54, %s20206_s19 }
 0xe94   : > { %12088 = vrot.lane.b32.xlu0 %v24350_v41, %s20205_s18 }
 0xe96   : > { %12377 = vrot.lane.b32.xlu1 %v24312_v21, %s20206_s19 }
 0xe98   : > { %18106 = vmatmul.mubr.msk.f32.vlgmr.msra.gmra.mrb[96].mxu1 %vm725_vm1, %v22679_v60  ;;  %12371 = vrot.lane.b32.xlu0 %v24306_v58, %s20206_s19  ;;  %v18879_v60 = vpack.c.bf16 %v19459_v34, %v19458_v48 }
 0xe99   : > { %18872 = vmatpush3.bf16.xpose.msk.msra.mxu1 %vm20710_vm2, %v18867_v28  ;;  %18112 = vmatprep.mubr.msk.f32.mxu1 %vm725_vm1, %v22691_v23  ;;  %v19464_v23 = vunpack.i.h.bf16 %v22723_v39  ;;  %v19468_v39 = vunpack.i.l.bf16 %v22726_v19 }
 0xe9a   : > { %18875 = vmatprep.subr.msk.bf16.mxu1 %vm20710_vm2, %v18873_v35  ;;  %12381 = vrot.lane.b32.xlu1 %v24315_v30, %s20206_s19 }
 0xe9c   : > { %12375 = vrot.lane.b32.xlu0 %v24309_v56, %s20206_s19 }
 0xe9e   : > { %12385 = vrot.lane.b32.xlu1 %v24345_v57, %s20206_s19 }
 0xea0   : > { %18113 = vmatmul.mubr.msk.f32.vlgmr.msra.gmra.mrb[98].mxu1 %vm725_vm1, %v22699_v51  ;;  %12379 = vrot.lane.b32.xlu0 %v24313_v47, %s20206_s19  ;;  %v18885_v51 = vpack.c.bf16 %v19464_v23, %v19463_v40  ;;  %v24382_v23 = vld [vmem:[#allocation35_spill] sm:$0xff] }
 0xea1   : > { %18878 = vmatpush3.bf16.xpose.msk.msra.mxu1 %vm20710_vm2, %v18873_v35  ;;  %18119 = vmatprep.mubr.msk.f32.mxu1 %vm725_vm1, %v22707_v11  ;;  %v19469_v11 = vunpack.i.h.bf16 %v22726_v19  ;;  %v19473_v19 = vunpack.i.l.bf16 %v22833_v8 }
 0xea2   : > { %18881 = vmatprep.subr.msk.bf16.mxu1 %vm20710_vm2, %v18879_v60  ;;  %12389 = vrot.lane.b32.xlu1 %v24347_v13, %s20206_s19 }
 0xea4   : > { %12383 = vrot.lane.b32.xlu0 %v24316_v2, %s20206_s19 }
 0xea6   : > { %12393 = vrot.lane.b32.xlu1 %v24351_v29, %s20206_s19 }
 0xea8   : > { %18120 = vmatmul.mubr.msk.f32.vlgmr.msra.gmra.mrb[100].mxu1 %vm725_vm1, %v22717_v3  ;;  %12387 = vrot.lane.b32.xlu0 %v24318_v46, %s20206_s19  ;;  %v18891_v3 = vpack.c.bf16 %v19469_v11, %v19468_v39 }
 0xea9   : > { %18884 = vmatpush3.bf16.xpose.msk.msra.mxu1 %vm20710_vm2, %v18879_v60  ;;  %18126 = vmatprep.mubr.msk.f32.mxu1 %vm725_vm1, %v22719_v9  ;;  %v19474_v9 = vunpack.i.h.bf16 %v22833_v8 }
 0xeaa   : > { %18887 = vmatprep.subr.msk.bf16.mxu1 %vm20710_vm2, %v18885_v51  ;;  %12397 = vrot.lane.b32.xlu1 %v24352_v20, %s20206_s19 }
 0xeac   : > { %12391 = vrot.lane.b32.xlu0 %v24349_v63, %s20206_s19 }
 0xeb0   : > { %18127 = vmatmul.mubr.msk.f32.vlgmr.msra.gmra.mrb[102].mxu1 %vm725_vm1, %v22730_v33  ;;  %12395 = vrot.lane.b32.xlu0 %v24348_v38, %s20206_s19  ;;  %v18897_v33 = vpack.c.bf16 %v19474_v9, %v19473_v19 }
 0xeb1   : > { %18890 = vmatpush3.bf16.xpose.msk.msra.mxu1 %vm20710_vm2, %v18885_v51  ;;  %18133 = vmatprep.mubr.msk.f32.mxu1 %vm725_vm1, %v22734_v14  ;;  %v22961_v14 = vld [vmem:[%s24167_s2 + $0x8] sm:$0xff] }
 0xeb2   : > { %18893 = vmatprep.subr.msk.bf16.mxu1 %vm20710_vm2, %v18891_v3  ;;  %v12401_v8 = vrot.slane %v22961_v14, 4 }
 0xeb4   : > { %12399 = vrot.lane.b32.xlu0 %v24350_v41, %s20206_s19 }
 0xeb8   : > { %18134 = vmatmul.mubr.msk.f32.vlgmr.msra.gmra.mrb[104].mxu1 %vm725_vm1, %v24378_v16 }
 0xeb9   : > { %18896 = vmatpush3.bf16.xpose.msk.msra.mxu1 %vm20710_vm2, %v18891_v3  ;;  %18140 = vmatprep.mubr.msk.f32.mxu1 %vm725_vm1, %v24379_v53 }
 0xeba   : > { %18899 = vmatprep.subr.msk.bf16.mxu1 %vm20710_vm2, %v18897_v33 }
 0xec0   : > { %18141 = vmatmul.mubr.msk.f32.vlgmr.msra.gmra.mrb[106].mxu1 %vm725_vm1, %v22835_v0  ;;  %v19909_v0 = vpop.eup %19908 }
 0xec1   : > { %18902 = vmatpush3.bf16.xpose.msk.msra.mxu1 %vm20710_vm2, %v18897_v33  ;;  %v10498_v31 = vpop.xlane.xlu1 %10497 }
 0xec2   : > { %18157 = vmatprep.subr.msk.mxu1 %vm1688_vm3, %v12401_v8  ;;  %19910 = vrcp.f32 %v10498_v31 }
 0xec5   : > { %v10495_v36 = vpop.xlane.xlu1 %10494 }
 0xec6   : > { %19912 = vrcp.f32 %v10495_v36 }
 0xec7   : > { %19914 = vrcp.f32 %v22839_v59  ;;  %v10559_v59 = vmul.f32 %v19909_v0, %v22771_v52 }
 0xec9   : > { %v10510_v43 = vpop.xlane.xlu1 %10509 }
 0xeca   : > { %v10507_v5 = vpop.xlane.xlu0 %10506 }
 0xecb   : > { %19916 = vrcp.f32 %v10507_v5 }
 0xecc   : > { %19918 = vrcp.f32 %v10510_v43  ;;  %v19911_v62 = vpop.eup %19910 }
 0xecd   : > { %19920 = vrcp.f32 %v22843_v12  ;;  %v10558_v44 = vmul.f32 %v19911_v62, %v22801_v42  ;;  %v24380_v12 = vld [vmem:[#allocation11_spill] sm:$0xff] }
 0xece   : > { %19922 = vrcp.f32 %v22837_v50 }
 0xed0   : > { %v19913_v27 = vpop.eup %19912 }
 0xed1   : > { %v10522_v28 = vpop.xlane.xlu1 %10521  ;;  %v10557_v55 = vmul.f32 %v19913_v27, %v22805_v1  ;;  %v19915_v35 = vpop.eup %19914  ;;  %v24381_v1 = vld [vmem:[#allocation34_spill] sm:$0xff] }
 0xed2   : > { %v10519_v37 = vpop.xlane.xlu0 %10518  ;;  %v10560_v42 = vmul.f32 %v19915_v35, %v22765_v25 }
 0xed3   : > { %19924 = vrcp.f32 %v10519_v37  ;;  %18049 = vmatprep.mubr.msk.f32.mxu0 %vm280_vm0, %v10557_v55 }
 0xed4   : > { %18050 = vmatmul.mubr.msk.f32.vlgmr.msra.gmra.mrb[58].mxu0 %vm280_vm0, %v10558_v44  ;;  %19926 = vrcp.f32 %v10522_v28 }
 0xed5   : > { %v19917_v34 = vpop.eup %19916  ;;  %18836 = vmatpush3.bf16.msra.mxu0 %v24380_v12  ;;  %v11996_v48 = vpop.permute.xlu1 %11995  ;;  %18056 = vmatprep.mubr.msk.f32.mxu0 %vm280_vm0, %v10559_v59  ;;  %19928 = vrcp.f32 %v22855_v26 }
 0xed6   : > { %18838 = vmatprep.subr.bf16.mxu0 %v24381_v1  ;;  %18147 = vmatprep.mubr.msk.f32.mxu1 %vm725_vm1, %v11996_v48  ;;  %v10561_v50 = vmul.f32 %v19917_v34, %v22813_v22  ;;  %v19919_v52 = vpop.eup %19918  ;;  %19930 = vrcp.f32 %v22851_v32  ;;  %v24383_v22 = vld [vmem:[#allocation36_spill] sm:$0xff] }
 0xed7   : > { %v19921_v60 = vpop.eup %19920  ;;  %v10562_v26 = vmul.f32 %v19919_v52, %v22811_v49  ;;  %v19477_v49 = vpop.permute.xlu0 %19476 }
 0xed8   : > { %18057 = vmatmul.mubr.msk.f32.vlgmr.msra.gmra.mrb[60].mxu0 %vm280_vm0, %v10560_v42  ;;  %v19923_v40 = vpop.eup %19922  ;;  %v10563_v51 = vmul.f32 %v19921_v60, %v22775_v18  ;;  %v24384_v18 = vld [vmem:[#allocation39_spill] sm:$0xff]  ;;  %v19479_v16 = vunpack.i.h.bf16 %v19477_v49 }
 0xed9   : > { %18840 = vmatpush3.bf16.msra.mxu0 %v24381_v1  ;;  %18063 = vmatprep.mubr.msk.f32.mxu0 %vm280_vm0, %v10561_v50  ;;  %v10564_v32 = vmul.f32 %v19923_v40, %v22767_v7  ;;  %v19478_v7 = vunpack.i.l.bf16 %v19477_v49 }
 0xeda   : > { %18842 = vmatprep.subr.bf16.mxu0 %v24382_v23 }
 0xedb   : > { %v18903_v31 = vpack.c.bf16 %v19479_v16, %v19478_v7 }
 0xedc   : > { %18064 = vmatmul.mubr.msk.f32.vlgmr.msra.gmra.mrb[62].mxu0 %vm280_vm0, %v10562_v26 }
 0xedd   : > { %v19925_v25 = vpop.eup %19924  ;;  %18844 = vmatpush3.bf16.msra.mxu0 %v24382_v23  ;;  %18070 = vmatprep.mubr.msk.f32.mxu0 %vm280_vm0, %v10563_v51 }
 0xede   : > { %18846 = vmatprep.subr.bf16.mxu0 %v24383_v22  ;;  %v10565_v11 = vmul.f32 %v19925_v25, %v22821_v45  ;;  %v19927_v39 = vpop.eup %19926  ;;  %v24385_v45 = vld [vmem:[#allocation40_spill] sm:$0xff] }
 0xedf   : > { %v19929_v3 = vpop.eup %19928  ;;  %v10566_v9 = vmul.f32 %v19927_v39, %v22819_v4 }
 0xee0   : > { %18071 = vmatmul.mubr.msk.f32.vlgmr.msra.gmra.mrb[64].mxu0 %vm280_vm0, %v10564_v32  ;;  %v19931_v19 = vpop.eup %19930  ;;  %v10567_v33 = vmul.f32 %v19929_v3, %v22789_v15 }
 0xee1   : > { %18848 = vmatpush3.bf16.msra.mxu0 %v24383_v22  ;;  %18077 = vmatprep.mubr.msk.f32.mxu0 %vm280_vm0, %v10565_v11  ;;  %v10568_v53 = vmul.f32 %v19931_v19, %v22783_v24 }
 0xee2   : > { %18850 = vmatprep.subr.bf16.mxu0 %v24384_v18 }
 0xee4   : > { %18078 = vmatmul.mubr.msk.f32.vlgmr.msra.gmra.mrb[66].mxu0 %vm280_vm0, %v10566_v9 }
 0xee5   : > { %18852 = vmatpush3.bf16.msra.mxu0 %v24384_v18  ;;  %18084 = vmatprep.mubr.msk.f32.mxu0 %vm280_vm0, %v10567_v33 }
 0xee6   : > { %18854 = vmatprep.subr.bf16.mxu0 %v24385_v45 }
 0xee8   : > { %18085 = vmatmul.mubr.msk.f32.vlgmr.msra.gmra.mrb[68].mxu0 %vm280_vm0, %v10568_v53 }
 0xee9   : > { %18856 = vmatpush3.bf16.msra.mxu0 %v24385_v45 }
 0xeea   : > { %18905 = vmatprep.subr.msk.bf16.mxu0 %vm20710_vm2, %v18903_v31 }
 0xf06   : > { %v10531_v15 = vpop.xlane.xlu1 %10530 }
 0xf07   : > { %19932 = vrcp.f32 %v10531_v15  ;;  %v10534_v4 = vpop.xlane.xlu0 %10533 }
 0xf08   : > { %19934 = vrcp.f32 %v10534_v4 }
 0xf0a   : > { %v12087_v36 = vpop.permute.xlu1 %12086 }
 0xf0b   : > { %v11998_v43 = vpop.permute.xlu0 %11997 }
 0xf0c   : > { %18148 = vmatmul.mubr.msk.f32.vlgmr.msra.gmra.mrb[108].mxu1 %vm725_vm1, %v11998_v43 }
 0xf0d   : > { %18158 = vmatpush3.msk.msra.mxu1 %vm1688_vm3, %v12401_v8 }
 0xf0e   : > { %v12370_v24 = vpop.permute.xlu1 %12369 }
 0xf0f   : > { %v12089_v5 = vpop.permute.xlu0 %12088  ;;  %18159 = vmatprep.mubr.msk.f32.mxu1 %vm725_vm1, %v12370_v24 }
 0xf11   : > { %v19933_v0 = vpop.eup %19932 }
 0xf12   : > { %v19935_v62 = vpop.eup %19934  ;;  %v12374_v27 = vpop.permute.xlu1 %12373  ;;  %v10569_v28 = vmul.f32 %v19933_v0, %v22841_v17 }
 0xf13   : > { %v12372_v55 = vpop.permute.xlu0 %12371  ;;  %v10570_v44 = vmul.f32 %v19935_v62, %v22845_v6 }
 0xf14   : > { %18091 = vmatprep.mubr.msk.f32.mxu0 %vm280_vm0, %v10569_v28  ;;  %18160 = vmatmul.mubr.msk.f32.vlgmr.msra.gmra.mrb[110].mxu1 %vm725_vm1, %v12372_v55 }
 0xf15   : > { %18092 = vmatmul.mubr.msk.f32.vlgmr.msra.gmra.mrb[70].mxu0 %vm280_vm0, %v10570_v44  ;;  %18162 = vmatprep.mubr.msk.f32.mxu1 %vm725_vm1, %v12374_v27 }
 0xf16   : > { %18908 = vmatpush3.bf16.xpose.msk.msra.mxu0 %vm20710_vm2, %v18903_v31  ;;  %v12378_v14 = vpop.permute.xlu1 %12377  ;;  %18154 = vmatprep.mubr.msk.f32.mxu0 %vm725_vm1, %v12087_v36 }
 0xf17   : > { %v12376_v8 = vpop.permute.xlu0 %12375 }
 0xf18   : > { %18163 = vmatmul.mubr.msk.f32.gmra.mrb[112].mxu1 %vm725_vm1, %v12376_v8 }
 0xf19   : > { %18165 = vmatprep.mubr.msk.f32.mxu1 %vm725_vm1, %v12378_v14 }
 0xf1a   : > { %v12382_v17 = vpop.permute.xlu1 %12381 }
 0xf1b   : > { %v12380_v6 = vpop.permute.xlu0 %12379 }
 0xf1c   : > { %18166 = vmatmul.mubr.msk.f32.gmra.mrb[114].mxu1 %vm725_vm1, %v12380_v6 }
 0xf1d   : > { %18155 = vmatmul.mubr.msk.f32.vlgmr.msra.gmra.mrb[130].mxu0 %vm725_vm1, %v12089_v5  ;;  %18168 = vmatprep.mubr.msk.f32.mxu1 %vm725_vm1, %v12382_v17 }
 0xf1e   : > { %v12386_v37 = vpop.permute.xlu1 %12385 }
 0xf1f   : > { %v12384_v35 = vpop.permute.xlu0 %12383 }
 0xf20   : > { %18169 = vmatmul.mubr.msk.f32.gmra.mrb[116].mxu1 %vm725_vm1, %v12384_v35 }
 0xf21   : > { %18171 = vmatprep.mubr.msk.f32.mxu1 %vm725_vm1, %v12386_v37 }
 0xf22   : > { %v12390_v59 = vpop.permute.xlu1 %12389 }
 0xf23   : > { %v12388_v34 = vpop.permute.xlu0 %12387 }
 0xf24   : > { %18172 = vmatmul.mubr.msk.f32.gmra.mrb[118].mxu1 %vm725_vm1, %v12388_v34 }
 0xf25   : > { %18174 = vmatprep.mubr.msk.f32.mxu1 %vm725_vm1, %v12390_v59 }
 0xf26   : > { %v12394_v12 = vpop.permute.xlu1 %12393 }
 0xf27   : > { %v12392_v48 = vpop.permute.xlu0 %12391 }
 0xf28   : > { %18175 = vmatmul.mubr.msk.f32.gmra.mrb[120].mxu1 %vm725_vm1, %v12392_v48 }
 0xf29   : > { %18177 = vmatprep.mubr.msk.f32.mxu1 %vm725_vm1, %v12394_v12 }
 0xf2a   : > { %v12398_v42 = vpop.permute.xlu1 %12397 }
 0xf2b   : > { %v12396_v1 = vpop.permute.xlu0 %12395 }
 0xf2c   : > { %18178 = vmatmul.mubr.msk.f32.gmra.mrb[122].mxu1 %vm725_vm1, %v12396_v1 }
 0xf2d   : > { %18180 = vmatprep.mubr.msk.f32.mxu1 %vm725_vm1, %v12398_v42 }
 0xf2f   : > { %v12400_v50 = vpop.permute.xlu0 %12399 }
 0xf30   : > { %18181 = vmatmul.mubr.msk.f32.gmra.mrb[124].mxu1 %vm725_vm1, %v12400_v50 }
 0xf6b   : > { %v18107_v52 = vpop.f32.mrb[96].mxu1 }
 0xf6c   : > { %v23043_v60 = vmul.f32 0.70710677, %v18107_v52  ;;  %v11531_v23 = vpop.f32.mrb[97].mxu1 }
 0xf6d   : > { %v23045_v26 = vmul.f32 0.70710677, %v11531_v23 }
 0xf6e   : > { %v12196_v40 = vsel %vm280_vm0, %v23043_v60, -inf }
 0xf6f   : > { %12197 = vmax.xlane.f32.xlu0 %v12196_v40  ;;  %v12193_v51 = vsel %vm280_vm0, %v23045_v26, -inf }
 0xf70   : > { %12194 = vmax.xlane.f32.xlu1 %v12193_v51 }
 0xf73   : > { %v18114_v25 = vpop.f32.mrb[98].mxu1 }
 0xf74   : > { %v23051_v22 = vmul.f32 0.70710677, %v18114_v25  ;;  %v11622_v32 = vpop.f32.mrb[99].mxu1 }
 0xf75   : > { %v23053_v11 = vmul.f32 0.70710677, %v11622_v32 }
 0xf76   : > { %v12202_v39 = vsel %vm280_vm0, %v23051_v22, -inf }
 0xf77   : > { %12203 = vmax.xlane.f32.xlu1 %v12202_v39  ;;  %v12199_v3 = vsel %vm280_vm0, %v23053_v11, -inf }
 0xf78   : > { %12200 = vmax.xlane.f32.xlu0 %v12199_v3 }
 0xf7b   : > { %v18121_v49 = vpop.f32.mrb[100].mxu1 }
 0xf7c   : > { %v23059_v18 = vmul.f32 0.70710677, %v18121_v49  ;;  %v11713_v9 = vpop.f32.mrb[101].mxu1 }
 0xf7d   : > { %v23061_v19 = vmul.f32 0.70710677, %v11713_v9 }
 0xf7e   : > { %v12208_v33 = vsel %vm280_vm0, %v23059_v18, -inf }
 0xf7f   : > { %12209 = vmax.xlane.f32.xlu1 %v12208_v33  ;;  %v12205_v16 = vsel %vm280_vm0, %v23061_v19, -inf }
 0xf80   : > { %12206 = vmax.xlane.f32.xlu0 %v12205_v16 }
 0xf83   : > { %v18128_v7 = vpop.f32.mrb[102].mxu1 }
 0xf84   : > { %v23067_v45 = vmul.f32 0.70710677, %v18128_v7  ;;  %v11804_v53 = vpop.f32.mrb[103].mxu1 }
 0xf85   : > { %v23069_v31 = vmul.f32 0.70710677, %v11804_v53 }
 0xf86   : > { %v12214_v15 = vsel %vm280_vm0, %v23067_v45, -inf }
 0xf87   : > { %12215 = vmax.xlane.f32.xlu1 %v12214_v15  ;;  %v12211_v4 = vsel %vm280_vm0, %v23069_v31, -inf }
 0xf88   : > { %12212 = vmax.xlane.f32.xlu0 %v12211_v4 }
 0xf8b   : > { %v18135_v36 = vpop.f32.mrb[104].mxu1 }
 0xf8c   : > { %v23075_v43 = vmul.f32 0.70710677, %v18135_v36  ;;  %v11895_v24 = vpop.f32.mrb[105].mxu1 }
 0xf8d   : > { %v23077_v5 = vmul.f32 0.70710677, %v11895_v24 }
 0xf8e   : > { %v12220_v0 = vsel %vm280_vm0, %v23075_v43, -inf }
 0xf8f   : > { %12221 = vmax.xlane.f32.xlu1 %v12220_v0  ;;  %v12217_v62 = vsel %vm280_vm0, %v23077_v5, -inf }
 0xf90   : > { %12218 = vmax.xlane.f32.xlu0 %v12217_v62 }
 0xf93   : > { %v18142_v27 = vpop.f32.mrb[106].mxu1 }
 0xf94   : > { %v23083_v28 = vmul.f32 0.70710677, %v18142_v27  ;;  %v11986_v55 = vpop.f32.mrb[107].mxu1 }
 0xf95   : > { %v23085_v44 = vmul.f32 0.70710677, %v11986_v55 }
 0xf96   : > { %v12226_v14 = vsel %vm280_vm0, %v23083_v28, -inf }
 0xf97   : > { %12227 = vmax.xlane.f32.xlu1 %v12226_v14  ;;  %v12223_v8 = vsel %vm280_vm0, %v23085_v44, -inf }
 0xf98   : > { %12224 = vmax.xlane.f32.xlu0 %v12223_v8 }
 0xfdf   : > { %v18149_v17 = vpop.f32.mrb[108].mxu1 }
 0xfe0   : > { %v23091_v6 = vmul.f32 0.70710677, %v18149_v17  ;;  %v12077_v37 = vpop.f32.mrb[109].mxu1 }
 0xfe1   : > { %v23093_v35 = vmul.f32 0.70710677, %v12077_v37 }
 0xfe2   : > { %v12232_v59 = vsel %vm280_vm0, %v23091_v6, -inf }
 0xfe3   : > { %12233 = vmax.xlane.f32.xlu1 %v12232_v59  ;;  %v12229_v34 = vsel %vm280_vm0, %v23093_v35, -inf }
 0xfe4   : > { %12230 = vmax.xlane.f32.xlu0 %v12229_v34 }
 0xfe7   : > { %v18161_v12 = vpop.f32.mrb[110].mxu1 }
 0xfe8   : > { %v12502_v48 = vpop.f32.mrb[111].mxu1 }
 0xfe9   : > { %v18909_v1 = vpack.c.bf16 %v18161_v12, %v12502_v48 }
 0xfeb   : > { %v18164_v42 = vpop.f32.mrb[112].mxu1  ;;  %18910 = vmatprep.subr.bf16.mxu0 %v18909_v1 }
 0xfec   : > { %v12512_v50 = vpop.f32.mrb[113].mxu1  ;;  %18912 = vmatpush3.bf16.msra.mxu0 %v18909_v1 }
 0xfed   : > { %v23099_v52 = vpack.c.bf16 %v18164_v42, %v12512_v50 }
 0xfef   : > { %v18167_v23 = vpop.f32.mrb[114].mxu1  ;;  %18914 = vmatprep.subr.bf16.mxu0 %v23099_v52 }
 0xff0   : > { %v18156_v40 = vpop.f32.mrb[130].mxu0  ;;  %v12522_v51 = vpop.f32.mrb[115].mxu1 }
 0xff1   : > { %v23102_v25 = vmul.f32 0.70710677, %v18156_v40  ;;  %v12168_v32 = vpop.f32.mrb[131].mxu0  ;;  %v23104_v39 = vpack.c.bf16 %v18167_v23, %v12522_v51 }
 0xff2   : > { %v23106_v3 = vmul.f32 0.70710677, %v12168_v32 }
 0xff3   : > { %v12238_v49 = vsel %vm280_vm0, %v23102_v25, -inf  ;;  %v18170_v9 = vpop.f32.mrb[116].mxu1 }
 0xff4   : > { %12239 = vmax.xlane.f32.xlu1 %v12238_v49  ;;  %v12532_v33 = vpop.f32.mrb[117].mxu1  ;;  %v12235_v16 = vsel %vm280_vm0, %v23106_v3, -inf }
 0xff5   : > { %v23112_v7 = vpack.c.bf16 %v18170_v9, %v12532_v33  ;;  %12236 = vmax.xlane.f32.xlu0 %v12235_v16 }
 0xff7   : > { %v18173_v53 = vpop.f32.mrb[118].mxu1 }
 0xff8   : > { %v12542_v15 = vpop.f32.mrb[119].mxu1 }
 0xff9   : > { %v23114_v4 = vpack.c.bf16 %v18173_v53, %v12542_v15 }
 0xffb   : > { %v18176_v36 = vpop.f32.mrb[120].mxu1 }
 0xffc   : > { %v12198_v24 = vpop.xlane.xlu0 %12197  ;;  %v12552_v0 = vpop.f32.mrb[121].mxu1 }
 0xffd   : > { %v12242_v62 = vsub.f32 %v23043_v60, %v12198_v24  ;;  %v12195_v27 = vpop.xlane.xlu1 %12194  ;;  %v23117_v55 = vpack.c.bf16 %v18176_v36, %v12552_v0 }
 0xffe   : > { %v12241_v14 = vsub.f32 %v23045_v26, %v12195_v27 }
 0xfff   : > { %v12259_v8 = vmul.f32 1.442695, %v12242_v62  ;;  %v18179_v17 = vpop.f32.mrb[122].mxu1 }
0x1000   : > { %v12257_v37 = vmul.f32 1.442695, %v12241_v14  ;;  %v12562_v59 = vpop.f32.mrb[123].mxu1 }
0x1001   : > { %19936 = vpow2.f32 %v12259_v8  ;;  %v23120_v34 = vpack.c.bf16 %v18179_v17, %v12562_v59 }
0x1002   : > { %19938 = vpow2.f32 %v12257_v37 }
0x1003   : > { %v18182_v12 = vpop.f32.mrb[124].mxu1 }
0x1004   : > { %v12204_v48 = vpop.xlane.xlu1 %12203  ;;  %v12572_v1 = vpop.f32.mrb[125].mxu1 }
0x1005   : > { %v12244_v42 = vsub.f32 %v23051_v22, %v12204_v48  ;;  %v12201_v50 = vpop.xlane.xlu0 %12200  ;;  %v18937_v60 = vpack.c.bf16 %v18182_v12, %v12572_v1 }
0x1006   : > { %v12243_v23 = vsub.f32 %v23053_v11, %v12201_v50 }
0x1007   : > { %v12263_v40 = vmul.f32 1.442695, %v12244_v42  ;;  %18938 = vmatprep.subr.bf16.mxu1 %v18937_v60 }
0x1008   : > { %v12261_v26 = vmul.f32 1.442695, %v12243_v23  ;;  %18940 = vmatpush3.bf16.msra.mxu1 %v18937_v60 }
0x1009   : > { %19940 = vpow2.f32 %v12263_v40 }
0x100a   : > { %19942 = vpow2.f32 %v12261_v26 }
0x100b   : > { %v23124_v51 = vpop.eup %19936 }
0x100c   : > { %v23126_v32 = vpop.eup %19938  ;;  %v12210_v49 = vpop.xlane.xlu1 %12209  ;;  %v12292_v9 = vsel %vm280_vm0, %v23124_v51, 0.0 }
0x100d   : > { %v12246_v22 = vsub.f32 %v23059_v18, %v12210_v49  ;;  %v12207_v33 = vpop.xlane.xlu0 %12206  ;;  %12293 = vadd.xlane.f32.xlu1 %v12292_v9  ;;  %v12289_v11 = vsel %vm280_vm0, %v23126_v32, 0.0 }
0x100e   : > { %v12245_v16 = vsub.f32 %v23061_v19, %v12207_v33  ;;  %12290 = vadd.xlane.f32.xlu0 %v12289_v11 }
0x100f   : > { %v12267_v53 = vmul.f32 1.442695, %v12246_v22 }
0x1010   : > { %v12265_v15 = vmul.f32 1.442695, %v12245_v16 }
0x1011   : > { %19944 = vpow2.f32 %v12267_v53 }
0x1012   : > { %19946 = vpow2.f32 %v12265_v15 }
0x1013   : > { %v23134_v36 = vpop.eup %19940 }
0x1014   : > { %v23136_v24 = vpop.eup %19942  ;;  %v12216_v0 = vpop.xlane.xlu1 %12215  ;;  %v12298_v18 = vsel %vm280_vm0, %v23134_v36, 0.0 }
0x1015   : > { %v12248_v62 = vsub.f32 %v23067_v45, %v12216_v0  ;;  %v12213_v27 = vpop.xlane.xlu0 %12212  ;;  %12299 = vadd.xlane.f32.xlu1 %v12298_v18  ;;  %v12295_v19 = vsel %vm280_vm0, %v23136_v24, 0.0 }
0x1016   : > { %v12247_v14 = vsub.f32 %v23069_v31, %v12213_v27  ;;  %12296 = vadd.xlane.f32.xlu0 %v12295_v19  ;;  %v24386_v27 = vld [vmem:[#allocation7_spill] sm:$0xff]  ;;  %v24387_v19 = vld [vmem:[#allocation4_spill] sm:$0xff] }
0x1017   : > { %v12271_v8 = vmul.f32 1.442695, %v12248_v62 }
0x1018   : > { %v12269_v17 = vmul.f32 1.442695, %v12247_v14 }
0x1019   : > { %19948 = vpow2.f32 %v12271_v8 }
0x101a   : > { %19950 = vpow2.f32 %v12269_v17 }
0x101b   : > { %v23144_v37 = vpop.eup %19944 }
0x101c   : > { %v23146_v59 = vpop.eup %19946  ;;  %v12222_v12 = vpop.xlane.xlu1 %12221  ;;  %v12304_v45 = vsel %vm280_vm0, %v23144_v37, 0.0 }
0x101d   : > { %v12250_v48 = vsub.f32 %v23075_v43, %v12222_v12  ;;  %v12219_v1 = vpop.xlane.xlu0 %12218  ;;  %12305 = vadd.xlane.f32.xlu1 %v12304_v45  ;;  %v12301_v31 = vsel %vm280_vm0, %v23146_v59, 0.0 }
0x101e   : > { %v12249_v42 = vsub.f32 %v23077_v5, %v12219_v1  ;;  %12302 = vadd.xlane.f32.xlu0 %v12301_v31 }
0x101f   : > { %v12275_v50 = vmul.f32 1.442695, %v12250_v48 }
0x1020   : > { %v12273_v60 = vmul.f32 1.442695, %v12249_v42 }
0x1021   : > { %19952 = vpow2.f32 %v12275_v50 }
0x1022   : > { %19954 = vpow2.f32 %v12273_v60 }
0x1023   : > { %v23154_v23 = vpop.eup %19948 }
0x1024   : > { %v23156_v40 = vpop.eup %19950  ;;  %v12228_v26 = vpop.xlane.xlu1 %12227  ;;  %v12310_v43 = vsel %vm280_vm0, %v23154_v23, 0.0 }
0x1025   : > { %v12252_v49 = vsub.f32 %v23083_v28, %v12228_v26  ;;  %v12225_v9 = vpop.xlane.xlu0 %12224  ;;  %12311 = vadd.xlane.f32.xlu1 %v12310_v43  ;;  %v12307_v5 = vsel %vm280_vm0, %v23156_v40, 0.0 }
0x1026   : > { %v12251_v22 = vsub.f32 %v23085_v44, %v12225_v9  ;;  %12308 = vadd.xlane.f32.xlu0 %v12307_v5 }
0x1027   : > { %v12279_v33 = vmul.f32 1.442695, %v12252_v49 }
0x1028   : > { %v12277_v11 = vmul.f32 1.442695, %v12251_v22 }
0x1029   : > { %19956 = vpow2.f32 %v12279_v33 }
0x102a   : > { %19958 = vpow2.f32 %v12277_v11 }
0x102b   : > { %v23164_v16 = vpop.eup %19952 }
0x102c   : > { %v23166_v53 = vpop.eup %19954  ;;  %v12316_v15 = vsel %vm280_vm0, %v23164_v16, 0.0 }
0x102d   : > { %12317 = vadd.xlane.f32.xlu1 %v12316_v15  ;;  %v12313_v28 = vsel %vm280_vm0, %v23166_v53, 0.0  ;;  %v24388_v15 = vld [vmem:[#allocation10_spill] sm:$0xff] }
0x102e   : > { %12314 = vadd.xlane.f32.xlu0 %v12313_v28 }
0x1033   : > { %v23172_v0 = vpop.eup %19956 }
0x1034   : > { %v23174_v44 = vpop.eup %19958  ;;  %v12322_v18 = vsel %vm280_vm0, %v23172_v0, 0.0 }
0x1035   : > { %12323 = vadd.xlane.f32.xlu1 %v12322_v18  ;;  %v12319_v62 = vsel %vm280_vm0, %v23174_v44, 0.0 }
0x1036   : > { %12320 = vadd.xlane.f32.xlu0 %v12319_v62 }
0x1046   : > { %19486 = vrot.lane.b32.xlu1 %v24386_v27, %s20207_s25 }
0x104a   : > { %13245 = vrot.lane.b32.xlu1 %v24353_v10, %s20208_s26 }
0x104c   : > { %19481 = vrot.lane.b32.xlu0 %v24387_v19, %s20207_s25 }
0x1070   : > { %v12234_v14 = vpop.xlane.xlu1 %12233 }
0x1071   : > { %v12254_v8 = vsub.f32 %v23091_v6, %v12234_v14  ;;  %v12231_v17 = vpop.xlane.xlu0 %12230 }
0x1072   : > { %v12253_v12 = vsub.f32 %v23093_v35, %v12231_v17  ;;  %v24389_v17 = vld [vmem:[#allocation15_spill] sm:$0xff] }
0x1073   : > { %v12283_v45 = vmul.f32 1.442695, %v12254_v8 }
0x1074   : > { %v12281_v48 = vmul.f32 1.442695, %v12253_v12 }
0x1075   : > { %19960 = vpow2.f32 %v12283_v45 }
0x1076   : > { %19962 = vpow2.f32 %v12281_v48 }
0x107f   : > { %v23188_v1 = vpop.eup %19960 }
0x1080   : > { %v23190_v31 = vpop.eup %19962  ;;  %v12328_v42 = vsel %vm280_vm0, %v23188_v1, 0.0 }
0x1081   : > { %v12240_v50 = vpop.xlane.xlu1 %12239  ;;  %12329 = vadd.xlane.f32.xlu1 %v12328_v42  ;;  %v12325_v60 = vsel %vm280_vm0, %v23190_v31, 0.0 }
0x1082   : > { %v12256_v6 = vsub.f32 %v23102_v25, %v12240_v50  ;;  %v12237_v26 = vpop.xlane.xlu0 %12236  ;;  %12326 = vadd.xlane.f32.xlu0 %v12325_v60 }
0x1083   : > { %v12255_v35 = vsub.f32 %v23106_v3, %v12237_v26 }
0x1084   : > { %v12287_v43 = vmul.f32 1.442695, %v12256_v6  ;;  %v24391_v6 = vld [vmem:[#allocation21_spill] sm:$0xff] }
0x1085   : > { %v12285_v49 = vmul.f32 1.442695, %v12255_v35 }
0x1086   : > { %19964 = vpow2.f32 %v12287_v43 }
0x1087   : > { %19966 = vpow2.f32 %v12285_v49 }
0x1090   : > { %v23198_v9 = vpop.eup %19964 }
0x1091   : > { %v23200_v5 = vpop.eup %19966  ;;  %v12334_v22 = vsel %vm280_vm0, %v23198_v9, 0.0 }
0x1092   : > { %12335 = vadd.xlane.f32.xlu1 %v12334_v22  ;;  %v12331_v33 = vsel %vm280_vm0, %v23200_v5, 0.0 }
0x1093   : > { %12332 = vadd.xlane.f32.xlu0 %v12331_v33 }
0x109a   : > { %v12294_v25 = vpop.xlane.xlu1 %12293 }
0x109b   : > { %19968 = vrcp.f32 %v12294_v25  ;;  %v12291_v11 = vpop.xlane.xlu0 %12290 }
0x109c   : > { %19970 = vrcp.f32 %v12291_v11 }
0x10a2   : > { %v12300_v3 = vpop.xlane.xlu1 %12299 }
0x10a3   : > { %19972 = vrcp.f32 %v12300_v3  ;;  %19491 = vrot.lane.b32.xlu1 %v24388_v15, %s20207_s25  ;;  %v12297_v28 = vpop.xlane.xlu0 %12296 }
0x10a4   : > { %19974 = vrcp.f32 %v12297_v28  ;;  %v24393_v28 = vld [vmem:[#allocation25_spill] sm:$0xff] }
0x10a5   : > { %v19969_v18 = vpop.eup %19968 }
0x10a6   : > { %v19971_v62 = vpop.eup %19970  ;;  %v12354_v19 = vmul.f32 %v19969_v18, %v23124_v51 }
0x10a7   : > { %13338 = vrot.lane.b32.xlu1 %v24309_v56, %s20208_s26  ;;  %v12353_v27 = vmul.f32 %v19971_v62, %v23126_v32 }
0x10a9   : > { %13247 = vrot.lane.b32.xlu0 %v24306_v58, %s20208_s26  ;;  %18187 = vmatprep.mubr.msk.f32.mxu0 %vm280_vm0, %v12353_v27 }
0x10aa   : > { %v12306_v14 = vpop.xlane.xlu1 %12305  ;;  %18188 = vmatmul.mubr.msk.f32.vlgmr.msra.gmra.mrb[58].mxu0 %vm280_vm0, %v12354_v19 }
0x10ab   : > { %19976 = vrcp.f32 %v12306_v14  ;;  %18916 = vmatpush3.bf16.msra.mxu0 %v23099_v52  ;;  %13427 = vrot.lane.b32.xlu1 %v24312_v21, %s20208_s26  ;;  %v12303_v8 = vpop.xlane.xlu0 %12302  ;;  %v24390_v52 = vld [vmem:[#allocation16_spill] sm:$0xff] }
0x10ac   : > { %18918 = vmatprep.subr.bf16.mxu0 %v23104_v39  ;;  %19978 = vrcp.f32 %v12303_v8 }
0x10ad   : > { %v19973_v32 = vpop.eup %19972  ;;  %13336 = vrot.lane.b32.xlu0 %v24308_v54, %s20208_s26 }
0x10ae   : > { %v19975_v51 = vpop.eup %19974  ;;  %v12356_v45 = vmul.f32 %v19973_v32, %v23134_v36 }
0x10af   : > { %19501 = vrot.lane.b32.xlu1 %v24389_v17, %s20207_s25  ;;  %v12355_v12 = vmul.f32 %v19975_v51, %v23136_v24 }
0x10b1   : > { %19496 = vrot.lane.b32.xlu0 %v24390_v52, %s20207_s25  ;;  %18194 = vmatprep.mubr.msk.f32.mxu0 %vm280_vm0, %v12355_v12 }
0x10b2   : > { %v12312_v48 = vpop.xlane.xlu1 %12311  ;;  %18195 = vmatmul.mubr.msk.f32.vlgmr.msra.gmra.mrb[60].mxu0 %vm280_vm0, %v12356_v45 }
0x10b3   : > { %19980 = vrcp.f32 %v12312_v48  ;;  %18920 = vmatpush3.bf16.msra.mxu0 %v23104_v39  ;;  %13520 = vrot.lane.b32.xlu1 %v24316_v2, %s20208_s26  ;;  %v12309_v42 = vpop.xlane.xlu0 %12308 }
0x10b4   : > { %18922 = vmatprep.subr.bf16.mxu0 %v23112_v7  ;;  %19982 = vrcp.f32 %v12309_v42 }
0x10b5   : > { %v19977_v24 = vpop.eup %19976  ;;  %13429 = vrot.lane.b32.xlu0 %v24313_v47, %s20208_s26 }
0x10b6   : > { %v19979_v36 = vpop.eup %19978  ;;  %v12358_v60 = vmul.f32 %v19977_v24, %v23144_v37  ;;  %v24392_v37 = vld [vmem:[#allocation22_spill] sm:$0xff] }
0x10b7   : > { %13609 = vrot.lane.b32.xlu1 %v24345_v57, %s20208_s26  ;;  %v12357_v50 = vmul.f32 %v19979_v36, %v23146_v59 }
0x10b9   : > { %13518 = vrot.lane.b32.xlu0 %v24315_v30, %s20208_s26  ;;  %18201 = vmatprep.mubr.msk.f32.mxu0 %vm280_vm0, %v12357_v50 }
0x10ba   : > { %v12318_v39 = vpop.xlane.xlu1 %12317  ;;  %18202 = vmatmul.mubr.msk.f32.vlgmr.msra.gmra.mrb[62].mxu0 %vm280_vm0, %v12358_v60 }
0x10bb   : > { %19984 = vrcp.f32 %v12318_v39  ;;  %18924 = vmatpush3.bf16.msra.mxu0 %v23112_v7  ;;  %19511 = vrot.lane.b32.xlu1 %v24391_v6, %s20207_s25  ;;  %v12315_v26 = vpop.xlane.xlu0 %12314 }
0x10bc   : > { %18926 = vmatprep.subr.bf16.mxu0 %v23114_v4  ;;  %19986 = vrcp.f32 %v12315_v26 }
0x10bd   : > { %v19981_v59 = vpop.eup %19980  ;;  %19506 = vrot.lane.b32.xlu0 %v24392_v37, %s20207_s25 }
0x10be   : > { %v19983_v35 = vpop.eup %19982  ;;  %v12360_v49 = vmul.f32 %v19981_v59, %v23154_v23 }
0x10bf   : > { %13702 = vrot.lane.b32.xlu1 %v24349_v63, %s20208_s26  ;;  %v12359_v43 = vmul.f32 %v19983_v35, %v23156_v40 }
0x10c1   : > { %13611 = vrot.lane.b32.xlu0 %v24318_v46, %s20208_s26  ;;  %18208 = vmatprep.mubr.msk.f32.mxu0 %vm280_vm0, %v12359_v43  ;;  %v20162_v43 = vld [vmem:[%s24167_s2 + $0x8] sm:$0xff] }
0x10c2   : > { %v12324_v7 = vpop.xlane.xlu1 %12323  ;;  %18209 = vmatmul.mubr.msk.f32.vlgmr.msra.gmra.mrb[64].mxu0 %vm280_vm0, %v12360_v49  ;;  %v14197_v49 = vrot.slane %v20162_v43, 6 }
0x10c3   : > { %19988 = vrcp.f32 %v12324_v7  ;;  %18928 = vmatpush3.bf16.msra.mxu0 %v23114_v4  ;;  %13791 = vrot.lane.b32.xlu1 %v24351_v29, %s20208_s26  ;;  %v12321_v22 = vpop.xlane.xlu0 %12320 }
0x10c4   : > { %18930 = vmatprep.subr.bf16.mxu0 %v23117_v55  ;;  %19990 = vrcp.f32 %v12321_v22 }
0x10c5   : > { %v19985_v40 = vpop.eup %19984  ;;  %13700 = vrot.lane.b32.xlu0 %v24347_v13, %s20208_s26 }
0x10c6   : > { %v19987_v23 = vpop.eup %19986  ;;  %v19487_v33 = vpop.permute.xlu1 %19486  ;;  %v12362_v3 = vmul.f32 %v19985_v40, %v23164_v16 }
0x10c7   : > { %v19489_v25 = vunpack.i.h.bf16 %v19487_v33  ;;  %v19488_v11 = vunpack.i.l.bf16 %v19487_v33  ;;  %13882 = vrot.lane.b32.xlu1 %v24352_v20, %s20208_s26  ;;  %v12361_v4 = vmul.f32 %v19987_v23, %v23166_v53  ;;  %v19482_v18 = vpop.permute.xlu0 %19481 }
0x10c8   : > { %v19484_v62 = vunpack.i.h.bf16 %v19482_v18  ;;  %v19483_v27 = vunpack.i.l.bf16 %v19482_v18 }
0x10c9   : > { %v23268_v15 = vpack.c.bf16 %v19489_v25, %v19488_v11  ;;  %19516 = vrot.lane.b32.xlu0 %v24393_v28, %s20207_s25  ;;  %18215 = vmatprep.mubr.msk.f32.mxu0 %vm280_vm0, %v12361_v4 }
0x10ca   : > { %18216 = vmatmul.mubr.msk.f32.vlgmr.msra.gmra.mrb[66].mxu0 %vm280_vm0, %v12362_v3  ;;  %v18941_v19 = vpack.c.bf16 %v19484_v62, %v19483_v27 }
0x10cb   : > { %18932 = vmatpush3.bf16.msra.mxu0 %v23117_v55  ;;  %14165 = vrot.lane.b32.xlu1 %v24353_v10, %s20209_s28 }
0x10cc   : > { %18934 = vmatprep.subr.bf16.mxu0 %v23120_v34  ;;  %18949 = vmatprep.subr.msk.bf16.mxu1 %vm20710_vm2, %v23268_v15 }
0x10cd   : > { %v19989_v16 = vpop.eup %19988  ;;  %13793 = vrot.lane.b32.xlu0 %v24348_v38, %s20208_s26 }
0x10ce   : > { %v19991_v53 = vpop.eup %19990  ;;  %v12364_v10 = vmul.f32 %v19989_v16, %v23172_v0 }
0x10cf   : > { %14169 = vrot.lane.b32.xlu1 %v24308_v54, %s20209_s28  ;;  %v12363_v55 = vmul.f32 %v19991_v53, %v23174_v44 }
0x10d1   : > { %13884 = vrot.lane.b32.xlu0 %v24350_v41, %s20208_s26  ;;  %18222 = vmatprep.mubr.msk.f32.mxu0 %vm280_vm0, %v12363_v55 }
0x10d2   : > { %18223 = vmatmul.mubr.msk.f32.vlgmr.msra.gmra.mrb[68].mxu0 %vm280_vm0, %v12364_v10 }
0x10d3   : > { %18936 = vmatpush3.bf16.msra.mxu0 %v23120_v34  ;;  %14173 = vrot.lane.b32.xlu1 %v24312_v21, %s20209_s28 }
0x10d4   : > { %18943 = vmatprep.subr.msk.bf16.mxu0 %vm20710_vm2, %v18941_v19 }
0x10d5   : > { %14167 = vrot.lane.b32.xlu0 %v24306_v58, %s20209_s28  ;;  %v13246_v58 = vpop.permute.xlu1 %13245 }
0x10d7   : > { %14177 = vrot.lane.b32.xlu1 %v24315_v30, %s20209_s28 }
0x10d9   : > { %14171 = vrot.lane.b32.xlu0 %v24309_v56, %s20209_s28 }
0x10db   : > { %14181 = vrot.lane.b32.xlu1 %v24345_v57, %s20209_s28 }
0x10dd   : > { %14175 = vrot.lane.b32.xlu0 %v24313_v47, %s20209_s28 }
0x10df   : > { %14185 = vrot.lane.b32.xlu1 %v24347_v13, %s20209_s28 }
0x10e1   : > { %14179 = vrot.lane.b32.xlu0 %v24316_v2, %s20209_s28 }
0x10e3   : > { %14189 = vrot.lane.b32.xlu1 %v24351_v29, %s20209_s28 }
0x10e5   : > { %14183 = vrot.lane.b32.xlu0 %v24318_v46, %s20209_s28 }
0x10e7   : > { %14193 = vrot.lane.b32.xlu1 %v24352_v20, %s20209_s28 }
0x10e9   : > { %14187 = vrot.lane.b32.xlu0 %v24349_v63, %s20209_s28 }
0x10ed   : > { %14191 = vrot.lane.b32.xlu0 %v24348_v38, %s20209_s28 }
0x10f1   : > { %14195 = vrot.lane.b32.xlu0 %v24350_v41, %s20209_s28  ;;  %s24097_s28 = scalar_lea.vmem %s24171_s6, %s16005_s24 }
0x110e   : > { %v12330_v54 = vpop.xlane.xlu1 %12329 }
0x110f   : > { %19992 = vrcp.f32 %v12330_v54  ;;  %v12327_v56 = vpop.xlane.xlu0 %12326 }
0x1110   : > { %19994 = vrcp.f32 %v12327_v56 }
0x1119   : > { %v19993_v21 = vpop.eup %19992 }
0x111a   : > { %v19995_v47 = vpop.eup %19994  ;;  %v12366_v2 = vmul.f32 %v19993_v21, %v23188_v1 }
0x111b   : > { %v12365_v30 = vmul.f32 %v19995_v47, %v23190_v31 }
0x111d   : > { %18229 = vmatprep.mubr.msk.f32.mxu0 %vm280_vm0, %v12365_v30 }
0x111e   : > { %18230 = vmatmul.mubr.msk.f32.vlgmr.msra.gmra.mrb[70].mxu0 %vm280_vm0, %v12366_v2 }
0x111f   : > { %v12336_v46 = vpop.xlane.xlu1 %12335  ;;  %18946 = vmatpush3.bf16.xpose.msk.msra.mxu0 %vm20710_vm2, %v18941_v19  ;;  %18243 = vmatprep.mubr.msk.f32.mxu0 %vm725_vm1, %v13246_v58 }
0x1120   : > { %19996 = vrcp.f32 %v12336_v46  ;;  %v12333_v57 = vpop.xlane.xlu0 %12332 }
0x1121   : > { %19998 = vrcp.f32 %v12333_v57 }
0x1123   : > { %v19492_v13 = vpop.permute.xlu1 %19491 }
0x1124   : > { %v19494_v38 = vunpack.i.h.bf16 %v19492_v13  ;;  %v19493_v63 = vunpack.i.l.bf16 %v19492_v13  ;;  %v13248_v41 = vpop.permute.xlu0 %13247 }
0x1126   : > { %v18953_v29 = vpack.c.bf16 %v19494_v38, %v19493_v63  ;;  %18244 = vmatmul.mubr.msk.f32.vlgmr.msra.gmra.mrb[132].mxu0 %vm725_vm1, %v13248_v41 }
0x1127   : > { %v13339_v20 = vpop.permute.xlu1 %13338 }
0x1128   : > { %v13337_v34 = vpop.permute.xlu0 %13336  ;;  %18955 = vmatprep.subr.msk.bf16.mxu0 %vm20710_vm2, %v18953_v29 }
0x1129   : > { %18958 = vmatpush3.bf16.xpose.msk.msra.mxu0 %vm20710_vm2, %v18953_v29 }
0x112a   : > { %v19997_v0 = vpop.eup %19996 }
0x112b   : > { %v19999_v44 = vpop.eup %19998  ;;  %v13428_v1 = vpop.permute.xlu1 %13427  ;;  %v12368_v8 = vmul.f32 %v19997_v0, %v23198_v9 }
0x112c   : > { %v19497_v31 = vpop.permute.xlu0 %19496  ;;  %18257 = vmatprep.mubr.msk.f32.mxu0 %vm725_vm1, %v13428_v1  ;;  %v12367_v14 = vmul.f32 %v19999_v44, %v23200_v5 }
0x112d   : > { %v19499_v32 = vunpack.i.h.bf16 %v19497_v31  ;;  %v19498_v51 = vunpack.i.l.bf16 %v19497_v31 }
0x112e   : > { %18236 = vmatprep.mubr.msk.f32.mxu1 %vm280_vm0, %v12367_v14 }
0x112f   : > { %v18959_v17 = vpack.c.bf16 %v19499_v32, %v19498_v51  ;;  %v19502_v12 = vpop.permute.xlu1 %19501  ;;  %18237 = vmatmul.mubr.msk.f32.vlgmr.msra.gmra.mrb[22].mxu1 %vm280_vm0, %v12368_v8 }
0x1130   : > { %v19504_v45 = vunpack.i.h.bf16 %v19502_v12  ;;  %v19503_v52 = vunpack.i.l.bf16 %v19502_v12  ;;  %18952 = vmatpush3.bf16.xpose.msk.msra.mxu1 %vm20710_vm2, %v23268_v15  ;;  %18250 = vmatprep.mubr.msk.f32.mxu1 %vm725_vm1, %v13337_v34  ;;  %v13430_v48 = vpop.permute.xlu0 %13429 }
0x1131   : > { %18258 = vmatmul.mubr.msk.f32.vlgmr.msra.gmra.mrb[134].mxu0 %vm725_vm1, %v13430_v48  ;;  %18961 = vmatprep.subr.msk.bf16.mxu1 %vm20710_vm2, %v18959_v17 }
0x1132   : > { %v18965_v9 = vpack.c.bf16 %v19504_v45, %v19503_v52 }
0x1133   : > { %v13521_v5 = vpop.permute.xlu1 %13520 }
0x1134   : > { %v13519_v42 = vpop.permute.xlu0 %13518  ;;  %18967 = vmatprep.subr.msk.bf16.mxu0 %vm20710_vm2, %v18965_v9 }
0x1135   : > { %18970 = vmatpush3.bf16.xpose.msk.msra.mxu0 %vm20710_vm2, %v18965_v9 }
0x1137   : > { %18251 = vmatmul.mubr.msk.f32.vlgmr.msra.gmra.mrb[126].mxu1 %vm725_vm1, %v13339_v20  ;;  %v13610_v24 = vpop.permute.xlu1 %13609 }
0x1138   : > { %18964 = vmatpush3.bf16.xpose.msk.msra.mxu1 %vm20710_vm2, %v18959_v17  ;;  %18264 = vmatprep.mubr.msk.f32.mxu1 %vm725_vm1, %v13519_v42  ;;  %v19507_v36 = vpop.permute.xlu0 %19506 }
0x1139   : > { %v19509_v50 = vunpack.i.h.bf16 %v19507_v36  ;;  %v19508_v60 = vunpack.i.l.bf16 %v19507_v36  ;;  %18271 = vmatprep.mubr.msk.f32.mxu0 %vm725_vm1, %v13610_v24 }
0x113b   : > { %v18971_v39 = vpack.c.bf16 %v19509_v50, %v19508_v60  ;;  %v19512_v6 = vpop.permute.xlu1 %19511 }
0x113c   : > { %v19514_v26 = vunpack.i.h.bf16 %v19512_v6  ;;  %v19513_v59 = vunpack.i.l.bf16 %v19512_v6  ;;  %v13612_v37 = vpop.permute.xlu0 %13611 }
0x113d   : > { %18272 = vmatmul.mubr.msk.f32.vlgmr.msra.gmra.mrb[136].mxu0 %vm725_vm1, %v13612_v37  ;;  %18973 = vmatprep.subr.msk.bf16.mxu1 %vm20710_vm2, %v18971_v39 }
0x113e   : > { %v18977_v35 = vpack.c.bf16 %v19514_v26, %v19513_v59 }
0x113f   : > { %18265 = vmatmul.mubr.msk.f32.vlgmr.msra.gmra.mrb[128].mxu1 %vm725_vm1, %v13521_v5  ;;  %v13703_v7 = vpop.permute.xlu1 %13702 }
0x1140   : > { %18976 = vmatpush3.bf16.xpose.msk.msra.mxu1 %vm20710_vm2, %v18971_v39  ;;  %v13701_v22 = vpop.permute.xlu0 %13700  ;;  %18979 = vmatprep.subr.msk.bf16.mxu0 %vm20710_vm2, %v18977_v35 }
0x1141   : > { %18278 = vmatprep.mubr.msk.f32.mxu1 %vm725_vm1, %v13701_v22  ;;  %18982 = vmatpush3.bf16.xpose.msk.msra.mxu0 %vm20710_vm2, %v18977_v35 }
0x1142   : > { %18295 = vmatprep.subr.msk.mxu0 %vm1688_vm3, %v14197_v49 }
0x1143   : > { %v13792_v40 = vpop.permute.xlu1 %13791 }
0x1144   : > { %v19517_v23 = vpop.permute.xlu0 %19516  ;;  %18285 = vmatprep.mubr.msk.f32.mxu0 %vm725_vm1, %v13792_v40 }
0x1145   : > { %v19519_v33 = vunpack.i.h.bf16 %v19517_v23  ;;  %v19518_v25 = vunpack.i.l.bf16 %v19517_v23 }
0x1147   : > { %v18983_v11 = vpack.c.bf16 %v19519_v33, %v19518_v25  ;;  %18279 = vmatmul.mubr.msk.f32.vlgmr.msra.gmra.mrb[130].mxu1 %vm725_vm1, %v13703_v7  ;;  %v13883_v4 = vpop.permute.xlu1 %13882 }
0x1148   : > { %v13794_v3 = vpop.permute.xlu0 %13793  ;;  %18292 = vmatprep.mubr.msk.f32.mxu1 %vm725_vm1, %v13883_v4 }
0x1149   : > { %18286 = vmatmul.mubr.msk.f32.vlgmr.msra.gmra.mrb[138].mxu0 %vm725_vm1, %v13794_v3  ;;  %18985 = vmatprep.subr.msk.bf16.mxu1 %vm20710_vm2, %v18983_v11 }
0x114a   : > { %18988 = vmatpush3.bf16.xpose.msk.msra.mxu1 %vm20710_vm2, %v18983_v11  ;;  %18296 = vmatpush3.msk.msra.mxu0 %vm1688_vm3, %v14197_v49 }
0x114b   : > { %v14166_v15 = vpop.permute.xlu1 %14165 }
0x114c   : > { %v13885_v28 = vpop.permute.xlu0 %13884  ;;  %18297 = vmatprep.mubr.msk.f32.mxu0 %vm725_vm1, %v14166_v15 }
0x114f   : > { %v14170_v18 = vpop.permute.xlu1 %14169 }
0x1150   : > { %v14168_v16 = vpop.permute.xlu0 %14167 }
0x1151   : > { %18293 = vmatmul.mubr.msk.f32.vlgmr.msra.gmra.mrb[132].mxu1 %vm725_vm1, %v13885_v28  ;;  %18298 = vmatmul.mubr.msk.f32.vlgmr.msra.gmra.mrb[140].mxu0 %vm725_vm1, %v14168_v16 }
0x1152   : > { %18300 = vmatprep.mubr.msk.f32.mxu0 %vm725_vm1, %v14170_v18 }
0x1153   : > { %v14174_v53 = vpop.permute.xlu1 %14173 }
0x1154   : > { %v14172_v62 = vpop.permute.xlu0 %14171 }
0x1155   : > { %18301 = vmatmul.mubr.msk.f32.gmra.mrb[142].mxu0 %vm725_vm1, %v14172_v62 }
0x1156   : > { %18303 = vmatprep.mubr.msk.f32.mxu0 %vm725_vm1, %v14174_v53 }
0x1157   : > { %v14178_v61 = vpop.permute.xlu1 %14177 }
0x1158   : > { %v14176_v27 = vpop.permute.xlu0 %14175 }
0x1159   : > { %18304 = vmatmul.mubr.msk.f32.gmra.mrb[144].mxu0 %vm725_vm1, %v14176_v27 }
0x115a   : > { %18306 = vmatprep.mubr.msk.f32.mxu0 %vm725_vm1, %v14178_v61 }
0x115b   : > { %v14182_v55 = vpop.permute.xlu1 %14181 }
0x115c   : > { %v14180_v10 = vpop.permute.xlu0 %14179 }
0x115d   : > { %18307 = vmatmul.mubr.msk.f32.gmra.mrb[146].mxu0 %vm725_vm1, %v14180_v10 }
0x115e   : > { %18309 = vmatprep.mubr.msk.f32.mxu0 %vm725_vm1, %v14182_v55 }
0x115f   : > { %v14186_v19 = vpop.permute.xlu1 %14185 }
0x1160   : > { %v14184_v58 = vpop.permute.xlu0 %14183 }
0x1161   : > { %18310 = vmatmul.mubr.msk.f32.gmra.mrb[148].mxu0 %vm725_vm1, %v14184_v58 }
0x1162   : > { %18312 = vmatprep.mubr.msk.f32.mxu0 %vm725_vm1, %v14186_v19 }
0x1163   : > { %v14190_v54 = vpop.permute.xlu1 %14189 }
0x1164   : > { %v14188_v56 = vpop.permute.xlu0 %14187 }
0x1165   : > { %18313 = vmatmul.mubr.msk.f32.gmra.mrb[150].mxu0 %vm725_vm1, %v14188_v56 }
0x1166   : > { %18315 = vmatprep.mubr.msk.f32.mxu0 %vm725_vm1, %v14190_v54 }
0x1167   : > { %v14194_v47 = vpop.permute.xlu1 %14193 }
0x1168   : > { %v14192_v21 = vpop.permute.xlu0 %14191 }
0x1169   : > { %18316 = vmatmul.mubr.msk.f32.gmra.mrb[152].mxu0 %vm725_vm1, %v14192_v21 }
0x116a   : > { %18318 = vmatprep.mubr.msk.f32.mxu0 %vm725_vm1, %v14194_v47 }
0x116c   : > { %v14196_v30 = vpop.permute.xlu0 %14195 }
0x116d   : > { %18319 = vmatmul.mubr.msk.f32.gmra.mrb[154].mxu0 %vm725_vm1, %v14196_v30 }
0x11f9   : > { %v18245_v2 = vpop.f32.mrb[132].mxu0 }
0x11fa   : > { %v23396_v46 = vmul.f32 0.70710677, %v18245_v2  ;;  %v13327_v57 = vpop.f32.mrb[133].mxu0 }
0x11fb   : > { %v23398_v13 = vmul.f32 0.70710677, %v13327_v57 }
0x11fc   : > { %v13992_v38 = vsel %vm280_vm0, %v23396_v46, -inf }
0x11fd   : > { %13993 = vmax.xlane.f32.xlu0 %v13992_v38  ;;  %v13989_v63 = vsel %vm280_vm0, %v23398_v13, -inf }
0x11fe   : > { %13990 = vmax.xlane.f32.xlu1 %v13989_v63 }
0x1204   : > { %v18259_v41 = vpop.f32.mrb[134].mxu0 }
0x1205   : > { %v13509_v29 = vpop.f32.mrb[135].mxu0  ;;  %v23408_v1 = vmul.f32 0.70710677, %v18259_v41 }
0x1206   : > { %v23412_v14 = vmul.f32 0.70710677, %v13509_v29 }
0x1207   : > { %v14004_v51 = vsel %vm280_vm0, %v23408_v1, -inf }
0x1208   : > { %v14001_v45 = vsel %vm280_vm0, %v23412_v14, -inf }
0x120a   : > { %v18252_v20 = vpop.f32.mrb[126].mxu1 }
0x120b   : > { %v23404_v34 = vmul.f32 0.70710677, %v18252_v20  ;;  %v13418_v0 = vpop.f32.mrb[127].mxu1 }
0x120c   : > { %v23406_v44 = vmul.f32 0.70710677, %v13418_v0 }
0x120d   : > { %v13998_v31 = vsel %vm280_vm0, %v23404_v34, -inf }
0x120e   : > { %13999 = vmax.xlane.f32.xlu1 %v13998_v31  ;;  %v13995_v8 = vsel %vm280_vm0, %v23406_v44, -inf }
0x120f   : > { %13996 = vmax.xlane.f32.xlu0 %v13995_v8 }
0x1210   : > { %v18273_v32 = vpop.f32.mrb[136].mxu0 }
0x1211   : > { %v13691_v17 = vpop.f32.mrb[137].mxu0  ;;  %v23424_v5 = vmul.f32 0.70710677, %v18273_v32 }
0x1212   : > { %v18266_v12 = vpop.f32.mrb[128].mxu1  ;;  %14005 = vmax.xlane.f32.xlu1 %v14004_v51  ;;  %v23428_v24 = vmul.f32 0.70710677, %v13691_v17 }
0x1213   : > { %v23420_v52 = vmul.f32 0.70710677, %v18266_v12  ;;  %v13600_v48 = vpop.f32.mrb[129].mxu1  ;;  %14002 = vmax.xlane.f32.xlu0 %v14001_v45  ;;  %v14016_v50 = vsel %vm280_vm0, %v23424_v5, -inf }
0x1214   : > { %v23422_v9 = vmul.f32 0.70710677, %v13600_v48  ;;  %v14013_v39 = vsel %vm280_vm0, %v23428_v24, -inf }
0x1215   : > { %v14010_v42 = vsel %vm280_vm0, %v23420_v52, -inf }
0x1216   : > { %14011 = vmax.xlane.f32.xlu1 %v14010_v42  ;;  %v14007_v36 = vsel %vm280_vm0, %v23422_v9, -inf }
0x1217   : > { %14008 = vmax.xlane.f32.xlu0 %v14007_v36 }
0x121a   : > { %v18280_v60 = vpop.f32.mrb[130].mxu1  ;;  %14017 = vmax.xlane.f32.xlu1 %v14016_v50 }
0x121b   : > { %v23436_v6 = vmul.f32 0.70710677, %v18280_v60  ;;  %v13782_v26 = vpop.f32.mrb[131].mxu1  ;;  %14014 = vmax.xlane.f32.xlu0 %v14013_v39 }
0x121c   : > { %v23438_v59 = vmul.f32 0.70710677, %v13782_v26  ;;  %v18287_v37 = vpop.f32.mrb[138].mxu0 }
0x121d   : > { %v23440_v35 = vmul.f32 0.70710677, %v18287_v37  ;;  %v14022_v43 = vsel %vm280_vm0, %v23436_v6, -inf  ;;  %v13873_v49 = vpop.f32.mrb[139].mxu0 }
0x121e   : > { %14023 = vmax.xlane.f32.xlu1 %v14022_v43  ;;  %v23444_v7 = vmul.f32 0.70710677, %v13873_v49  ;;  %v14019_v22 = vsel %vm280_vm0, %v23438_v59, -inf }
0x121f   : > { %14020 = vmax.xlane.f32.xlu0 %v14019_v22  ;;  %v14028_v40 = vsel %vm280_vm0, %v23440_v35, -inf }
0x1220   : > { %v14025_v23 = vsel %vm280_vm0, %v23444_v7, -inf }
0x1222   : > { %14029 = vmax.xlane.f32.xlu1 %v14028_v40 }
0x1223   : > { %14026 = vmax.xlane.f32.xlu0 %v14025_v23 }
0x1224   : > { %v18294_v33 = vpop.f32.mrb[132].mxu1  ;;  %v18299_v25 = vpop.f32.mrb[140].mxu0 }
0x1225   : > { %v23452_v11 = vmul.f32 0.70710677, %v18294_v33  ;;  %v13964_v4 = vpop.f32.mrb[133].mxu1  ;;  %v14298_v3 = vpop.f32.mrb[141].mxu0 }
0x1226   : > { %v23454_v15 = vmul.f32 0.70710677, %v13964_v4  ;;  %v18989_v28 = vpack.c.bf16 %v18299_v25, %v14298_v3 }
0x1227   : > { %v14034_v18 = vsel %vm280_vm0, %v23452_v11, -inf }
0x1228   : > { %14035 = vmax.xlane.f32.xlu1 %v14034_v18  ;;  %v18302_v16 = vpop.f32.mrb[142].mxu0  ;;  %18990 = vmatprep.subr.bf16.mxu0 %v18989_v28  ;;  %v14031_v53 = vsel %vm280_vm0, %v23454_v15, -inf }
0x1229   : > { %v14308_v62 = vpop.f32.mrb[143].mxu0  ;;  %18992 = vmatpush3.bf16.msra.mxu0 %v18989_v28  ;;  %14032 = vmax.xlane.f32.xlu0 %v14031_v53 }
0x122a   : > { %v23460_v61 = vpack.c.bf16 %v18302_v16, %v14308_v62 }
0x122c   : > { %v18305_v27 = vpop.f32.mrb[144].mxu0  ;;  %18994 = vmatprep.subr.bf16.mxu0 %v23460_v61 }
0x122d   : > { %v14318_v55 = vpop.f32.mrb[145].mxu0 }
0x122e   : > { %v23463_v10 = vpack.c.bf16 %v18305_v27, %v14318_v55 }
0x1230   : > { %v18308_v19 = vpop.f32.mrb[146].mxu0 }
0x1231   : > { %v14328_v58 = vpop.f32.mrb[147].mxu0 }
0x1232   : > { %v23465_v54 = vpack.c.bf16 %v18308_v19, %v14328_v58 }
0x1234   : > { %v18311_v56 = vpop.f32.mrb[148].mxu0 }
0x1235   : > { %v14338_v21 = vpop.f32.mrb[149].mxu0 }
0x1236   : > { %v23467_v47 = vpack.c.bf16 %v18311_v56, %v14338_v21 }
0x1238   : > { %v18314_v30 = vpop.f32.mrb[150].mxu0 }
0x1239   : > { %v14348_v2 = vpop.f32.mrb[151].mxu0 }
0x123a   : > { %v23469_v57 = vpack.c.bf16 %v18314_v30, %v14348_v2 }
0x123c   : > { %v18317_v38 = vpop.f32.mrb[152].mxu0 }
0x123d   : > { %v14358_v63 = vpop.f32.mrb[153].mxu0 }
0x123e   : > { %v23471_v41 = vpack.c.bf16 %v18317_v38, %v14358_v63 }
0x1240   : > { %v18320_v29 = vpop.f32.mrb[154].mxu0 }
0x1241   : > { %v14368_v20 = vpop.f32.mrb[155].mxu0 }
0x1242   : > { %v19017_v0 = vpack.c.bf16 %v18320_v29, %v14368_v20 }
0x1244   : > { %19018 = vmatprep.subr.bf16.mxu1 %v19017_v0 }
0x1245   : > { %19020 = vmatpush3.bf16.msra.mxu1 %v19017_v0 }
0x128a   : > { %v13994_v31 = vpop.xlane.xlu0 %13993 }
0x128b   : > { %v14038_v8 = vsub.f32 %v23396_v46, %v13994_v31  ;;  %v13991_v32 = vpop.xlane.xlu1 %13990 }
0x128c   : > { %v14037_v51 = vsub.f32 %v23398_v13, %v13991_v32 }
0x128d   : > { %v14055_v17 = vmul.f32 1.442695, %v14038_v8 }
0x128e   : > { %v14053_v12 = vmul.f32 1.442695, %v14037_v51 }
0x128f   : > { %20000 = vpow2.f32 %v14055_v17 }
0x1290   : > { %20002 = vpow2.f32 %v14053_v12 }
0x1299   : > { %v23475_v45 = vpop.eup %20000 }
0x129a   : > { %v23477_v48 = vpop.eup %20002  ;;  %v14088_v42 = vsel %vm280_vm0, %v23475_v45, 0.0 }
0x129b   : > { %v14000_v36 = vpop.xlane.xlu1 %13999  ;;  %14089 = vadd.xlane.f32.xlu1 %v14088_v42  ;;  %v14085_v50 = vsel %vm280_vm0, %v23477_v48, 0.0 }
0x129c   : > { %v14040_v46 = vsub.f32 %v23404_v34, %v14000_v36  ;;  %v13997_v60 = vpop.xlane.xlu0 %13996  ;;  %14086 = vadd.xlane.f32.xlu0 %v14085_v50 }
0x129d   : > { %v14039_v13 = vsub.f32 %v23406_v44, %v13997_v60 }
0x129e   : > { %v14059_v39 = vmul.f32 1.442695, %v14040_v46 }
0x129f   : > { %v14057_v26 = vmul.f32 1.442695, %v14039_v13  ;;  %v14006_v37 = vpop.xlane.xlu1 %14005 }
0x12a0   : > { %20004 = vpow2.f32 %v14059_v39  ;;  %v14042_v43 = vsub.f32 %v23408_v1, %v14006_v37  ;;  %v14003_v49 = vpop.xlane.xlu0 %14002 }
0x12a1   : > { %20006 = vpow2.f32 %v14057_v26  ;;  %v14041_v22 = vsub.f32 %v23412_v14, %v14003_v49 }
0x12a2   : > { %v14063_v40 = vmul.f32 1.442695, %v14042_v43 }
0x12a3   : > { %v14061_v23 = vmul.f32 1.442695, %v14041_v22  ;;  %v14012_v33 = vpop.xlane.xlu1 %14011 }
0x12a4   : > { %20008 = vpow2.f32 %v14063_v40  ;;  %v14044_v34 = vsub.f32 %v23420_v52, %v14012_v33  ;;  %v14009_v25 = vpop.xlane.xlu0 %14008 }
0x12a5   : > { %20010 = vpow2.f32 %v14061_v23  ;;  %v14043_v44 = vsub.f32 %v23422_v9, %v14009_v25 }
0x12a6   : > { %v14067_v4 = vmul.f32 1.442695, %v14044_v34 }
0x12a7   : > { %v14065_v3 = vmul.f32 1.442695, %v14043_v44  ;;  %v14018_v28 = vpop.xlane.xlu1 %14017 }
0x12a8   : > { %20012 = vpow2.f32 %v14067_v4  ;;  %v14046_v1 = vsub.f32 %v23424_v5, %v14018_v28  ;;  %v14015_v18 = vpop.xlane.xlu0 %14014 }
0x12a9   : > { %20014 = vpow2.f32 %v14065_v3  ;;  %v14045_v14 = vsub.f32 %v23428_v24, %v14015_v18 }
0x12aa   : > { %v23491_v16 = vpop.eup %20004  ;;  %v14071_v53 = vmul.f32 1.442695, %v14046_v1 }
0x12ab   : > { %v23493_v62 = vpop.eup %20006  ;;  %v14069_v52 = vmul.f32 1.442695, %v14045_v14  ;;  %v14024_v27 = vpop.xlane.xlu1 %14023  ;;  %v14094_v9 = vsel %vm280_vm0, %v23491_v16, 0.0 }
0x12ac   : > { %20016 = vpow2.f32 %v14071_v53  ;;  %v14048_v55 = vsub.f32 %v23436_v6, %v14024_v27  ;;  %v14021_v19 = vpop.xlane.xlu0 %14020  ;;  %14095 = vadd.xlane.f32.xlu1 %v14094_v9  ;;  %v14091_v5 = vsel %vm280_vm0, %v23493_v62, 0.0 }
0x12ad   : > { %20018 = vpow2.f32 %v14069_v52  ;;  %v14047_v24 = vsub.f32 %v23438_v59, %v14021_v19  ;;  %14092 = vadd.xlane.f32.xlu0 %v14091_v5 }
0x12ae   : > { %v23501_v58 = vpop.eup %20008  ;;  %v14075_v56 = vmul.f32 1.442695, %v14048_v55 }
0x12af   : > { %v23503_v21 = vpop.eup %20010  ;;  %v14073_v30 = vmul.f32 1.442695, %v14047_v24  ;;  %v14030_v2 = vpop.xlane.xlu1 %14029  ;;  %v14100_v38 = vsel %vm280_vm0, %v23501_v58, 0.0 }
0x12b0   : > { %20020 = vpow2.f32 %v14075_v56  ;;  %v14050_v6 = vsub.f32 %v23440_v35, %v14030_v2  ;;  %14101 = vadd.xlane.f32.xlu1 %v14100_v38  ;;  %v14027_v63 = vpop.xlane.xlu0 %14026  ;;  %v14097_v29 = vsel %vm280_vm0, %v23503_v21, 0.0 }
0x12b1   : > { %20022 = vpow2.f32 %v14073_v30  ;;  %v14049_v59 = vsub.f32 %v23444_v7, %v14027_v63  ;;  %14098 = vadd.xlane.f32.xlu0 %v14097_v29 }
0x12b2   : > { %v23511_v20 = vpop.eup %20012  ;;  %v14079_v0 = vmul.f32 1.442695, %v14050_v6 }
0x12b3   : > { %v23513_v31 = vpop.eup %20014  ;;  %v14077_v8 = vmul.f32 1.442695, %v14049_v59  ;;  %v14106_v32 = vsel %vm280_vm0, %v23511_v20, 0.0 }
0x12b4   : > { %20024 = vpow2.f32 %v14079_v0  ;;  %14107 = vadd.xlane.f32.xlu1 %v14106_v32  ;;  %v14103_v35 = vsel %vm280_vm0, %v23513_v31, 0.0 }
0x12b5   : > { %20026 = vpow2.f32 %v14077_v8  ;;  %14104 = vadd.xlane.f32.xlu0 %v14103_v35  ;;  %v14036_v51 = vpop.xlane.xlu1 %14035 }
0x12b6   : > { %v23519_v17 = vpop.eup %20016  ;;  %v14052_v7 = vsub.f32 %v23452_v11, %v14036_v51  ;;  %v14033_v12 = vpop.xlane.xlu0 %14032 }
0x12b7   : > { %v23522_v42 = vpop.eup %20018  ;;  %v14051_v36 = vsub.f32 %v23454_v15, %v14033_v12  ;;  %v14112_v50 = vsel %vm280_vm0, %v23519_v17, 0.0 }
0x12b8   : > { %v14083_v46 = vmul.f32 1.442695, %v14052_v7  ;;  %14113 = vadd.xlane.f32.xlu1 %v14112_v50  ;;  %v14109_v60 = vsel %vm280_vm0, %v23522_v42, 0.0 }
0x12b9   : > { %v14081_v13 = vmul.f32 1.442695, %v14051_v36  ;;  %14110 = vadd.xlane.f32.xlu0 %v14109_v60  ;;  %v20163_v60 = vld [vmem:[%s20263_s27 + $0x8] sm:$0xff] }
0x12ba   : > { %v23529_v39 = vpop.eup %20020  ;;  %20028 = vpow2.f32 %v14083_v46 }
0x12bb   : > { %v23531_v26 = vpop.eup %20022  ;;  %20030 = vpow2.f32 %v14081_v13  ;;  %v14118_v11 = vsel %vm280_vm0, %v23529_v39, 0.0 }
0x12bc   : > { %14119 = vadd.xlane.f32.xlu1 %v14118_v11  ;;  %v14115_v15 = vsel %vm280_vm0, %v23531_v26, 0.0 }
0x12bd   : > { %14116 = vadd.xlane.f32.xlu0 %v14115_v15 }
0x12be   : > { %v23537_v37 = vpop.eup %20024 }
0x12bf   : > { %v23539_v43 = vpop.eup %20026  ;;  %v14124_v49 = vsel %vm280_vm0, %v23537_v37, 0.0 }
0x12c0   : > { %14125 = vadd.xlane.f32.xlu1 %v14124_v49  ;;  %v14121_v22 = vsel %vm280_vm0, %v23539_v43, 0.0 }
0x12c1   : > { %14122 = vadd.xlane.f32.xlu0 %v14121_v22 }
0x12c4   : > { %v23545_v40 = vpop.eup %20028 }
0x12c5   : > { %v23547_v23 = vpop.eup %20030  ;;  %v14130_v33 = vsel %vm280_vm0, %v23545_v40, 0.0 }
0x12c6   : > { %14131 = vadd.xlane.f32.xlu1 %v14130_v33  ;;  %v14127_v34 = vsel %vm280_vm0, %v23547_v23, 0.0 }
0x12c7   : > { %14128 = vadd.xlane.f32.xlu0 %v14127_v34  ;;  %v20166_v34 = vld [vmem:[%s20263_s27 + $0x10] sm:$0xff] }
0x1328   : > { %v14090_v25 = vpop.xlane.xlu1 %14089 }
0x1329   : > { %20032 = vrcp.f32 %v14090_v25  ;;  %v14087_v44 = vpop.xlane.xlu0 %14086 }
0x132a   : > { %20034 = vrcp.f32 %v14087_v44 }
0x1333   : > { %v20033_v4 = vpop.eup %20032 }
0x1334   : > { %v20035_v3 = vpop.eup %20034  ;;  %v14150_v1 = vmul.f32 %v20033_v4, %v23475_v45 }
0x1335   : > { %v14149_v28 = vmul.f32 %v20035_v3, %v23477_v48 }
0x1337   : > { %18325 = vmatprep.mubr.msk.f32.mxu0 %vm280_vm0, %v14149_v28  ;;  %v20167_v28 = vld [vmem:[%s20263_s27 + $0x28] sm:$0xff] }
0x1338   : > { %18326 = vmatmul.mubr.msk.f32.vlgmr.msra.gmra.mrb[58].mxu0 %vm280_vm0, %v14150_v1 }
0x1339   : > { %v14096_v18 = vpop.xlane.xlu1 %14095  ;;  %18996 = vmatpush3.bf16.msra.mxu0 %v23460_v61 }
0x133a   : > { %20036 = vrcp.f32 %v14096_v18  ;;  %18998 = vmatprep.subr.bf16.mxu0 %v23463_v10  ;;  %v14093_v14 = vpop.xlane.xlu0 %14092 }
0x133b   : > { %20038 = vrcp.f32 %v14093_v14 }
0x133d   : > { %v14102_v53 = vpop.xlane.xlu1 %14101 }
0x133e   : > { %20040 = vrcp.f32 %v14102_v53  ;;  %v14099_v52 = vpop.xlane.xlu0 %14098  ;;  %v20168_v53 = vld [vmem:[%s20263_s27 + $0x20] sm:$0xff] }
0x133f   : > { %20042 = vrcp.f32 %v14099_v52 }
0x1341   : > { %v14108_v27 = vpop.xlane.xlu1 %14107 }
0x1342   : > { %20044 = vrcp.f32 %v14108_v27  ;;  %v14105_v48 = vpop.xlane.xlu0 %14104 }
0x1343   : > { %20046 = vrcp.f32 %v14105_v48 }
0x1344   : > { %v20037_v45 = vpop.eup %20036 }
0x1345   : > { %v20039_v9 = vpop.eup %20038  ;;  %v14114_v55 = vpop.xlane.xlu1 %14113  ;;  %v14152_v5 = vmul.f32 %v20037_v45, %v23491_v16 }
0x1346   : > { %20048 = vrcp.f32 %v14114_v55  ;;  %v14111_v19 = vpop.xlane.xlu0 %14110  ;;  %v14151_v61 = vmul.f32 %v20039_v9, %v23493_v62  ;;  %v20169_v55 = vld [vmem:[%s20263_s27 + $0x38] sm:$0xff] }
0x1347   : > { %20050 = vrcp.f32 %v14111_v19 }
0x1348   : > { %v20041_v24 = vpop.eup %20040  ;;  %18332 = vmatprep.mubr.msk.f32.mxu0 %vm280_vm0, %v14151_v61 }
0x1349   : > { %v20043_v56 = vpop.eup %20042  ;;  %v14120_v30 = vpop.xlane.xlu1 %14119  ;;  %18333 = vmatmul.mubr.msk.f32.vlgmr.msra.gmra.mrb[60].mxu0 %vm280_vm0, %v14152_v5  ;;  %v14154_v6 = vmul.f32 %v20041_v24, %v23501_v58  ;;  %v20170_v24 = vld [vmem:[%s20263_s27 + $0x30] sm:$0xff] }
0x134a   : > { %20052 = vrcp.f32 %v14120_v30  ;;  %19000 = vmatpush3.bf16.msra.mxu0 %v23463_v10  ;;  %v14117_v2 = vpop.xlane.xlu0 %14116  ;;  %v14153_v38 = vmul.f32 %v20043_v56, %v23503_v21 }
0x134b   : > { %19002 = vmatprep.subr.bf16.mxu0 %v23465_v54  ;;  %20054 = vrcp.f32 %v14117_v2 }
0x134c   : > { %v20045_v16 = vpop.eup %20044  ;;  %18339 = vmatprep.mubr.msk.f32.mxu0 %vm280_vm0, %v14153_v38 }
0x134d   : > { %v20047_v62 = vpop.eup %20046  ;;  %v14126_v63 = vpop.xlane.xlu1 %14125  ;;  %18340 = vmatmul.mubr.msk.f32.vlgmr.msra.gmra.mrb[62].mxu0 %vm280_vm0, %v14154_v6  ;;  %v14156_v21 = vmul.f32 %v20045_v16, %v23511_v20  ;;  %v20171_v16 = vld [vmem:[%s20263_s27 + $0x48] sm:$0xff] }
0x134e   : > { %20056 = vrcp.f32 %v14126_v63  ;;  %19004 = vmatpush3.bf16.msra.mxu0 %v23465_v54  ;;  %v14123_v29 = vpop.xlane.xlu0 %14122  ;;  %v14155_v10 = vmul.f32 %v20047_v62, %v23513_v31 }
0x134f   : > { %19006 = vmatprep.subr.bf16.mxu0 %v23467_v47  ;;  %20058 = vrcp.f32 %v14123_v29 }
0x1350   : > { %v20049_v58 = vpop.eup %20048  ;;  %18346 = vmatprep.mubr.msk.f32.mxu0 %vm280_vm0, %v14155_v10  ;;  %v20172_v10 = vld [vmem:[%s20263_s27 + $0x40] sm:$0xff] }
0x1351   : > { %v20051_v59 = vpop.eup %20050  ;;  %18347 = vmatmul.mubr.msk.f32.vlgmr.msra.gmra.mrb[64].mxu0 %vm280_vm0, %v14156_v21  ;;  %v14158_v54 = vmul.f32 %v20049_v58, %v23519_v17 }
0x1352   : > { %19008 = vmatpush3.bf16.msra.mxu0 %v23467_v47  ;;  %v14157_v0 = vmul.f32 %v20051_v59, %v23522_v42 }
0x1353   : > { %19010 = vmatprep.subr.bf16.mxu0 %v23469_v57  ;;  %v14132_v31 = vpop.xlane.xlu1 %14131 }
0x1354   : > { %v20053_v8 = vpop.eup %20052  ;;  %20060 = vrcp.f32 %v14132_v31  ;;  %18353 = vmatprep.mubr.msk.f32.mxu0 %vm280_vm0, %v14157_v0  ;;  %v14129_v20 = vpop.xlane.xlu0 %14128  ;;  %v20173_v31 = vld [vmem:[%s20263_s27 + $0x58] sm:$0xff] }
0x1355   : > { %v20055_v32 = vpop.eup %20054  ;;  %18354 = vmatmul.mubr.msk.f32.vlgmr.msra.gmra.mrb[66].mxu0 %vm280_vm0, %v14158_v54  ;;  %20062 = vrcp.f32 %v14129_v20  ;;  %v14160_v35 = vmul.f32 %v20053_v8, %v23529_v39 }
0x1356   : > { %19012 = vmatpush3.bf16.msra.mxu0 %v23469_v57  ;;  %v14159_v47 = vmul.f32 %v20055_v32, %v23531_v26  ;;  %v20164_v26 = vld [vmem:[%s20263_s27] sm:$0xff] }
0x1357   : > { %19014 = vmatprep.subr.bf16.mxu0 %v23471_v41 }
0x1358   : > { %v20057_v51 = vpop.eup %20056  ;;  %18360 = vmatprep.mubr.msk.f32.mxu0 %vm280_vm0, %v14159_v47  ;;  %v20174_v47 = vld [vmem:[%s20263_s27 + $0x50] sm:$0xff] }
0x1359   : > { %v20059_v17 = vpop.eup %20058  ;;  %18361 = vmatmul.mubr.msk.f32.vlgmr.msra.gmra.mrb[68].mxu0 %vm280_vm0, %v14160_v35  ;;  %v14162_v57 = vmul.f32 %v20057_v51, %v23537_v37 }
0x135a   : > { %19016 = vmatpush3.bf16.msra.mxu0 %v23471_v41  ;;  %v14161_v7 = vmul.f32 %v20059_v17, %v23539_v43  ;;  %v23599_v41 = vld [vmem:[%s24170_s5 + $0x3] ss:$0 sm:$0xff] }
0x135c   : > { %18367 = vmatprep.mubr.msk.f32.mxu0 %vm280_vm0, %v14161_v7 }
0x135d   : > { %18368 = vmatmul.mubr.msk.f32.vlgmr.msra.gmra.mrb[70].mxu0 %vm280_vm0, %v14162_v57 }
0x135e   : > { %v20061_v12 = vpop.eup %20060 }
0x135f   : > { %v20063_v42 = vpop.eup %20062  ;;  %v14164_v50 = vmul.f32 %v20061_v12, %v23545_v40  ;;  %v20165_v40 = vld [vmem:[%s20263_s27 + $0x18] sm:$0xff]  ;;  %v20175_v12 = vld [vmem:[%s20263_s27 + $0x68] sm:$0xff] }
0x1360   : > { %v14163_v36 = vmul.f32 %v20063_v42, %v23547_v23 }
0x1362   : > { %18374 = vmatprep.mubr.msk.f32.mxu1 %vm280_vm0, %v14163_v36 }
0x1363   : > { %18375 = vmatmul.mubr.msk.f32.vlgmr.msra.gmra.mrb[22].mxu1 %vm280_vm0, %v14164_v50 }
0x140b   : > { %v18327_v46 = vpop.f32.mrb[58].mxu0 }
0x140c   : > { %v15042_v13 = vadd.f32 %v20163_v60, %v18327_v46  ;;  %v14449_v39 = vpop.f32.mrb[59].mxu0  ;;  %v20176_v46 = vld [vmem:[%s20263_s27 + $0x60] sm:$0xff] }
0x140d   : > { %v15041_v11 = vadd.f32 %v20164_v26, %v14449_v39 }
0x140e   : > { %v23604_v15 = vadd.f32 %v15042_v13, %v23599_v41 }
0x140f   : > { %v23607_v37 = vadd.f32 %v15041_v11, %v23599_v41 }
0x1410   : > { %v15076_v43 = vsel %vm280_vm0, %v23604_v15, 0.0 }
0x1411   : > { %15077 = vadd.xlane.f32.xlu1 %v15076_v43  ;;  %v15073_v49 = vsel %vm280_vm0, %v23607_v37, 0.0 }
0x1412   : > { %15074 = vadd.xlane.f32.xlu0 %v15073_v49 }
0x141c   : > { %v18334_v22 = vpop.f32.mrb[60].mxu0 }
0x141d   : > { %v15044_v23 = vadd.f32 %v20165_v40, %v18334_v22  ;;  %v14530_v33 = vpop.f32.mrb[61].mxu0  ;;  %v24394_v22 = vld [vmem:[#allocation2_spill] sm:$0xff] }
0x141e   : > { %v15043_v25 = vadd.f32 %v20166_v34, %v14530_v33  ;;  %v24395_v33 = vld [vmem:[#allocation6_spill] sm:$0xff] }
0x141f   : > { %v23616_v44 = vadd.f32 %v15044_v23, %v23599_v41 }
0x1420   : > { %v23619_v4 = vadd.f32 %v15043_v25, %v23599_v41  ;;  %v18341_v3 = vpop.f32.mrb[62].mxu0  ;;  %v20177_v25 = vld [vmem:[%s20263_s27 + $0x78] sm:$0xff] }
0x1421   : > { %v15046_v1 = vadd.f32 %v20167_v28, %v18341_v3  ;;  %v14611_v18 = vpop.f32.mrb[63].mxu0  ;;  %v15082_v14 = vsel %vm280_vm0, %v23616_v44, 0.0  ;;  %v20178_v28 = vld [vmem:[%s20263_s27 + $0x70] sm:$0xff] }
0x1422   : > { %v15045_v52 = vadd.f32 %v20168_v53, %v14611_v18  ;;  %15083 = vadd.xlane.f32.xlu1 %v15082_v14  ;;  %v15079_v27 = vsel %vm280_vm0, %v23619_v4, 0.0 }
0x1423   : > { %v23628_v48 = vadd.f32 %v15046_v1, %v23599_v41  ;;  %15080 = vadd.xlane.f32.xlu0 %v15079_v27 }
0x1424   : > { %v23631_v45 = vadd.f32 %v15045_v52, %v23599_v41  ;;  %v18348_v9 = vpop.f32.mrb[64].mxu0 }
0x1425   : > { %v15048_v19 = vadd.f32 %v20169_v55, %v18348_v9  ;;  %v14692_v61 = vpop.f32.mrb[65].mxu0  ;;  %v15088_v5 = vsel %vm280_vm0, %v23628_v48, 0.0 }
0x1426   : > { %v15047_v56 = vadd.f32 %v20170_v24, %v14692_v61  ;;  %15089 = vadd.xlane.f32.xlu1 %v15088_v5  ;;  %v15085_v30 = vsel %vm280_vm0, %v23631_v45, 0.0 }
0x1427   : > { %v23640_v2 = vadd.f32 %v15048_v19, %v23599_v41  ;;  %15086 = vadd.xlane.f32.xlu0 %v15085_v30 }
0x1428   : > { %v23643_v38 = vadd.f32 %v15047_v56, %v23599_v41  ;;  %v18355_v6 = vpop.f32.mrb[66].mxu0 }
0x1429   : > { %v15050_v62 = vadd.f32 %v20171_v16, %v18355_v6  ;;  %v14773_v63 = vpop.f32.mrb[67].mxu0  ;;  %v15094_v29 = vsel %vm280_vm0, %v23640_v2, 0.0 }
0x142a   : > { %v15049_v21 = vadd.f32 %v20172_v10, %v14773_v63  ;;  %15095 = vadd.xlane.f32.xlu1 %v15094_v29  ;;  %v15091_v58 = vsel %vm280_vm0, %v23643_v38, 0.0 }
0x142b   : > { %v23652_v59 = vadd.f32 %v15050_v62, %v23599_v41  ;;  %15092 = vadd.xlane.f32.xlu0 %v15091_v58 }
0x142c   : > { %v23655_v0 = vadd.f32 %v15049_v21, %v23599_v41  ;;  %v18362_v54 = vpop.f32.mrb[68].mxu0 }
0x142d   : > { %v15052_v8 = vadd.f32 %v20173_v31, %v18362_v54  ;;  %v14854_v20 = vpop.f32.mrb[69].mxu0  ;;  %v15100_v32 = vsel %vm280_vm0, %v23652_v59, 0.0 }
0x142e   : > { %v15051_v35 = vadd.f32 %v20174_v47, %v14854_v20  ;;  %15101 = vadd.xlane.f32.xlu1 %v15100_v32  ;;  %v15097_v51 = vsel %vm280_vm0, %v23655_v0, 0.0 }
0x142f   : > { %v23664_v17 = vadd.f32 %v15052_v8, %v23599_v41  ;;  %15098 = vadd.xlane.f32.xlu0 %v15097_v51 }
0x1430   : > { %v23667_v7 = vadd.f32 %v15051_v35, %v23599_v41  ;;  %v18369_v57 = vpop.f32.mrb[70].mxu0 }
0x1431   : > { %v15054_v42 = vadd.f32 %v20175_v12, %v18369_v57  ;;  %v14935_v36 = vpop.f32.mrb[71].mxu0  ;;  %v15106_v50 = vsel %vm280_vm0, %v23664_v17, 0.0 }
0x1432   : > { %v15053_v60 = vadd.f32 %v20176_v46, %v14935_v36  ;;  %15107 = vadd.xlane.f32.xlu1 %v15106_v50  ;;  %v15103_v13 = vsel %vm280_vm0, %v23667_v7, 0.0 }
0x1433   : > { %v23676_v39 = vadd.f32 %v15054_v42, %v23599_v41  ;;  %15104 = vadd.xlane.f32.xlu0 %v15103_v13 }
0x1434   : > { %v23679_v26 = vadd.f32 %v15053_v60, %v23599_v41 }
0x1435   : > { %v15112_v11 = vsel %vm280_vm0, %v23676_v39, 0.0 }
0x1436   : > { %15113 = vadd.xlane.f32.xlu1 %v15112_v11  ;;  %v15109_v43 = vsel %vm280_vm0, %v23679_v26, 0.0  ;;  %v18376_v49 = vpop.f32.mrb[22].mxu1 }
0x1437   : > { %15110 = vadd.xlane.f32.xlu0 %v15109_v43  ;;  %v19055_v40 = vadd.f32 %v18376_v49, %v24394_v22  ;;  %v15016_v23 = vpop.f32.mrb[23].mxu1 }
0x1438   : > { %v19056_v34 = vadd.f32 %v15016_v23, %v24395_v33 }
0x1439   : > { %v15056_v3 = vadd.f32 %v20177_v25, %v19055_v40 }
0x143a   : > { %v15055_v1 = vadd.f32 %v20178_v28, %v19056_v34 }
0x143b   : > { %v23690_v18 = vadd.f32 %v15056_v3, %v23599_v41 }
0x143c   : > { %v23693_v14 = vadd.f32 %v15055_v1, %v23599_v41 }
0x143d   : > { %v15118_v53 = vsel %vm280_vm0, %v23690_v18, 0.0 }
0x143e   : > { %15119 = vadd.xlane.f32.xlu1 %v15118_v53  ;;  %v15115_v52 = vsel %vm280_vm0, %v23693_v14, 0.0 }
0x143f   : > { %15116 = vadd.xlane.f32.xlu0 %v15115_v52 }
0x149e   : > { %v15078_v27 = vpop.xlane.xlu1 %15077 }
0x149f   : > { %v15122_v9 = vmul.f32 0.0625, %v15078_v27  ;;  %v15075_v55 = vpop.xlane.xlu0 %15074 }
0x14a0   : > { %v15121_v19 = vmul.f32 0.0625, %v15075_v55 }
0x14a1   : > { %v23700_v61 = vsub.f32 %v23604_v15, %v15122_v9 }
0x14a2   : > { %v23703_v5 = vsub.f32 %v23607_v37, %v15121_v19 }
0x14a3   : > { %v15154_v41 = vmul.f32 %v23700_v61, %v23700_v61 }
0x14a4   : > { %v15153_v24 = vmul.f32 %v23703_v5, %v23703_v5 }
0x14a5   : > { %v15172_v56 = vsel %vm280_vm0, %v15154_v41, 0.0 }
0x14a6   : > { %15173 = vadd.xlane.f32.xlu1 %v15172_v56  ;;  %v15169_v30 = vsel %vm280_vm0, %v15153_v24, 0.0 }
0x14a7   : > { %15170 = vadd.xlane.f32.xlu0 %v15169_v30 }
0x14af   : > { %v15084_v6 = vpop.xlane.xlu1 %15083 }
0x14b0   : > { %v15124_v16 = vmul.f32 0.0625, %v15084_v6  ;;  %v15081_v62 = vpop.xlane.xlu0 %15080 }
0x14b1   : > { %v15123_v63 = vmul.f32 0.0625, %v15081_v62 }
0x14b2   : > { %v23712_v29 = vsub.f32 %v23616_v44, %v15124_v16 }
0x14b3   : > { %v23715_v10 = vsub.f32 %v23619_v4, %v15123_v63  ;;  %v15090_v21 = vpop.xlane.xlu1 %15089 }
0x14b4   : > { %v15126_v58 = vmul.f32 0.0625, %v15090_v21  ;;  %v15087_v54 = vpop.xlane.xlu0 %15086  ;;  %v15156_v31 = vmul.f32 %v23712_v29, %v23712_v29 }
0x14b5   : > { %v15125_v8 = vmul.f32 0.0625, %v15087_v54  ;;  %v15155_v20 = vmul.f32 %v23715_v10, %v23715_v10  ;;  %v15314_v54 = vld [vmem:[%s24168_s3 + $0x8] sm:$0xff] }
0x14b6   : > { %v23722_v32 = vsub.f32 %v23628_v48, %v15126_v58  ;;  %v15178_v47 = vsel %vm280_vm0, %v15156_v31, 0.0  ;;  %v15316_v31 = vld [vmem:[%s24168_s3 + $0x18] sm:$0xff] }
0x14b7   : > { %v23726_v35 = vsub.f32 %v23631_v45, %v15125_v8  ;;  %v15096_v51 = vpop.xlane.xlu1 %15095  ;;  %15179 = vadd.xlane.f32.xlu1 %v15178_v47  ;;  %v15175_v57 = vsel %vm280_vm0, %v15155_v20, 0.0  ;;  %v19021_v47 = vpack.c.bf16 %v15316_v31, %v15314_v54 }
0x14b8   : > { %v15128_v12 = vmul.f32 0.0625, %v15096_v51  ;;  %15176 = vadd.xlane.f32.xlu0 %v15175_v57  ;;  %v15093_v42 = vpop.xlane.xlu0 %15092  ;;  %v15158_v36 = vmul.f32 %v23722_v32, %v23722_v32  ;;  %v15313_v51 = vld [vmem:[%s24168_s3] sm:$0xff]  ;;  %v15315_v57 = vld [vmem:[%s24168_s3 + $0x10] sm:$0xff] }
0x14b9   : > { %v15127_v50 = vmul.f32 0.0625, %v15093_v42  ;;  %v15157_v46 = vmul.f32 %v23726_v35, %v23726_v35  ;;  %19022 = vmatprep.subr.bf16.mxu1 %v19021_v47  ;;  %v15698_v47 = vld [vmem:[%s24169_s4 + $0x8] sm:$0xff] }
0x14ba   : > { %v23734_v60 = vsub.f32 %v23640_v2, %v15128_v12  ;;  %v15184_v13 = vsel %vm280_vm0, %v15158_v36, 0.0  ;;  %v19023_v36 = vpack.c.bf16 %v15315_v57, %v15313_v51 }
0x14bb   : > { %v23738_v11 = vsub.f32 %v23643_v38, %v15127_v50  ;;  %v15102_v43 = vpop.xlane.xlu1 %15101  ;;  %15185 = vadd.xlane.f32.xlu1 %v15184_v13  ;;  %v15181_v49 = vsel %vm280_vm0, %v15157_v46, 0.0 }
0x14bc   : > { %v15130_v22 = vmul.f32 0.0625, %v15102_v43  ;;  %15182 = vadd.xlane.f32.xlu0 %v15181_v49  ;;  %v15099_v40 = vpop.xlane.xlu0 %15098  ;;  %v15160_v23 = vmul.f32 %v23734_v60, %v23734_v60  ;;  %19024 = vmatpush1.bf16.msra.mxu1 %v19023_v36 }
0x14bd   : > { %v15129_v33 = vmul.f32 0.0625, %v15099_v40  ;;  %v15159_v34 = vmul.f32 %v23738_v11, %v23738_v11 }
0x14be   : > { %v23746_v25 = vsub.f32 %v23652_v59, %v15130_v22  ;;  %v15190_v3 = vsel %vm280_vm0, %v15160_v23, 0.0  ;;  %v20210_v22 = vmov 0.0  }
0x14bf   : > { %v23750_v28 = vsub.f32 %v23655_v0, %v15129_v33  ;;  %v15108_v1 = vpop.xlane.xlu1 %15107  ;;  %15191 = vadd.xlane.f32.xlu1 %v15190_v3  ;;  %v15187_v53 = vsel %vm280_vm0, %v15159_v34, 0.0  ;;  %15440 = vmatprep.mubr.f32.mxu1 %v20210_v22 }
0x14c0   : > { %v15132_v52 = vmul.f32 0.0625, %v15108_v1  ;;  %15188 = vadd.xlane.f32.xlu0 %v15187_v53  ;;  %v15105_v27 = vpop.xlane.xlu0 %15104  ;;  %v15162_v9 = vmul.f32 %v23746_v25, %v23746_v25 }
0x14c1   : > { %v15131_v55 = vmul.f32 0.0625, %v15105_v27  ;;  %v15161_v19 = vmul.f32 %v23750_v28, %v23750_v28 }
0x14c2   : > { %v23758_v41 = vsub.f32 %v23664_v17, %v15132_v52  ;;  %v15196_v24 = vsel %vm280_vm0, %v15162_v9, 0.0  ;;  %v20211_v9 = vmov 0.0|0.0  }
0x14c3   : > { %v23762_v56 = vsub.f32 %v23667_v7, %v15131_v55  ;;  %v15114_v30 = vpop.xlane.xlu1 %15113  ;;  %15197 = vadd.xlane.f32.xlu1 %v15196_v24  ;;  %v15193_v6 = vsel %vm280_vm0, %v15161_v19, 0.0  ;;  %19025 = vmatprep.subr.bf16.mxu1 %v20211_v9 }
0x14c4   : > { %v15134_v16 = vmul.f32 0.0625, %v15114_v30  ;;  %15194 = vadd.xlane.f32.xlu0 %v15193_v6  ;;  %v15111_v62 = vpop.xlane.xlu0 %15110  ;;  %v15164_v63 = vmul.f32 %v23758_v41, %v23758_v41 }
0x14c5   : > { %v15133_v21 = vmul.f32 0.0625, %v15111_v62  ;;  %v15163_v58 = vmul.f32 %v23762_v56, %v23762_v56 }
0x14c6   : > { %v23776_v8 = vsub.f32 %v23676_v39, %v15134_v16  ;;  %v15202_v20 = vsel %vm280_vm0, %v15164_v63, 0.0 }
0x14c7   : > { %v23786_v12 = vsub.f32 %v23679_v26, %v15133_v21  ;;  %15203 = vadd.xlane.f32.xlu1 %v15202_v20  ;;  %v15199_v42 = vsel %vm280_vm0, %v15163_v58, 0.0  ;;  %v23812_v21 = vld [vmem:[%s24170_s5 + $0x4] ss:$0 sm:$0xff] }
0x14c8   : > { %15200 = vadd.xlane.f32.xlu0 %v15199_v42  ;;  %v15166_v50 = vmul.f32 %v23776_v8, %v23776_v8  ;;  %v15697_v20 = vld [vmem:[%s24169_s4] sm:$0xff] }
0x14c9   : > { %v15165_v46 = vmul.f32 %v23786_v12, %v23786_v12  ;;  %v23825_v42 = vld [vmem:[%s24170_s5 + $0x5] ss:$0 sm:$0xff] }
0x14ca   : > { %v15208_v13 = vsel %vm280_vm0, %v15166_v50, 0.0 }
0x14cb   : > { %15209 = vadd.xlane.f32.xlu1 %v15208_v13  ;;  %v15120_v43 = vpop.xlane.xlu1 %15119  ;;  %v15205_v49 = vsel %vm280_vm0, %v15165_v46, 0.0 }
0x14cc   : > { %v15136_v40 = vmul.f32 0.0625, %v15120_v43  ;;  %15206 = vadd.xlane.f32.xlu0 %v15205_v49  ;;  %v15117_v23 = vpop.xlane.xlu0 %15116 }
0x14cd   : > { %v15135_v33 = vmul.f32 0.0625, %v15117_v23  ;;  %v15700_v23 = vld [vmem:[%s24169_s4 + $0x18] sm:$0xff] }
0x14ce   : > { %v23797_v34 = vsub.f32 %v23690_v18, %v15136_v40  ;;  %v15699_v40 = vld [vmem:[%s24169_s4 + $0x10] sm:$0xff] }
0x14cf   : > { %v23800_v3 = vsub.f32 %v23693_v14, %v15135_v33 }
0x14d0   : > { %v15168_v1 = vmul.f32 %v23797_v34, %v23797_v34 }
0x14d1   : > { %v15167_v53 = vmul.f32 %v23800_v3, %v23800_v3 }
0x14d2   : > { %v15214_v52 = vsel %vm280_vm0, %v15168_v1, 0.0 }
0x14d3   : > { %15215 = vadd.xlane.f32.xlu1 %v15214_v52  ;;  %v15211_v27 = vsel %vm280_vm0, %v15167_v53, 0.0  ;;  %v19029_v52 = vpack.c.bf16 %v15700_v23, %v15699_v40 }
0x14d4   : > { %15212 = vadd.xlane.f32.xlu0 %v15211_v27 }
0x1533   : > { %v15174_v55 = vpop.xlane.xlu1 %15173 }
0x1534   : > { %v15218_v19 = vmul.f32 0.0625, %v15174_v55  ;;  %v15171_v24 = vpop.xlane.xlu0 %15170 }
0x1535   : > { %v15217_v30 = vmul.f32 0.0625, %v15171_v24 }
0x1536   : > { %v15234_v6 = vadd.f32 1e-05, %v15218_v19 }
0x1537   : > { %v15233_v16 = vadd.f32 1e-05, %v15217_v30  ;;  %v15701_v30 = vld [vmem:[%s24169_s4 + $0x20] sm:$0xff] }
0x1538   : > { %20064 = vrsqrt.f32 %v15234_v6  ;;  %v15702_v6 = vld [vmem:[%s24169_s4 + $0x28] sm:$0xff] }
0x1539   : > { %20066 = vrsqrt.f32 %v15233_v16 }
0x1542   : > { %v20065_v62 = vpop.eup %20064 }
0x1543   : > { %v20067_v63 = vpop.eup %20066  ;;  %v15266_v31 = vmul.f32 %v20065_v62, %v23700_v61  ;;  %v19026_v61 = vpack.c.bf16 %v15698_v47, %v15697_v20  ;;  %v15703_v20 = vld [vmem:[%s24169_s4 + $0x30] sm:$0xff]  ;;  %v15704_v47 = vld [vmem:[%s24169_s4 + $0x38] sm:$0xff] }
0x1544   : > { %v15265_v58 = vmul.f32 %v20067_v63, %v23703_v5  ;;  %v15180_v54 = vpop.xlane.xlu1 %15179  ;;  %v19032_v63 = vpack.c.bf16 %v15702_v6, %v15701_v30 }
0x1545   : > { %v15220_v51 = vmul.f32 0.0625, %v15180_v54  ;;  %v15177_v57 = vpop.xlane.xlu0 %15176  ;;  %v15282_v49 = vmul.f32 %v15266_v31, %v23812_v21 }
0x1546   : > { %v15219_v36 = vmul.f32 0.0625, %v15177_v57  ;;  %v15281_v5 = vmul.f32 %v15265_v58, %v23812_v21 }
0x1547   : > { %v15236_v50 = vadd.f32 1e-05, %v15220_v51  ;;  %v15298_v24 = vadd.f32 %v15282_v49, %v23825_v42  ;;  %v15706_v49 = vld [vmem:[%s24169_s4 + $0x48] sm:$0xff] }
0x1548   : > { %v15235_v46 = vadd.f32 1e-05, %v15219_v36  ;;  %v15186_v13 = vpop.xlane.xlu1 %15185  ;;  %v15297_v43 = vadd.f32 %v15281_v5, %v23825_v42  ;;  %v19035_v36 = vpack.c.bf16 %v15704_v47, %v15703_v20 }
0x1549   : > { %20068 = vrsqrt.f32 %v15236_v50  ;;  %v15222_v33 = vmul.f32 0.0625, %v15186_v13  ;;  %v15183_v1 = vpop.xlane.xlu0 %15182 }
0x154a   : > { %20070 = vrsqrt.f32 %v15235_v46  ;;  %v15221_v53 = vmul.f32 0.0625, %v15183_v1  ;;  %16545 = vmatmul.mubr.msk.f32.vlgmr.msra.gmra.mrb[134].mxu1 %vm280_vm0, %v15297_v43  ;;  %v15705_v43 = vld [vmem:[%s24169_s4 + $0x40] sm:$0xff] }
0x154b   : > { %15446 = vmatprep.mubr.f32.mxu1 %v20210_v22  ;;  %19027 = vmatpush1.bf16.msra.mxu1 %v19026_v61  ;;  %v15238_v27 = vadd.f32 1e-05, %v15222_v33 }
0x154c   : > { %v15237_v55 = vadd.f32 1e-05, %v15221_v53  ;;  %v15192_v19 = vpop.xlane.xlu1 %15191  ;;  %19028 = vmatprep.subr.bf16.mxu1 %v20211_v9 }
0x154d   : > { %v15189_v16 = vpop.xlane.xlu0 %15188  ;;  %v15224_v58 = vmul.f32 0.0625, %v15192_v19 }
0x154e   : > { %20072 = vrsqrt.f32 %v15237_v55  ;;  %v15223_v62 = vmul.f32 0.0625, %v15189_v16  ;;  %16546 = vmatmul.mubr.msk.f32.gmra.mrb[136].mxu1 %vm280_vm0, %v15298_v24 }
0x154f   : > { %15452 = vmatprep.mubr.f32.mxu1 %v20210_v22  ;;  %19030 = vmatpush1.bf16.msra.mxu1 %v19029_v52  ;;  %20074 = vrsqrt.f32 %v15238_v27  ;;  %v15240_v50 = vadd.f32 1e-05, %v15224_v58 }
0x1550   : > { %v15239_v54 = vadd.f32 1e-05, %v15223_v62  ;;  %v15198_v31 = vpop.xlane.xlu1 %15197  ;;  %19031 = vmatprep.subr.bf16.mxu1 %v20211_v9 }
0x1551   : > { %v15195_v51 = vpop.xlane.xlu0 %15194  ;;  %v15226_v53 = vmul.f32 0.0625, %v15198_v31 }
0x1552   : > { %20076 = vrsqrt.f32 %v15239_v54  ;;  %v15225_v61 = vmul.f32 0.0625, %v15195_v51 }
0x1553   : > { %v20069_v57 = vpop.eup %20068  ;;  %19033 = vmatpush1.bf16.msra.mxu1 %v19032_v63  ;;  %20078 = vrsqrt.f32 %v15240_v50  ;;  %v15242_v24 = vadd.f32 1e-05, %v15226_v53 }
0x1554   : > { %v20071_v5 = vpop.eup %20070  ;;  %19034 = vmatprep.subr.bf16.mxu1 %v20211_v9  ;;  %v15268_v13 = vmul.f32 %v20069_v57, %v23712_v29  ;;  %v15204_v40 = vpop.xlane.xlu1 %15203  ;;  %v15241_v52 = vadd.f32 1e-05, %v15225_v61  ;;  %v19038_v29 = vpack.c.bf16 %v15706_v49, %v15705_v43 }
0x1555   : > { %v15267_v46 = vmul.f32 %v20071_v5, %v23715_v10  ;;  %v15201_v23 = vpop.xlane.xlu0 %15200  ;;  %v15228_v54 = vmul.f32 0.0625, %v15204_v40 }
0x1556   : > { %v15284_v27 = vmul.f32 %v15268_v13, %v23812_v21  ;;  %20080 = vrsqrt.f32 %v15241_v52  ;;  %v15227_v30 = vmul.f32 0.0625, %v15201_v23 }
0x1557   : > { %v15283_v33 = vmul.f32 %v15267_v46, %v23812_v21  ;;  %19036 = vmatpush1.bf16.msra.mxu1 %v19035_v36  ;;  %20082 = vrsqrt.f32 %v15242_v24  ;;  %v15244_v46 = vadd.f32 1e-05, %v15228_v54 }
0x1558   : > { %v20073_v1 = vpop.eup %20072  ;;  %19037 = vmatprep.subr.bf16.mxu1 %v20211_v9  ;;  %v15210_v6 = vpop.xlane.xlu1 %15209  ;;  %v15300_v62 = vadd.f32 %v15284_v27, %v23825_v42  ;;  %v15243_v31 = vadd.f32 1e-05, %v15227_v30 }
0x1559   : > { %v15299_v10 = vadd.f32 %v15283_v33, %v23825_v42  ;;  %v15269_v55 = vmul.f32 %v20073_v1, %v23726_v35  ;;  %v20075_v19 = vpop.eup %20074  ;;  %v15207_v16 = vpop.xlane.xlu0 %15206 }
0x155a   : > { %v15270_v58 = vmul.f32 %v20075_v19, %v23722_v32  ;;  %20084 = vrsqrt.f32 %v15243_v31  ;;  %v15229_v13 = vmul.f32 0.0625, %v15207_v16 }
0x155b   : > { %16547 = vmatmul.mubr.msk.f32.gmra.mrb[138].mxu1 %vm280_vm0, %v15299_v10  ;;  %v15285_v63 = vmul.f32 %v15269_v55, %v23812_v21 }
0x155c   : > { %15458 = vmatprep.mubr.f32.mxu1 %v20210_v22  ;;  %19039 = vmatpush1.bf16.msra.mxu1 %v19038_v29  ;;  %v20077_v35 = vpop.eup %20076  ;;  %v15286_v36 = vmul.f32 %v15270_v58, %v23812_v21  ;;  %v15245_v1 = vadd.f32 1e-05, %v15229_v13 }
0x155d   : > { %19040 = vmatprep.subr.bf16.mxu1 %v20211_v9  ;;  %v15301_v57 = vadd.f32 %v15285_v63, %v23825_v42  ;;  %v15271_v5 = vmul.f32 %v20077_v35, %v23738_v11  ;;  %v20079_v32 = vpop.eup %20078  ;;  %v15230_v11 = vmul.f32 0.0625, %v15210_v6 }
0x155e   : > { %v15302_v49 = vadd.f32 %v15286_v36, %v23825_v42  ;;  %v15272_v23 = vmul.f32 %v20079_v32, %v23734_v60 }
0x155f   : > { %16548 = vmatmul.mubr.msk.f32.gmra.mrb[140].mxu1 %vm280_vm0, %v15300_v62  ;;  %v15287_v40 = vmul.f32 %v15271_v5, %v23812_v21  ;;  %v15246_v27 = vadd.f32 1e-05, %v15230_v11  ;;  %v15714_v11 = vld [vmem:[%s24169_s4 + $0x88] sm:$0xff] }
0x1560   : > { %v15216_v20 = vpop.xlane.xlu1 %15215  ;;  %15464 = vmatprep.mubr.f32.mxu1 %v20210_v22  ;;  %v20081_v33 = vpop.eup %20080  ;;  %v15288_v52 = vmul.f32 %v15272_v23, %v23812_v21 }
0x1561   : > { %v15232_v47 = vmul.f32 0.0625, %v15216_v20  ;;  %v15213_v51 = vpop.xlane.xlu0 %15212  ;;  %v15303_v53 = vadd.f32 %v15287_v40, %v23825_v42  ;;  %v15273_v29 = vmul.f32 %v20081_v33, %v23750_v28  ;;  %v20083_v10 = vpop.eup %20082  ;;  %v15712_v40 = vld [vmem:[%s24169_s4 + $0x78] sm:$0xff]  ;;  %v15713_v33 = vld [vmem:[%s24169_s4 + $0x80] sm:$0xff] }
0x1562   : > { %v15231_v50 = vmul.f32 0.0625, %v15213_v51  ;;  %v15304_v60 = vadd.f32 %v15288_v52, %v23825_v42  ;;  %v15274_v19 = vmul.f32 %v20083_v10, %v23746_v25  ;;  %v15716_v52 = vld [vmem:[%s24169_s4 + $0x98] sm:$0xff]  ;;  %v15318_v10 = vlaneseq }
0x1563   : > { %v15248_v61 = vadd.f32 1e-05, %v15232_v47  ;;  %16549 = vmatmul.mubr.msk.f32.gmra.mrb[142].mxu1 %vm280_vm0, %v15301_v57  ;;  %v15289_v55 = vmul.f32 %v15273_v29, %v23812_v21 }
0x1564   : > { %v15247_v43 = vadd.f32 1e-05, %v15231_v50  ;;  %15470 = vmatprep.mubr.f32.mxu1 %v20210_v22  ;;  %v20085_v24 = vpop.eup %20084  ;;  %v15290_v62 = vmul.f32 %v15274_v19, %v23812_v21 }
0x1565   : > { %20086 = vrsqrt.f32 %v15248_v61  ;;  %v15305_v16 = vadd.f32 %v15289_v55, %v23825_v42  ;;  %v15275_v63 = vmul.f32 %v20085_v24, %v23762_v56  ;;  %v16008_v55 = vld [vmem:[%s24170_s5 + $0x6] ss:$8 sm:$0x3] }
0x1566   : > { %20088 = vrsqrt.f32 %v15247_v43 }
0x1567   : > { %16550 = vmatmul.mubr.msk.f32.gmra.mrb[144].mxu1 %vm280_vm0, %v15302_v49  ;;  %20090 = vrsqrt.f32 %v15244_v46  ;;  %v15291_v20 = vmul.f32 %v15275_v63, %v23812_v21  ;;  %v15711_v49 = vld [vmem:[%s24169_s4 + $0x70] sm:$0xff] }
0x1568   : > { %15476 = vmatprep.mubr.f32.mxu1 %v20210_v22  ;;  %20092 = vrsqrt.f32 %v15245_v1  ;;  %v19047_v23 = vpack.c.bf16 %v15712_v40, %v15711_v49  ;;  %v19050_v1 = vpack.c.bf16 %v15714_v11, %v15713_v33 }
0x1569   : > { %20094 = vrsqrt.f32 %v15246_v27  ;;  %v15307_v51 = vadd.f32 %v15291_v20, %v23825_v42  ;;  %v15319_v27 = vshrl.u32 %v15318_v10, 7 }
0x156b   : > { %16551 = vmatmul.mubr.msk.f32.gmra.mrb[146].mxu1 %vm280_vm0, %v15303_v53  ;;  %v15715_v53 = vld [vmem:[%s24169_s4 + $0x90] sm:$0xff]  ;;  %v15324_v19 = vsub.s32 1, %v15319_v27 }
0x156c   : > { %15482 = vmatprep.mubr.f32.mxu1 %v20210_v22  ;;  %v19053_v29 = vpack.c.bf16 %v15716_v52, %v15715_v53 }
0x156f   : > { %v20087_v30 = vpop.eup %20086  ;;  %16552 = vmatmul.mubr.msk.f32.gmra.mrb[148].mxu1 %vm280_vm0, %v15304_v60  ;;  %v15320_v60 = vsub.s32 0, %v15319_v27 }
0x1570   : > { %v20089_v6 = vpop.eup %20088  ;;  %15488 = vmatprep.mubr.f32.mxu1 %v20210_v22  ;;  %v15280_v28 = vmul.f32 %v20087_v30, %v23797_v34  ;;  %v15306_v34 = vadd.f32 %v15290_v62, %v23825_v42 }
0x1571   : > { %v15279_v58 = vmul.f32 %v20089_v6, %v23800_v3  ;;  %v20091_v35 = vpop.eup %20090  ;;  %v23970_v24 = vrot.slane %v16008_v55, %v15320_v60 }
0x1572   : > { %v15296_v25 = vmul.f32 %v15280_v28, %v23812_v21  ;;  %v15276_v47 = vmul.f32 %v20091_v35, %v23758_v41  ;;  %v20093_v3 = vpop.eup %20092 }
0x1573   : > { %16553 = vmatmul.mubr.msk.f32.gmra.mrb[150].mxu1 %vm280_vm0, %v15305_v16  ;;  %v15295_v54 = vmul.f32 %v15279_v58, %v23812_v21  ;;  %v15277_v36 = vmul.f32 %v20093_v3, %v23786_v12  ;;  %v20095_v5 = vpop.eup %20094 }
0x1574   : > { %15494 = vmatprep.mubr.f32.mxu1 %v20210_v22  ;;  %v15312_v31 = vadd.f32 %v15296_v25, %v23825_v42  ;;  %v15292_v57 = vmul.f32 %v15276_v47, %v23812_v21  ;;  %v15278_v50 = vmul.f32 %v20095_v5, %v23776_v8  ;;  %v15707_v8 = vld [vmem:[%s24169_s4 + $0x50] sm:$0xff] }
0x1575   : > { %v15311_v56 = vadd.f32 %v15295_v54, %v23825_v42  ;;  %v15293_v32 = vmul.f32 %v15277_v36, %v23812_v21 }
0x1576   : > { %v15308_v41 = vadd.f32 %v15292_v57, %v23825_v42  ;;  %v15294_v46 = vmul.f32 %v15278_v50, %v23812_v21  ;;  %v15708_v21 = vld [vmem:[%s24169_s4 + $0x58] sm:$0xff] }
0x1577   : > { %16554 = vmatmul.mubr.msk.f32.gmra.mrb[152].mxu1 %vm280_vm0, %v15306_v34  ;;  %v15309_v61 = vadd.f32 %v15293_v32, %v23825_v42  ;;  %v19041_v13 = vpack.c.bf16 %v15708_v21, %v15707_v8 }
0x1578   : > { %15500 = vmatprep.mubr.f32.mxu1 %v20210_v22  ;;  %v15310_v12 = vadd.f32 %v15294_v46, %v23825_v42  ;;  %v15709_v42 = vld [vmem:[%s24169_s4 + $0x60] sm:$0xff] }
0x1579   : > { %19042 = vmatpush1.bf16.msra.mxu1 %v19041_v13 }
0x157a   : > { %19043 = vmatprep.subr.bf16.mxu1 %v20211_v9 }
0x157b   : > { %16555 = vmatmul.mubr.msk.f32.gmra.mrb[154].mxu1 %vm280_vm0, %v15307_v51 }
0x157c   : > { %15506 = vmatprep.mubr.f32.mxu1 %v20210_v22 }
0x157f   : > { %16556 = vmatmul.mubr.msk.f32.gmra.mrb[156].mxu1 %vm280_vm0, %v15308_v41 }
0x1580   : > { %15512 = vmatprep.mubr.f32.mxu1 %v20210_v22 }
0x1583   : > { %16557 = vmatmul.mubr.msk.f32.gmra.mrb[158].mxu1 %vm280_vm0, %v15309_v61 }
0x1584   : > { %15518 = vmatprep.mubr.f32.mxu1 %v20210_v22 }
0x1587   : > { %16558 = vmatmul.mubr.msk.f32.gmra.mrb[160].mxu1 %vm280_vm0, %v15310_v12 }
0x1588   : > { %15524 = vmatprep.mubr.f32.mxu1 %v20210_v22 }
0x158b   : > { %16559 = vmatmul.mubr.msk.f32.gmra.mrb[162].mxu1 %vm280_vm0, %v15311_v56 }
0x158c   : > { %15530 = vmatprep.mubr.f32.mxu1 %v20210_v22  ;;  %v15710_v22 = vld [vmem:[%s24169_s4 + $0x68] sm:$0xff] }
0x158d   : > { %v19044_v43 = vpack.c.bf16 %v15710_v22, %v15709_v42 }
0x158f   : > { %16560 = vmatmul.mubr.msk.f32.gmra.mrb[164].mxu1 %vm280_vm0, %v15312_v31 }
0x1590   : > { %19045 = vmatpush1.bf16.msra.mxu1 %v19044_v43 }
0x1591   : > { %19046 = vmatprep.subr.bf16.mxu1 %v20211_v9 }
0x1594   : > { %19048 = vmatpush1.bf16.msra.mxu1 %v19047_v23 }
0x1595   : > { %19049 = vmatprep.subr.bf16.mxu1 %v20211_v9 }
0x1598   : > { %19051 = vmatpush1.bf16.msra.mxu1 %v19050_v1 }
0x1599   : > { %19052 = vmatprep.subr.bf16.mxu1 %v20211_v9  ;;  %v23972_v9 = vrot.slane %v16008_v55, %v15324_v19 }
0x159c   : > { %19054 = vmatpush1.bf16.msra.mxu1 %v19053_v29 }
0x161d   : > { %v15442_v30 = vpop.f32.mrb[134].mxu1 }
0x161e   : > { %v15443_v6 = vadd.f32 %v15442_v30, %v23970_v24  ;;  %v15444_v28 = vpop.f32.mrb[135].mxu1 }
0x161f   : > { %v15445_v16 = vadd.f32 %v15444_v28, %v23972_v9 }
0x1620   : > { %v15569_v62 = vmul.f32 0.70710677, %v15443_v6  ;;  %v15537_v36 = vmul.f32 0.5, %v15443_v6 }
0x1621   : > { %v15570_v63 = vmul.f32 0.70710677, %v15445_v16  ;;  %v15448_v58 = vpop.f32.mrb[136].mxu1  ;;  %v15538_v3 = vmul.f32 0.5, %v15445_v16 }
0x1622   : > { %20096 = verf.f32 %v15569_v62  ;;  %v15449_v35 = vadd.f32 %v15448_v58, %v23970_v24  ;;  %v15450_v25 = vpop.f32.mrb[137].mxu1 }
0x1623   : > { %20098 = verf.f32 %v15570_v63  ;;  %v15451_v54 = vadd.f32 %v15450_v25, %v23972_v9 }
0x1624   : > { %v15571_v31 = vmul.f32 0.70710677, %v15449_v35  ;;  %v15539_v49 = vmul.f32 0.5, %v15449_v35 }
0x1625   : > { %v15572_v34 = vmul.f32 0.70710677, %v15451_v54  ;;  %v15540_v13 = vmul.f32 0.5, %v15451_v54 }
0x1626   : > { %20100 = verf.f32 %v15571_v31 }
0x1627   : > { %20102 = verf.f32 %v15572_v34 }
0x162c   : > { %v20097_v20 = vpop.eup %20096 }
0x162d   : > { %v20099_v47 = vpop.eup %20098  ;;  %v15633_v56 = vadd.f32 1.0, %v20097_v20 }
0x162e   : > { %v15634_v51 = vadd.f32 1.0, %v20099_v47  ;;  %v15454_v57 = vpop.f32.mrb[138].mxu1 }
0x162f   : > { %v15455_v5 = vadd.f32 %v15454_v57, %v23970_v24  ;;  %v15456_v41 = vpop.f32.mrb[139].mxu1  ;;  %v15665_v12 = vmul.f32 %v15633_v56, %v15537_v36 }
0x1630   : > { %v20101_v32 = vpop.eup %20100  ;;  %v15666_v50 = vmul.f32 %v15634_v51, %v15538_v3  ;;  %v15457_v61 = vadd.f32 %v15456_v41, %v23972_v9 }
0x1631   : > { %v20103_v46 = vpop.eup %20102  ;;  %v15635_v8 = vadd.f32 1.0, %v20101_v32  ;;  %v15573_v21 = vmul.f32 0.70710677, %v15455_v5  ;;  %v15541_v56 = vmul.f32 0.5, %v15455_v5 }
0x1632   : > { %v15636_v42 = vadd.f32 1.0, %v20103_v46  ;;  %v15574_v22 = vmul.f32 0.70710677, %v15457_v61  ;;  %v15460_v43 = vpop.f32.mrb[140].mxu1  ;;  %16561 = vmatprep.mubr.msk.f32.mxu1 %vm15717_vm4, %v15666_v50  ;;  %v15542_v31 = vmul.f32 0.5, %v15457_v61 }
0x1633   : > { %20104 = verf.f32 %v15573_v21  ;;  %v15461_v40 = vadd.f32 %v15460_v43, %v23970_v24  ;;  %v15462_v23 = vpop.f32.mrb[141].mxu1  ;;  %15831 = vmatmul.mubr.f32.vlgmr.msra.gmra.mrb[166].mxu1 %v15665_v12  ;;  %v15667_v53 = vmul.f32 %v15635_v8, %v15539_v49 }
0x1634   : > { %v15668_v33 = vmul.f32 %v15636_v42, %v15540_v13  ;;  %20106 = verf.f32 %v15574_v22  ;;  %v15463_v11 = vadd.f32 %v15462_v23, %v23972_v9 }
0x1635   : > { %v15575_v1 = vmul.f32 0.70710677, %v15461_v40  ;;  %v15543_v13 = vmul.f32 0.5, %v15461_v40 }
0x1636   : > { %v15576_v52 = vmul.f32 0.70710677, %v15463_v11  ;;  %v15466_v29 = vpop.f32.mrb[142].mxu1  ;;  %16562 = vmatprep.mubr.msk.f32.mxu1 %vm15717_vm4, %v15668_v33  ;;  %v15544_v12 = vmul.f32 0.5, %v15463_v11 }
0x1637   : > { %20108 = verf.f32 %v15575_v1  ;;  %v15467_v10 = vadd.f32 %v15466_v29, %v23970_v24  ;;  %v15468_v27 = vpop.f32.mrb[143].mxu1  ;;  %15836 = vmatmul.mubr.f32.gmra.mrb[168].mxu1 %v15667_v53 }
0x1638   : > { %20110 = verf.f32 %v15576_v52  ;;  %v15469_v60 = vadd.f32 %v15468_v27, %v23972_v9 }
0x1639   : > { %v15577_v55 = vmul.f32 0.70710677, %v15467_v10 }
0x163a   : > { %v15578_v19 = vmul.f32 0.70710677, %v15469_v60  ;;  %v15472_v30 = vpop.f32.mrb[144].mxu1  ;;  %v15546_v52 = vmul.f32 0.5, %v15469_v60 }
0x163b   : > { %20112 = verf.f32 %v15577_v55  ;;  %v23987_v6 = vadd.f32 %v15472_v30, %v23970_v24  ;;  %v15474_v28 = vpop.f32.mrb[145].mxu1  ;;  %v15545_v55 = vmul.f32 0.5, %v15467_v10 }
0x163c   : > { %20114 = verf.f32 %v15578_v19  ;;  %v15475_v16 = vadd.f32 %v15474_v28, %v23972_v9 }
0x163d   : > { %v20105_v62 = vpop.eup %20104  ;;  %v15579_v63 = vmul.f32 0.70710677, %v23987_v6 }
0x163e   : > { %v20107_v58 = vpop.eup %20106  ;;  %v15637_v35 = vadd.f32 1.0, %v20105_v62  ;;  %v15580_v25 = vmul.f32 0.70710677, %v15475_v16  ;;  %v15478_v54 = vpop.f32.mrb[146].mxu1 }
0x163f   : > { %v15638_v34 = vadd.f32 1.0, %v20107_v58  ;;  %20116 = verf.f32 %v15579_v63  ;;  %v23992_v20 = vadd.f32 %v15478_v54, %v23970_v24  ;;  %v15480_v47 = vpop.f32.mrb[147].mxu1  ;;  %v15548_v54 = vmul.f32 0.5, %v15475_v16 }
0x1640   : > { %20118 = verf.f32 %v15580_v25  ;;  %v23995_v3 = vadd.f32 %v15480_v47, %v23972_v9  ;;  %v15669_v46 = vmul.f32 %v15637_v35, %v15541_v56  ;;  %v15547_v47 = vmul.f32 0.5, %v23987_v6 }
0x1641   : > { %v20109_v51 = vpop.eup %20108  ;;  %v15670_v57 = vmul.f32 %v15638_v34, %v15542_v31  ;;  %v15581_v36 = vmul.f32 0.70710677, %v23992_v20 }
0x1642   : > { %v20111_v41 = vpop.eup %20110  ;;  %v15639_v32 = vadd.f32 1.0, %v20109_v51  ;;  %v15582_v50 = vmul.f32 0.70710677, %v23995_v3  ;;  %v15484_v61 = vpop.f32.mrb[148].mxu1 }
0x1643   : > { %v15640_v8 = vadd.f32 1.0, %v20111_v41  ;;  %20120 = verf.f32 %v15581_v36  ;;  %v24000_v21 = vadd.f32 %v15484_v61, %v23970_v24  ;;  %v15486_v5 = vpop.f32.mrb[149].mxu1  ;;  %16563 = vmatprep.mubr.msk.f32.mxu1 %vm15717_vm4, %v15670_v57 }
0x1644   : > { %20122 = verf.f32 %v15582_v50  ;;  %v24004_v42 = vadd.f32 %v15486_v5, %v23972_v9  ;;  %15841 = vmatmul.mubr.f32.gmra.mrb[170].mxu1 %v15669_v46  ;;  %v15671_v53 = vmul.f32 %v15639_v32, %v15543_v13  ;;  %v15550_v46 = vmul.f32 0.5, %v23995_v3 }
0x1645   : > { %v20113_v22 = vpop.eup %20112  ;;  %v15672_v43 = vmul.f32 %v15640_v8, %v15544_v12  ;;  %v15583_v49 = vmul.f32 0.70710677, %v24000_v21  ;;  %v15549_v5 = vmul.f32 0.5, %v23992_v20 }
0x1646   : > { %v20115_v23 = vpop.eup %20114  ;;  %v15641_v33 = vadd.f32 1.0, %v20113_v22  ;;  %v15584_v11 = vmul.f32 0.70710677, %v24004_v42  ;;  %v15490_v1 = vpop.f32.mrb[150].mxu1 }
0x1647   : > { %v15642_v29 = vadd.f32 1.0, %v20115_v23  ;;  %20124 = verf.f32 %v15583_v49  ;;  %v24009_v40 = vadd.f32 %v15490_v1, %v23970_v24  ;;  %v15492_v27 = vpop.f32.mrb[151].mxu1  ;;  %16564 = vmatprep.mubr.msk.f32.mxu1 %vm15717_vm4, %v15672_v43 }
0x1648   : > { %20126 = verf.f32 %v15584_v11  ;;  %v24013_v19 = vadd.f32 %v15492_v27, %v23972_v9  ;;  %15846 = vmatmul.mubr.f32.gmra.mrb[172].mxu1 %v15671_v53  ;;  %v15673_v25 = vmul.f32 %v15641_v33, %v15545_v55  ;;  %v15552_v53 = vmul.f32 0.5, %v24004_v42 }
0x1649   : > { %v20117_v30 = vpop.eup %20116  ;;  %v15674_v28 = vmul.f32 %v15642_v29, %v15546_v52  ;;  %v15585_v62 = vmul.f32 0.70710677, %v24009_v40  ;;  %v15551_v27 = vmul.f32 0.5, %v24000_v21 }
0x164a   : > { %v20119_v63 = vpop.eup %20118  ;;  %v15643_v60 = vadd.f32 1.0, %v20117_v30  ;;  %v15586_v58 = vmul.f32 0.70710677, %v24013_v19  ;;  %v15496_v35 = vpop.f32.mrb[152].mxu1 }
0x164b   : > { %v15644_v31 = vadd.f32 1.0, %v20119_v63  ;;  %20128 = verf.f32 %v15585_v62  ;;  %v24018_v10 = vadd.f32 %v15496_v35, %v23970_v24  ;;  %v15498_v34 = vpop.f32.mrb[153].mxu1  ;;  %16565 = vmatprep.mubr.msk.f32.mxu1 %vm15717_vm4, %v15674_v28 }
0x164c   : > { %20130 = verf.f32 %v15586_v58  ;;  %v24023_v56 = vadd.f32 %v15498_v34, %v23972_v9  ;;  %15851 = vmatmul.mubr.f32.gmra.mrb[174].mxu1 %v15673_v25  ;;  %v15675_v61 = vmul.f32 %v15643_v60, %v15547_v47  ;;  %v15554_v25 = vmul.f32 0.5, %v24013_v19 }
0x164d   : > { %v20121_v51 = vpop.eup %20120  ;;  %v15676_v57 = vmul.f32 %v15644_v31, %v15548_v54  ;;  %v15587_v36 = vmul.f32 0.70710677, %v24018_v10  ;;  %v15553_v34 = vmul.f32 0.5, %v24009_v40 }
0x164e   : > { %v20123_v16 = vpop.eup %20122  ;;  %v15645_v41 = vadd.f32 1.0, %v20121_v51  ;;  %v15588_v32 = vmul.f32 0.70710677, %v24023_v56  ;;  %v15502_v50 = vpop.f32.mrb[154].mxu1 }
0x164f   : > { %v15646_v12 = vadd.f32 1.0, %v20123_v16  ;;  %20132 = verf.f32 %v15587_v36  ;;  %v24029_v6 = vadd.f32 %v15502_v50, %v23970_v24  ;;  %v15504_v8 = vpop.f32.mrb[155].mxu1  ;;  %16566 = vmatprep.mubr.msk.f32.mxu1 %vm15717_vm4, %v15676_v57 }
0x1650   : > { %20134 = verf.f32 %v15588_v32  ;;  %v24034_v13 = vadd.f32 %v15504_v8, %v23972_v9  ;;  %15856 = vmatmul.mubr.f32.gmra.mrb[176].mxu1 %v15675_v61  ;;  %v15677_v1 = vmul.f32 %v15645_v41, %v15549_v5  ;;  %v15556_v61 = vmul.f32 0.5, %v24023_v56 }
0x1651   : > { %v20125_v22 = vpop.eup %20124  ;;  %v15678_v43 = vmul.f32 %v15646_v12, %v15550_v46  ;;  %v15589_v49 = vmul.f32 0.70710677, %v24029_v6  ;;  %v15555_v8 = vmul.f32 0.5, %v24018_v10 }
0x1652   : > { %v20127_v3 = vpop.eup %20126  ;;  %v15647_v23 = vadd.f32 1.0, %v20125_v22  ;;  %v15590_v33 = vmul.f32 0.70710677, %v24034_v13  ;;  %v15508_v11 = vpop.f32.mrb[156].mxu1 }
0x1653   : > { %v15648_v52 = vadd.f32 1.0, %v20127_v3  ;;  %20136 = verf.f32 %v15589_v49  ;;  %v24040_v20 = vadd.f32 %v15508_v11, %v23970_v24  ;;  %v15510_v29 = vpop.f32.mrb[157].mxu1  ;;  %16567 = vmatprep.mubr.msk.f32.mxu1 %vm15717_vm4, %v15678_v43 }
0x1654   : > { %20138 = verf.f32 %v15590_v33  ;;  %v24045_v55 = vadd.f32 %v15510_v29, %v23972_v9  ;;  %15861 = vmatmul.mubr.f32.gmra.mrb[178].mxu1 %v15677_v1  ;;  %v15679_v35 = vmul.f32 %v15647_v23, %v15551_v27  ;;  %v15558_v1 = vmul.f32 0.5, %v24034_v13 }
0x1655   : > { %v20129_v30 = vpop.eup %20128  ;;  %v15680_v28 = vmul.f32 %v15648_v52, %v15552_v53  ;;  %v15591_v62 = vmul.f32 0.70710677, %v24040_v20  ;;  %v15557_v29 = vmul.f32 0.5, %v24029_v6  ;;  %v15559_v6 = vmul.f32 0.5, %v24040_v20 }
0x1656   : > { %v20131_v42 = vpop.eup %20130  ;;  %v15649_v63 = vadd.f32 1.0, %v20129_v30  ;;  %v15592_v60 = vmul.f32 0.70710677, %v24045_v55  ;;  %v15514_v58 = vpop.f32.mrb[158].mxu1 }
0x1657   : > { %v15650_v54 = vadd.f32 1.0, %v20131_v42  ;;  %20140 = verf.f32 %v15591_v62  ;;  %v24051_v21 = vadd.f32 %v15514_v58, %v23970_v24  ;;  %v15516_v31 = vpop.f32.mrb[159].mxu1  ;;  %16568 = vmatprep.mubr.msk.f32.mxu1 %vm15717_vm4, %v15680_v28 }
0x1658   : > { %20142 = verf.f32 %v15592_v60  ;;  %v24056_v47 = vadd.f32 %v15516_v31, %v23972_v9  ;;  %15866 = vmatmul.mubr.f32.gmra.mrb[180].mxu1 %v15679_v35  ;;  %v15681_v50 = vmul.f32 %v15649_v63, %v15553_v34  ;;  %v15560_v35 = vmul.f32 0.5, %v24045_v55 }
0x1659   : > { %v20133_v51 = vpop.eup %20132  ;;  %v15682_v57 = vmul.f32 %v15650_v54, %v15554_v25  ;;  %v15593_v36 = vmul.f32 0.70710677, %v24051_v21 }
0x165a   : > { %v20135_v19 = vpop.eup %20134  ;;  %v15651_v16 = vadd.f32 1.0, %v20133_v51  ;;  %v15594_v41 = vmul.f32 0.70710677, %v24056_v47  ;;  %v15520_v32 = vpop.f32.mrb[160].mxu1 }
0x165b   : > { %v15652_v46 = vadd.f32 1.0, %v20135_v19  ;;  %20144 = verf.f32 %v15593_v36  ;;  %v24062_v40 = vadd.f32 %v15520_v32, %v23970_v24  ;;  %v15522_v12 = vpop.f32.mrb[161].mxu1  ;;  %16569 = vmatprep.mubr.msk.f32.mxu1 %vm15717_vm4, %v15682_v57  ;;  %v15562_v32 = vmul.f32 0.5, %v24056_v47 }
0x165c   : > { %20146 = verf.f32 %v15594_v41  ;;  %v15523_v5 = vadd.f32 %v15522_v12, %v23972_v9  ;;  %15871 = vmatmul.mubr.f32.gmra.mrb[182].mxu1 %v15681_v50  ;;  %v15683_v11 = vmul.f32 %v15651_v16, %v15555_v8 }
0x165d   : > { %v20137_v22 = vpop.eup %20136  ;;  %v15684_v43 = vmul.f32 %v15652_v46, %v15556_v61  ;;  %v15595_v49 = vmul.f32 0.70710677, %v24062_v40 }
0x165e   : > { %v20139_v3 = vpop.eup %20138  ;;  %v15653_v56 = vadd.f32 1.0, %v20137_v22  ;;  %v15596_v23 = vmul.f32 0.70710677, %v15523_v5  ;;  %v15526_v33 = vpop.f32.mrb[162].mxu1  ;;  %v15564_v8 = vmul.f32 0.5, %v15523_v5 }
0x165f   : > { %v15654_v53 = vadd.f32 1.0, %v20139_v3  ;;  %20148 = verf.f32 %v15595_v49  ;;  %v15527_v52 = vadd.f32 %v15526_v33, %v23970_v24  ;;  %v15528_v10 = vpop.f32.mrb[163].mxu1  ;;  %16570 = vmatprep.mubr.msk.f32.mxu1 %vm15717_vm4, %v15684_v43  ;;  %v15563_v43 = vmul.f32 0.5, %v24062_v40 }
0x1660   : > { %20150 = verf.f32 %v15596_v23  ;;  %v15529_v27 = vadd.f32 %v15528_v10, %v23972_v9  ;;  %15876 = vmatmul.mubr.f32.gmra.mrb[184].mxu1 %v15683_v11  ;;  %v15685_v58 = vmul.f32 %v15653_v56, %v15557_v29 }
0x1661   : > { %v20141_v30 = vpop.eup %20140  ;;  %v15686_v28 = vmul.f32 %v15654_v53, %v15558_v1  ;;  %v15597_v62 = vmul.f32 0.70710677, %v15527_v52  ;;  %v15565_v11 = vmul.f32 0.5, %v15527_v52  ;;  %v24089_v52 = vld [vmem:[%s24170_s5 + $0x7] ss:$0 sm:$0xff] }
0x1662   : > { %v20143_v42 = vpop.eup %20142  ;;  %v15655_v63 = vadd.f32 1.0, %v20141_v30  ;;  %v15598_v60 = vmul.f32 0.70710677, %v15529_v27  ;;  %v15532_v13 = vpop.f32.mrb[164].mxu1 }
0x1663   : > { %v15656_v25 = vadd.f32 1.0, %v20143_v42  ;;  %20152 = verf.f32 %v15597_v62  ;;  %v15533_v54 = vadd.f32 %v15532_v13, %v23970_v24  ;;  %v15534_v31 = vpop.f32.mrb[165].mxu1  ;;  %16571 = vmatprep.mubr.msk.f32.mxu1 %vm15717_vm4, %v15686_v28  ;;  %v15561_v24 = vmul.f32 0.5, %v24051_v21 }
0x1664   : > { %20154 = verf.f32 %v15598_v60  ;;  %v15535_v34 = vadd.f32 %v15534_v31, %v23972_v9  ;;  %15881 = vmatmul.mubr.f32.gmra.mrb[186].mxu1 %v15685_v58  ;;  %v15687_v55 = vmul.f32 %v15655_v63, %v15559_v6  ;;  %v15566_v21 = vmul.f32 0.5, %v15529_v27 }
0x1665   : > { %v20145_v51 = vpop.eup %20144  ;;  %v15688_v57 = vmul.f32 %v15656_v25, %v15560_v35  ;;  %v15599_v36 = vmul.f32 0.70710677, %v15533_v54  ;;  %v15567_v28 = vmul.f32 0.5, %v15533_v54 }
0x1666   : > { %v20147_v19 = vpop.eup %20146  ;;  %v15657_v16 = vadd.f32 1.0, %v20145_v51  ;;  %v15600_v41 = vmul.f32 0.70710677, %v15535_v34  ;;  %v15568_v30 = vmul.f32 0.5, %v15535_v34 }
0x1667   : > { %v15658_v50 = vadd.f32 1.0, %v20147_v19  ;;  %20156 = verf.f32 %v15599_v36  ;;  %16572 = vmatprep.mubr.msk.f32.mxu1 %vm15717_vm4, %v15688_v57 }
0x1668   : > { %20158 = verf.f32 %v15600_v41  ;;  %15886 = vmatmul.mubr.f32.gmra.mrb[188].mxu1 %v15687_v55  ;;  %v15689_v12 = vmul.f32 %v15657_v16, %v15561_v24 }
0x1669   : > { %v20149_v20 = vpop.eup %20148  ;;  %v15690_v9 = vmul.f32 %v15658_v50, %v15562_v32 }
0x166a   : > { %v20151_v61 = vpop.eup %20150  ;;  %v15659_v46 = vadd.f32 1.0, %v20149_v20 }
0x166b   : > { %v15660_v22 = vadd.f32 1.0, %v20151_v61  ;;  %16573 = vmatprep.mubr.msk.f32.mxu1 %vm15717_vm4, %v15690_v9 }
0x166c   : > { %15891 = vmatmul.mubr.f32.gmra.mrb[190].mxu1 %v15689_v12  ;;  %v15691_v23 = vmul.f32 %v15659_v46, %v15563_v43 }
0x166d   : > { %v20153_v47 = vpop.eup %20152  ;;  %v15692_v49 = vmul.f32 %v15660_v22, %v15564_v8 }
0x166e   : > { %v20155_v3 = vpop.eup %20154  ;;  %v15661_v56 = vadd.f32 1.0, %v20153_v47 }
0x166f   : > { %v15662_v33 = vadd.f32 1.0, %v20155_v3  ;;  %16574 = vmatprep.mubr.msk.f32.mxu1 %vm15717_vm4, %v15692_v49 }
0x1670   : > { %15896 = vmatmul.mubr.f32.gmra.mrb[192].mxu1 %v15691_v23  ;;  %v15693_v29 = vmul.f32 %v15661_v56, %v15565_v11 }
0x1671   : > { %v20157_v1 = vpop.eup %20156  ;;  %v15694_v53 = vmul.f32 %v15662_v33, %v15566_v21 }
0x1672   : > { %v20159_v5 = vpop.eup %20158  ;;  %v15663_v10 = vadd.f32 1.0, %v20157_v1 }
0x1673   : > { %v15664_v40 = vadd.f32 1.0, %v20159_v5  ;;  %16575 = vmatprep.mubr.msk.f32.mxu1 %vm15717_vm4, %v15694_v53 }
0x1674   : > { %15901 = vmatmul.mubr.f32.gmra.mrb[194].mxu1 %v15693_v29  ;;  %v15695_v42 = vmul.f32 %v15663_v10, %v15567_v28 }
0x1675   : > { %v15696_v62 = vmul.f32 %v15664_v40, %v15568_v30 }
0x1677   : > { %16576 = vmatprep.mubr.msk.f32.mxu1 %vm15717_vm4, %v15696_v62 }
0x1678   : > { %15906 = vmatmul.mubr.f32.gmra.mrb[196].mxu1 %v15695_v42 }
0x1706   : > { %v15832_v27 = vpop.f32.mrb[166].mxu1 }
0x1707   : > { %v15833_v63 = vadd.f32 %v15832_v27, %v24089_v52  ;;  %v15834_v60 = vpop.f32.mrb[167].mxu1 }
0x1709   : > { %v15911_v13 = vadd.f32 %v15833_v63, %v23607_v37 }
0x170a   : > { %v15837_v58 = vpop.f32.mrb[168].mxu1 }
0x170b   : > { %15927 = vst.msk [vmem:[%s24097_s28] sm:$0xff] %vm280_vm0, %v15911_v13  ;;  %v15838_v35 = vadd.f32 %v15837_v58, %v24089_v52  ;;  %v15839_v25 = vpop.f32.mrb[169].mxu1 }
0x170d   : > { %v15912_v54 = vadd.f32 %v15838_v35, %v23604_v15 }
0x170f   : > { %15928 = vst.msk [vmem:[%s24097_s28 + $0x8] sm:$0xff] %vm280_vm0, %v15912_v54 }
0x1717   : > { %v15842_v31 = vpop.f32.mrb[170].mxu1 }
0x1718   : > { %v15843_v6 = vadd.f32 %v15842_v31, %v24089_v52  ;;  %v15844_v34 = vpop.f32.mrb[171].mxu1 }
0x171a   : > { %v15913_v51 = vadd.f32 %v15843_v6, %v23619_v4 }
0x171b   : > { %v15847_v57 = vpop.f32.mrb[172].mxu1 }
0x171c   : > { %15929 = vst.msk [vmem:[%s24097_s28 + $0x10] sm:$0xff] %vm280_vm0, %v15913_v51  ;;  %v15848_v37 = vadd.f32 %v15847_v57, %v24089_v52  ;;  %v15849_v36 = vpop.f32.mrb[173].mxu1 }
0x171e   : > { %v15914_v19 = vadd.f32 %v15848_v37, %v23616_v44 }
0x171f   : > { %v15852_v16 = vpop.f32.mrb[174].mxu1 }
0x1720   : > { %15930 = vst.msk [vmem:[%s24097_s28 + $0x18] sm:$0xff] %vm280_vm0, %v15914_v19  ;;  %v15853_v15 = vadd.f32 %v15852_v16, %v24089_v52  ;;  %v15854_v41 = vpop.f32.mrb[175].mxu1 }
0x1722   : > { %v15915_v55 = vadd.f32 %v15853_v15, %v23631_v45 }
0x1723   : > { %v15857_v32 = vpop.f32.mrb[176].mxu1 }
0x1724   : > { %15931 = vst.msk [vmem:[%s24097_s28 + $0x20] sm:$0xff] %vm280_vm0, %v15915_v55  ;;  %v15858_v4 = vadd.f32 %v15857_v32, %v24089_v52  ;;  %v15859_v50 = vpop.f32.mrb[177].mxu1 }
0x1726   : > { %v15916_v24 = vadd.f32 %v15858_v4, %v23628_v48 }
0x1727   : > { %v15862_v20 = vpop.f32.mrb[178].mxu1 }
0x1728   : > { %15932 = vst.msk [vmem:[%s24097_s28 + $0x28] sm:$0xff] %vm280_vm0, %v15916_v24  ;;  %v15863_v44 = vadd.f32 %v15862_v20, %v24089_v52  ;;  %v15864_v9 = vpop.f32.mrb[179].mxu1 }
0x172a   : > { %v15917_v61 = vadd.f32 %v15863_v44, %v23643_v38 }
0x172b   : > { %v15867_v46 = vpop.f32.mrb[180].mxu1 }
0x172c   : > { %15933 = vst.msk [vmem:[%s24097_s28 + $0x30] sm:$0xff] %vm280_vm0, %v15917_v61  ;;  %v15868_v45 = vadd.f32 %v15867_v46, %v24089_v52  ;;  %v15869_v12 = vpop.f32.mrb[181].mxu1 }
0x172e   : > { %v15918_v8 = vadd.f32 %v15868_v45, %v23640_v2 }
0x172f   : > { %v15872_v22 = vpop.f32.mrb[182].mxu1 }
0x1730   : > { %15934 = vst.msk [vmem:[%s24097_s28 + $0x38] sm:$0xff] %vm280_vm0, %v15918_v8  ;;  %v15873_v48 = vadd.f32 %v15872_v22, %v24089_v52  ;;  %v15874_v43 = vpop.f32.mrb[183].mxu1 }
0x1732   : > { %v15919_v47 = vadd.f32 %v15873_v48, %v23655_v0 }
0x1733   : > { %v15877_v49 = vpop.f32.mrb[184].mxu1 }
0x1734   : > { %15935 = vst.msk [vmem:[%s24097_s28 + $0x40] sm:$0xff] %vm280_vm0, %v15919_v47  ;;  %v15878_v38 = vadd.f32 %v15877_v49, %v24089_v52  ;;  %v15879_v3 = vpop.f32.mrb[185].mxu1 }
0x1736   : > { %v15920_v56 = vadd.f32 %v15878_v38, %v23652_v59 }
0x1737   : > { %v15882_v23 = vpop.f32.mrb[186].mxu1 }
0x1738   : > { %15936 = vst.msk [vmem:[%s24097_s28 + $0x48] sm:$0xff] %vm280_vm0, %v15920_v56  ;;  %v15883_v2 = vadd.f32 %v15882_v23, %v24089_v52  ;;  %v15884_v21 = vpop.f32.mrb[187].mxu1 }
0x173a   : > { %v15921_v33 = vadd.f32 %v15883_v2, %v23667_v7 }
0x173b   : > { %v15887_v11 = vpop.f32.mrb[188].mxu1 }
0x173c   : > { %15937 = vst.msk [vmem:[%s24097_s28 + $0x50] sm:$0xff] %vm280_vm0, %v15921_v33  ;;  %v15888_v0 = vadd.f32 %v15887_v11, %v24089_v52  ;;  %v15889_v1 = vpop.f32.mrb[189].mxu1 }
0x173e   : > { %v15922_v53 = vadd.f32 %v15888_v0, %v23664_v17 }
0x173f   : > { %v15892_v5 = vpop.f32.mrb[190].mxu1 }
0x1740   : > { %15938 = vst.msk [vmem:[%s24097_s28 + $0x58] sm:$0xff] %vm280_vm0, %v15922_v53  ;;  %v15893_v59 = vadd.f32 %v15892_v5, %v24089_v52  ;;  %v15894_v10 = vpop.f32.mrb[191].mxu1 }
0x1742   : > { %v15923_v29 = vadd.f32 %v15893_v59, %v23679_v26 }
0x1743   : > { %v15897_v7 = vpop.f32.mrb[192].mxu1 }
0x1744   : > { %15939 = vst.msk [vmem:[%s24097_s28 + $0x60] sm:$0xff] %vm280_vm0, %v15923_v29  ;;  %v15898_v30 = vadd.f32 %v15897_v7, %v24089_v52  ;;  %v15899_v40 = vpop.f32.mrb[193].mxu1 }
0x1746   : > { %v15924_v28 = vadd.f32 %v15898_v30, %v23676_v39 }
0x1747   : > { %v15902_v62 = vpop.f32.mrb[194].mxu1 }
0x1748   : > { %15940 = vst.msk [vmem:[%s24097_s28 + $0x68] sm:$0xff] %vm280_vm0, %v15924_v28  ;;  %v15903_v17 = vadd.f32 %v15902_v62, %v24089_v52  ;;  %v15904_v42 = vpop.f32.mrb[195].mxu1 }
0x174a   : > { %v15925_v27 = vadd.f32 %v15903_v17, %v23693_v14 }
0x174b   : > { %v15907_v63 = vpop.f32.mrb[196].mxu1 }
0x174c   : > { %15941 = vst.msk [vmem:[%s24097_s28 + $0x70] sm:$0xff] %vm280_vm0, %v15925_v27  ;;  %v15908_v26 = vadd.f32 %v15907_v63, %v24089_v52  ;;  %v15909_v60 = vpop.f32.mrb[197].mxu1 }
0x174e   : > { %v15926_v13 = vadd.f32 %v15908_v26, %v23690_v18 }
0x1750   : > { %15942 = vst.msk [vmem:[%s24097_s28 + $0x78] sm:$0xff] %vm280_vm0, %v15926_v13 }
0x1751 PF: > { %s16_s21 = sadd.s32 1, %s20185_s21  }
0x1752   : > { %p13_p4 = scmp.ge.s32.totalorder %s16_s21, 4  }
0x1754   :  { %15 = sbr.rel (!%p13_p4) target bundleno = 1 (0x1), region = 75 }

</bundles_post_ra>
